<compile_context>
chip_gen: v7x
topology: tpu7x:2x2x1
jax: 0.10.0
libtpu: 0.0.40
codegen_flags: <defaults>
</compile_context>

<pallas_src>
import functools

import numpy as np
import jax
import jax.numpy as jnp
from jax import lax
from jax.experimental import pallas as pl
from jax.experimental.pallas import tpu as pltpu

NEG_SLOPE = 0.2     # LeakyReLU slope
BN_EPS = 0.8        # nn.BatchNorm2d(C, 0.8) -> eps = 0.8

# (cout, kernel, stride, pad); pad=1 == 'same' for the 3x3 stride-1 convs.
CONV_CFG = [
    (16, 3, 1, 1),
    (32, 4, 2, 1),
    (64, 4, 2, 1),
    (128, 4, 2, 1),
    (256, 4, 2, 1),
    (256, 3, 1, 1),
]


def _round_up(x, m):
    return ((x + m - 1) // m) * m


# ---------------------------------------------------------------------------
# Static per-layer geometry for the fused-kernel activation layout
# ---------------------------------------------------------------------------
def build_layer_dims(width, channels):
    """Activations live as 2-D (N*H, W*C) matrices: rows=(n,h), lanes=(w,c).

    Only the raw image's channel count is padded (4 -> 8) so the first lane
    width (16*8 = 128) is lane-dense; every later layer's W*C is naturally 256.
    The output layout of layer L is exactly the input layout of layer L+1, so
    no relayout is needed anywhere inside the kernel.
    """
    dims = []
    h = w = width
    cin = channels
    cin_lane = _round_up(channels, 8)
    for (cout, k, s, p) in CONV_CFG:
        ho = (h + 2 * p - k) // s + 1
        wo = (w + 2 * p - k) // s + 1
        valid_di = tuple(
            di for di in range(k)
            if any(0 <= s * o - p + di < h for o in range(ho)))
        dims.append(dict(cin=cin, cin_lane=cin_lane, h=h, w=w, k=k, s=s, p=p,
                         cout=cout, ho=ho, wo=wo, valid_di=valid_di))
        h, w, cin, cin_lane = ho, wo, cout, cout
    return dims


# ---------------------------------------------------------------------------
# Parameters (deterministic synthetic init, pre-expanded into kernel layouts)
# ---------------------------------------------------------------------------
def init_params(key, latent_dim, layer_dims, batch):
    """Per conv layer:
         R: (kv, N*Ho, N*H)       bf16  height-tap row-selection (0/1)
         M: (kv, W*Cin, Wo*Cout)  bf16  width-Toeplitz-expanded conv weights
                                        (only valid height taps kept)
         b: (1, Wo*Cout)          f32   bias tiled over wo
       FC layers: lane-padded (Fin_p, Fout_p) bf16 weights + (1, Fout_p) bias.
    """
    params = {"conv": [], "fc": []}
    for d in layer_dims:
        key, k1, k2 = jax.random.split(key, 3)
        wt = np.asarray(0.05 * jax.random.normal(
            k1, (d["k"], d["k"], d["cin"], d["cout"]), jnp.float32))
        bias = np.asarray(0.05 * jax.random.normal(
            k2, (d["cout"],), jnp.float32))

        kv = len(d["valid_di"])
        r = np.zeros((kv, batch * d["ho"], batch * d["h"]), np.float32)
        m = np.zeros((kv, d["w"] * d["cin_lane"], d["wo"] * d["cout"]),
                     np.float32)
        for t, di in enumerate(d["valid_di"]):
            for n in range(batch):
                for ho in range(d["ho"]):
                    hh = d["s"] * ho - d["p"] + di
                    if 0 <= hh < d["h"]:
                        r[t, n * d["ho"] + ho, n * d["h"] + hh] = 1.0
            for wo in range(d["wo"]):
                for dj in range(d["k"]):
                    ww = d["s"] * wo - d["p"] + dj
                    if 0 <= ww < d["w"]:
                        m[t,
                          ww * d["cin_lane"]: ww * d["cin_lane"] + d["cin"],
                          wo * d["cout"]: (wo + 1) * d["cout"]] = wt[di, dj]
        brow = np.tile(bias, d["wo"])[None, :]
        params["conv"].append((jnp.asarray(r, jnp.bfloat16),
                               jnp.asarray(m, jnp.bfloat16),
                               jnp.asarray(brow, jnp.float32)))

    last = layer_dims[-1]
    feat = last["cout"] * last["ho"] * last["wo"]          # 256 for width=16
    fc_cfg = [(feat, 128), (128, 64), (64, latent_dim), (latent_dim, 1)]
    for (fin, fout) in fc_cfg:
        key, k1, k2 = jax.random.split(key, 3)
        fin_p, fout_p = _round_up(fin, 128), _round_up(fout, 128)
        w = np.zeros((fin_p, fout_p), np.float32)
        w[:fin, :fout] = np.asarray(
            0.05 * jax.random.normal(k1, (fin, fout), jnp.float32))
        b = np.zeros((1, fout_p), np.float32)
        b[0, :fout] = np.asarray(
            0.05 * jax.random.normal(k2, (fout,), jnp.float32))
        params["fc"].append((jnp.asarray(w, jnp.bfloat16),
                             jnp.asarray(b, jnp.float32)))
    return params


# ---------------------------------------------------------------------------
# The single fused Pallas kernel: whole Discriminator forward
# ---------------------------------------------------------------------------
def _discriminator_kernel(*refs, layer_dims, batch, n_fc, neg_slope, eps):
    """refs = [img, (R, M, b) per conv layer, (W, b) per FC layer, out]."""
    idx = 0
    a = refs[idx][...]                       # (N*H, W*Cin) bf16 activation
    idx += 1

    for d in layer_dims:
        r_ref, m_ref, b_ref = refs[idx], refs[idx + 1], refs[idx + 2]
        idx += 3
        rows = batch * d["ho"]
        wo, cout = d["wo"], d["cout"]
        lanes = wo * cout

        # --- Conv2d: sum over valid height taps of (row-select @ A) @ M_tap.
        acc = None
        for t, di in enumerate(d["valid_di"]):
            if d["s"] == 1 and d["ho"] == d["h"] and di == d["p"]:
                sel = a                                    # identity row map
            else:
                sel = jnp.dot(r_ref[t], a,
                              preferred_element_type=jnp.float32
                              ).astype(jnp.bfloat16)       # exact 0/1 gather
            part = jnp.dot(sel, m_ref[t],
                           preferred_element_type=jnp.float32)
            acc = part if acc is None else acc + part
        acc = acc + b_ref[...]                             # bias (f32)

        # --- LeakyReLU(0.2), f32 epilogue.
        acc = jnp.where(acc >= 0.0, acc, neg_slope * acc)

        # --- BatchNorm2d: training batch stats (gamma=1, beta=0, eps=0.8),
        #     single pass, biased variance, clamped at 0.
        inv_cnt = 1.0 / float(rows * wo)
        if wo == 1:
            sum_c = jnp.sum(acc, axis=0, keepdims=True)
            sq_c = jnp.sum(acc * acc, axis=0, keepdims=True)
            mean = sum_c * inv_cnt
            var = jnp.maximum(sq_c * inv_cnt - mean * mean, 0.0)
            y = (acc - mean) * lax.rsqrt(var + eps)
        else:
            # Per-channel pooling over the wo groups inside the lane axis via
            # tiny 0/1 fold matmuls built in-register from iota (no DMA, no
            # layout-hostile reshapes).
            fold = (lax.broadcasted_iota(jnp.int32, (lanes, cout), 0) % cout
                    == lax.broadcasted_iota(jnp.int32, (lanes, cout), 1)
                    ).astype(jnp.float32)
            fold_t = (lax.broadcasted_iota(jnp.int32, (cout, lanes), 1) % cout
                      == lax.broadcasted_iota(jnp.int32, (cout, lanes), 0)
                      ).astype(jnp.float32)
            sum_c = jnp.dot(jnp.sum(acc, axis=0, keepdims=True), fold,
                            preferred_element_type=jnp.float32)
            sq_c = jnp.dot(jnp.sum(acc * acc, axis=0, keepdims=True), fold,
                           preferred_element_type=jnp.float32)
            mean = sum_c * inv_cnt
            var = jnp.maximum(sq_c * inv_cnt - mean * mean, 0.0)
            inv = lax.rsqrt(var + eps)
            scale_l = jnp.dot(inv, fold_t,
                              preferred_element_type=jnp.float32)
            shift_l = jnp.dot(mean * inv, fold_t,
                              preferred_element_type=jnp.float32)
            y = acc * scale_l - shift_l

        a = y.astype(jnp.bfloat16)                         # next layer input

    # --- Linear head.  The conv stack ends at 1x1 spatial, so torch.flatten
    #     is the identity on our (N, C) layout: 3x (Linear+LeakyReLU), then
    #     Linear + Sigmoid.  All intermediates stay in vregs.
    h = a
    z = None
    for li in range(n_fc):
        w_ref, b_ref = refs[idx], refs[idx + 1]
        idx += 2
        z = jnp.dot(h, w_ref[...],
                    preferred_element_type=jnp.float32) + b_ref[...]
        if li < n_fc - 1:
            h = jnp.where(z >= 0.0, z, neg_slope * z).astype(jnp.bfloat16)

    out_ref = refs[idx]
    assert idx == len(refs) - 1
    out_ref[...] = jax.nn.sigmoid(z)                       # (N, 128) f32


# ---------------------------------------------------------------------------
# Cost estimate hint for XLA scheduling around the fused call
# ---------------------------------------------------------------------------
def _cost_estimate(layer_dims, params, batch, operands, out_bytes):
    flops = 0
    for d in layer_dims:
        rows_out, rows_in = batch * d["ho"], batch * d["h"]
        kk, nn = d["w"] * d["cin_lane"], d["wo"] * d["cout"]
        kv = len(d["valid_di"])
        flops += kv * 2 * rows_out * (rows_in * kk + kk * nn)   # conv matmuls
        flops += 8 * nn * d["cout"]                             # BN folds
    for (w, _) in params["fc"]:
        flops += 2 * batch * w.shape[0] * w.shape[1]
    bytes_accessed = out_bytes + sum(
        int(np.prod(o.shape)) * o.dtype.itemsize for o in operands)
    return int(flops), int(bytes_accessed)


# ---------------------------------------------------------------------------
# Forward pass (one pallas_call; only the NCHW->layout transform is XLA glue)
# ---------------------------------------------------------------------------
def discriminator_forward(params, img, layer_dims):
    """img: (N, C, H, W) float32 -> validity (N, 1) float32."""
    n, c, h, w = img.shape
    d0 = layer_dims[0]

    # NCHW -> (N*H, W*C_lane) bf16 "row=(n,h), lane=(w,c)" layout.  One-time
    # glue on the 8 KiB input; everything else happens inside the kernel.
    x = jnp.transpose(img, (0, 2, 3, 1))
    if d0["cin_lane"] > c:
        x = jnp.pad(x, ((0, 0), (0, 0), (0, 0), (0, d0["cin_lane"] - c)))
    a0 = x.reshape(n * h, w * d0["cin_lane"]).astype(jnp.bfloat16)

    operands = [a0]
    for rmb in params["conv"]:
        operands.extend(rmb)
    for wb in params["fc"]:
        operands.extend(wb)

    out_lanes = params["fc"][-1][0].shape[1]               # 128 (lane-padded)
    out_shape = jax.ShapeDtypeStruct((n, out_lanes), jnp.float32)

    kernel = functools.partial(
        _discriminator_kernel, layer_dims=layer_dims, batch=n,
        n_fc=len(params["fc"]), neg_slope=NEG_SLOPE, eps=BN_EPS)

    in_specs = [pl.BlockSpec(op.shape, lambda i, nd=op.ndim: (0,) * nd)
                for op in operands]

    flops, bytes_accessed = _cost_estimate(layer_dims, params, n, operands,
                                           n * out_lanes * 4)

    validity = pl.pallas_call(
        kernel,
        out_shape=out_shape,
        grid=(1,),
        in_specs=in_specs,
        out_specs=pl.BlockSpec((n, out_lanes), lambda i: (0, 0)),
        compiler_params=pltpu.CompilerParams(
            dimension_semantics=("arbitrary",),
            vmem_limit_bytes=16 * 1024 * 1024),
        cost_estimate=pl.CostEstimate(
            flops=flops, transcendentals=1024, bytes_accessed=bytes_accessed),
    )(*operands)

    return validity[:, :1]                                 # drop padded lanes


if __name__ == "__main__":
    latent_dim, width, channels = 32, 16, 4
    batch = 2

    layer_dims = build_layer_dims(width, channels)
    # The fused flatten->FC path relies on the conv stack ending at 1x1
    # spatial (true for width=16, the reference configuration).
    assert layer_dims[-1]["ho"] == 1 and layer_dims[-1]["wo"] == 1

    key = jax.random.PRNGKey(0)
    kp, kx = jax.random.split(key)
    params = init_params(kp, latent_dim, layer_dims, batch)
    img = jax.random.normal(kx, (batch, channels, width, width), jnp.float32)

    fwd = jax.jit(functools.partial(discriminator_forward,
                                    layer_dims=layer_dims))
    out = jax.block_until_ready(fwd(params, img))
    assert out.shape == (batch, 1)
    assert bool(jnp.all(jnp.isfinite(out)))
    print("KERNEL_OK")
</pallas_src>

<mosaic_0001>
module attributes {stable_mosaic.version = 11 : i64} {
  func.func @_discriminator_kernel(%arg0: i32, %arg1: memref<32x128xbf16, #tpu.memory_space<vmem>>, %arg2: memref<3x32x32xbf16, #tpu.memory_space<vmem>>, %arg3: memref<3x128x256xbf16, #tpu.memory_space<vmem>>, %arg4: memref<1x256xf32, #tpu.memory_space<vmem>>, %arg5: memref<4x16x32xbf16, #tpu.memory_space<vmem>>, %arg6: memref<4x256x256xbf16, #tpu.memory_space<vmem>>, %arg7: memref<1x256xf32, #tpu.memory_space<vmem>>, %arg8: memref<4x8x16xbf16, #tpu.memory_space<vmem>>, %arg9: memref<4x256x256xbf16, #tpu.memory_space<vmem>>, %arg10: memref<1x256xf32, #tpu.memory_space<vmem>>, %arg11: memref<4x4x8xbf16, #tpu.memory_space<vmem>>, %arg12: memref<4x256x256xbf16, #tpu.memory_space<vmem>>, %arg13: memref<1x256xf32, #tpu.memory_space<vmem>>, %arg14: memref<2x2x4xbf16, #tpu.memory_space<vmem>>, %arg15: memref<2x256x256xbf16, #tpu.memory_space<vmem>>, %arg16: memref<1x256xf32, #tpu.memory_space<vmem>>, %arg17: memref<1x2x2xbf16, #tpu.memory_space<vmem>>, %arg18: memref<1x256x256xbf16, #tpu.memory_space<vmem>>, %arg19: memref<1x256xf32, #tpu.memory_space<vmem>>, %arg20: memref<256x128xbf16, #tpu.memory_space<vmem>>, %arg21: memref<1x128xf32, #tpu.memory_space<vmem>>, %arg22: memref<128x128xbf16, #tpu.memory_space<vmem>>, %arg23: memref<1x128xf32, #tpu.memory_space<vmem>>, %arg24: memref<128x128xbf16, #tpu.memory_space<vmem>>, %arg25: memref<1x128xf32, #tpu.memory_space<vmem>>, %arg26: memref<128x128xbf16, #tpu.memory_space<vmem>>, %arg27: memref<1x128xf32, #tpu.memory_space<vmem>>, %arg28: memref<2x128xf32, #tpu.memory_space<vmem>>) attributes {dimension_semantics = [#tpu.dimension_semantics<arbitrary>], iteration_bounds = array<i64: 1>, scalar_prefetch = 0 : i64, scratch_operands = 0 : i64, tpu.core_type = #tpu.core_type<tc>, window_params = [{pipeline_mode = #tpu.pipeline_mode<synchronous>, transform_indices = @transform_0, window_bounds = array<i64: 32, 128>}, {pipeline_mode = #tpu.pipeline_mode<synchronous>, transform_indices = @transform_1, window_bounds = array<i64: 3, 32, 32>}, {pipeline_mode = #tpu.pipeline_mode<synchronous>, transform_indices = @transform_2, window_bounds = array<i64: 3, 128, 256>}, {pipeline_mode = #tpu.pipeline_mode<synchronous>, transform_indices = @transform_3, window_bounds = array<i64: 1, 256>}, {pipeline_mode = #tpu.pipeline_mode<synchronous>, transform_indices = @transform_4, window_bounds = array<i64: 4, 16, 32>}, {pipeline_mode = #tpu.pipeline_mode<synchronous>, transform_indices = @transform_5, window_bounds = array<i64: 4, 256, 256>}, {pipeline_mode = #tpu.pipeline_mode<synchronous>, transform_indices = @transform_6, window_bounds = array<i64: 1, 256>}, {pipeline_mode = #tpu.pipeline_mode<synchronous>, transform_indices = @transform_7, window_bounds = array<i64: 4, 8, 16>}, {pipeline_mode = #tpu.pipeline_mode<synchronous>, transform_indices = @transform_8, window_bounds = array<i64: 4, 256, 256>}, {pipeline_mode = #tpu.pipeline_mode<synchronous>, transform_indices = @transform_9, window_bounds = array<i64: 1, 256>}, {pipeline_mode = #tpu.pipeline_mode<synchronous>, transform_indices = @transform_10, window_bounds = array<i64: 4, 4, 8>}, {pipeline_mode = #tpu.pipeline_mode<synchronous>, transform_indices = @transform_11, window_bounds = array<i64: 4, 256, 256>}, {pipeline_mode = #tpu.pipeline_mode<synchronous>, transform_indices = @transform_12, window_bounds = array<i64: 1, 256>}, {pipeline_mode = #tpu.pipeline_mode<synchronous>, transform_indices = @transform_13, window_bounds = array<i64: 2, 2, 4>}, {pipeline_mode = #tpu.pipeline_mode<synchronous>, transform_indices = @transform_14, window_bounds = array<i64: 2, 256, 256>}, {pipeline_mode = #tpu.pipeline_mode<synchronous>, transform_indices = @transform_15, window_bounds = array<i64: 1, 256>}, {pipeline_mode = #tpu.pipeline_mode<synchronous>, transform_indices = @transform_16, window_bounds = array<i64: 1, 2, 2>}, {pipeline_mode = #tpu.pipeline_mode<synchronous>, transform_indices = @transform_17, window_bounds = array<i64: 1, 256, 256>}, {pipeline_mode = #tpu.pipeline_mode<synchronous>, transform_indices = @transform_18, window_bounds = array<i64: 1, 256>}, {pipeline_mode = #tpu.pipeline_mode<synchronous>, transform_indices = @transform_19, window_bounds = array<i64: 256, 128>}, {pipeline_mode = #tpu.pipeline_mode<synchronous>, transform_indices = @transform_20, window_bounds = array<i64: 1, 128>}, {pipeline_mode = #tpu.pipeline_mode<synchronous>, transform_indices = @transform_21, window_bounds = array<i64: 128, 128>}, {pipeline_mode = #tpu.pipeline_mode<synchronous>, transform_indices = @transform_22, window_bounds = array<i64: 1, 128>}, {pipeline_mode = #tpu.pipeline_mode<synchronous>, transform_indices = @transform_23, window_bounds = array<i64: 128, 128>}, {pipeline_mode = #tpu.pipeline_mode<synchronous>, transform_indices = @transform_24, window_bounds = array<i64: 1, 128>}, {pipeline_mode = #tpu.pipeline_mode<synchronous>, transform_indices = @transform_25, window_bounds = array<i64: 128, 128>}, {pipeline_mode = #tpu.pipeline_mode<synchronous>, transform_indices = @transform_26, window_bounds = array<i64: 1, 128>}, {pipeline_mode = #tpu.pipeline_mode<synchronous>, transform_indices = @transform_27, window_bounds = array<i64: 2, 128>}]} {
    %c0 = arith.constant 0 : index
    %c0_0 = arith.constant 0 : index
    %0 = vector.load %arg1[%c0, %c0_0] : memref<32x128xbf16, #tpu.memory_space<vmem>>, vector<32x128xbf16>
    %c0_1 = arith.constant 0 : index
    %c0_2 = arith.constant 0 : index
    %c0_3 = arith.constant 0 : index
    %1 = vector.load %arg2[%c0_1, %c0_2, %c0_3] : memref<3x32x32xbf16, #tpu.memory_space<vmem>>, vector<1x32x32xbf16>
    %2 = vector.shape_cast %1 : vector<1x32x32xbf16> to vector<32x32xbf16>
    %cst = arith.constant dense<0.000000e+00> : vector<32x128xf32>
    %3 = tpu.matmul %2, %0, %cst {dimension_numbers = #tpu.dot_dimension_numbers<[1], [0], [0], [1], [0, 0, 1, 1], [], []>} : vector<32x32xbf16>, vector<32x128xbf16>, vector<32x128xf32> -> vector<32x128xf32>
    %4 = arith.truncf %3 : vector<32x128xf32> to vector<32x128xbf16>
    %c0_4 = arith.constant 0 : index
    %c0_5 = arith.constant 0 : index
    %c0_6 = arith.constant 0 : index
    %5 = vector.load %arg3[%c0_4, %c0_5, %c0_6] : memref<3x128x256xbf16, #tpu.memory_space<vmem>>, vector<1x128x256xbf16>
    %6 = vector.shape_cast %5 : vector<1x128x256xbf16> to vector<128x256xbf16>
    %cst_7 = arith.constant dense<0.000000e+00> : vector<32x256xf32>
    %7 = tpu.matmul %4, %6, %cst_7 {dimension_numbers = #tpu.dot_dimension_numbers<[1], [0], [0], [1], [0, 0, 1, 1], [], []>} : vector<32x128xbf16>, vector<128x256xbf16>, vector<32x256xf32> -> vector<32x256xf32>
    %c1 = arith.constant 1 : index
    %c0_8 = arith.constant 0 : index
    %c0_9 = arith.constant 0 : index
    %8 = vector.load %arg3[%c1, %c0_8, %c0_9] : memref<3x128x256xbf16, #tpu.memory_space<vmem>>, vector<1x128x256xbf16>
    %9 = vector.shape_cast %8 : vector<1x128x256xbf16> to vector<128x256xbf16>
    %cst_10 = arith.constant dense<0.000000e+00> : vector<32x256xf32>
    %10 = tpu.matmul %0, %9, %cst_10 {dimension_numbers = #tpu.dot_dimension_numbers<[1], [0], [0], [1], [0, 0, 1, 1], [], []>} : vector<32x128xbf16>, vector<128x256xbf16>, vector<32x256xf32> -> vector<32x256xf32>
    %11 = arith.addf %7, %10 : vector<32x256xf32>
    %c2 = arith.constant 2 : index
    %c0_11 = arith.constant 0 : index
    %c0_12 = arith.constant 0 : index
    %12 = vector.load %arg2[%c2, %c0_11, %c0_12] : memref<3x32x32xbf16, #tpu.memory_space<vmem>>, vector<1x32x32xbf16>
    %13 = vector.shape_cast %12 : vector<1x32x32xbf16> to vector<32x32xbf16>
    %cst_13 = arith.constant dense<0.000000e+00> : vector<32x128xf32>
    %14 = tpu.matmul %13, %0, %cst_13 {dimension_numbers = #tpu.dot_dimension_numbers<[1], [0], [0], [1], [0, 0, 1, 1], [], []>} : vector<32x32xbf16>, vector<32x128xbf16>, vector<32x128xf32> -> vector<32x128xf32>
    %15 = arith.truncf %14 : vector<32x128xf32> to vector<32x128xbf16>
    %c2_14 = arith.constant 2 : index
    %c0_15 = arith.constant 0 : index
    %c0_16 = arith.constant 0 : index
    %16 = vector.load %arg3[%c2_14, %c0_15, %c0_16] : memref<3x128x256xbf16, #tpu.memory_space<vmem>>, vector<1x128x256xbf16>
    %17 = vector.shape_cast %16 : vector<1x128x256xbf16> to vector<128x256xbf16>
    %cst_17 = arith.constant dense<0.000000e+00> : vector<32x256xf32>
    %18 = tpu.matmul %15, %17, %cst_17 {dimension_numbers = #tpu.dot_dimension_numbers<[1], [0], [0], [1], [0, 0, 1, 1], [], []>} : vector<32x128xbf16>, vector<128x256xbf16>, vector<32x256xf32> -> vector<32x256xf32>
    %19 = arith.addf %11, %18 : vector<32x256xf32>
    %c0_18 = arith.constant 0 : index
    %c0_19 = arith.constant 0 : index
    %20 = vector.load %arg4[%c0_18, %c0_19] : memref<1x256xf32, #tpu.memory_space<vmem>>, vector<1x256xf32>
    %21 = vector.broadcast %20 : vector<1x256xf32> to vector<32x256xf32>
    %22 = arith.addf %19, %21 : vector<32x256xf32>
    %cst_20 = arith.constant 0.000000e+00 : f32
    %23 = vector.broadcast %cst_20 : f32 to vector<32x256xf32>
    %24 = arith.cmpf oge, %22, %23 : vector<32x256xf32>
    %cst_21 = arith.constant 2.000000e-01 : f32
    %25 = vector.broadcast %cst_21 : f32 to vector<32x256xf32>
    %26 = arith.mulf %25, %22 : vector<32x256xf32>
    %27 = arith.select %24, %22, %26 : vector<32x256xi1>, vector<32x256xf32>
    %28 = tpu.iota {dimensions = array<i32: 0>} : vector<256x16xi32>
    %c16_i32 = arith.constant 16 : i32
    %c0_i32 = arith.constant 0 : i32
    %29 = arith.cmpi eq, %c16_i32, %c0_i32 : i32
    %c1_i32 = arith.constant 1 : i32
    %30 = arith.select %29, %c1_i32, %c16_i32 : i32
    %31 = vector.broadcast %30 : i32 to vector<256x16xi32>
    %32 = arith.remsi %28, %31 : vector<256x16xi32>
    %c0_i32_22 = arith.constant 0 : i32
    %33 = vector.broadcast %c0_i32_22 : i32 to vector<256x16xi32>
    %34 = arith.cmpi ne, %32, %33 : vector<256x16xi32>
    %c0_i32_23 = arith.constant 0 : i32
    %35 = vector.broadcast %c0_i32_23 : i32 to vector<256x16xi32>
    %36 = arith.cmpi slt, %32, %35 : vector<256x16xi32>
    %c0_i32_24 = arith.constant 0 : i32
    %37 = arith.cmpi slt, %30, %c0_i32_24 : i32
    %38 = vector.broadcast %37 : i1 to vector<256x16xi1>
    %39 = vector.broadcast %38 : vector<256x16xi1> to vector<256x16xi1>
    %40 = arith.xori %36, %39 : vector<256x16xi1>
    %41 = arith.andi %40, %34 : vector<256x16xi1>
    %42 = vector.broadcast %30 : i32 to vector<256x16xi32>
    %43 = arith.addi %32, %42 : vector<256x16xi32>
    %44 = arith.select %41, %43, %32 : vector<256x16xi1>, vector<256x16xi32>
    %45 = tpu.iota {dimensions = array<i32: 1>} : vector<256x16xi32>
    %46 = arith.cmpi eq, %44, %45 : vector<256x16xi32>
    %47 = arith.extui %46 : vector<256x16xi1> to vector<256x16xi32>
    %48 = arith.sitofp %47 : vector<256x16xi32> to vector<256x16xf32>
    %49 = tpu.iota {dimensions = array<i32: 1>} : vector<16x256xi32>
    %c16_i32_25 = arith.constant 16 : i32
    %c0_i32_26 = arith.constant 0 : i32
    %50 = arith.cmpi eq, %c16_i32_25, %c0_i32_26 : i32
    %c1_i32_27 = arith.constant 1 : i32
    %51 = arith.select %50, %c1_i32_27, %c16_i32_25 : i32
    %52 = vector.broadcast %51 : i32 to vector<16x256xi32>
    %53 = arith.remsi %49, %52 : vector<16x256xi32>
    %c0_i32_28 = arith.constant 0 : i32
    %54 = vector.broadcast %c0_i32_28 : i32 to vector<16x256xi32>
    %55 = arith.cmpi ne, %53, %54 : vector<16x256xi32>
    %c0_i32_29 = arith.constant 0 : i32
    %56 = vector.broadcast %c0_i32_29 : i32 to vector<16x256xi32>
    %57 = arith.cmpi slt, %53, %56 : vector<16x256xi32>
    %c0_i32_30 = arith.constant 0 : i32
    %58 = arith.cmpi slt, %51, %c0_i32_30 : i32
    %59 = vector.broadcast %58 : i1 to vector<16x256xi1>
    %60 = vector.broadcast %59 : vector<16x256xi1> to vector<16x256xi1>
    %61 = arith.xori %57, %60 : vector<16x256xi1>
    %62 = arith.andi %61, %55 : vector<16x256xi1>
    %63 = vector.broadcast %51 : i32 to vector<16x256xi32>
    %64 = arith.addi %53, %63 : vector<16x256xi32>
    %65 = arith.select %62, %64, %53 : vector<16x256xi1>, vector<16x256xi32>
    %66 = tpu.iota {dimensions = array<i32: 0>} : vector<16x256xi32>
    %67 = arith.cmpi eq, %65, %66 : vector<16x256xi32>
    %68 = arith.extui %67 : vector<16x256xi1> to vector<16x256xi32>
    %69 = arith.sitofp %68 : vector<16x256xi32> to vector<16x256xf32>
    %cst_31 = arith.constant dense<0.000000e+00> : vector<256xf32>
    %70 = vector.multi_reduction <add>, %27, %cst_31 [0] : vector<32x256xf32> to vector<256xf32>
    %71 = vector.shape_cast %70 : vector<256xf32> to vector<1x256xf32>
    %cst_32 = arith.constant dense<0.000000e+00> : vector<1x16xf32>
    %72 = tpu.matmul %71, %48, %cst_32 {dimension_numbers = #tpu.dot_dimension_numbers<[1], [0], [0], [1], [0, 0, 1, 1], [], []>} : vector<1x256xf32>, vector<256x16xf32>, vector<1x16xf32> -> vector<1x16xf32>
    %73 = arith.mulf %27, %27 : vector<32x256xf32>
    %cst_33 = arith.constant dense<0.000000e+00> : vector<256xf32>
    %74 = vector.multi_reduction <add>, %73, %cst_33 [0] : vector<32x256xf32> to vector<256xf32>
    %75 = vector.shape_cast %74 : vector<256xf32> to vector<1x256xf32>
    %cst_34 = arith.constant dense<0.000000e+00> : vector<1x16xf32>
    %76 = tpu.matmul %75, %48, %cst_34 {dimension_numbers = #tpu.dot_dimension_numbers<[1], [0], [0], [1], [0, 0, 1, 1], [], []>} : vector<1x256xf32>, vector<256x16xf32>, vector<1x16xf32> -> vector<1x16xf32>
    %cst_35 = arith.constant 0.001953125 : f32
    %77 = vector.broadcast %cst_35 : f32 to vector<1x16xf32>
    %78 = arith.mulf %72, %77 : vector<1x16xf32>
    %cst_36 = arith.constant 0.001953125 : f32
    %79 = vector.broadcast %cst_36 : f32 to vector<1x16xf32>
    %80 = arith.mulf %76, %79 : vector<1x16xf32>
    %81 = arith.mulf %78, %78 : vector<1x16xf32>
    %82 = arith.subf %80, %81 : vector<1x16xf32>
    %cst_37 = arith.constant 0.000000e+00 : f32
    %83 = vector.broadcast %cst_37 : f32 to vector<1x16xf32>
    %84 = arith.maximumf %82, %83 : vector<1x16xf32>
    %cst_38 = arith.constant 8.000000e-01 : f32
    %85 = vector.broadcast %cst_38 : f32 to vector<1x16xf32>
    %86 = arith.addf %84, %85 : vector<1x16xf32>
    %87 = math.rsqrt %86 : vector<1x16xf32>
    %cst_39 = arith.constant dense<0.000000e+00> : vector<1x256xf32>
    %88 = tpu.matmul %87, %69, %cst_39 {dimension_numbers = #tpu.dot_dimension_numbers<[1], [0], [0], [1], [0, 0, 1, 1], [], []>} : vector<1x16xf32>, vector<16x256xf32>, vector<1x256xf32> -> vector<1x256xf32>
    %89 = arith.mulf %78, %87 : vector<1x16xf32>
    %cst_40 = arith.constant dense<0.000000e+00> : vector<1x256xf32>
    %90 = tpu.matmul %89, %69, %cst_40 {dimension_numbers = #tpu.dot_dimension_numbers<[1], [0], [0], [1], [0, 0, 1, 1], [], []>} : vector<1x16xf32>, vector<16x256xf32>, vector<1x256xf32> -> vector<1x256xf32>
    %91 = vector.broadcast %88 : vector<1x256xf32> to vector<32x256xf32>
    %92 = arith.mulf %27, %91 : vector<32x256xf32>
    %93 = vector.broadcast %90 : vector<1x256xf32> to vector<32x256xf32>
    %94 = arith.subf %92, %93 : vector<32x256xf32>
    %95 = arith.truncf %94 : vector<32x256xf32> to vector<32x256xbf16>
    %c0_41 = arith.constant 0 : index
    %c0_42 = arith.constant 0 : index
    %c0_43 = arith.constant 0 : index
    %96 = vector.load %arg5[%c0_41, %c0_42, %c0_43] : memref<4x16x32xbf16, #tpu.memory_space<vmem>>, vector<1x16x32xbf16>
    %97 = vector.shape_cast %96 : vector<1x16x32xbf16> to vector<16x32xbf16>
    %cst_44 = arith.constant dense<0.000000e+00> : vector<16x256xf32>
    %98 = tpu.matmul %97, %95, %cst_44 {dimension_numbers = #tpu.dot_dimension_numbers<[1], [0], [0], [1], [0, 0, 1, 1], [], []>} : vector<16x32xbf16>, vector<32x256xbf16>, vector<16x256xf32> -> vector<16x256xf32>
    %99 = arith.truncf %98 : vector<16x256xf32> to vector<16x256xbf16>
    %c0_45 = arith.constant 0 : index
    %c0_46 = arith.constant 0 : index
    %c0_47 = arith.constant 0 : index
    %100 = vector.load %arg6[%c0_45, %c0_46, %c0_47] : memref<4x256x256xbf16, #tpu.memory_space<vmem>>, vector<1x256x256xbf16>
    %101 = vector.shape_cast %100 : vector<1x256x256xbf16> to vector<256x256xbf16>
    %cst_48 = arith.constant dense<0.000000e+00> : vector<16x256xf32>
    %102 = tpu.matmul %99, %101, %cst_48 {dimension_numbers = #tpu.dot_dimension_numbers<[1], [0], [0], [1], [0, 0, 1, 1], [], []>} : vector<16x256xbf16>, vector<256x256xbf16>, vector<16x256xf32> -> vector<16x256xf32>
    %c1_49 = arith.constant 1 : index
    %c0_50 = arith.constant 0 : index
    %c0_51 = arith.constant 0 : index
    %103 = vector.load %arg5[%c1_49, %c0_50, %c0_51] : memref<4x16x32xbf16, #tpu.memory_space<vmem>>, vector<1x16x32xbf16>
    %104 = vector.shape_cast %103 : vector<1x16x32xbf16> to vector<16x32xbf16>
    %cst_52 = arith.constant dense<0.000000e+00> : vector<16x256xf32>
    %105 = tpu.matmul %104, %95, %cst_52 {dimension_numbers = #tpu.dot_dimension_numbers<[1], [0], [0], [1], [0, 0, 1, 1], [], []>} : vector<16x32xbf16>, vector<32x256xbf16>, vector<16x256xf32> -> vector<16x256xf32>
    %106 = arith.truncf %105 : vector<16x256xf32> to vector<16x256xbf16>
    %c1_53 = arith.constant 1 : index
    %c0_54 = arith.constant 0 : index
    %c0_55 = arith.constant 0 : index
    %107 = vector.load %arg6[%c1_53, %c0_54, %c0_55] : memref<4x256x256xbf16, #tpu.memory_space<vmem>>, vector<1x256x256xbf16>
    %108 = vector.shape_cast %107 : vector<1x256x256xbf16> to vector<256x256xbf16>
    %cst_56 = arith.constant dense<0.000000e+00> : vector<16x256xf32>
    %109 = tpu.matmul %106, %108, %cst_56 {dimension_numbers = #tpu.dot_dimension_numbers<[1], [0], [0], [1], [0, 0, 1, 1], [], []>} : vector<16x256xbf16>, vector<256x256xbf16>, vector<16x256xf32> -> vector<16x256xf32>
    %110 = arith.addf %102, %109 : vector<16x256xf32>
    %c2_57 = arith.constant 2 : index
    %c0_58 = arith.constant 0 : index
    %c0_59 = arith.constant 0 : index
    %111 = vector.load %arg5[%c2_57, %c0_58, %c0_59] : memref<4x16x32xbf16, #tpu.memory_space<vmem>>, vector<1x16x32xbf16>
    %112 = vector.shape_cast %111 : vector<1x16x32xbf16> to vector<16x32xbf16>
    %cst_60 = arith.constant dense<0.000000e+00> : vector<16x256xf32>
    %113 = tpu.matmul %112, %95, %cst_60 {dimension_numbers = #tpu.dot_dimension_numbers<[1], [0], [0], [1], [0, 0, 1, 1], [], []>} : vector<16x32xbf16>, vector<32x256xbf16>, vector<16x256xf32> -> vector<16x256xf32>
    %114 = arith.truncf %113 : vector<16x256xf32> to vector<16x256xbf16>
    %c2_61 = arith.constant 2 : index
    %c0_62 = arith.constant 0 : index
    %c0_63 = arith.constant 0 : index
    %115 = vector.load %arg6[%c2_61, %c0_62, %c0_63] : memref<4x256x256xbf16, #tpu.memory_space<vmem>>, vector<1x256x256xbf16>
    %116 = vector.shape_cast %115 : vector<1x256x256xbf16> to vector<256x256xbf16>
    %cst_64 = arith.constant dense<0.000000e+00> : vector<16x256xf32>
    %117 = tpu.matmul %114, %116, %cst_64 {dimension_numbers = #tpu.dot_dimension_numbers<[1], [0], [0], [1], [0, 0, 1, 1], [], []>} : vector<16x256xbf16>, vector<256x256xbf16>, vector<16x256xf32> -> vector<16x256xf32>
    %118 = arith.addf %110, %117 : vector<16x256xf32>
    %c3 = arith.constant 3 : index
    %c0_65 = arith.constant 0 : index
    %c0_66 = arith.constant 0 : index
    %119 = vector.load %arg5[%c3, %c0_65, %c0_66] : memref<4x16x32xbf16, #tpu.memory_space<vmem>>, vector<1x16x32xbf16>
    %120 = vector.shape_cast %119 : vector<1x16x32xbf16> to vector<16x32xbf16>
    %cst_67 = arith.constant dense<0.000000e+00> : vector<16x256xf32>
    %121 = tpu.matmul %120, %95, %cst_67 {dimension_numbers = #tpu.dot_dimension_numbers<[1], [0], [0], [1], [0, 0, 1, 1], [], []>} : vector<16x32xbf16>, vector<32x256xbf16>, vector<16x256xf32> -> vector<16x256xf32>
    %122 = arith.truncf %121 : vector<16x256xf32> to vector<16x256xbf16>
    %c3_68 = arith.constant 3 : index
    %c0_69 = arith.constant 0 : index
    %c0_70 = arith.constant 0 : index
    %123 = vector.load %arg6[%c3_68, %c0_69, %c0_70] : memref<4x256x256xbf16, #tpu.memory_space<vmem>>, vector<1x256x256xbf16>
    %124 = vector.shape_cast %123 : vector<1x256x256xbf16> to vector<256x256xbf16>
    %cst_71 = arith.constant dense<0.000000e+00> : vector<16x256xf32>
    %125 = tpu.matmul %122, %124, %cst_71 {dimension_numbers = #tpu.dot_dimension_numbers<[1], [0], [0], [1], [0, 0, 1, 1], [], []>} : vector<16x256xbf16>, vector<256x256xbf16>, vector<16x256xf32> -> vector<16x256xf32>
    %126 = arith.addf %118, %125 : vector<16x256xf32>
    %c0_72 = arith.constant 0 : index
    %c0_73 = arith.constant 0 : index
    %127 = vector.load %arg7[%c0_72, %c0_73] : memref<1x256xf32, #tpu.memory_space<vmem>>, vector<1x256xf32>
    %128 = vector.broadcast %127 : vector<1x256xf32> to vector<16x256xf32>
    %129 = arith.addf %126, %128 : vector<16x256xf32>
    %cst_74 = arith.constant 0.000000e+00 : f32
    %130 = vector.broadcast %cst_74 : f32 to vector<16x256xf32>
    %131 = arith.cmpf oge, %129, %130 : vector<16x256xf32>
    %cst_75 = arith.constant 2.000000e-01 : f32
    %132 = vector.broadcast %cst_75 : f32 to vector<16x256xf32>
    %133 = arith.mulf %132, %129 : vector<16x256xf32>
    %134 = arith.select %131, %129, %133 : vector<16x256xi1>, vector<16x256xf32>
    %135 = tpu.iota {dimensions = array<i32: 0>} : vector<256x32xi32>
    %c32_i32 = arith.constant 32 : i32
    %c0_i32_76 = arith.constant 0 : i32
    %136 = arith.cmpi eq, %c32_i32, %c0_i32_76 : i32
    %c1_i32_77 = arith.constant 1 : i32
    %137 = arith.select %136, %c1_i32_77, %c32_i32 : i32
    %138 = vector.broadcast %137 : i32 to vector<256x32xi32>
    %139 = arith.remsi %135, %138 : vector<256x32xi32>
    %c0_i32_78 = arith.constant 0 : i32
    %140 = vector.broadcast %c0_i32_78 : i32 to vector<256x32xi32>
    %141 = arith.cmpi ne, %139, %140 : vector<256x32xi32>
    %c0_i32_79 = arith.constant 0 : i32
    %142 = vector.broadcast %c0_i32_79 : i32 to vector<256x32xi32>
    %143 = arith.cmpi slt, %139, %142 : vector<256x32xi32>
    %c0_i32_80 = arith.constant 0 : i32
    %144 = arith.cmpi slt, %137, %c0_i32_80 : i32
    %145 = vector.broadcast %144 : i1 to vector<256x32xi1>
    %146 = vector.broadcast %145 : vector<256x32xi1> to vector<256x32xi1>
    %147 = arith.xori %143, %146 : vector<256x32xi1>
    %148 = arith.andi %147, %141 : vector<256x32xi1>
    %149 = vector.broadcast %137 : i32 to vector<256x32xi32>
    %150 = arith.addi %139, %149 : vector<256x32xi32>
    %151 = arith.select %148, %150, %139 : vector<256x32xi1>, vector<256x32xi32>
    %152 = tpu.iota {dimensions = array<i32: 1>} : vector<256x32xi32>
    %153 = arith.cmpi eq, %151, %152 : vector<256x32xi32>
    %154 = arith.extui %153 : vector<256x32xi1> to vector<256x32xi32>
    %155 = arith.sitofp %154 : vector<256x32xi32> to vector<256x32xf32>
    %156 = tpu.iota {dimensions = array<i32: 1>} : vector<32x256xi32>
    %c32_i32_81 = arith.constant 32 : i32
    %c0_i32_82 = arith.constant 0 : i32
    %157 = arith.cmpi eq, %c32_i32_81, %c0_i32_82 : i32
    %c1_i32_83 = arith.constant 1 : i32
    %158 = arith.select %157, %c1_i32_83, %c32_i32_81 : i32
    %159 = vector.broadcast %158 : i32 to vector<32x256xi32>
    %160 = arith.remsi %156, %159 : vector<32x256xi32>
    %c0_i32_84 = arith.constant 0 : i32
    %161 = vector.broadcast %c0_i32_84 : i32 to vector<32x256xi32>
    %162 = arith.cmpi ne, %160, %161 : vector<32x256xi32>
    %c0_i32_85 = arith.constant 0 : i32
    %163 = vector.broadcast %c0_i32_85 : i32 to vector<32x256xi32>
    %164 = arith.cmpi slt, %160, %163 : vector<32x256xi32>
    %c0_i32_86 = arith.constant 0 : i32
    %165 = arith.cmpi slt, %158, %c0_i32_86 : i32
    %166 = vector.broadcast %165 : i1 to vector<32x256xi1>
    %167 = vector.broadcast %166 : vector<32x256xi1> to vector<32x256xi1>
    %168 = arith.xori %164, %167 : vector<32x256xi1>
    %169 = arith.andi %168, %162 : vector<32x256xi1>
    %170 = vector.broadcast %158 : i32 to vector<32x256xi32>
    %171 = arith.addi %160, %170 : vector<32x256xi32>
    %172 = arith.select %169, %171, %160 : vector<32x256xi1>, vector<32x256xi32>
    %173 = tpu.iota {dimensions = array<i32: 0>} : vector<32x256xi32>
    %174 = arith.cmpi eq, %172, %173 : vector<32x256xi32>
    %175 = arith.extui %174 : vector<32x256xi1> to vector<32x256xi32>
    %176 = arith.sitofp %175 : vector<32x256xi32> to vector<32x256xf32>
    %cst_87 = arith.constant dense<0.000000e+00> : vector<256xf32>
    %177 = vector.multi_reduction <add>, %134, %cst_87 [0] : vector<16x256xf32> to vector<256xf32>
    %178 = vector.shape_cast %177 : vector<256xf32> to vector<1x256xf32>
    %cst_88 = arith.constant dense<0.000000e+00> : vector<1x32xf32>
    %179 = tpu.matmul %178, %155, %cst_88 {dimension_numbers = #tpu.dot_dimension_numbers<[1], [0], [0], [1], [0, 0, 1, 1], [], []>} : vector<1x256xf32>, vector<256x32xf32>, vector<1x32xf32> -> vector<1x32xf32>
    %180 = arith.mulf %134, %134 : vector<16x256xf32>
    %cst_89 = arith.constant dense<0.000000e+00> : vector<256xf32>
    %181 = vector.multi_reduction <add>, %180, %cst_89 [0] : vector<16x256xf32> to vector<256xf32>
    %182 = vector.shape_cast %181 : vector<256xf32> to vector<1x256xf32>
    %cst_90 = arith.constant dense<0.000000e+00> : vector<1x32xf32>
    %183 = tpu.matmul %182, %155, %cst_90 {dimension_numbers = #tpu.dot_dimension_numbers<[1], [0], [0], [1], [0, 0, 1, 1], [], []>} : vector<1x256xf32>, vector<256x32xf32>, vector<1x32xf32> -> vector<1x32xf32>
    %cst_91 = arith.constant 7.812500e-03 : f32
    %184 = vector.broadcast %cst_91 : f32 to vector<1x32xf32>
    %185 = arith.mulf %179, %184 : vector<1x32xf32>
    %cst_92 = arith.constant 7.812500e-03 : f32
    %186 = vector.broadcast %cst_92 : f32 to vector<1x32xf32>
    %187 = arith.mulf %183, %186 : vector<1x32xf32>
    %188 = arith.mulf %185, %185 : vector<1x32xf32>
    %189 = arith.subf %187, %188 : vector<1x32xf32>
    %cst_93 = arith.constant 0.000000e+00 : f32
    %190 = vector.broadcast %cst_93 : f32 to vector<1x32xf32>
    %191 = arith.maximumf %189, %190 : vector<1x32xf32>
    %cst_94 = arith.constant 8.000000e-01 : f32
    %192 = vector.broadcast %cst_94 : f32 to vector<1x32xf32>
    %193 = arith.addf %191, %192 : vector<1x32xf32>
    %194 = math.rsqrt %193 : vector<1x32xf32>
    %cst_95 = arith.constant dense<0.000000e+00> : vector<1x256xf32>
    %195 = tpu.matmul %194, %176, %cst_95 {dimension_numbers = #tpu.dot_dimension_numbers<[1], [0], [0], [1], [0, 0, 1, 1], [], []>} : vector<1x32xf32>, vector<32x256xf32>, vector<1x256xf32> -> vector<1x256xf32>
    %196 = arith.mulf %185, %194 : vector<1x32xf32>
    %cst_96 = arith.constant dense<0.000000e+00> : vector<1x256xf32>
    %197 = tpu.matmul %196, %176, %cst_96 {dimension_numbers = #tpu.dot_dimension_numbers<[1], [0], [0], [1], [0, 0, 1, 1], [], []>} : vector<1x32xf32>, vector<32x256xf32>, vector<1x256xf32> -> vector<1x256xf32>
    %198 = vector.broadcast %195 : vector<1x256xf32> to vector<16x256xf32>
    %199 = arith.mulf %134, %198 : vector<16x256xf32>
    %200 = vector.broadcast %197 : vector<1x256xf32> to vector<16x256xf32>
    %201 = arith.subf %199, %200 : vector<16x256xf32>
    %202 = arith.truncf %201 : vector<16x256xf32> to vector<16x256xbf16>
    %c0_97 = arith.constant 0 : index
    %c0_98 = arith.constant 0 : index
    %c0_99 = arith.constant 0 : index
    %203 = vector.load %arg8[%c0_97, %c0_98, %c0_99] : memref<4x8x16xbf16, #tpu.memory_space<vmem>>, vector<1x8x16xbf16>
    %204 = vector.shape_cast %203 : vector<1x8x16xbf16> to vector<8x16xbf16>
    %cst_100 = arith.constant dense<0.000000e+00> : vector<8x256xf32>
    %205 = tpu.matmul %204, %202, %cst_100 {dimension_numbers = #tpu.dot_dimension_numbers<[1], [0], [0], [1], [0, 0, 1, 1], [], []>} : vector<8x16xbf16>, vector<16x256xbf16>, vector<8x256xf32> -> vector<8x256xf32>
    %206 = arith.truncf %205 : vector<8x256xf32> to vector<8x256xbf16>
    %c0_101 = arith.constant 0 : index
    %c0_102 = arith.constant 0 : index
    %c0_103 = arith.constant 0 : index
    %207 = vector.load %arg9[%c0_101, %c0_102, %c0_103] : memref<4x256x256xbf16, #tpu.memory_space<vmem>>, vector<1x256x256xbf16>
    %208 = vector.shape_cast %207 : vector<1x256x256xbf16> to vector<256x256xbf16>
    %cst_104 = arith.constant dense<0.000000e+00> : vector<8x256xf32>
    %209 = tpu.matmul %206, %208, %cst_104 {dimension_numbers = #tpu.dot_dimension_numbers<[1], [0], [0], [1], [0, 0, 1, 1], [], []>} : vector<8x256xbf16>, vector<256x256xbf16>, vector<8x256xf32> -> vector<8x256xf32>
    %c1_105 = arith.constant 1 : index
    %c0_106 = arith.constant 0 : index
    %c0_107 = arith.constant 0 : index
    %210 = vector.load %arg8[%c1_105, %c0_106, %c0_107] : memref<4x8x16xbf16, #tpu.memory_space<vmem>>, vector<1x8x16xbf16>
    %211 = vector.shape_cast %210 : vector<1x8x16xbf16> to vector<8x16xbf16>
    %cst_108 = arith.constant dense<0.000000e+00> : vector<8x256xf32>
    %212 = tpu.matmul %211, %202, %cst_108 {dimension_numbers = #tpu.dot_dimension_numbers<[1], [0], [0], [1], [0, 0, 1, 1], [], []>} : vector<8x16xbf16>, vector<16x256xbf16>, vector<8x256xf32> -> vector<8x256xf32>
    %213 = arith.truncf %212 : vector<8x256xf32> to vector<8x256xbf16>
    %c1_109 = arith.constant 1 : index
    %c0_110 = arith.constant 0 : index
    %c0_111 = arith.constant 0 : index
    %214 = vector.load %arg9[%c1_109, %c0_110, %c0_111] : memref<4x256x256xbf16, #tpu.memory_space<vmem>>, vector<1x256x256xbf16>
    %215 = vector.shape_cast %214 : vector<1x256x256xbf16> to vector<256x256xbf16>
    %cst_112 = arith.constant dense<0.000000e+00> : vector<8x256xf32>
    %216 = tpu.matmul %213, %215, %cst_112 {dimension_numbers = #tpu.dot_dimension_numbers<[1], [0], [0], [1], [0, 0, 1, 1], [], []>} : vector<8x256xbf16>, vector<256x256xbf16>, vector<8x256xf32> -> vector<8x256xf32>
    %217 = arith.addf %209, %216 : vector<8x256xf32>
    %c2_113 = arith.constant 2 : index
    %c0_114 = arith.constant 0 : index
    %c0_115 = arith.constant 0 : index
    %218 = vector.load %arg8[%c2_113, %c0_114, %c0_115] : memref<4x8x16xbf16, #tpu.memory_space<vmem>>, vector<1x8x16xbf16>
    %219 = vector.shape_cast %218 : vector<1x8x16xbf16> to vector<8x16xbf16>
    %cst_116 = arith.constant dense<0.000000e+00> : vector<8x256xf32>
    %220 = tpu.matmul %219, %202, %cst_116 {dimension_numbers = #tpu.dot_dimension_numbers<[1], [0], [0], [1], [0, 0, 1, 1], [], []>} : vector<8x16xbf16>, vector<16x256xbf16>, vector<8x256xf32> -> vector<8x256xf32>
    %221 = arith.truncf %220 : vector<8x256xf32> to vector<8x256xbf16>
    %c2_117 = arith.constant 2 : index
    %c0_118 = arith.constant 0 : index
    %c0_119 = arith.constant 0 : index
    %222 = vector.load %arg9[%c2_117, %c0_118, %c0_119] : memref<4x256x256xbf16, #tpu.memory_space<vmem>>, vector<1x256x256xbf16>
    %223 = vector.shape_cast %222 : vector<1x256x256xbf16> to vector<256x256xbf16>
    %cst_120 = arith.constant dense<0.000000e+00> : vector<8x256xf32>
    %224 = tpu.matmul %221, %223, %cst_120 {dimension_numbers = #tpu.dot_dimension_numbers<[1], [0], [0], [1], [0, 0, 1, 1], [], []>} : vector<8x256xbf16>, vector<256x256xbf16>, vector<8x256xf32> -> vector<8x256xf32>
    %225 = arith.addf %217, %224 : vector<8x256xf32>
    %c3_121 = arith.constant 3 : index
    %c0_122 = arith.constant 0 : index
    %c0_123 = arith.constant 0 : index
    %226 = vector.load %arg8[%c3_121, %c0_122, %c0_123] : memref<4x8x16xbf16, #tpu.memory_space<vmem>>, vector<1x8x16xbf16>
    %227 = vector.shape_cast %226 : vector<1x8x16xbf16> to vector<8x16xbf16>
    %cst_124 = arith.constant dense<0.000000e+00> : vector<8x256xf32>
    %228 = tpu.matmul %227, %202, %cst_124 {dimension_numbers = #tpu.dot_dimension_numbers<[1], [0], [0], [1], [0, 0, 1, 1], [], []>} : vector<8x16xbf16>, vector<16x256xbf16>, vector<8x256xf32> -> vector<8x256xf32>
    %229 = arith.truncf %228 : vector<8x256xf32> to vector<8x256xbf16>
    %c3_125 = arith.constant 3 : index
    %c0_126 = arith.constant 0 : index
    %c0_127 = arith.constant 0 : index
    %230 = vector.load %arg9[%c3_125, %c0_126, %c0_127] : memref<4x256x256xbf16, #tpu.memory_space<vmem>>, vector<1x256x256xbf16>
    %231 = vector.shape_cast %230 : vector<1x256x256xbf16> to vector<256x256xbf16>
    %cst_128 = arith.constant dense<0.000000e+00> : vector<8x256xf32>
    %232 = tpu.matmul %229, %231, %cst_128 {dimension_numbers = #tpu.dot_dimension_numbers<[1], [0], [0], [1], [0, 0, 1, 1], [], []>} : vector<8x256xbf16>, vector<256x256xbf16>, vector<8x256xf32> -> vector<8x256xf32>
    %233 = arith.addf %225, %232 : vector<8x256xf32>
    %c0_129 = arith.constant 0 : index
    %c0_130 = arith.constant 0 : index
    %234 = vector.load %arg10[%c0_129, %c0_130] : memref<1x256xf32, #tpu.memory_space<vmem>>, vector<1x256xf32>
    %235 = vector.broadcast %234 : vector<1x256xf32> to vector<8x256xf32>
    %236 = arith.addf %233, %235 : vector<8x256xf32>
    %cst_131 = arith.constant 0.000000e+00 : f32
    %237 = vector.broadcast %cst_131 : f32 to vector<8x256xf32>
    %238 = arith.cmpf oge, %236, %237 : vector<8x256xf32>
    %cst_132 = arith.constant 2.000000e-01 : f32
    %239 = vector.broadcast %cst_132 : f32 to vector<8x256xf32>
    %240 = arith.mulf %239, %236 : vector<8x256xf32>
    %241 = arith.select %238, %236, %240 : vector<8x256xi1>, vector<8x256xf32>
    %242 = tpu.iota {dimensions = array<i32: 0>} : vector<256x64xi32>
    %c64_i32 = arith.constant 64 : i32
    %c0_i32_133 = arith.constant 0 : i32
    %243 = arith.cmpi eq, %c64_i32, %c0_i32_133 : i32
    %c1_i32_134 = arith.constant 1 : i32
    %244 = arith.select %243, %c1_i32_134, %c64_i32 : i32
    %245 = vector.broadcast %244 : i32 to vector<256x64xi32>
    %246 = arith.remsi %242, %245 : vector<256x64xi32>
    %c0_i32_135 = arith.constant 0 : i32
    %247 = vector.broadcast %c0_i32_135 : i32 to vector<256x64xi32>
    %248 = arith.cmpi ne, %246, %247 : vector<256x64xi32>
    %c0_i32_136 = arith.constant 0 : i32
    %249 = vector.broadcast %c0_i32_136 : i32 to vector<256x64xi32>
    %250 = arith.cmpi slt, %246, %249 : vector<256x64xi32>
    %c0_i32_137 = arith.constant 0 : i32
    %251 = arith.cmpi slt, %244, %c0_i32_137 : i32
    %252 = vector.broadcast %251 : i1 to vector<256x64xi1>
    %253 = vector.broadcast %252 : vector<256x64xi1> to vector<256x64xi1>
    %254 = arith.xori %250, %253 : vector<256x64xi1>
    %255 = arith.andi %254, %248 : vector<256x64xi1>
    %256 = vector.broadcast %244 : i32 to vector<256x64xi32>
    %257 = arith.addi %246, %256 : vector<256x64xi32>
    %258 = arith.select %255, %257, %246 : vector<256x64xi1>, vector<256x64xi32>
    %259 = tpu.iota {dimensions = array<i32: 1>} : vector<256x64xi32>
    %260 = arith.cmpi eq, %258, %259 : vector<256x64xi32>
    %261 = arith.extui %260 : vector<256x64xi1> to vector<256x64xi32>
    %262 = arith.sitofp %261 : vector<256x64xi32> to vector<256x64xf32>
    %263 = tpu.iota {dimensions = array<i32: 1>} : vector<64x256xi32>
    %c64_i32_138 = arith.constant 64 : i32
    %c0_i32_139 = arith.constant 0 : i32
    %264 = arith.cmpi eq, %c64_i32_138, %c0_i32_139 : i32
    %c1_i32_140 = arith.constant 1 : i32
    %265 = arith.select %264, %c1_i32_140, %c64_i32_138 : i32
    %266 = vector.broadcast %265 : i32 to vector<64x256xi32>
    %267 = arith.remsi %263, %266 : vector<64x256xi32>
    %c0_i32_141 = arith.constant 0 : i32
    %268 = vector.broadcast %c0_i32_141 : i32 to vector<64x256xi32>
    %269 = arith.cmpi ne, %267, %268 : vector<64x256xi32>
    %c0_i32_142 = arith.constant 0 : i32
    %270 = vector.broadcast %c0_i32_142 : i32 to vector<64x256xi32>
    %271 = arith.cmpi slt, %267, %270 : vector<64x256xi32>
    %c0_i32_143 = arith.constant 0 : i32
    %272 = arith.cmpi slt, %265, %c0_i32_143 : i32
    %273 = vector.broadcast %272 : i1 to vector<64x256xi1>
    %274 = vector.broadcast %273 : vector<64x256xi1> to vector<64x256xi1>
    %275 = arith.xori %271, %274 : vector<64x256xi1>
    %276 = arith.andi %275, %269 : vector<64x256xi1>
    %277 = vector.broadcast %265 : i32 to vector<64x256xi32>
    %278 = arith.addi %267, %277 : vector<64x256xi32>
    %279 = arith.select %276, %278, %267 : vector<64x256xi1>, vector<64x256xi32>
    %280 = tpu.iota {dimensions = array<i32: 0>} : vector<64x256xi32>
    %281 = arith.cmpi eq, %279, %280 : vector<64x256xi32>
    %282 = arith.extui %281 : vector<64x256xi1> to vector<64x256xi32>
    %283 = arith.sitofp %282 : vector<64x256xi32> to vector<64x256xf32>
    %cst_144 = arith.constant dense<0.000000e+00> : vector<256xf32>
    %284 = vector.multi_reduction <add>, %241, %cst_144 [0] : vector<8x256xf32> to vector<256xf32>
    %285 = vector.shape_cast %284 : vector<256xf32> to vector<1x256xf32>
    %cst_145 = arith.constant dense<0.000000e+00> : vector<1x64xf32>
    %286 = tpu.matmul %285, %262, %cst_145 {dimension_numbers = #tpu.dot_dimension_numbers<[1], [0], [0], [1], [0, 0, 1, 1], [], []>} : vector<1x256xf32>, vector<256x64xf32>, vector<1x64xf32> -> vector<1x64xf32>
    %287 = arith.mulf %241, %241 : vector<8x256xf32>
    %cst_146 = arith.constant dense<0.000000e+00> : vector<256xf32>
    %288 = vector.multi_reduction <add>, %287, %cst_146 [0] : vector<8x256xf32> to vector<256xf32>
    %289 = vector.shape_cast %288 : vector<256xf32> to vector<1x256xf32>
    %cst_147 = arith.constant dense<0.000000e+00> : vector<1x64xf32>
    %290 = tpu.matmul %289, %262, %cst_147 {dimension_numbers = #tpu.dot_dimension_numbers<[1], [0], [0], [1], [0, 0, 1, 1], [], []>} : vector<1x256xf32>, vector<256x64xf32>, vector<1x64xf32> -> vector<1x64xf32>
    %cst_148 = arith.constant 3.125000e-02 : f32
    %291 = vector.broadcast %cst_148 : f32 to vector<1x64xf32>
    %292 = arith.mulf %286, %291 : vector<1x64xf32>
    %cst_149 = arith.constant 3.125000e-02 : f32
    %293 = vector.broadcast %cst_149 : f32 to vector<1x64xf32>
    %294 = arith.mulf %290, %293 : vector<1x64xf32>
    %295 = arith.mulf %292, %292 : vector<1x64xf32>
    %296 = arith.subf %294, %295 : vector<1x64xf32>
    %cst_150 = arith.constant 0.000000e+00 : f32
    %297 = vector.broadcast %cst_150 : f32 to vector<1x64xf32>
    %298 = arith.maximumf %296, %297 : vector<1x64xf32>
    %cst_151 = arith.constant 8.000000e-01 : f32
    %299 = vector.broadcast %cst_151 : f32 to vector<1x64xf32>
    %300 = arith.addf %298, %299 : vector<1x64xf32>
    %301 = math.rsqrt %300 : vector<1x64xf32>
    %cst_152 = arith.constant dense<0.000000e+00> : vector<1x256xf32>
    %302 = tpu.matmul %301, %283, %cst_152 {dimension_numbers = #tpu.dot_dimension_numbers<[1], [0], [0], [1], [0, 0, 1, 1], [], []>} : vector<1x64xf32>, vector<64x256xf32>, vector<1x256xf32> -> vector<1x256xf32>
    %303 = arith.mulf %292, %301 : vector<1x64xf32>
    %cst_153 = arith.constant dense<0.000000e+00> : vector<1x256xf32>
    %304 = tpu.matmul %303, %283, %cst_153 {dimension_numbers = #tpu.dot_dimension_numbers<[1], [0], [0], [1], [0, 0, 1, 1], [], []>} : vector<1x64xf32>, vector<64x256xf32>, vector<1x256xf32> -> vector<1x256xf32>
    %305 = vector.broadcast %302 : vector<1x256xf32> to vector<8x256xf32>
    %306 = arith.mulf %241, %305 : vector<8x256xf32>
    %307 = vector.broadcast %304 : vector<1x256xf32> to vector<8x256xf32>
    %308 = arith.subf %306, %307 : vector<8x256xf32>
    %309 = arith.truncf %308 : vector<8x256xf32> to vector<8x256xbf16>
    %c0_154 = arith.constant 0 : index
    %c0_155 = arith.constant 0 : index
    %c0_156 = arith.constant 0 : index
    %310 = vector.load %arg11[%c0_154, %c0_155, %c0_156] : memref<4x4x8xbf16, #tpu.memory_space<vmem>>, vector<1x4x8xbf16>
    %311 = vector.shape_cast %310 : vector<1x4x8xbf16> to vector<4x8xbf16>
    %cst_157 = arith.constant dense<0.000000e+00> : vector<4x256xf32>
    %312 = tpu.matmul %311, %309, %cst_157 {dimension_numbers = #tpu.dot_dimension_numbers<[1], [0], [0], [1], [0, 0, 1, 1], [], []>} : vector<4x8xbf16>, vector<8x256xbf16>, vector<4x256xf32> -> vector<4x256xf32>
    %313 = arith.truncf %312 : vector<4x256xf32> to vector<4x256xbf16>
    %c0_158 = arith.constant 0 : index
    %c0_159 = arith.constant 0 : index
    %c0_160 = arith.constant 0 : index
    %314 = vector.load %arg12[%c0_158, %c0_159, %c0_160] : memref<4x256x256xbf16, #tpu.memory_space<vmem>>, vector<1x256x256xbf16>
    %315 = vector.shape_cast %314 : vector<1x256x256xbf16> to vector<256x256xbf16>
    %cst_161 = arith.constant dense<0.000000e+00> : vector<4x256xf32>
    %316 = tpu.matmul %313, %315, %cst_161 {dimension_numbers = #tpu.dot_dimension_numbers<[1], [0], [0], [1], [0, 0, 1, 1], [], []>} : vector<4x256xbf16>, vector<256x256xbf16>, vector<4x256xf32> -> vector<4x256xf32>
    %c1_162 = arith.constant 1 : index
    %c0_163 = arith.constant 0 : index
    %c0_164 = arith.constant 0 : index
    %317 = vector.load %arg11[%c1_162, %c0_163, %c0_164] : memref<4x4x8xbf16, #tpu.memory_space<vmem>>, vector<1x4x8xbf16>
    %318 = vector.shape_cast %317 : vector<1x4x8xbf16> to vector<4x8xbf16>
    %cst_165 = arith.constant dense<0.000000e+00> : vector<4x256xf32>
    %319 = tpu.matmul %318, %309, %cst_165 {dimension_numbers = #tpu.dot_dimension_numbers<[1], [0], [0], [1], [0, 0, 1, 1], [], []>} : vector<4x8xbf16>, vector<8x256xbf16>, vector<4x256xf32> -> vector<4x256xf32>
    %320 = arith.truncf %319 : vector<4x256xf32> to vector<4x256xbf16>
    %c1_166 = arith.constant 1 : index
    %c0_167 = arith.constant 0 : index
    %c0_168 = arith.constant 0 : index
    %321 = vector.load %arg12[%c1_166, %c0_167, %c0_168] : memref<4x256x256xbf16, #tpu.memory_space<vmem>>, vector<1x256x256xbf16>
    %322 = vector.shape_cast %321 : vector<1x256x256xbf16> to vector<256x256xbf16>
    %cst_169 = arith.constant dense<0.000000e+00> : vector<4x256xf32>
    %323 = tpu.matmul %320, %322, %cst_169 {dimension_numbers = #tpu.dot_dimension_numbers<[1], [0], [0], [1], [0, 0, 1, 1], [], []>} : vector<4x256xbf16>, vector<256x256xbf16>, vector<4x256xf32> -> vector<4x256xf32>
    %324 = arith.addf %316, %323 : vector<4x256xf32>
    %c2_170 = arith.constant 2 : index
    %c0_171 = arith.constant 0 : index
    %c0_172 = arith.constant 0 : index
    %325 = vector.load %arg11[%c2_170, %c0_171, %c0_172] : memref<4x4x8xbf16, #tpu.memory_space<vmem>>, vector<1x4x8xbf16>
    %326 = vector.shape_cast %325 : vector<1x4x8xbf16> to vector<4x8xbf16>
    %cst_173 = arith.constant dense<0.000000e+00> : vector<4x256xf32>
    %327 = tpu.matmul %326, %309, %cst_173 {dimension_numbers = #tpu.dot_dimension_numbers<[1], [0], [0], [1], [0, 0, 1, 1], [], []>} : vector<4x8xbf16>, vector<8x256xbf16>, vector<4x256xf32> -> vector<4x256xf32>
    %328 = arith.truncf %327 : vector<4x256xf32> to vector<4x256xbf16>
    %c2_174 = arith.constant 2 : index
    %c0_175 = arith.constant 0 : index
    %c0_176 = arith.constant 0 : index
    %329 = vector.load %arg12[%c2_174, %c0_175, %c0_176] : memref<4x256x256xbf16, #tpu.memory_space<vmem>>, vector<1x256x256xbf16>
    %330 = vector.shape_cast %329 : vector<1x256x256xbf16> to vector<256x256xbf16>
    %cst_177 = arith.constant dense<0.000000e+00> : vector<4x256xf32>
    %331 = tpu.matmul %328, %330, %cst_177 {dimension_numbers = #tpu.dot_dimension_numbers<[1], [0], [0], [1], [0, 0, 1, 1], [], []>} : vector<4x256xbf16>, vector<256x256xbf16>, vector<4x256xf32> -> vector<4x256xf32>
    %332 = arith.addf %324, %331 : vector<4x256xf32>
    %c3_178 = arith.constant 3 : index
    %c0_179 = arith.constant 0 : index
    %c0_180 = arith.constant 0 : index
    %333 = vector.load %arg11[%c3_178, %c0_179, %c0_180] : memref<4x4x8xbf16, #tpu.memory_space<vmem>>, vector<1x4x8xbf16>
    %334 = vector.shape_cast %333 : vector<1x4x8xbf16> to vector<4x8xbf16>
    %cst_181 = arith.constant dense<0.000000e+00> : vector<4x256xf32>
    %335 = tpu.matmul %334, %309, %cst_181 {dimension_numbers = #tpu.dot_dimension_numbers<[1], [0], [0], [1], [0, 0, 1, 1], [], []>} : vector<4x8xbf16>, vector<8x256xbf16>, vector<4x256xf32> -> vector<4x256xf32>
    %336 = arith.truncf %335 : vector<4x256xf32> to vector<4x256xbf16>
    %c3_182 = arith.constant 3 : index
    %c0_183 = arith.constant 0 : index
    %c0_184 = arith.constant 0 : index
    %337 = vector.load %arg12[%c3_182, %c0_183, %c0_184] : memref<4x256x256xbf16, #tpu.memory_space<vmem>>, vector<1x256x256xbf16>
    %338 = vector.shape_cast %337 : vector<1x256x256xbf16> to vector<256x256xbf16>
    %cst_185 = arith.constant dense<0.000000e+00> : vector<4x256xf32>
    %339 = tpu.matmul %336, %338, %cst_185 {dimension_numbers = #tpu.dot_dimension_numbers<[1], [0], [0], [1], [0, 0, 1, 1], [], []>} : vector<4x256xbf16>, vector<256x256xbf16>, vector<4x256xf32> -> vector<4x256xf32>
    %340 = arith.addf %332, %339 : vector<4x256xf32>
    %c0_186 = arith.constant 0 : index
    %c0_187 = arith.constant 0 : index
    %341 = vector.load %arg13[%c0_186, %c0_187] : memref<1x256xf32, #tpu.memory_space<vmem>>, vector<1x256xf32>
    %342 = vector.broadcast %341 : vector<1x256xf32> to vector<4x256xf32>
    %343 = arith.addf %340, %342 : vector<4x256xf32>
    %cst_188 = arith.constant 0.000000e+00 : f32
    %344 = vector.broadcast %cst_188 : f32 to vector<4x256xf32>
    %345 = arith.cmpf oge, %343, %344 : vector<4x256xf32>
    %cst_189 = arith.constant 2.000000e-01 : f32
    %346 = vector.broadcast %cst_189 : f32 to vector<4x256xf32>
    %347 = arith.mulf %346, %343 : vector<4x256xf32>
    %348 = arith.select %345, %343, %347 : vector<4x256xi1>, vector<4x256xf32>
    %349 = tpu.iota {dimensions = array<i32: 0>} : vector<256x128xi32>
    %c128_i32 = arith.constant 128 : i32
    %c0_i32_190 = arith.constant 0 : i32
    %350 = arith.cmpi eq, %c128_i32, %c0_i32_190 : i32
    %c1_i32_191 = arith.constant 1 : i32
    %351 = arith.select %350, %c1_i32_191, %c128_i32 : i32
    %352 = vector.broadcast %351 : i32 to vector<256x128xi32>
    %353 = arith.remsi %349, %352 : vector<256x128xi32>
    %c0_i32_192 = arith.constant 0 : i32
    %354 = vector.broadcast %c0_i32_192 : i32 to vector<256x128xi32>
    %355 = arith.cmpi ne, %353, %354 : vector<256x128xi32>
    %c0_i32_193 = arith.constant 0 : i32
    %356 = vector.broadcast %c0_i32_193 : i32 to vector<256x128xi32>
    %357 = arith.cmpi slt, %353, %356 : vector<256x128xi32>
    %c0_i32_194 = arith.constant 0 : i32
    %358 = arith.cmpi slt, %351, %c0_i32_194 : i32
    %359 = vector.broadcast %358 : i1 to vector<256x128xi1>
    %360 = vector.broadcast %359 : vector<256x128xi1> to vector<256x128xi1>
    %361 = arith.xori %357, %360 : vector<256x128xi1>
    %362 = arith.andi %361, %355 : vector<256x128xi1>
    %363 = vector.broadcast %351 : i32 to vector<256x128xi32>
    %364 = arith.addi %353, %363 : vector<256x128xi32>
    %365 = arith.select %362, %364, %353 : vector<256x128xi1>, vector<256x128xi32>
    %366 = tpu.iota {dimensions = array<i32: 1>} : vector<256x128xi32>
    %367 = arith.cmpi eq, %365, %366 : vector<256x128xi32>
    %368 = arith.extui %367 : vector<256x128xi1> to vector<256x128xi32>
    %369 = arith.sitofp %368 : vector<256x128xi32> to vector<256x128xf32>
    %370 = tpu.iota {dimensions = array<i32: 1>} : vector<128x256xi32>
    %c128_i32_195 = arith.constant 128 : i32
    %c0_i32_196 = arith.constant 0 : i32
    %371 = arith.cmpi eq, %c128_i32_195, %c0_i32_196 : i32
    %c1_i32_197 = arith.constant 1 : i32
    %372 = arith.select %371, %c1_i32_197, %c128_i32_195 : i32
    %373 = vector.broadcast %372 : i32 to vector<128x256xi32>
    %374 = arith.remsi %370, %373 : vector<128x256xi32>
    %c0_i32_198 = arith.constant 0 : i32
    %375 = vector.broadcast %c0_i32_198 : i32 to vector<128x256xi32>
    %376 = arith.cmpi ne, %374, %375 : vector<128x256xi32>
    %c0_i32_199 = arith.constant 0 : i32
    %377 = vector.broadcast %c0_i32_199 : i32 to vector<128x256xi32>
    %378 = arith.cmpi slt, %374, %377 : vector<128x256xi32>
    %c0_i32_200 = arith.constant 0 : i32
    %379 = arith.cmpi slt, %372, %c0_i32_200 : i32
    %380 = vector.broadcast %379 : i1 to vector<128x256xi1>
    %381 = vector.broadcast %380 : vector<128x256xi1> to vector<128x256xi1>
    %382 = arith.xori %378, %381 : vector<128x256xi1>
    %383 = arith.andi %382, %376 : vector<128x256xi1>
    %384 = vector.broadcast %372 : i32 to vector<128x256xi32>
    %385 = arith.addi %374, %384 : vector<128x256xi32>
    %386 = arith.select %383, %385, %374 : vector<128x256xi1>, vector<128x256xi32>
    %387 = tpu.iota {dimensions = array<i32: 0>} : vector<128x256xi32>
    %388 = arith.cmpi eq, %386, %387 : vector<128x256xi32>
    %389 = arith.extui %388 : vector<128x256xi1> to vector<128x256xi32>
    %390 = arith.sitofp %389 : vector<128x256xi32> to vector<128x256xf32>
    %cst_201 = arith.constant dense<0.000000e+00> : vector<256xf32>
    %391 = vector.multi_reduction <add>, %348, %cst_201 [0] : vector<4x256xf32> to vector<256xf32>
    %392 = vector.shape_cast %391 : vector<256xf32> to vector<1x256xf32>
    %cst_202 = arith.constant dense<0.000000e+00> : vector<1x128xf32>
    %393 = tpu.matmul %392, %369, %cst_202 {dimension_numbers = #tpu.dot_dimension_numbers<[1], [0], [0], [1], [0, 0, 1, 1], [], []>} : vector<1x256xf32>, vector<256x128xf32>, vector<1x128xf32> -> vector<1x128xf32>
    %394 = arith.mulf %348, %348 : vector<4x256xf32>
    %cst_203 = arith.constant dense<0.000000e+00> : vector<256xf32>
    %395 = vector.multi_reduction <add>, %394, %cst_203 [0] : vector<4x256xf32> to vector<256xf32>
    %396 = vector.shape_cast %395 : vector<256xf32> to vector<1x256xf32>
    %cst_204 = arith.constant dense<0.000000e+00> : vector<1x128xf32>
    %397 = tpu.matmul %396, %369, %cst_204 {dimension_numbers = #tpu.dot_dimension_numbers<[1], [0], [0], [1], [0, 0, 1, 1], [], []>} : vector<1x256xf32>, vector<256x128xf32>, vector<1x128xf32> -> vector<1x128xf32>
    %cst_205 = arith.constant 1.250000e-01 : f32
    %398 = vector.broadcast %cst_205 : f32 to vector<1x128xf32>
    %399 = arith.mulf %393, %398 : vector<1x128xf32>
    %cst_206 = arith.constant 1.250000e-01 : f32
    %400 = vector.broadcast %cst_206 : f32 to vector<1x128xf32>
    %401 = arith.mulf %397, %400 : vector<1x128xf32>
    %402 = arith.mulf %399, %399 : vector<1x128xf32>
    %403 = arith.subf %401, %402 : vector<1x128xf32>
    %cst_207 = arith.constant 0.000000e+00 : f32
    %404 = vector.broadcast %cst_207 : f32 to vector<1x128xf32>
    %405 = arith.maximumf %403, %404 : vector<1x128xf32>
    %cst_208 = arith.constant 8.000000e-01 : f32
    %406 = vector.broadcast %cst_208 : f32 to vector<1x128xf32>
    %407 = arith.addf %405, %406 : vector<1x128xf32>
    %408 = math.rsqrt %407 : vector<1x128xf32>
    %cst_209 = arith.constant dense<0.000000e+00> : vector<1x256xf32>
    %409 = tpu.matmul %408, %390, %cst_209 {dimension_numbers = #tpu.dot_dimension_numbers<[1], [0], [0], [1], [0, 0, 1, 1], [], []>} : vector<1x128xf32>, vector<128x256xf32>, vector<1x256xf32> -> vector<1x256xf32>
    %410 = arith.mulf %399, %408 : vector<1x128xf32>
    %cst_210 = arith.constant dense<0.000000e+00> : vector<1x256xf32>
    %411 = tpu.matmul %410, %390, %cst_210 {dimension_numbers = #tpu.dot_dimension_numbers<[1], [0], [0], [1], [0, 0, 1, 1], [], []>} : vector<1x128xf32>, vector<128x256xf32>, vector<1x256xf32> -> vector<1x256xf32>
    %412 = vector.broadcast %409 : vector<1x256xf32> to vector<4x256xf32>
    %413 = arith.mulf %348, %412 : vector<4x256xf32>
    %414 = vector.broadcast %411 : vector<1x256xf32> to vector<4x256xf32>
    %415 = arith.subf %413, %414 : vector<4x256xf32>
    %416 = arith.truncf %415 : vector<4x256xf32> to vector<4x256xbf16>
    %c0_211 = arith.constant 0 : index
    %c0_212 = arith.constant 0 : index
    %c0_213 = arith.constant 0 : index
    %417 = vector.load %arg14[%c0_211, %c0_212, %c0_213] : memref<2x2x4xbf16, #tpu.memory_space<vmem>>, vector<1x2x4xbf16>
    %418 = vector.shape_cast %417 : vector<1x2x4xbf16> to vector<2x4xbf16>
    %cst_214 = arith.constant dense<0.000000e+00> : vector<2x256xf32>
    %419 = tpu.matmul %418, %416, %cst_214 {dimension_numbers = #tpu.dot_dimension_numbers<[1], [0], [0], [1], [0, 0, 1, 1], [], []>} : vector<2x4xbf16>, vector<4x256xbf16>, vector<2x256xf32> -> vector<2x256xf32>
    %420 = arith.truncf %419 : vector<2x256xf32> to vector<2x256xbf16>
    %c0_215 = arith.constant 0 : index
    %c0_216 = arith.constant 0 : index
    %c0_217 = arith.constant 0 : index
    %421 = vector.load %arg15[%c0_215, %c0_216, %c0_217] : memref<2x256x256xbf16, #tpu.memory_space<vmem>>, vector<1x256x256xbf16>
    %422 = vector.shape_cast %421 : vector<1x256x256xbf16> to vector<256x256xbf16>
    %cst_218 = arith.constant dense<0.000000e+00> : vector<2x256xf32>
    %423 = tpu.matmul %420, %422, %cst_218 {dimension_numbers = #tpu.dot_dimension_numbers<[1], [0], [0], [1], [0, 0, 1, 1], [], []>} : vector<2x256xbf16>, vector<256x256xbf16>, vector<2x256xf32> -> vector<2x256xf32>
    %c1_219 = arith.constant 1 : index
    %c0_220 = arith.constant 0 : index
    %c0_221 = arith.constant 0 : index
    %424 = vector.load %arg14[%c1_219, %c0_220, %c0_221] : memref<2x2x4xbf16, #tpu.memory_space<vmem>>, vector<1x2x4xbf16>
    %425 = vector.shape_cast %424 : vector<1x2x4xbf16> to vector<2x4xbf16>
    %cst_222 = arith.constant dense<0.000000e+00> : vector<2x256xf32>
    %426 = tpu.matmul %425, %416, %cst_222 {dimension_numbers = #tpu.dot_dimension_numbers<[1], [0], [0], [1], [0, 0, 1, 1], [], []>} : vector<2x4xbf16>, vector<4x256xbf16>, vector<2x256xf32> -> vector<2x256xf32>
    %427 = arith.truncf %426 : vector<2x256xf32> to vector<2x256xbf16>
    %c1_223 = arith.constant 1 : index
    %c0_224 = arith.constant 0 : index
    %c0_225 = arith.constant 0 : index
    %428 = vector.load %arg15[%c1_223, %c0_224, %c0_225] : memref<2x256x256xbf16, #tpu.memory_space<vmem>>, vector<1x256x256xbf16>
    %429 = vector.shape_cast %428 : vector<1x256x256xbf16> to vector<256x256xbf16>
    %cst_226 = arith.constant dense<0.000000e+00> : vector<2x256xf32>
    %430 = tpu.matmul %427, %429, %cst_226 {dimension_numbers = #tpu.dot_dimension_numbers<[1], [0], [0], [1], [0, 0, 1, 1], [], []>} : vector<2x256xbf16>, vector<256x256xbf16>, vector<2x256xf32> -> vector<2x256xf32>
    %431 = arith.addf %423, %430 : vector<2x256xf32>
    %c0_227 = arith.constant 0 : index
    %c0_228 = arith.constant 0 : index
    %432 = vector.load %arg16[%c0_227, %c0_228] : memref<1x256xf32, #tpu.memory_space<vmem>>, vector<1x256xf32>
    %433 = vector.broadcast %432 : vector<1x256xf32> to vector<2x256xf32>
    %434 = arith.addf %431, %433 : vector<2x256xf32>
    %cst_229 = arith.constant 0.000000e+00 : f32
    %435 = vector.broadcast %cst_229 : f32 to vector<2x256xf32>
    %436 = arith.cmpf oge, %434, %435 : vector<2x256xf32>
    %cst_230 = arith.constant 2.000000e-01 : f32
    %437 = vector.broadcast %cst_230 : f32 to vector<2x256xf32>
    %438 = arith.mulf %437, %434 : vector<2x256xf32>
    %439 = arith.select %436, %434, %438 : vector<2x256xi1>, vector<2x256xf32>
    %cst_231 = arith.constant dense<0.000000e+00> : vector<256xf32>
    %440 = vector.multi_reduction <add>, %439, %cst_231 [0] : vector<2x256xf32> to vector<256xf32>
    %441 = vector.shape_cast %440 : vector<256xf32> to vector<1x256xf32>
    %442 = arith.mulf %439, %439 : vector<2x256xf32>
    %cst_232 = arith.constant dense<0.000000e+00> : vector<256xf32>
    %443 = vector.multi_reduction <add>, %442, %cst_232 [0] : vector<2x256xf32> to vector<256xf32>
    %444 = vector.shape_cast %443 : vector<256xf32> to vector<1x256xf32>
    %cst_233 = arith.constant 5.000000e-01 : f32
    %445 = vector.broadcast %cst_233 : f32 to vector<1x256xf32>
    %446 = arith.mulf %441, %445 : vector<1x256xf32>
    %cst_234 = arith.constant 5.000000e-01 : f32
    %447 = vector.broadcast %cst_234 : f32 to vector<1x256xf32>
    %448 = arith.mulf %444, %447 : vector<1x256xf32>
    %449 = arith.mulf %446, %446 : vector<1x256xf32>
    %450 = arith.subf %448, %449 : vector<1x256xf32>
    %cst_235 = arith.constant 0.000000e+00 : f32
    %451 = vector.broadcast %cst_235 : f32 to vector<1x256xf32>
    %452 = arith.maximumf %450, %451 : vector<1x256xf32>
    %453 = vector.broadcast %446 : vector<1x256xf32> to vector<2x256xf32>
    %454 = arith.subf %439, %453 : vector<2x256xf32>
    %cst_236 = arith.constant 8.000000e-01 : f32
    %455 = vector.broadcast %cst_236 : f32 to vector<1x256xf32>
    %456 = arith.addf %452, %455 : vector<1x256xf32>
    %457 = math.rsqrt %456 : vector<1x256xf32>
    %458 = vector.broadcast %457 : vector<1x256xf32> to vector<2x256xf32>
    %459 = arith.mulf %454, %458 : vector<2x256xf32>
    %460 = arith.truncf %459 : vector<2x256xf32> to vector<2x256xbf16>
    %c0_237 = arith.constant 0 : index
    %c0_238 = arith.constant 0 : index
    %c0_239 = arith.constant 0 : index
    %461 = vector.load %arg18[%c0_237, %c0_238, %c0_239] : memref<1x256x256xbf16, #tpu.memory_space<vmem>>, vector<1x256x256xbf16>
    %462 = vector.shape_cast %461 : vector<1x256x256xbf16> to vector<256x256xbf16>
    %cst_240 = arith.constant dense<0.000000e+00> : vector<2x256xf32>
    %463 = tpu.matmul %460, %462, %cst_240 {dimension_numbers = #tpu.dot_dimension_numbers<[1], [0], [0], [1], [0, 0, 1, 1], [], []>} : vector<2x256xbf16>, vector<256x256xbf16>, vector<2x256xf32> -> vector<2x256xf32>
    %c0_241 = arith.constant 0 : index
    %c0_242 = arith.constant 0 : index
    %464 = vector.load %arg19[%c0_241, %c0_242] : memref<1x256xf32, #tpu.memory_space<vmem>>, vector<1x256xf32>
    %465 = vector.broadcast %464 : vector<1x256xf32> to vector<2x256xf32>
    %466 = arith.addf %463, %465 : vector<2x256xf32>
    %cst_243 = arith.constant 0.000000e+00 : f32
    %467 = vector.broadcast %cst_243 : f32 to vector<2x256xf32>
    %468 = arith.cmpf oge, %466, %467 : vector<2x256xf32>
    %cst_244 = arith.constant 2.000000e-01 : f32
    %469 = vector.broadcast %cst_244 : f32 to vector<2x256xf32>
    %470 = arith.mulf %469, %466 : vector<2x256xf32>
    %471 = arith.select %468, %466, %470 : vector<2x256xi1>, vector<2x256xf32>
    %cst_245 = arith.constant dense<0.000000e+00> : vector<256xf32>
    %472 = vector.multi_reduction <add>, %471, %cst_245 [0] : vector<2x256xf32> to vector<256xf32>
    %473 = vector.shape_cast %472 : vector<256xf32> to vector<1x256xf32>
    %474 = arith.mulf %471, %471 : vector<2x256xf32>
    %cst_246 = arith.constant dense<0.000000e+00> : vector<256xf32>
    %475 = vector.multi_reduction <add>, %474, %cst_246 [0] : vector<2x256xf32> to vector<256xf32>
    %476 = vector.shape_cast %475 : vector<256xf32> to vector<1x256xf32>
    %cst_247 = arith.constant 5.000000e-01 : f32
    %477 = vector.broadcast %cst_247 : f32 to vector<1x256xf32>
    %478 = arith.mulf %473, %477 : vector<1x256xf32>
    %cst_248 = arith.constant 5.000000e-01 : f32
    %479 = vector.broadcast %cst_248 : f32 to vector<1x256xf32>
    %480 = arith.mulf %476, %479 : vector<1x256xf32>
    %481 = arith.mulf %478, %478 : vector<1x256xf32>
    %482 = arith.subf %480, %481 : vector<1x256xf32>
    %cst_249 = arith.constant 0.000000e+00 : f32
    %483 = vector.broadcast %cst_249 : f32 to vector<1x256xf32>
    %484 = arith.maximumf %482, %483 : vector<1x256xf32>
    %485 = vector.broadcast %478 : vector<1x256xf32> to vector<2x256xf32>
    %486 = arith.subf %471, %485 : vector<2x256xf32>
    %cst_250 = arith.constant 8.000000e-01 : f32
    %487 = vector.broadcast %cst_250 : f32 to vector<1x256xf32>
    %488 = arith.addf %484, %487 : vector<1x256xf32>
    %489 = math.rsqrt %488 : vector<1x256xf32>
    %490 = vector.broadcast %489 : vector<1x256xf32> to vector<2x256xf32>
    %491 = arith.mulf %486, %490 : vector<2x256xf32>
    %492 = arith.truncf %491 : vector<2x256xf32> to vector<2x256xbf16>
    %c0_251 = arith.constant 0 : index
    %c0_252 = arith.constant 0 : index
    %493 = vector.load %arg20[%c0_251, %c0_252] : memref<256x128xbf16, #tpu.memory_space<vmem>>, vector<256x128xbf16>
    %cst_253 = arith.constant dense<0.000000e+00> : vector<2x128xf32>
    %494 = tpu.matmul %492, %493, %cst_253 {dimension_numbers = #tpu.dot_dimension_numbers<[1], [0], [0], [1], [0, 0, 1, 1], [], []>} : vector<2x256xbf16>, vector<256x128xbf16>, vector<2x128xf32> -> vector<2x128xf32>
    %c0_254 = arith.constant 0 : index
    %c0_255 = arith.constant 0 : index
    %495 = vector.load %arg21[%c0_254, %c0_255] : memref<1x128xf32, #tpu.memory_space<vmem>>, vector<1x128xf32>
    %496 = vector.broadcast %495 : vector<1x128xf32> to vector<2x128xf32>
    %497 = arith.addf %494, %496 : vector<2x128xf32>
    %cst_256 = arith.constant 0.000000e+00 : f32
    %498 = vector.broadcast %cst_256 : f32 to vector<2x128xf32>
    %499 = arith.cmpf oge, %497, %498 : vector<2x128xf32>
    %cst_257 = arith.constant 2.000000e-01 : f32
    %500 = vector.broadcast %cst_257 : f32 to vector<2x128xf32>
    %501 = arith.mulf %500, %497 : vector<2x128xf32>
    %502 = arith.select %499, %497, %501 : vector<2x128xi1>, vector<2x128xf32>
    %503 = arith.truncf %502 : vector<2x128xf32> to vector<2x128xbf16>
    %c0_258 = arith.constant 0 : index
    %c0_259 = arith.constant 0 : index
    %504 = vector.load %arg22[%c0_258, %c0_259] : memref<128x128xbf16, #tpu.memory_space<vmem>>, vector<128x128xbf16>
    %cst_260 = arith.constant dense<0.000000e+00> : vector<2x128xf32>
    %505 = tpu.matmul %503, %504, %cst_260 {dimension_numbers = #tpu.dot_dimension_numbers<[1], [0], [0], [1], [0, 0, 1, 1], [], []>} : vector<2x128xbf16>, vector<128x128xbf16>, vector<2x128xf32> -> vector<2x128xf32>
    %c0_261 = arith.constant 0 : index
    %c0_262 = arith.constant 0 : index
    %506 = vector.load %arg23[%c0_261, %c0_262] : memref<1x128xf32, #tpu.memory_space<vmem>>, vector<1x128xf32>
    %507 = vector.broadcast %506 : vector<1x128xf32> to vector<2x128xf32>
    %508 = arith.addf %505, %507 : vector<2x128xf32>
    %cst_263 = arith.constant 0.000000e+00 : f32
    %509 = vector.broadcast %cst_263 : f32 to vector<2x128xf32>
    %510 = arith.cmpf oge, %508, %509 : vector<2x128xf32>
    %cst_264 = arith.constant 2.000000e-01 : f32
    %511 = vector.broadcast %cst_264 : f32 to vector<2x128xf32>
    %512 = arith.mulf %511, %508 : vector<2x128xf32>
    %513 = arith.select %510, %508, %512 : vector<2x128xi1>, vector<2x128xf32>
    %514 = arith.truncf %513 : vector<2x128xf32> to vector<2x128xbf16>
    %c0_265 = arith.constant 0 : index
    %c0_266 = arith.constant 0 : index
    %515 = vector.load %arg24[%c0_265, %c0_266] : memref<128x128xbf16, #tpu.memory_space<vmem>>, vector<128x128xbf16>
    %cst_267 = arith.constant dense<0.000000e+00> : vector<2x128xf32>
    %516 = tpu.matmul %514, %515, %cst_267 {dimension_numbers = #tpu.dot_dimension_numbers<[1], [0], [0], [1], [0, 0, 1, 1], [], []>} : vector<2x128xbf16>, vector<128x128xbf16>, vector<2x128xf32> -> vector<2x128xf32>
    %c0_268 = arith.constant 0 : index
    %c0_269 = arith.constant 0 : index
    %517 = vector.load %arg25[%c0_268, %c0_269] : memref<1x128xf32, #tpu.memory_space<vmem>>, vector<1x128xf32>
    %518 = vector.broadcast %517 : vector<1x128xf32> to vector<2x128xf32>
    %519 = arith.addf %516, %518 : vector<2x128xf32>
    %cst_270 = arith.constant 0.000000e+00 : f32
    %520 = vector.broadcast %cst_270 : f32 to vector<2x128xf32>
    %521 = arith.cmpf oge, %519, %520 : vector<2x128xf32>
    %cst_271 = arith.constant 2.000000e-01 : f32
    %522 = vector.broadcast %cst_271 : f32 to vector<2x128xf32>
    %523 = arith.mulf %522, %519 : vector<2x128xf32>
    %524 = arith.select %521, %519, %523 : vector<2x128xi1>, vector<2x128xf32>
    %525 = arith.truncf %524 : vector<2x128xf32> to vector<2x128xbf16>
    %c0_272 = arith.constant 0 : index
    %c0_273 = arith.constant 0 : index
    %526 = vector.load %arg26[%c0_272, %c0_273] : memref<128x128xbf16, #tpu.memory_space<vmem>>, vector<128x128xbf16>
    %cst_274 = arith.constant dense<0.000000e+00> : vector<2x128xf32>
    %527 = tpu.matmul %525, %526, %cst_274 {dimension_numbers = #tpu.dot_dimension_numbers<[1], [0], [0], [1], [0, 0, 1, 1], [], []>} : vector<2x128xbf16>, vector<128x128xbf16>, vector<2x128xf32> -> vector<2x128xf32>
    %c0_275 = arith.constant 0 : index
    %c0_276 = arith.constant 0 : index
    %528 = vector.load %arg27[%c0_275, %c0_276] : memref<1x128xf32, #tpu.memory_space<vmem>>, vector<1x128xf32>
    %529 = vector.broadcast %528 : vector<1x128xf32> to vector<2x128xf32>
    %530 = arith.addf %527, %529 : vector<2x128xf32>
    %531 = arith.negf %530 : vector<2x128xf32>
    %532 = math.exp %531 : vector<2x128xf32>
    %cst_277 = arith.constant 1.000000e+00 : f32
    %533 = vector.broadcast %cst_277 : f32 to vector<2x128xf32>
    %534 = arith.addf %533, %532 : vector<2x128xf32>
    %535 = arith.divf %533, %534 : vector<2x128xf32>
    %c0_278 = arith.constant 0 : index
    %c0_279 = arith.constant 0 : index
    %536 = vector.load %arg28[%c0_278, %c0_279] : memref<2x128xf32, #tpu.memory_space<vmem>>, vector<2x128xf32>
    tpu.vector_store %arg28[%c0_278, %c0_279], %535 {strides = array<i32>} : memref<2x128xf32, #tpu.memory_space<vmem>>, vector<2x128xf32>,
    return
  }
  func.func @transform_0(%arg0: i32) -> (i32, i32) {
    %c0_i32 = arith.constant 0 : i32
    %c0_i32_0 = arith.constant 0 : i32
    %c0_i32_1 = arith.constant 0 : i32
    return %c0_i32, %c0_i32_0 : i32, i32
  }
  func.func @transform_1(%arg0: i32) -> (i32, i32, i32) {
    %c0_i32 = arith.constant 0 : i32
    %c0_i32_0 = arith.constant 0 : i32
    %c0_i32_1 = arith.constant 0 : i32
    %c0_i32_2 = arith.constant 0 : i32
    return %c0_i32, %c0_i32_0, %c0_i32_1 : i32, i32, i32
  }
  func.func @transform_2(%arg0: i32) -> (i32, i32, i32) {
    %c0_i32 = arith.constant 0 : i32
    %c0_i32_0 = arith.constant 0 : i32
    %c0_i32_1 = arith.constant 0 : i32
    %c0_i32_2 = arith.constant 0 : i32
    return %c0_i32, %c0_i32_0, %c0_i32_1 : i32, i32, i32
  }
  func.func @transform_3(%arg0: i32) -> (i32, i32) {
    %c0_i32 = arith.constant 0 : i32
    %c0_i32_0 = arith.constant 0 : i32
    %c0_i32_1 = arith.constant 0 : i32
    return %c0_i32, %c0_i32_0 : i32, i32
  }
  func.func @transform_4(%arg0: i32) -> (i32, i32, i32) {
    %c0_i32 = arith.constant 0 : i32
    %c0_i32_0 = arith.constant 0 : i32
    %c0_i32_1 = arith.constant 0 : i32
    %c0_i32_2 = arith.constant 0 : i32
    return %c0_i32, %c0_i32_0, %c0_i32_1 : i32, i32, i32
  }
  func.func @transform_5(%arg0: i32) -> (i32, i32, i32) {
    %c0_i32 = arith.constant 0 : i32
    %c0_i32_0 = arith.constant 0 : i32
    %c0_i32_1 = arith.constant 0 : i32
    %c0_i32_2 = arith.constant 0 : i32
    return %c0_i32, %c0_i32_0, %c0_i32_1 : i32, i32, i32
  }
  func.func @transform_6(%arg0: i32) -> (i32, i32) {
    %c0_i32 = arith.constant 0 : i32
    %c0_i32_0 = arith.constant 0 : i32
    %c0_i32_1 = arith.constant 0 : i32
    return %c0_i32, %c0_i32_0 : i32, i32
  }
  func.func @transform_7(%arg0: i32) -> (i32, i32, i32) {
    %c0_i32 = arith.constant 0 : i32
    %c0_i32_0 = arith.constant 0 : i32
    %c0_i32_1 = arith.constant 0 : i32
    %c0_i32_2 = arith.constant 0 : i32
    return %c0_i32, %c0_i32_0, %c0_i32_1 : i32, i32, i32
  }
  func.func @transform_8(%arg0: i32) -> (i32, i32, i32) {
    %c0_i32 = arith.constant 0 : i32
    %c0_i32_0 = arith.constant 0 : i32
    %c0_i32_1 = arith.constant 0 : i32
    %c0_i32_2 = arith.constant 0 : i32
    return %c0_i32, %c0_i32_0, %c0_i32_1 : i32, i32, i32
  }
  func.func @transform_9(%arg0: i32) -> (i32, i32) {
    %c0_i32 = arith.constant 0 : i32
    %c0_i32_0 = arith.constant 0 : i32
    %c0_i32_1 = arith.constant 0 : i32
    return %c0_i32, %c0_i32_0 : i32, i32
  }
  func.func @transform_10(%arg0: i32) -> (i32, i32, i32) {
    %c0_i32 = arith.constant 0 : i32
    %c0_i32_0 = arith.constant 0 : i32
    %c0_i32_1 = arith.constant 0 : i32
    %c0_i32_2 = arith.constant 0 : i32
    return %c0_i32, %c0_i32_0, %c0_i32_1 : i32, i32, i32
  }
  func.func @transform_11(%arg0: i32) -> (i32, i32, i32) {
    %c0_i32 = arith.constant 0 : i32
    %c0_i32_0 = arith.constant 0 : i32
    %c0_i32_1 = arith.constant 0 : i32
    %c0_i32_2 = arith.constant 0 : i32
    return %c0_i32, %c0_i32_0, %c0_i32_1 : i32, i32, i32
  }
  func.func @transform_12(%arg0: i32) -> (i32, i32) {
    %c0_i32 = arith.constant 0 : i32
    %c0_i32_0 = arith.constant 0 : i32
    %c0_i32_1 = arith.constant 0 : i32
    return %c0_i32, %c0_i32_0 : i32, i32
  }
  func.func @transform_13(%arg0: i32) -> (i32, i32, i32) {
    %c0_i32 = arith.constant 0 : i32
    %c0_i32_0 = arith.constant 0 : i32
    %c0_i32_1 = arith.constant 0 : i32
    %c0_i32_2 = arith.constant 0 : i32
    return %c0_i32, %c0_i32_0, %c0_i32_1 : i32, i32, i32
  }
  func.func @transform_14(%arg0: i32) -> (i32, i32, i32) {
    %c0_i32 = arith.constant 0 : i32
    %c0_i32_0 = arith.constant 0 : i32
    %c0_i32_1 = arith.constant 0 : i32
    %c0_i32_2 = arith.constant 0 : i32
    return %c0_i32, %c0_i32_0, %c0_i32_1 : i32, i32, i32
  }
  func.func @transform_15(%arg0: i32) -> (i32, i32) {
    %c0_i32 = arith.constant 0 : i32
    %c0_i32_0 = arith.constant 0 : i32
    %c0_i32_1 = arith.constant 0 : i32
    return %c0_i32, %c0_i32_0 : i32, i32
  }
  func.func @transform_16(%arg0: i32) -> (i32, i32, i32) {
    %c0_i32 = arith.constant 0 : i32
    %c0_i32_0 = arith.constant 0 : i32
    %c0_i32_1 = arith.constant 0 : i32
    %c0_i32_2 = arith.constant 0 : i32
    return %c0_i32, %c0_i32_0, %c0_i32_1 : i32, i32, i32
  }
  func.func @transform_17(%arg0: i32) -> (i32, i32, i32) {
    %c0_i32 = arith.constant 0 : i32
    %c0_i32_0 = arith.constant 0 : i32
    %c0_i32_1 = arith.constant 0 : i32
    %c0_i32_2 = arith.constant 0 : i32
    return %c0_i32, %c0_i32_0, %c0_i32_1 : i32, i32, i32
  }
  func.func @transform_18(%arg0: i32) -> (i32, i32) {
    %c0_i32 = arith.constant 0 : i32
    %c0_i32_0 = arith.constant 0 : i32
    %c0_i32_1 = arith.constant 0 : i32
    return %c0_i32, %c0_i32_0 : i32, i32
  }
  func.func @transform_19(%arg0: i32) -> (i32, i32) {
    %c0_i32 = arith.constant 0 : i32
    %c0_i32_0 = arith.constant 0 : i32
    %c0_i32_1 = arith.constant 0 : i32
    return %c0_i32, %c0_i32_0 : i32, i32
  }
  func.func @transform_20(%arg0: i32) -> (i32, i32) {
    %c0_i32 = arith.constant 0 : i32
    %c0_i32_0 = arith.constant 0 : i32
    %c0_i32_1 = arith.constant 0 : i32
    return %c0_i32, %c0_i32_0 : i32, i32
  }
  func.func @transform_21(%arg0: i32) -> (i32, i32) {
    %c0_i32 = arith.constant 0 : i32
    %c0_i32_0 = arith.constant 0 : i32
    %c0_i32_1 = arith.constant 0 : i32
    return %c0_i32, %c0_i32_0 : i32, i32
  }
  func.func @transform_22(%arg0: i32) -> (i32, i32) {
    %c0_i32 = arith.constant 0 : i32
    %c0_i32_0 = arith.constant 0 : i32
    %c0_i32_1 = arith.constant 0 : i32
    return %c0_i32, %c0_i32_0 : i32, i32
  }
  func.func @transform_23(%arg0: i32) -> (i32, i32) {
    %c0_i32 = arith.constant 0 : i32
    %c0_i32_0 = arith.constant 0 : i32
    %c0_i32_1 = arith.constant 0 : i32
    return %c0_i32, %c0_i32_0 : i32, i32
  }
  func.func @transform_24(%arg0: i32) -> (i32, i32) {
    %c0_i32 = arith.constant 0 : i32
    %c0_i32_0 = arith.constant 0 : i32
    %c0_i32_1 = arith.constant 0 : i32
    return %c0_i32, %c0_i32_0 : i32, i32
  }
  func.func @transform_25(%arg0: i32) -> (i32, i32) {
    %c0_i32 = arith.constant 0 : i32
    %c0_i32_0 = arith.constant 0 : i32
    %c0_i32_1 = arith.constant 0 : i32
    return %c0_i32, %c0_i32_0 : i32, i32
  }
  func.func @transform_26(%arg0: i32) -> (i32, i32) {
    %c0_i32 = arith.constant 0 : i32
    %c0_i32_0 = arith.constant 0 : i32
    %c0_i32_1 = arith.constant 0 : i32
    return %c0_i32, %c0_i32_0 : i32, i32
  }
  func.func @transform_27(%arg0: i32) -> (i32, i32) {
    %c0_i32 = arith.constant 0 : i32
    %c0_i32_0 = arith.constant 0 : i32
    %c0_i32_1 = arith.constant 0 : i32
    return %c0_i32, %c0_i32_0 : i32, i32
  }
}

</mosaic_0001>

<bundles_post_ra>
// kernel: discriminator_forward.1
= control target key start
LH: loop header
LB: loop body
LE: loop exit
PB: predicated region body
PF: predicated region fallthrough
CT: control target
= control target key end

     0   :  { %s15430_s0 = inlined_call_operand.vmem [shape: bf16[32,128], index: 0, kind: input, shape index: {}]   ;;  %s15431_s1 = inlined_call_operand.hbm [shape: bf16[3,32,32], index: 1, kind: input, shape index: {}]   ;;  %s15432_s2 = inlined_call_operand.hbm [shape: bf16[3,128,256], index: 2, kind: input, shape index: {}]   ;;  %s15433_s3 = inlined_call_operand.vmem [shape: f32[1,256], index: 3, kind: input, shape index: {}]   ;;  %s15434_s4 = inlined_call_operand.hbm [shape: bf16[4,16,32], index: 4, kind: input, shape index: {}]   ;;  %s15435_s5 = inlined_call_operand.hbm [shape: bf16[4,256,256], index: 5, kind: input, shape index: {}]   ;;  %s15436_s6 = inlined_call_operand.hbm [shape: f32[1,256], index: 6, kind: input, shape index: {}]   ;;  %s15437_s7 = inlined_call_operand.hbm [shape: bf16[4,8,16], index: 7, kind: input, shape index: {}]   ;;  %s15438_s8 = inlined_call_operand.hbm [shape: bf16[4,256,256], index: 8, kind: input, shape index: {}]   ;;  %s15439_s9 = inlined_call_operand.hbm [shape: f32[1,256], index: 9, kind: input, shape index: {}]   ;;  %s15440_s10 = inlined_call_operand.hbm [shape: bf16[4,4,8], index: 10, kind: input, shape index: {}]   ;;  %s15441_s11 = inlined_call_operand.hbm [shape: bf16[4,256,256], index: 11, kind: input, shape index: {}]   ;;  %s15442_s12 = inlined_call_operand.hbm [shape: f32[1,256], index: 12, kind: input, shape index: {}]   ;;  %s15443_s13 = inlined_call_operand.hbm [shape: bf16[2,2,4], index: 13, kind: input, shape index: {}]   ;;  %s15444_s14 = inlined_call_operand.vmem [shape: bf16[2,256,256], index: 14, kind: input, shape index: {}]   ;;  %s15445_s15 = inlined_call_operand.hbm [shape: f32[1,256], index: 15, kind: input, shape index: {}]   ;;  %s15446_s16 = inlined_call_operand.vmem [shape: bf16[1,2,2], index: 16, kind: input, shape index: {}]   ;;  %s15447_s17 = inlined_call_operand.vmem [shape: bf16[1,256,256], index: 17, kind: input, shape index: {}]   ;;  %s15448_s18 = inlined_call_operand.vmem [shape: f32[1,256], index: 18, kind: input, shape index: {}]   ;;  %s15449_s19 = inlined_call_operand.hbm [shape: bf16[256,128], index: 19, kind: input, shape index: {}]   ;;  %s15450_s20 = inlined_call_operand.vmem [shape: f32[1,128], index: 20, kind: input, shape index: {}]   ;;  %s15451_s21 = inlined_call_operand.vmem [shape: bf16[128,128], index: 21, kind: input, shape index: {}]   ;;  %s15452_s22 = inlined_call_operand.vmem [shape: f32[1,128], index: 22, kind: input, shape index: {}]   ;;  %s15453_s23 = inlined_call_operand.hbm [shape: bf16[128,128], index: 23, kind: input, shape index: {}]   ;;  %s15454_s24 = inlined_call_operand.vmem [shape: f32[1,128], index: 24, kind: input, shape index: {}]   ;;  %s15455_s25 = inlined_call_operand.hbm [shape: bf16[128,128], index: 25, kind: input, shape index: {}]   ;;  %s15456_s26 = inlined_call_operand.vmem [shape: f32[1,128], index: 26, kind: input, shape index: {}]   ;;  %s15457_s27 = inlined_call_operand.vmem [shape: f32[2,128], index: 27, kind: output, shape index: {}]  }
   0x1   :  { %15616 = sst [smem:[#allocation67_spill]] %s15430_s0 }
   0x2   :  { %15617 = sst [smem:[#allocation68_spill]] %s15431_s1 }
   0x3   :  { %15618 = sst [smem:[#allocation69_spill]] %s15432_s2 }
   0x4   :  { %15619 = sst [smem:[#allocation70_spill]] %s15433_s3 }
   0x5   :  { %15620 = sst [smem:[#allocation71_spill]] %s15434_s4 }
   0x6   :  { %15621 = sst [smem:[#allocation72_spill]] %s15435_s5 }
   0x7   :  { %15622 = sst [smem:[#allocation73_spill]] %s15436_s6 }
   0x8   :  { %15623 = sst [smem:[#allocation74_spill]] %s15437_s7 }
   0x9   :  { %15624 = sst [smem:[#allocation75_spill]] %s15438_s8 }
   0xa   :  { %15625 = sst [smem:[#allocation76_spill]] %s15439_s9 }
   0xb   :  { %15626 = sst [smem:[#allocation77_spill]] %s15440_s10 }
   0xc   :  { %15627 = sst [smem:[#allocation78_spill]] %s15441_s11 }
   0xd   :  { %15628 = sst [smem:[#allocation79_spill]] %s15456_s26 }
   0xe   :  { %15629 = sst [smem:[#allocation80_spill]] %s15457_s27 }
   0xf   :  { %32 = vsyncpa [#allocation3], 0 }
  0x10   :  { %33 = vsyncpa [#allocation5], 0 }
  0x11   :  { %34 = vsyncpa [#allocation8], 0 }
  0x12   :  { %35 = vsyncpa [#allocation11], 0 }
  0x13   :  { %36 = vsyncpa [#allocation14], 0 }
  0x14   :  { %37 = vsyncpa [#allocation17], 0 }
  0x15   :  { %38 = vsyncpa [#allocation20], 0 }
  0x16   :  { %39 = vsyncpa [#allocation23], 0 }
  0x17   :  { %40 = vsyncpa [#allocation26], 0  ;;  %s12884_s3 = smov [#allocation4]   ;;  %s15630_s30 = sld [smem:[#allocation69_spill]] }
  0x18   :  { %s60_s7 = sshll.u32 %s12884_s3, 4  ;;  %s61_s7 = int_to_ptr.vmem [resolvable:$true] %s60_s7 }
  0x1d   :  { %s12514_s9 = scalar_lea.hbm %s15630_s30, 6144 }
  0x1e   :  { %p12515_p0 = scmp.ne.s32.totalorder %s15630_s30, %s12514_s9  ;;  %p12518_p1 = scmp.lt.u32.totalorder %s12514_s9, %s15630_s30 }
  0x20   :  { %p12520_p2 = pnand %p12518_p1, %p12515_p0 }
  0x22   :  { %12523 = shalt.err (!%p12520_p2)
}
  0x23   :  { %s12524_s0 = scalar_lea.vmem %s61_s7, 6144  ;;  %p12529_p4 = scmp.lt.s32.totalorder %s61_s7, %s61_s7 }
  0x24   :  { %p12525_p3 = scmp.ne.s32.totalorder %s61_s7, %s12524_s0  ;;  %p12530_p5 = scmp.lt.s32.totalorder %s12524_s0, %s12524_s0 }
  0x26   :  { %p12531_p6 = por %p12530_p5, %p12529_p4 }
  0x28   :  { %p12532_p7 = pnand %p12531_p6, %p12525_p3 }
  0x2a   :  { %12535 = shalt.err (!%p12532_p7)
}
  0x2b   :  { %s12885_s29 = smov 128   ;;  %s12886_s1 = smov 8  }
  0x2c   :  { %66 = dma.hbm_to_vmem [thread:$0]  %s15630_s30, 6144, %s61_s7, [#allocation5], %s12885_s29, %s12885_s29, %s12886_s1  }
  0x2d   :  { %s12887_s2 = smov [#allocation7]   ;;  %s15631_s9 = sld [smem:[#allocation72_spill]] }
  0x2e   :  { %s86_s3 = sshll.u32 %s12887_s2, 4  ;;  %s87_s3 = int_to_ptr.vmem [resolvable:$true] %s86_s3 }
  0x33   :  { %s12536_s5 = scalar_lea.hbm %s15631_s9, 16384 }
  0x34   :  { %p12537_p8 = scmp.ne.s32.totalorder %s15631_s9, %s12536_s5  ;;  %p12540_p9 = scmp.lt.u32.totalorder %s12536_s5, %s15631_s9 }
  0x36   :  { %p12542_p10 = pnand %p12540_p9, %p12537_p8 }
  0x38   :  { %12545 = shalt.err (!%p12542_p10)
}
  0x39   :  { %s12546_s27 = scalar_lea.vmem %s87_s3, 16384  ;;  %p12551_p12 = scmp.lt.s32.totalorder %s87_s3, %s87_s3 }
  0x3a   :  { %p12547_p11 = scmp.ne.s32.totalorder %s87_s3, %s12546_s27  ;;  %p12552_p13 = scmp.lt.s32.totalorder %s12546_s27, %s12546_s27 }
  0x3c   :  { %p12553_p0 = por %p12552_p13, %p12551_p12 }
  0x3e   :  { %p12554_p1 = pnand %p12553_p0, %p12547_p11 }
  0x40   :  { %12557 = shalt.err (!%p12554_p1)
}
  0x41   :  { %92 = dma.hbm_to_vmem [thread:$0]  %s15631_s9, 16384, %s87_s3, [#allocation8], %s12885_s29, %s12885_s29, %s12886_s1  }
  0x42   :  { %s12888_s11 = smov [#allocation10]   ;;  %s12889_s2 = smov [#allocation13]  }
  0x43   :  { %s108_s6 = sshll.u32 %s12888_s11, 4  ;;  %s133_s4 = sshll.u32 %s12889_s2, 4  ;;  %s109_s6 = int_to_ptr.vmem [resolvable:$true] %s108_s6  ;;  %s134_s4 = int_to_ptr.vmem [resolvable:$true] %s133_s4 }
  0x44   :  { %s15632_s16 = sld [smem:[#allocation74_spill]] }
  0x4a   :  { %s12558_s27 = scalar_lea.hbm %s15632_s16, 256 }
  0x4b   :  { %p12559_p2 = scmp.ne.s32.totalorder %s15632_s16, %s12558_s27  ;;  %p12562_p3 = scmp.lt.u32.totalorder %s12558_s27, %s15632_s16 }
  0x4d   :  { %p12564_p4 = pnand %p12562_p3, %p12559_p2 }
  0x4f   :  { %12567 = shalt.err (!%p12564_p4)
}
  0x50   :  { %s12568_s3 = scalar_lea.vmem %s109_s6, 256  ;;  %p12573_p6 = scmp.lt.s32.totalorder %s109_s6, %s109_s6 }
  0x51   :  { %p12569_p5 = scmp.ne.s32.totalorder %s109_s6, %s12568_s3  ;;  %p12574_p7 = scmp.lt.s32.totalorder %s12568_s3, %s12568_s3 }
  0x53   :  { %p12575_p8 = por %p12574_p7, %p12573_p6 }
  0x55   :  { %p12576_p9 = pnand %p12575_p8, %p12569_p5 }
  0x57   :  { %12579 = shalt.err (!%p12576_p9)
}
  0x58   :  { %s15469_s9 = smov 64   ;;  %s15471_s7 = smov 4  }
  0x59   :  { %114 = dma.hbm_to_vmem [thread:$0]  %s15632_s16, 256, %s109_s6, [#allocation11], %s15469_s9, %s15469_s9, %s15471_s7  }
  0x5a   :  { %s15633_s8 = sld [smem:[#allocation76_spill]] }
  0x60   :  { %s12580_s5 = scalar_lea.hbm %s15633_s8, 32 }
  0x61   :  { %p12581_p10 = scmp.ne.s32.totalorder %s15633_s8, %s12580_s5  ;;  %p12584_p11 = scmp.lt.u32.totalorder %s12580_s5, %s15633_s8 }
  0x63   :  { %p12586_p12 = pnand %p12584_p11, %p12581_p10 }
  0x65   :  { %12589 = shalt.err (!%p12586_p12)
}
  0x66   :  { %s12590_s3 = scalar_lea.vmem %s134_s4, 32  ;;  %p12595_p0 = scmp.lt.s32.totalorder %s134_s4, %s134_s4 }
  0x67   :  { %p12591_p13 = scmp.ne.s32.totalorder %s134_s4, %s12590_s3  ;;  %p12596_p1 = scmp.lt.s32.totalorder %s12590_s3, %s12590_s3 }
  0x69   :  { %p12597_p2 = por %p12596_p1, %p12595_p0 }
  0x6b   :  { %p12598_p3 = pnand %p12597_p2, %p12591_p13 }
  0x6d   :  { %12601 = shalt.err (!%p12598_p3)
}
  0x6e   :  { %136 = dma.hbm_to_vmem [thread:$0]  %s15633_s8, 32, %s134_s4, [#allocation14]  }
  0x6f   :  { %s12892_s30 = smov [#allocation16]   ;;  %s12893_s26 = smov [#allocation19]  }
  0x70   :  { %s154_s11 = sshll.u32 %s12892_s30, 4  ;;  %s176_s2 = sshll.u32 %s12893_s26, 4  ;;  %s155_s11 = int_to_ptr.vmem [resolvable:$true] %s154_s11  ;;  %s13109_s2 = int_to_ptr.vmem [resolvable:$true] %s176_s2 }
  0x71   :  { %s15634_s28 = sld [smem:[#allocation78_spill]] }
  0x77   :  { %s12602_s10 = scalar_lea.hbm %s15634_s28, 16384 }
  0x78   :  { %p12603_p4 = scmp.ne.s32.totalorder %s15634_s28, %s12602_s10  ;;  %p12606_p5 = scmp.lt.u32.totalorder %s12602_s10, %s15634_s28 }
  0x7a   :  { %p12608_p6 = pnand %p12606_p5, %p12603_p4 }
  0x7c   :  { %12611 = shalt.err (!%p12608_p6)
}
  0x7d   :  { %s12612_s4 = scalar_lea.vmem %s155_s11, 16384  ;;  %p12617_p8 = scmp.lt.s32.totalorder %s155_s11, %s155_s11 }
  0x7e   :  { %p12613_p7 = scmp.ne.s32.totalorder %s155_s11, %s12612_s4  ;;  %p12618_p9 = scmp.lt.s32.totalorder %s12612_s4, %s12612_s4 }
  0x80   :  { %p12619_p10 = por %p12618_p9, %p12617_p8 }
  0x82   :  { %p12620_p11 = pnand %p12619_p10, %p12613_p7 }
  0x84   :  { %12623 = shalt.err (!%p12620_p11)
}
  0x85   :  { %160 = dma.hbm_to_vmem [thread:$0]  %s15634_s28, 16384, %s155_s11, [#allocation17], %s12885_s29, %s12885_s29, %s12886_s1  }
  0x86   :  { %s12624_s9 = scalar_lea.hbm %s15443_s13, 32 }
  0x87   :  { %p12625_p12 = scmp.ne.s32.totalorder %s15443_s13, %s12624_s9  ;;  %p12628_p13 = scmp.lt.u32.totalorder %s12624_s9, %s15443_s13 }
  0x89   :  { %p12630_p0 = pnand %p12628_p13, %p12625_p12 }
  0x8b   :  { %12633 = shalt.err (!%p12630_p0)
}
  0x8c   :  { %s12634_s10 = scalar_lea.vmem %s13109_s2, 32  ;;  %p12639_p2 = scmp.lt.s32.totalorder %s13109_s2, %s13109_s2 }
  0x8d   :  { %p12635_p1 = scmp.ne.s32.totalorder %s13109_s2, %s12634_s10  ;;  %p12640_p3 = scmp.lt.s32.totalorder %s12634_s10, %s12634_s10 }
  0x8f   :  { %p12641_p4 = por %p12640_p3, %p12639_p2 }
  0x91   :  { %p12642_p5 = pnand %p12641_p4, %p12635_p1 }
  0x93   :  { %12645 = shalt.err (!%p12642_p5)
}
  0x94   :  { %s12894_s11 = smov 16   ;;  %s12895_s28 = smov 1  }
  0x95   :  { %182 = dma.hbm_to_vmem [thread:$0]  %s15443_s13, 32, %s13109_s2, [#allocation20], %s12894_s11, %s12894_s11, %s12895_s28  }
  0x96   :  { %s12896_s4 = smov [#allocation22]   ;;  %s12897_s6 = smov [#allocation2]  }
  0x97   :  { %s206_s8 = sshll.u32 %s12896_s4, 4  ;;  %s48_s16 = sshll.u32 %s12897_s6, 4  ;;  %s207_s8 = int_to_ptr.vmem [resolvable:$true] %s206_s8  ;;  %s13143_s16 = int_to_ptr.vmem [resolvable:$true] %s48_s16 }
  0x98   :  { %s12646_s7 = scalar_lea.hbm %s15449_s19, 2048 }
  0x99   :  { %p12647_p6 = scmp.ne.s32.totalorder %s15449_s19, %s12646_s7  ;;  %p12650_p7 = scmp.lt.u32.totalorder %s12646_s7, %s15449_s19 }
  0x9b   :  { %p12652_p8 = pnand %p12650_p7, %p12647_p6 }
  0x9d   :  { %12655 = shalt.err (!%p12652_p8)
}
  0x9e   :  { %s12656_s13 = scalar_lea.vmem %s207_s8, 2048  ;;  %p12661_p10 = scmp.lt.s32.totalorder %s207_s8, %s207_s8 }
  0x9f   :  { %p12657_p9 = scmp.ne.s32.totalorder %s207_s8, %s12656_s13  ;;  %p12662_p11 = scmp.lt.s32.totalorder %s12656_s13, %s12656_s13 }
  0xa1   :  { %p12663_p12 = por %p12662_p11, %p12661_p10 }
  0xa3   :  { %p12664_p13 = pnand %p12663_p12, %p12657_p9 }
  0xa5   :  { %12667 = shalt.err (!%p12664_p13)
}
  0xa6   :  { %s15635_s2 = smov 4   ;;  %s15636_s11 = smov 64  }
  0xa7   :  { %212 = dma.hbm_to_vmem [thread:$0]  %s15449_s19, 2048, %s207_s8, [#allocation23], %s15636_s11, %s15636_s11, %s15635_s2  }
  0xa8   :  { %s15637_s6 = sld [smem:[#allocation68_spill]] }
  0xae   :  { %s12668_s30 = scalar_lea.hbm %s15637_s6, 768 }
  0xaf   :  { %p12669_p0 = scmp.ne.s32.totalorder %s15637_s6, %s12668_s30  ;;  %p12672_p1 = scmp.lt.u32.totalorder %s12668_s30, %s15637_s6 }
  0xb1   :  { %p12674_p2 = pnand %p12672_p1, %p12669_p0 }
  0xb3   :  { %12677 = shalt.err (!%p12674_p2)
}
  0xb4   :  { %s12678_s27 = scalar_lea.vmem %s13143_s16, 768  ;;  %p12683_p4 = scmp.lt.s32.totalorder %s13143_s16, %s13143_s16 }
  0xb5   :  { %p12679_p3 = scmp.ne.s32.totalorder %s13143_s16, %s12678_s27  ;;  %p12684_p5 = scmp.lt.s32.totalorder %s12678_s27, %s12678_s27 }
  0xb7   :  { %p12685_p6 = por %p12684_p5, %p12683_p4 }
  0xb9   :  { %p12686_p7 = pnand %p12685_p6, %p12679_p3 }
  0xbb   :  { %12689 = shalt.err (!%p12686_p7)
}
  0xbc   :  { %54 = dma.hbm_to_vmem [thread:$0]  %s15637_s6, 768, %s13143_s16, [#allocation3], %s15636_s11, %s15636_s11, %s15635_s2  }
  0xbd   :  { %s12898_s10 = smov [#allocation6]   ;;  %s12899_s28 = smov [#allocation9]  }
  0xbe   :  { %s74_s13 = sshll.u32 %s12898_s10, 4  ;;  %s99_s0 = sshll.u32 %s12899_s28, 4  ;;  %s75_s13 = int_to_ptr.vmem [resolvable:$true] %s74_s13  ;;  %s100_s0 = int_to_ptr.vmem [resolvable:$true] %s99_s0 }
  0xbf   :  { %s15638_s30 = sld [smem:[#allocation71_spill]] }
  0xc5   :  { %s12690_s9 = scalar_lea.hbm %s15638_s30, 512 }
  0xc6   :  { %p12691_p8 = scmp.ne.s32.totalorder %s15638_s30, %s12690_s9  ;;  %p12694_p9 = scmp.lt.u32.totalorder %s12690_s9, %s15638_s30 }
  0xc8   :  { %p12696_p10 = pnand %p12694_p9, %p12691_p8 }
  0xca   :  { %12699 = shalt.err (!%p12696_p10)
}
  0xcb   :  { %s12700_s16 = scalar_lea.vmem %s75_s13, 512  ;;  %p12705_p12 = scmp.lt.s32.totalorder %s75_s13, %s75_s13 }
  0xcc   :  { %p12701_p11 = scmp.ne.s32.totalorder %s75_s13, %s12700_s16  ;;  %p12706_p13 = scmp.lt.s32.totalorder %s12700_s16, %s12700_s16 }
  0xce   :  { %p12707_p0 = por %p12706_p13, %p12705_p12 }
  0xd0   :  { %p12708_p1 = pnand %p12707_p0, %p12701_p11 }
  0xd2   :  { %12711 = shalt.err (!%p12708_p1)
}
  0xd3   :  { %80 = dma.hbm_to_vmem [thread:$0]  %s15638_s30, 512, %s75_s13, [#allocation5], %s15636_s11, %s15636_s11, %s15635_s2  }
  0xd4   :  { %s15639_s28 = sld [smem:[#allocation73_spill]] }
  0xda   :  { %s12712_s3 = scalar_lea.hbm %s15639_s28, 32 }
  0xdb   :  { %p12713_p2 = scmp.ne.s32.totalorder %s15639_s28, %s12712_s3  ;;  %p12716_p3 = scmp.lt.u32.totalorder %s12712_s3, %s15639_s28 }
  0xdd   :  { %p12718_p4 = pnand %p12716_p3, %p12713_p2 }
  0xdf   :  { %12721 = shalt.err (!%p12718_p4)
}
  0xe0   :  { %s12722_s5 = scalar_lea.vmem %s100_s0, 32  ;;  %p12727_p6 = scmp.lt.s32.totalorder %s100_s0, %s100_s0 }
  0xe1   :  { %p12723_p5 = scmp.ne.s32.totalorder %s100_s0, %s12722_s5  ;;  %p12728_p7 = scmp.lt.s32.totalorder %s12722_s5, %s12722_s5 }
  0xe3   :  { %p12729_p8 = por %p12728_p7, %p12727_p6 }
  0xe5   :  { %p12730_p9 = pnand %p12729_p8, %p12723_p5 }
  0xe7   :  { %12733 = shalt.err (!%p12730_p9)
}
  0xe8   :  { %102 = dma.hbm_to_vmem [thread:$0]  %s15639_s28, 32, %s100_s0, [#allocation8]  }
  0xe9   :  { %s12900_s27 = smov [#allocation12]   ;;  %s12901_s6 = smov [#allocation15]  }
  0xea   :  { %s120_s16 = sshll.u32 %s12900_s27, 4  ;;  %s142_s19 = sshll.u32 %s12901_s6, 4  ;;  %s121_s16 = int_to_ptr.vmem [resolvable:$true] %s120_s16  ;;  %s13207_s19 = int_to_ptr.vmem [resolvable:$true] %s142_s19 }
  0xeb   :  { %s15640_s3 = sld [smem:[#allocation75_spill]] }
  0xf1   :  { %s12734_s4 = scalar_lea.hbm %s15640_s3, 16384 }
  0xf2   :  { %p12735_p10 = scmp.ne.s32.totalorder %s15640_s3, %s12734_s4  ;;  %p12738_p11 = scmp.lt.u32.totalorder %s12734_s4, %s15640_s3 }
  0xf4   :  { %p12740_p12 = pnand %p12738_p11, %p12735_p10 }
  0xf6   :  { %12743 = shalt.err (!%p12740_p12)
}
  0xf7   :  { %s12744_s0 = scalar_lea.vmem %s121_s16, 16384  ;;  %p12749_p0 = scmp.lt.s32.totalorder %s121_s16, %s121_s16 }
  0xf8   :  { %p12745_p13 = scmp.ne.s32.totalorder %s121_s16, %s12744_s0  ;;  %p12750_p1 = scmp.lt.s32.totalorder %s12744_s0, %s12744_s0 }
  0xfa   :  { %p12751_p2 = por %p12750_p1, %p12749_p0 }
  0xfc   :  { %p12752_p3 = pnand %p12751_p2, %p12745_p13 }
  0xfe   :  { %12755 = shalt.err (!%p12752_p3)
}
  0xff   :  { %126 = dma.hbm_to_vmem [thread:$0]  %s15640_s3, 16384, %s121_s16, [#allocation11], %s12885_s29, %s12885_s29, %s12886_s1  }
 0x100   :  { %s15641_s6 = sld [smem:[#allocation77_spill]] }
 0x106   :  { %s12756_s8 = scalar_lea.hbm %s15641_s6, 128 }
 0x107   :  { %p12757_p4 = scmp.ne.s32.totalorder %s15641_s6, %s12756_s8  ;;  %p12760_p5 = scmp.lt.u32.totalorder %s12756_s8, %s15641_s6 }
 0x109   :  { %p12762_p6 = pnand %p12760_p5, %p12757_p4 }
 0x10b   :  { %12765 = shalt.err (!%p12762_p6)
}
 0x10c   :  { %s12766_s26 = scalar_lea.vmem %s13207_s19, 128  ;;  %p12771_p8 = scmp.lt.s32.totalorder %s13207_s19, %s13207_s19 }
 0x10d   :  { %p12767_p7 = scmp.ne.s32.totalorder %s13207_s19, %s12766_s26  ;;  %p12772_p9 = scmp.lt.s32.totalorder %s12766_s26, %s12766_s26 }
 0x10f   :  { %p12773_p10 = por %p12772_p9, %p12771_p8 }
 0x111   :  { %p12774_p11 = pnand %p12773_p10, %p12767_p7 }
 0x113   :  { %12777 = shalt.err (!%p12774_p11)
}
 0x114   :  { %s12902_s29 = smov 32   ;;  %s12903_s1 = smov 2  }
 0x115   :  { %148 = dma.hbm_to_vmem [thread:$0]  %s15641_s6, 128, %s13207_s19, [#allocation14], %s12902_s29, %s12902_s29, %s12903_s1  }
 0x116   :  { %s12904_s5 = smov [#allocation18]   ;;  %s12905_s28 = smov [#allocation21]  }
 0x117   :  { %s167_s0 = sshll.u32 %s12904_s5, 4  ;;  %s191_s13 = sshll.u32 %s12905_s28, 4  ;;  %s168_s0 = int_to_ptr.vmem [resolvable:$true] %s167_s0  ;;  %s192_s13 = int_to_ptr.vmem [resolvable:$true] %s191_s13 }
 0x118   :  { %s12778_s8 = scalar_lea.hbm %s15442_s12, 32 }
 0x119   :  { %p12779_p12 = scmp.ne.s32.totalorder %s15442_s12, %s12778_s8  ;;  %p12782_p13 = scmp.lt.u32.totalorder %s12778_s8, %s15442_s12 }
 0x11b   :  { %p12784_p0 = pnand %p12782_p13, %p12779_p12 }
 0x11d   :  { %12787 = shalt.err (!%p12784_p0)
}
 0x11e   :  { %s12788_s19 = scalar_lea.vmem %s168_s0, 32  ;;  %p12793_p2 = scmp.lt.s32.totalorder %s168_s0, %s168_s0 }
 0x11f   :  { %p12789_p1 = scmp.ne.s32.totalorder %s168_s0, %s12788_s19  ;;  %p12794_p3 = scmp.lt.s32.totalorder %s12788_s19, %s12788_s19 }
 0x121   :  { %p12795_p4 = por %p12794_p3, %p12793_p2 }
 0x123   :  { %p12796_p5 = pnand %p12795_p4, %p12789_p1 }
 0x125   :  { %12799 = shalt.err (!%p12796_p5)
}
 0x126   :  { %170 = dma.hbm_to_vmem [thread:$0]  %s15442_s12, 32, %s168_s0, [#allocation17]  }
 0x127   :  { %s12800_s16 = scalar_lea.hbm %s15445_s15, 32 }
 0x128   :  { %p12801_p6 = scmp.ne.s32.totalorder %s15445_s15, %s12800_s16  ;;  %p12804_p7 = scmp.lt.u32.totalorder %s12800_s16, %s15445_s15 }
 0x12a   :  { %p12806_p8 = pnand %p12804_p7, %p12801_p6 }
 0x12c   :  { %12809 = shalt.err (!%p12806_p8)
}
 0x12d   :  { %s12810_s27 = scalar_lea.vmem %s192_s13, 32  ;;  %p12815_p10 = scmp.lt.s32.totalorder %s192_s13, %s192_s13 }
 0x12e   :  { %p12811_p9 = scmp.ne.s32.totalorder %s192_s13, %s12810_s27  ;;  %p12816_p11 = scmp.lt.s32.totalorder %s12810_s27, %s12810_s27 }
 0x130   :  { %p12817_p12 = por %p12816_p11, %p12815_p10 }
 0x132   :  { %p12818_p13 = pnand %p12817_p12, %p12811_p9 }
 0x134   :  { %12821 = shalt.err (!%p12818_p13)
}
 0x135   :  { %194 = dma.hbm_to_vmem [thread:$0]  %s15445_s15, 32, %s192_s13, [#allocation20]  }
 0x136   :  { %s12906_s8 = smov [#allocation24]   ;;  %s12907_s4 = smov [#allocation25]  }
 0x137   :  { %s224_s10 = sshll.u32 %s12906_s8, 4  ;;  %s238_s9 = sshll.u32 %s12907_s4, 4  ;;  %s225_s10 = int_to_ptr.vmem [resolvable:$true] %s224_s10  ;;  %s13265_s9 = int_to_ptr.vmem [resolvable:$true] %s238_s9 }
 0x138   :  { %s12822_s6 = scalar_lea.hbm %s15453_s23, 1024 }
 0x139   :  { %p12823_p0 = scmp.ne.s32.totalorder %s15453_s23, %s12822_s6  ;;  %p12826_p1 = scmp.lt.u32.totalorder %s12822_s6, %s15453_s23 }
 0x13b   :  { %p12828_p2 = pnand %p12826_p1, %p12823_p0 }
 0x13d   :  { %12831 = shalt.err (!%p12828_p2)
}
 0x13e   :  { %s12832_s15 = scalar_lea.vmem %s225_s10, 1024  ;;  %p12837_p4 = scmp.lt.s32.totalorder %s225_s10, %s225_s10 }
 0x13f   :  { %p12833_p3 = scmp.ne.s32.totalorder %s225_s10, %s12832_s15  ;;  %p12838_p5 = scmp.lt.s32.totalorder %s12832_s15, %s12832_s15 }
 0x141   :  { %p12839_p6 = por %p12838_p5, %p12837_p4 }
 0x143   :  { %p12840_p7 = pnand %p12839_p6, %p12833_p3 }
 0x145   :  { %12843 = shalt.err (!%p12840_p7)
}
 0x146   :  { %230 = dma.hbm_to_vmem [thread:$0]  %s15453_s23, 1024, %s225_s10, [#allocation23], %s15636_s11, %s15636_s11, %s15635_s2  }
 0x147   :  { %s12844_s30 = scalar_lea.hbm %s15455_s25, 1024 }
 0x148   :  { %p12845_p8 = scmp.ne.s32.totalorder %s15455_s25, %s12844_s30  ;;  %p12848_p9 = scmp.lt.u32.totalorder %s12844_s30, %s15455_s25 }
 0x14a   :  { %p12850_p10 = pnand %p12848_p9, %p12845_p8 }
 0x14c   :  { %12853 = shalt.err (!%p12850_p10)
}
 0x14d   :  { %s12854_s4 = scalar_lea.vmem %s13265_s9, 1024  ;;  %p12859_p12 = scmp.lt.s32.totalorder %s13265_s9, %s13265_s9 }
 0x14e   :  { %p12855_p11 = scmp.ne.s32.totalorder %s13265_s9, %s12854_s4  ;;  %p12860_p13 = scmp.lt.s32.totalorder %s12854_s4, %s12854_s4 }
 0x150   :  { %p12861_p0 = por %p12860_p13, %p12859_p12 }
 0x152   :  { %p12862_p1 = pnand %p12861_p0, %p12855_p11 }
 0x154   :  { %12865 = shalt.err (!%p12862_p1)
}
 0x155   :  { %244 = dma.hbm_to_vmem [thread:$0]  %s15455_s25, 1024, %s13265_s9, [#allocation26], %s15636_s11, %s15636_s11, %s15635_s2  }
 0x156   :  { %12866 = dma.done.wait [#allocation3], 768  }
 0x157   :  { %12867 = vsyncadd [#allocation3], 4294966528 }
 0x158   :  { %12868 = dma.done.wait [#allocation5], 6656  }
 0x159   :  { %12869 = vsyncadd [#allocation5], 4294960640 }
 0x15a   :  { %12870 = dma.done.wait [#allocation8], 16416  }
 0x15b   :  { %12871 = vsyncadd [#allocation8], 4294950880 }
 0x15c   :  { %12872 = dma.done.wait [#allocation11], 16640  }
 0x15d   :  { %12873 = vsyncadd [#allocation11], 4294950656 }
 0x15e   :  { %12874 = dma.done.wait [#allocation14], 160  }
 0x15f   :  { %12875 = vsyncadd [#allocation14], 4294967136 }
 0x160   :  { %12876 = dma.done.wait [#allocation17], 16416  }
 0x161   :  { %12877 = vsyncadd [#allocation17], 4294950880 }
 0x162   :  { %12878 = dma.done.wait [#allocation20], 64  }
 0x163   :  { %12879 = vsyncadd [#allocation20], 4294967232 }
 0x164   :  { %12880 = dma.done.wait [#allocation23], 3072  }
 0x165   :  { %12881 = vsyncadd [#allocation23], 4294964224 }
 0x166   :  { %12882 = dma.done.wait [#allocation26], 1024  }
 0x167   :  { %12883 = vsyncadd [#allocation26], 4294966272  ;;  %v15499_v0 = vmov 0   ;;  %s15642_s11 = sld [smem:[#allocation67_spill]]  ;;  %vm15473_vm0 = vcmask 261120   ;;  %v11654_v3 = vld [vmem:[#allocation2] sm:$0xff]   ;;  %v915_v40 = vlaneseq }
 0x168   :  { %529 = vmatprep.mubr.bf16.mxu1 %v15499_v0  ;;  %11148 = vmatprep.mubr.msk.bf16.mxu0 %vm15473_vm0, %v11654_v3  ;;  %v11655_v4 = vld [vmem:[#allocation2 + $0x8] sm:$0xff]   ;;  %v11656_v5 = vld [vmem:[#allocation2 + $0x20] sm:$0xff]   ;;  %v11658_v6 = vld [vmem:[#allocation4 + $0x84] ss:$8 sps:$4 sm:$0xff]   ;;  %v15529_v49 = vmov 1.0|1.0  }
 0x169   :  { %v11660_v7 = vld [vmem:[#allocation4 + $0x80] ss:$8 sps:$4 sm:$0xff]   ;;  %497 = vmatprep.subr.bf16.mxu1 %v11658_v6  ;;  %v11661_v8 = vld [vmem:[#allocation4 + $0x94] ss:$8 sps:$4 sm:$0xff]   ;;  %v11663_v9 = vld [vmem:[#allocation4 + $0x90] ss:$8 sps:$4 sm:$0xff]  }
 0x16a   :  { %498 = vmatpush1.bf16.msra.mxu1 %v11660_v7  ;;  %v11664_v10 = vld [vmem:[#allocation4 + $0xa4] ss:$8 sps:$4 sm:$0xff]   ;;  %v11657_v11 = vld [vmem:[#allocation2 + $0x28] sm:$0xff]   ;;  %v11666_v12 = vld [vmem:[#allocation4 + $0xa0] ss:$8 sps:$4 sm:$0xff]   ;;  %v13322_v41 = vshrl.u32 %v915_v40, 7 }
 0x16b   :  { %499 = vmatprep.subr.bf16.mxu1 %v11661_v8  ;;  %v11667_v13 = vld [vmem:[#allocation4 + $0xb4] ss:$8 sps:$4 sm:$0xff]   ;;  %v11669_v14 = vld [vmem:[#allocation4 + $0xb0] ss:$8 sps:$4 sm:$0xff]   ;;  %v11670_v15 = vld [vmem:[#allocation4 + $0xc4] ss:$8 sps:$4 sm:$0xff]  }
 0x16c   :  { %v11672_v16 = vld [vmem:[#allocation4 + $0xc0] ss:$8 sps:$4 sm:$0xff]   ;;  %v11673_v17 = vld [vmem:[#allocation4 + $0xd4] ss:$8 sps:$4 sm:$0xff]   ;;  %v11675_v18 = vld [vmem:[#allocation4 + $0xd0] ss:$8 sps:$4 sm:$0xff]  }
 0x16d   :  { %v11652_v1 = vld [vmem:[%s15642_s11] sm:$0xff]   ;;  %v13309_v2 = vld [vmem:[%s15642_s11 + $0x8] sm:$0xff]   ;;  %v11676_v19 = vld [vmem:[#allocation4 + $0xe4] ss:$8 sps:$4 sm:$0xff]   ;;  %v13325_v42 = vadd.s32 128, %v13322_v41  ;;  %v13328_v43 = vadd.s32 136, %v13322_v41 }
 0x16e   :  { %11144 = vmatprep.subr.bf16.mxu0 %v11652_v1  ;;  %500 = vmatpush1.bf16.msra.mxu1 %v11663_v9  ;;  %v11678_v20 = vld [vmem:[#allocation4 + $0xe0] ss:$8 sps:$4 sm:$0xff]   ;;  %v11679_v21 = vld [vmem:[#allocation4 + $0xf4] ss:$8 sps:$4 sm:$0xff]   ;;  %v11681_v22 = vld [vmem:[#allocation4 + $0xf0] ss:$8 sps:$4 sm:$0xff]  }
 0x16f   :  { %11145 = vmatpush3.bf16.msra.mxu0 %v11652_v1  ;;  %501 = vmatprep.subr.bf16.mxu1 %v11664_v10  ;;  %v11684_v23 = vld [vmem:[#allocation4 + $0x4] ss:$8 sps:$4 sm:$0xff]   ;;  %v11682_v24 = vld [vmem:[#allocation4] ss:$8 sps:$4 sm:$0xff]   ;;  %v11687_v25 = vld [vmem:[#allocation4 + $0x14] ss:$8 sps:$4 sm:$0xff]  }
 0x170   :  { %11146 = vmatprep.subr.bf16.mxu0 %v13309_v2  ;;  %v11685_v26 = vld [vmem:[#allocation4 + $0x10] ss:$8 sps:$4 sm:$0xff]   ;;  %v11690_v27 = vld [vmem:[#allocation4 + $0x24] ss:$8 sps:$4 sm:$0xff]   ;;  %v11688_v28 = vld [vmem:[#allocation4 + $0x20] ss:$8 sps:$4 sm:$0xff]  }
 0x171   :  { %v11693_v29 = vld [vmem:[#allocation4 + $0x34] ss:$8 sps:$4 sm:$0xff]   ;;  %v11691_v30 = vld [vmem:[#allocation4 + $0x30] ss:$8 sps:$4 sm:$0xff]   ;;  %v11696_v31 = vld [vmem:[#allocation4 + $0x44] ss:$8 sps:$4 sm:$0xff]  }
 0x172   :  { %502 = vmatpush1.bf16.msra.mxu1 %v11666_v12  ;;  %v11694_v32 = vld [vmem:[#allocation4 + $0x40] ss:$8 sps:$4 sm:$0xff]   ;;  %v11699_v33 = vld [vmem:[#allocation4 + $0x54] ss:$8 sps:$4 sm:$0xff]   ;;  %v11697_v34 = vld [vmem:[#allocation4 + $0x50] ss:$8 sps:$4 sm:$0xff]  }
 0x173   :  { %11147 = vmatpush3.bf16.msra.mxu0 %v13309_v2  ;;  %503 = vmatprep.subr.bf16.mxu1 %v11667_v13  ;;  %v11702_v35 = vld [vmem:[#allocation4 + $0x64] ss:$8 sps:$4 sm:$0xff]   ;;  %v11700_v36 = vld [vmem:[#allocation4 + $0x60] ss:$8 sps:$4 sm:$0xff]   ;;  %v11705_v37 = vld [vmem:[#allocation4 + $0x74] ss:$8 sps:$4 sm:$0xff]  }
 0x174   :  { %11152 = vmatprep.subr.bf16.mxu0 %v11652_v1  ;;  %v11703_v38 = vld [vmem:[#allocation4 + $0x70] ss:$8 sps:$4 sm:$0xff]   ;;  %v11708_v39 = vld [vmem:[#allocation4 + $0x104] ss:$8 sps:$4 sm:$0xff]   ;;  %15643 = vst [vmem:[#allocation36_spill] sm:$0xff] %v13325_v42  ;;  %15644 = vst [vmem:[#allocation37_spill] sm:$0xff] %v13328_v43 }
 0x175   :  { %v13330_v44 = vand.u32 127, %v915_v40  ;;  %v1106_v45 = vand.u32 15, %v13325_v42  ;;  %v1113_v46 = vand.u32 15, %v13328_v43  ;;  %v11706_v52 = vld [vmem:[#allocation4 + $0x100] ss:$8 sps:$4 sm:$0xff]   ;;  %s15739_s26 = sld [smem:[#allocation70_spill]] }
 0x176   :  { %11149 = vmatmul.mubr.msk.bf16.vlgmr.msra.gmra.mrb[0].mxu0 %vm15473_vm0, %v11655_v4  ;;  %504 = vmatpush1.bf16.msra.mxu1 %v11669_v14  ;;  %v11711_v54 = vld [vmem:[#allocation4 + $0x114] ss:$8 sps:$4 sm:$0xff]   ;;  %v11709_v58 = vld [vmem:[#allocation4 + $0x110] ss:$8 sps:$4 sm:$0xff]   ;;  %v11714_v59 = vld [vmem:[#allocation4 + $0x124] ss:$8 sps:$4 sm:$0xff]  }
 0x177   :  { %11153 = vmatpush3.bf16.msra.mxu0 %v11652_v1  ;;  %11156 = vmatprep.mubr.msk.bf16.mxu0 %vm15473_vm0, %v11656_v5  ;;  %vm13335_vm1 = vcmp.eq.s32.totalorder %v1106_v45, %v13330_v44  ;;  %vm13340_vm2 = vcmp.eq.s32.totalorder %v1113_v46, %v13330_v44  ;;  %v11712_v63 = vld [vmem:[#allocation4 + $0x120] ss:$8 sps:$4 sm:$0xff]   ;;  %v11717_v3 = vld [vmem:[#allocation4 + $0x134] ss:$8 sps:$4 sm:$0xff]   ;;  %v11715_v5 = vld [vmem:[#allocation4 + $0x130] ss:$8 sps:$4 sm:$0xff]  }
 0x178   :  { %11154 = vmatprep.subr.bf16.mxu0 %v13309_v2  ;;  %505 = vmatprep.subr.bf16.mxu1 %v11670_v15  ;;  %vm15479_vm3 = vmpackc.low %vm13340_vm2, %vm13335_vm1  ;;  %v11720_v6 = vld [vmem:[#allocation4 + $0x144] ss:$8 sps:$4 sm:$0xff]   ;;  %v11718_v7 = vld [vmem:[#allocation4 + $0x140] ss:$8 sps:$4 sm:$0xff]   ;;  %v13358_v14 = vadd.s32 8, %v13322_v41  ;;  %v994_v15 = vand.u32 15, %v13322_v41 }
 0x179   :  { %v11723_v8 = vld [vmem:[#allocation4 + $0x154] ss:$8 sps:$4 sm:$0xff]   ;;  %v11721_v9 = vld [vmem:[#allocation4 + $0x150] ss:$8 sps:$4 sm:$0xff]   ;;  %v11726_v10 = vld [vmem:[#allocation4 + $0x164] ss:$8 sps:$4 sm:$0xff]  }
 0x17a   :  { %506 = vmatpush1.bf16.msra.mxu1 %v11672_v16  ;;  %v11729_v12 = vld [vmem:[#allocation4 + $0x174] ss:$8 sps:$4 sm:$0xff]   ;;  %v11727_v13 = vld [vmem:[#allocation4 + $0x170] ss:$8 sps:$4 sm:$0xff]   ;;  %v1001_v16 = vand.u32 15, %v13358_v14  ;;  %vm13369_vm4 = vcmp.eq.s32.totalorder %v994_v15, %v13330_v44  ;;  %v15673_v45 = vmov 0 }
 0x17b   :  { %11155 = vmatpush3.bf16.msra.mxu0 %v13309_v2  ;;  %507 = vmatprep.subr.bf16.mxu1 %v11673_v17  ;;  %v13363_v17 = vadd.s32 144, %v13322_v41  ;;  %v15675_v46 = vmov 0  ;;  %v15703_v15 = vmov 0  ;;  %v1477_v40 = vand.u32 15, %v13330_v44  ;;  %s15974_s2 = sld [smem:[#allocation79_spill]]  ;;  %s15975_s9 = sld [smem:[#allocation80_spill]] }
 0x17c   :  { %11221 = vmatprep.subr.msk.bf16.mxu0 %vm15479_vm3, %v15529_v49  ;;  %vm13374_vm5 = vcmp.eq.s32.totalorder %v1001_v16, %v13330_v44 }
 0x17d   :  { %15649 = vst [vmem:[#allocation38_spill] sm:$0xff] %v13363_v17  ;;  %vm15477_vm6 = vmpackc.low %vm13374_vm5, %vm13369_vm4 }
 0x17e   :  { %11157 = vmatmul.mubr.msk.bf16.vlgmr.msra.gmra.mrb[4].mxu0 %vm15473_vm0, %v11657_v11  ;;  %508 = vmatpush1.bf16.msra.mxu1 %v11675_v18  ;;  %v11724_v11 = vld [vmem:[#allocation4 + $0x160] ss:$8 sps:$4 sm:$0xff]   ;;  %v13366_v18 = vadd.s32 152, %v13322_v41 }
 0x17f   :  { %509 = vmatprep.subr.bf16.mxu1 %v11676_v19  ;;  %11223 = vmatpush3.bf16.msk.msra.mxu0 %vm15477_vm6, %v15529_v49 }
 0x180   :  { %15650 = vst [vmem:[#allocation39_spill] sm:$0xff] %v13366_v18 }
 0x182   :  { %510 = vmatpush1.bf16.msra.mxu1 %v11678_v20 }
 0x183   :  { %511 = vmatprep.subr.bf16.mxu1 %v11679_v21  ;;  %v13379_v21 = vadd.s32 16, %v13322_v41 }
 0x185   :  { %15655 = vst [vmem:[#allocation40_spill] sm:$0xff] %v13379_v21 }
 0x186   :  { %512 = vmatpush1.bf16.msra.mxu1 %v11681_v22  ;;  %v1120_v22 = vand.u32 15, %v13363_v17 }
 0x187   :  { %630 = vmatprep.subr.bf16.mxu1 %v11684_v23  ;;  %v1127_v23 = vand.u32 15, %v13366_v18 }
 0x188   :  { %vm13398_vm7 = vcmp.eq.s32.totalorder %v1120_v22, %v13330_v44 }
 0x189   :  { %530 = vmatmul.mubr.bf16.vlgmr.msra.gmra.mrb[0].mxu1 %v11652_v1  ;;  %vm13403_vm8 = vcmp.eq.s32.totalorder %v1127_v23, %v13330_v44 }
 0x18a   :  { %631 = vmatpush1.bf16.msra.mxu1 %v11682_v24  ;;  %539 = vmatprep.mubr.bf16.mxu1 %v15499_v0  ;;  %v13388_v24 = vadd.s32 24, %v13322_v41  ;;  %vm15475_vm9 = vmpackc.low %vm13403_vm8, %vm13398_vm7 }
 0x18b   :  { %632 = vmatprep.subr.bf16.mxu1 %v11687_v25  ;;  %v1008_v25 = vand.u32 15, %v13379_v21  ;;  %11225 = vmatprep.subr.msk.bf16.mxu0 %vm15475_vm9, %v15529_v49 }
 0x18c   :  { %15656 = vst [vmem:[#allocation41_spill] sm:$0xff] %v13388_v24 }
 0x18d   :  { %vm13416_vm10 = vcmp.eq.s32.totalorder %v1008_v25, %v13330_v44 }
 0x18e   :  { %633 = vmatpush1.bf16.msra.mxu1 %v11685_v26 }
 0x18f   :  { %634 = vmatprep.subr.bf16.mxu1 %v11690_v27 }
 0x191   :  { %540 = vmatmul.mubr.bf16.gmra.mrb[4].mxu1 %v13309_v2 }
 0x192   :  { %635 = vmatpush1.bf16.msra.mxu1 %v11688_v28  ;;  %662 = vmatprep.mubr.bf16.mxu1 %v15499_v0  ;;  %v1015_v28 = vand.u32 15, %v13388_v24 }
 0x193   :  { %636 = vmatprep.subr.bf16.mxu1 %v11693_v29  ;;  %v13409_v29 = vadd.s32 160, %v13322_v41 }
 0x194   :  { %vm13436_vm11 = vcmp.eq.s32.totalorder %v1015_v28, %v13330_v44  ;;  %v15705_v28 = vmov 0 }
 0x195   :  { %15661 = vst [vmem:[#allocation42_spill] sm:$0xff] %v13409_v29  ;;  %vm15474_vm12 = vmpackc.low %vm13436_vm11, %vm13416_vm10 }
 0x196   :  { %637 = vmatpush1.bf16.msra.mxu1 %v11691_v30  ;;  %11227 = vmatpush3.bf16.msk.msra.mxu0 %vm15474_vm12, %v15529_v49 }
 0x197   :  { %638 = vmatprep.subr.bf16.mxu1 %v11696_v31  ;;  %v13421_v31 = vadd.s32 168, %v13322_v41 }
 0x199   :  { %15664 = vst [vmem:[#allocation43_spill] sm:$0xff] %v13421_v31 }
 0x19a   :  { %639 = vmatpush1.bf16.msra.mxu1 %v11694_v32  ;;  %v13424_v32 = vadd.s32 32, %v13322_v41 }
 0x19b   :  { %640 = vmatprep.subr.bf16.mxu1 %v11699_v33  ;;  %v13427_v33 = vadd.s32 40, %v13322_v41 }
 0x19c   :  { %15665 = vst [vmem:[#allocation44_spill] sm:$0xff] %v13424_v32 }
 0x19d   :  { %15666 = vst [vmem:[#allocation45_spill] sm:$0xff] %v13427_v33 }
 0x19e   :  { %641 = vmatpush1.bf16.msra.mxu1 %v11697_v34 }
 0x19f   :  { %642 = vmatprep.subr.bf16.mxu1 %v11702_v35  ;;  %v1134_v35 = vand.u32 15, %v13409_v29 }
 0x1a1   :  { %vm13455_vm13 = vcmp.eq.s32.totalorder %v1134_v35, %v13330_v44  ;;  %v13628_v35 = vadd.s32 224, %v13322_v41 }
 0x1a2   :  { %643 = vmatpush1.bf16.msra.mxu1 %v11700_v36  ;;  %v1141_v36 = vand.u32 15, %v13421_v31 }
 0x1a3   :  { %644 = vmatprep.subr.bf16.mxu1 %v11705_v37  ;;  %v1022_v37 = vand.u32 15, %v13424_v32  ;;  %15707 = vst [vmem:[#allocation58_spill] sm:$0xff] %v13628_v35 }
 0x1a4   :  { %vm13460_vm14 = vcmp.eq.s32.totalorder %v1141_v36, %v13330_v44  ;;  %v13631_v36 = vadd.s32 232, %v13322_v41 }
 0x1a5   :  { %vm13465_vm15 = vcmp.eq.s32.totalorder %v1022_v37, %v13330_v44  ;;  %vm15476_vm12 = vmpackc.low %vm13460_vm14, %vm13455_vm13  ;;  %v15709_v37 = vmov 0 }
 0x1a6   :  { %645 = vmatpush1.bf16.msra.mxu1 %v11703_v38  ;;  %v1029_v38 = vand.u32 15, %v13427_v33  ;;  %v15674_v45 = vsel %vm13465_vm15, 4294967295, %v15673_v45  ;;  %11229 = vmatprep.subr.msk.bf16.mxu0 %vm15476_vm12, %v15529_v49  ;;  %15708 = vst [vmem:[#allocation59_spill] sm:$0xff] %v13631_v36 }
 0x1a7   :  { %852 = vmatprep.subr.bf16.mxu1 %v11708_v39  ;;  %v15669_v39 = vmov 0 }
 0x1a8   :  { %v15670_v39 = vsel %vm13455_vm13, 4294967295, %v15669_v39  ;;  %vm13470_vm0 = vcmp.eq.s32.totalorder %v1029_v38, %v13330_v44  ;;  %v15711_v38 = vmov 0 }
 0x1a9   :  { %v15676_v46 = vsel %vm13470_vm0, 4294967295, %v15675_v46  ;;  %vm15478_vm9 = vmpackc.low %vm13470_vm0, %vm13465_vm15 }
 0x1aa   :  { %11231 = vmatpush3.bf16.msk.msra.mxu0 %vm15478_vm9, %v15529_v49 }
 0x249   :  { %v11150_v50 = vpop.f32.mrb[0].mxu0 }
 0x24a   :  { %v367_v51 = vpop.f32.mrb[1].mxu0 }
 0x24b   :  { %v11151_v53 = vpop.f32.mrb[2].mxu0 }
 0x24c   :  { %v383_v55 = vpack.c.bf16 %v11151_v53, %v11150_v50  ;;  %v370_v56 = vpop.f32.mrb[3].mxu0  ;;  %v13475_v50 = vadd.s32 176, %v13322_v41  ;;  %v13488_v53 = vadd.s32 56, %v13322_v41 }
 0x24d   :  { %v382_v57 = vpack.c.bf16 %v370_v56, %v367_v51  ;;  %v13482_v51 = vadd.s32 184, %v13322_v41 }
 0x24e   :  { %15677 = vst [vmem:[#allocation46_spill] sm:$0xff] %v13475_v50  ;;  %15680 = vst [vmem:[#allocation49_spill] sm:$0xff] %v13488_v53 }
 0x24f   :  { %663 = vmatmul.mubr.bf16.vlgmr.msra.gmra.mrb[0].mxu1 %v382_v57  ;;  %15678 = vst [vmem:[#allocation47_spill] sm:$0xff] %v13482_v51  ;;  %v1043_v57 = vand.u32 15, %v13488_v53 }
 0x250   :  { %853 = vmatpush1.bf16.msra.mxu1 %v11706_v52  ;;  %672 = vmatprep.mubr.bf16.mxu1 %v15499_v0  ;;  %v13485_v52 = vadd.s32 48, %v13322_v41 }
 0x251   :  { %854 = vmatprep.subr.bf16.mxu1 %v11711_v54  ;;  %v11158_v60 = vpop.f32.mrb[4].mxu0  ;;  %v1148_v54 = vand.u32 15, %v13475_v50  ;;  %vm13532_vm3 = vcmp.eq.s32.totalorder %v1043_v57, %v13330_v44  ;;  %v1197_v57 = vand.u32 15, %v13631_v36 }
 0x252   :  { %v738_v61 = vpop.f32.mrb[5].mxu0  ;;  %15679 = vst [vmem:[#allocation48_spill] sm:$0xff] %v13485_v52  ;;  %v1036_v56 = vand.u32 15, %v13485_v52 }
 0x253   :  { %v11159_v62 = vpop.f32.mrb[6].mxu0  ;;  %vm13511_vm12 = vcmp.eq.s32.totalorder %v1148_v54, %v13330_v44  ;;  %v15713_v54 = vmov 0 }
 0x254   :  { %855 = vmatpush1.bf16.msra.mxu1 %v11709_v58  ;;  %v754_v1 = vpack.c.bf16 %v11159_v62, %v11158_v60  ;;  %v741_v2 = vpop.f32.mrb[7].mxu0  ;;  %v15681_v58 = vmov 0  ;;  %v13519_v60 = vadd.s32 200, %v13322_v41  ;;  %vm13527_vm9 = vcmp.eq.s32.totalorder %v1036_v56, %v13330_v44 }
 0x255   :  { %856 = vmatprep.subr.bf16.mxu1 %v11714_v59  ;;  %v753_v4 = vpack.c.bf16 %v741_v2, %v738_v61  ;;  %v15682_v58 = vsel %vm13511_vm12, 4294967295, %v15681_v58  ;;  %v13516_v59 = vadd.s32 192, %v13322_v41  ;;  %v15685_v61 = vmov 0  ;;  %vm15484_vm0 = vmpackc.low %vm13532_vm3, %vm13527_vm9 }
 0x256   :  { %15684 = vst [vmem:[#allocation51_spill] sm:$0xff] %v13519_v60  ;;  %v15687_v62 = vmov 0  ;;  %v1190_v56 = vand.u32 15, %v13628_v35 }
 0x257   :  { %673 = vmatmul.mubr.bf16.gmra.mrb[4].mxu1 %v383_v55  ;;  %v1155_v55 = vand.u32 15, %v13482_v51  ;;  %15683 = vst [vmem:[#allocation50_spill] sm:$0xff] %v13516_v59  ;;  %v15688_v62 = vsel %vm13527_vm9, 4294967295, %v15687_v62  ;;  %v1162_v2 = vand.u32 15, %v13516_v59 }
 0x258   :  { %857 = vmatpush1.bf16.msra.mxu1 %v11712_v63  ;;  %884 = vmatprep.mubr.bf16.mxu1 %v15499_v0  ;;  %v15689_v63 = vmov 0 }
 0x259   :  { %858 = vmatprep.subr.bf16.mxu1 %v11717_v3  ;;  %vm13522_vm6 = vcmp.eq.s32.totalorder %v1155_v55, %v13330_v44  ;;  %v15690_v63 = vsel %vm13532_vm3, 4294967295, %v15689_v63  ;;  %v1169_v3 = vand.u32 15, %v13519_v60  ;;  %vm13566_vm13 = vcmp.eq.s32.totalorder %v1162_v2, %v13330_v44 }
 0x25a   :  { %v15686_v61 = vsel %vm13522_vm6, 4294967295, %v15685_v61  ;;  %vm15483_vm15 = vmpackc.low %vm13522_vm6, %vm13511_vm12  ;;  %v13649_v55 = vadd.s32 96, %v13322_v41  ;;  %v13658_v2 = vadd.s32 104, %v13322_v41  ;;  %vm13678_vm6 = vcmp.eq.s32.totalorder %v1190_v56, %v13330_v44 }
 0x25b   :  { %11233 = vmatprep.subr.msk.bf16.mxu0 %vm15483_vm15, %v15529_v49  ;;  %vm13571_vm15 = vcmp.eq.s32.totalorder %v1169_v3, %v13330_v44  ;;  %v13704_v56 = vadd.s32 112, %v13322_v41 }
 0x25c   :  { %859 = vmatpush1.bf16.msra.mxu1 %v11715_v5  ;;  %11235 = vmatpush3.bf16.msk.msra.mxu0 %vm15484_vm0, %v15529_v49  ;;  %vm15488_vm0 = vmpackc.low %vm13571_vm15, %vm13566_vm13  ;;  %15715 = vst [vmem:[#allocation60_spill] sm:$0xff] %v13649_v55  ;;  %v1078_v3 = vand.u32 15, %v13649_v55 }
 0x25d   :  { %860 = vmatprep.subr.bf16.mxu1 %v11720_v6  ;;  %v15693_v6 = vmov 0  ;;  %11237 = vmatprep.subr.msk.bf16.mxu0 %vm15488_vm0, %v15529_v49  ;;  %15716 = vst [vmem:[#allocation61_spill] sm:$0xff] %v13658_v2  ;;  %15725 = vst [vmem:[#allocation64_spill] sm:$0xff] %v13704_v56  ;;  %v1092_v55 = vand.u32 15, %v13704_v56  ;;  %v15779_v56 = vmov 0  }
 0x25e   :  { %v15694_v6 = vsel %vm13566_vm13, 4294967295, %v15693_v6 }
 0x260   :  { %861 = vmatpush1.bf16.msra.mxu1 %v11718_v7  ;;  %v15695_v7 = vmov 0 }
 0x261   :  { %862 = vmatprep.subr.bf16.mxu1 %v11723_v8  ;;  %v15696_v7 = vsel %vm13571_vm15, 4294967295, %v15695_v7 }
 0x264   :  { %863 = vmatpush1.bf16.msra.mxu1 %v11721_v9  ;;  %v13577_v9 = vadd.s32 208, %v13322_v41 }
 0x265   :  { %864 = vmatprep.subr.bf16.mxu1 %v11726_v10  ;;  %v15698_v10 = vmov 0 }
 0x266   :  { %15697 = vst [vmem:[#allocation54_spill] sm:$0xff] %v13577_v9  ;;  %v1176_v16 = vand.u32 15, %v13577_v9 }
 0x268   :  { %865 = vmatpush1.bf16.msra.mxu1 %v11724_v11  ;;  %v13589_v11 = vadd.s32 216, %v13322_v41  ;;  %vm13623_vm0 = vcmp.eq.s32.totalorder %v1176_v16, %v13330_v44  ;;  %v1085_v16 = vand.u32 15, %v13658_v2 }
 0x269   :  { %866 = vmatprep.subr.bf16.mxu1 %v11729_v12  ;;  %v13592_v12 = vadd.s32 80, %v13322_v41  ;;  %v15706_v28 = vsel %vm13623_vm0, 4294967295, %v15705_v28 }
 0x26a   :  { %15700 = vst [vmem:[#allocation55_spill] sm:$0xff] %v13589_v11  ;;  %v1183_v22 = vand.u32 15, %v13589_v11 }
 0x26b   :  { %15701 = vst [vmem:[#allocation56_spill] sm:$0xff] %v13592_v12  ;;  %v1064_v23 = vand.u32 15, %v13592_v12 }
 0x26c   :  { %867 = vmatpush1.bf16.msra.mxu1 %v11727_v13  ;;  %v13595_v13 = vadd.s32 88, %v13322_v41  ;;  %vm13634_vm13 = vcmp.eq.s32.totalorder %v1183_v22, %v13330_v44  ;;  %v13689_v22 = vadd.s32 240, %v13322_v41 }
 0x26d   :  { %v15710_v37 = vsel %vm13634_vm13, 4294967295, %v15709_v37  ;;  %vm13639_vm15 = vcmp.eq.s32.totalorder %v1064_v23, %v13330_v44  ;;  %v15722_v23 = vmov 0 }
 0x26e   :  { %15702 = vst [vmem:[#allocation57_spill] sm:$0xff] %v13595_v13  ;;  %v1071_v25 = vand.u32 15, %v13595_v13  ;;  %v15712_v38 = vsel %vm13639_vm15, 4294967295, %v15711_v38  ;;  %15721 = vst [vmem:[#allocation62_spill] sm:$0xff] %v13689_v22 }
 0x26f   :  { %885 = vmatmul.mubr.bf16.vlgmr.msra.gmra.mrb[0].mxu1 %v753_v4  ;;  %v13546_v4 = vadd.s32 72, %v13322_v41 }
 0x270   :  { %894 = vmatprep.mubr.bf16.mxu1 %v15499_v0  ;;  %v1204_v0 = vand.u32 15, %v13689_v22 }
 0x271   :  { %15692 = vst [vmem:[#allocation53_spill] sm:$0xff] %v13546_v4  ;;  %v1057_v8 = vand.u32 15, %v13546_v4 }
 0x273   :  { %vm13604_vm3 = vcmp.eq.s32.totalorder %v1057_v8, %v13330_v44  ;;  %v15719_v8 = vmov 0 }
 0x274   :  { %v15704_v15 = vsel %vm13604_vm3, 4294967295, %v15703_v15 }
 0x277   :  { %895 = vmatmul.mubr.bf16.gmra.mrb[4].mxu1 %v754_v1  ;;  %v13537_v1 = vadd.s32 64, %v13322_v41 }
 0x279   :  { %15691 = vst [vmem:[#allocation52_spill] sm:$0xff] %v13537_v1  ;;  %v1050_v5 = vand.u32 15, %v13537_v1 }
 0x27b   :  { %vm13584_vm9 = vcmp.eq.s32.totalorder %v1050_v5, %v13330_v44  ;;  %v15717_v5 = vmov 0 }
 0x27c   :  { %v15699_v10 = vsel %vm13584_vm9, 4294967295, %v15698_v10  ;;  %vm15491_vm12 = vmpackc.low %vm13604_vm3, %vm13584_vm9  ;;  %v15718_v5 = vsel %vm13678_vm6, 4294967295, %v15717_v5 }
 0x27d   :  { %11239 = vmatpush3.bf16.msk.msra.mxu0 %vm15491_vm12, %v15529_v49  ;;  %vm13644_vm12 = vcmp.eq.s32.totalorder %v1071_v25, %v13330_v44  ;;  %vm15495_vm9 = vmpackc.low %vm13634_vm13, %vm13623_vm0  ;;  %v13701_v25 = vadd.s32 248, %v13322_v41 }
 0x27e   :  { %v15714_v54 = vsel %vm13644_vm12, 4294967295, %v15713_v54  ;;  %11241 = vmatprep.subr.msk.bf16.mxu0 %vm15495_vm9, %v15529_v49  ;;  %vm15496_vm3 = vmpackc.low %vm13644_vm12, %vm13639_vm15  ;;  %vm13683_vm9 = vcmp.eq.s32.totalorder %v1197_v57, %v13330_v44  ;;  %vm13696_vm15 = vcmp.eq.s32.totalorder %v1078_v3, %v13330_v44  ;;  %v13707_v57 = vadd.s32 120, %v13322_v41 }
 0x27f   :  { %v15720_v8 = vsel %vm13683_vm9, 4294967295, %v15719_v8  ;;  %v15723_v23 = vsel %vm13696_vm15, 4294967295, %v15722_v23  ;;  %15724 = vst [vmem:[#allocation63_spill] sm:$0xff] %v13701_v25  ;;  %vm13716_vm12 = vcmp.eq.s32.totalorder %v1085_v16, %v13330_v44  ;;  %v15727_v3 = vmov 0  ;;  %v11738_v16 = vld [vmem:[#allocation7 + $0x114] ss:$8 sps:$4 sm:$0xff]  }
 0x280   :  { %15726 = vst [vmem:[#allocation65_spill] sm:$0xff] %v13707_v57  ;;  %v15728_v3 = vsel %vm13716_vm12, 4294967295, %v15727_v3  ;;  %vm15518_vm0 = vmpackc.low %vm13716_vm12, %vm13696_vm15  ;;  %v1211_v2 = vand.u32 15, %v13701_v25  ;;  %v1099_v36 = vand.u32 15, %v13707_v57  ;;  %v11733_v57 = vld [vmem:[#allocation7 + $0x100] ss:$8 sps:$4 sm:$0xff]  }
 0x281   :  { %11243 = vmatpush3.bf16.msk.msra.mxu0 %vm15496_vm3, %v15529_v49  ;;  %vm15508_vm3 = vmpackc.low %vm13683_vm9, %vm13678_vm6  ;;  %vm13745_vm9 = vcmp.eq.s32.totalorder %v1092_v55, %v13330_v44  ;;  %v913_v55 = vld [vmem:[%s15739_s26] sm:$0x3] }
 0x282   :  { %11245 = vmatprep.subr.msk.bf16.mxu0 %vm15508_vm3, %v15529_v49  ;;  %vm13735_vm3 = vcmp.eq.s32.totalorder %v1204_v0, %v13330_v44  ;;  %vm13740_vm6 = vcmp.eq.s32.totalorder %v1211_v2, %v13330_v44  ;;  %vm13750_vm13 = vcmp.eq.s32.totalorder %v1099_v36, %v13330_v44  ;;  %vm15737_vm12 = vmpackc.low %vm13340_vm2, %vm13335_vm1  ;;  %v13781_v0 = vsub.s32 0, %v13322_v41 }
 0x283   :  { %vm15543_vm15 = vmpackc.low %vm13750_vm13, %vm13745_vm9  ;;  %v13784_v36 = vsub.s32 1, %v13322_v41 }
 0x284   :  { %v918_v2 = vrot.slane %v913_v55, %v13781_v0 }
 0x285   :  { %11247 = vmatpush3.bf16.msk.msra.mxu0 %vm15518_vm0, %v15529_v49  ;;  %vm15556_vm0 = vmpackc.low %vm13740_vm6, %vm13735_vm3  ;;  %15738 = vst [vmem:[#allocation66_spill] sm:$0xff] %v13784_v36  ;;  %v922_v25 = vrot.slane %v913_v55, %v13784_v36 }
 0x286   :  { %11249 = vmatprep.subr.msk.bf16.mxu0 %vm15556_vm0, %v15529_v49 }
 0x289   :  { %11251 = vmatpush3.bf16.msk.msra.mxu0 %vm15543_vm15, %v15529_v49 }
 0x28a   :  { %11253 = vmatprep.subr.msk.bf16.mxu0 %vm15737_vm12, %v15529_v49 }
 0x342   :  { %v886_v35 = vpop.f32.mrb[0].mxu1 }
 0x343   :  { %v888_v48 = vpop.f32.mrb[1].mxu1  ;;  %v925_v13 = vadd.f32 %v918_v2, %v886_v35 }
 0x344   :  { %v926_v47 = vadd.f32 %v922_v25, %v888_v48  ;;  %v890_v12 = vpop.f32.mrb[2].mxu1 }
 0x345   :  { %v927_v49 = vadd.f32 %v918_v2, %v890_v12  ;;  %v892_v11 = vpop.f32.mrb[3].mxu1  ;;  %v941_v60 = vmul.f32 0.2, %v925_v13  ;;  %vm933_vm15 = vcmp.ge.f32.partialorder %v925_v13, 0.0 }
 0x346   :  { %v942_v9 = vmul.f32 0.2, %v926_v47  ;;  %v928_v4 = vadd.f32 %v922_v25, %v892_v11  ;;  %vm934_vm1 = vcmp.ge.f32.partialorder %v926_v47, 0.0 }
 0x347   :  { %v943_v1 = vmul.f32 0.2, %v927_v49  ;;  %vm935_vm2 = vcmp.ge.f32.partialorder %v927_v49, 0.0  ;;  %v13797_v12 = vsel %vm933_vm15, %v925_v13, %v941_v60 }
 0x348   :  { %vm936_vm12 = vcmp.ge.f32.partialorder %v928_v4, 0.0  ;;  %v944_v59 = vmul.f32 0.2, %v928_v4  ;;  %v13791_v53 = vsel %vm934_vm1, %v926_v47, %v942_v9 }
 0x349   :  { %v13795_v36 = vsel %vm935_vm2, %v927_v49, %v943_v1  ;;  %v1598_v33 = vmul.f32 %v13791_v53, %v13791_v53 }
 0x34a   :  { %v13793_v52 = vsel %vm936_vm12, %v928_v4, %v944_v59  ;;  %v896_v55 = vpop.f32.mrb[4].mxu1  ;;  %v1509_v49 = vadd.f32 %v13795_v36, %v13797_v12  ;;  %vm15742_vm12 = vmpackc.low %vm13403_vm8, %vm13398_vm7  ;;  %vm15747_vm7 = vnez %v15674_v45  ;;  %v15600_v45 = vmov 0.0  }
 0x34b   :  { %v929_v35 = vadd.f32 %v918_v2, %v896_v55  ;;  %v898_v48 = vpop.f32.mrb[5].mxu1  ;;  %v1600_v11 = vmul.f32 %v13793_v52, %v13793_v52  ;;  %v1518_v60 = vadd.f32 %v13793_v52, %v13791_v53 }
 0x34c   :  { %v930_v51 = vadd.f32 %v922_v25, %v898_v48  ;;  %v900_v50 = vpop.f32.mrb[6].mxu1 }
 0x34d   :  { %vm937_vm0 = vcmp.ge.f32.partialorder %v929_v35, 0.0  ;;  %v945_v9 = vmul.f32 0.2, %v929_v35  ;;  %v931_v47 = vadd.f32 %v918_v2, %v900_v50  ;;  %v902_v59 = vpop.f32.mrb[7].mxu1  ;;  %v1614_v48 = vadd.f32 %v1600_v11, %v1598_v33 }
 0x34e   :  { %vm938_vm1 = vcmp.ge.f32.partialorder %v930_v51, 0.0  ;;  %v946_v1 = vmul.f32 0.2, %v930_v51  ;;  %v932_v4 = vadd.f32 %v922_v25, %v902_v59 }
 0x34f   :  { %v13807_v13 = vsel %vm937_vm0, %v929_v35, %v945_v9  ;;  %vm939_vm15 = vcmp.ge.f32.partialorder %v931_v47, 0.0  ;;  %v947_v55 = vmul.f32 0.2, %v931_v47  ;;  %vm15741_vm0 = vmpackc.low %vm13374_vm5, %vm13369_vm4  ;;  %vm15744_vm4 = vnez %v15670_v39 }
 0x350   :  { %v1510_v32 = vadd.f32 %v1509_v49, %v13807_v13  ;;  %v13810_v31 = vsel %vm938_vm1, %v930_v51, %v946_v1  ;;  %vm940_vm2 = vcmp.ge.f32.partialorder %v932_v4, 0.0  ;;  %v948_v25 = vmul.f32 0.2, %v932_v4  ;;  %vm15743_vm1 = vmpackc.low %vm13436_vm11, %vm13416_vm10 }
 0x351   :  { %v1519_v50 = vadd.f32 %v1518_v60, %v13810_v31  ;;  %v1602_v2 = vmul.f32 %v13810_v31, %v13810_v31  ;;  %v13815_v29 = vsel %vm939_vm15, %v931_v47, %v947_v55  ;;  %vm15745_vm5 = vmpackc.low %vm13460_vm14, %vm15744_vm4  ;;  %vm15746_vm15 = vnez %v15676_v46 }
 0x352   :  { %v1511_v59 = vadd.f32 %v1510_v32, %v13815_v29  ;;  %v13818_v9 = vsel %vm940_vm2, %v932_v4, %v948_v25  ;;  %vm15748_vm8 = vmpackc.low %vm15746_vm15, %vm15747_vm7  ;;  %vm15749_vm10 = vnez %v15686_v61  ;;  %vm15750_vm11 = vnez %v15682_v58 }
 0x353   :  { %v1615_v35 = vadd.f32 %v1614_v48, %v1602_v2  ;;  %v1520_v33 = vadd.f32 %v1519_v50, %v13818_v9  ;;  %v1604_v51 = vmul.f32 %v13818_v9, %v13818_v9  ;;  %v1599_v50 = vmul.f32 %v13795_v36, %v13795_v36  ;;  %vm15751_vm2 = vmpackc.low %vm15749_vm10, %vm15750_vm11 }
 0x354   :  { %v1512_v24 = vrot.slane %v1511_v59, 4  ;;  %vm15753_vm14 = vnez %v15688_v62  ;;  %vm15756_vm4 = vnez %v15694_v6  ;;  %vm15758_vm15 = vnez %v15704_v15 }
 0x355   :  { %v1521_v49 = vrot.slane %v1520_v33, 4  ;;  %v1616_v1 = vadd.f32 %v1615_v35, %v1604_v51  ;;  %vm15759_vm7 = vnez %v15699_v10  ;;  %vm15761_vm10 = vnez %v15710_v37  ;;  %v11736_v51 = vld [vmem:[#allocation7 + $0x110] ss:$8 sps:$4 sm:$0xff]  }
 0x356   :  { %v1513_v11 = vadd.f32 %v1512_v24, %v1511_v59  ;;  %v1597_v24 = vmul.f32 %v13797_v12, %v13797_v12  ;;  %v1601_v59 = vmul.f32 %v13807_v13, %v13807_v13  ;;  %vm15762_vm11 = vnez %v15706_v28 }
 0x357   :  { %v1522_v21 = vadd.f32 %v1521_v49, %v1520_v33  ;;  %v1617_v18 = vrot.slane %v1616_v1, 4  ;;  %v13922_v39 = vadd.s32 128, %v13330_v44  ;;  %v11739_v49 = vld [vmem:[#allocation7 + $0x120] ss:$8 sps:$4 sm:$0xff]  }
 0x358   :  { %v1514_v60 = vrot.slane %v1513_v11, 2 }
 0x359   :  { %v1523_v47 = vrot.slane %v1522_v21, 2  ;;  %v1618_v17 = vadd.f32 %v1617_v18, %v1616_v1  ;;  %v1605_v18 = vadd.f32 %v1599_v50, %v1597_v24  ;;  %v1484_v46 = vand.u32 15, %v13922_v39  ;;  %v11744_v1 = vld [vmem:[#allocation7 + $0x134] ss:$8 sps:$4 sm:$0xff]   ;;  %v11759_v24 = vld [vmem:[#allocation7 + $0x184] ss:$8 sps:$4 sm:$0xff]  }
 0x35a   :  { %v1515_v55 = vadd.f32 %v1514_v60, %v1513_v11  ;;  %v11741_v11 = vld [vmem:[#allocation7 + $0x124] ss:$8 sps:$4 sm:$0xff]   ;;  %v11742_v60 = vld [vmem:[#allocation7 + $0x130] ss:$8 sps:$4 sm:$0xff]   ;;  %v11756_v50 = vld [vmem:[#allocation7 + $0x174] ss:$8 sps:$4 sm:$0xff]  }
 0x35b   :  { %v1524_v43 = vadd.f32 %v1523_v47, %v1522_v21  ;;  %v1619_v32 = vrot.slane %v1618_v17, 2  ;;  %v15740_v21 = vmov 1.0|1.0   ;;  %v11747_v47 = vld [vmem:[#allocation7 + $0x144] ss:$8 sps:$4 sm:$0xff]  }
 0x35c   :  { %v1516_v48 = vrot.slane %v1515_v55, 1 }
 0x35d   :  { %v1525_v4 = vrot.slane %v1524_v43, 1  ;;  %v1620_v2 = vadd.f32 %v1619_v32, %v1618_v17  ;;  %v1603_v17 = vmul.f32 %v13815_v29, %v13815_v29  ;;  %v11750_v32 = vld [vmem:[#allocation7 + $0x154] ss:$8 sps:$4 sm:$0xff]  }
 0x35e   :  { %v1517_v35 = vadd.f32 %v1516_v48, %v1515_v55  ;;  %v11745_v55 = vld [vmem:[#allocation7 + $0x140] ss:$8 sps:$4 sm:$0xff]   ;;  %v11748_v48 = vld [vmem:[#allocation7 + $0x150] ss:$8 sps:$4 sm:$0xff]  }
 0x35f   :  { %v1526_v25 = vadd.f32 %v1525_v4, %v1524_v43  ;;  %v1621_v42 = vrot.slane %v1620_v2, 1  ;;  %v1606_v43 = vadd.f32 %v1605_v18, %v1601_v59  ;;  %v11753_v4 = vld [vmem:[#allocation7 + $0x164] ss:$8 sps:$4 sm:$0xff]   ;;  %v11757_v59 = vld [vmem:[#allocation7 + $0x180] ss:$8 sps:$4 sm:$0xff]  }
 0x360   :  { %v11766_v18 = vld [vmem:[#allocation7 + $0x1a4] ss:$8 sps:$4 sm:$0xff]  }
 0x361   :  { %1591 = vmatprep.mubr.f32.mxu0 %v1526_v25  ;;  %v1622_v33 = vadd.f32 %v1621_v42, %v1620_v2  ;;  %v1607_v42 = vadd.f32 %v1606_v43, %v1603_v17  ;;  %v11751_v2 = vld [vmem:[#allocation7 + $0x160] ss:$8 sps:$4 sm:$0xff]   ;;  %v11754_v25 = vld [vmem:[#allocation7 + $0x170] ss:$8 sps:$4 sm:$0xff]   ;;  %v11769_v17 = vld [vmem:[#allocation7 + $0x1b4] ss:$8 sps:$4 sm:$0xff]  }
 0x362   :  { %1592 = vmatmul.mubr.f32.vlgmr.msra.gmra.mrb[8].mxu0 %v1517_v35  ;;  %v11763_v35 = vld [vmem:[#allocation7 + $0x194] ss:$8 sps:$4 sm:$0xff]   ;;  %v11764_v43 = vld [vmem:[#allocation7 + $0x1a0] ss:$8 sps:$4 sm:$0xff]  }
 0x363   :  { %11255 = vmatpush3.bf16.msk.msra.mxu0 %vm15741_vm0, %v15740_v21  ;;  %1687 = vmatprep.mubr.f32.mxu0 %v1622_v33  ;;  %v1608_v19 = vrot.slane %v1607_v42, 4  ;;  %vm15752_vm0 = vnez %v15690_v63  ;;  %v11761_v33 = vld [vmem:[#allocation7 + $0x190] ss:$8 sps:$4 sm:$0xff]  }
 0x364   :  { %11257 = vmatprep.subr.msk.bf16.mxu0 %vm15742_vm12, %v15740_v21  ;;  %vm15754_vm12 = vmpackc.low %vm15752_vm0, %vm15753_vm14  ;;  %vm15764_vm0 = vnez %v15714_v54  ;;  %vm15765_vm14 = vnez %v15712_v38 }
 0x365   :  { %v1609_v20 = vadd.f32 %v1608_v19, %v1607_v42  ;;  %v11767_v42 = vld [vmem:[#allocation7 + $0x1b0] ss:$8 sps:$4 sm:$0xff]   ;;  %v11772_v19 = vld [vmem:[#allocation7 + $0x1c4] ss:$8 sps:$4 sm:$0xff]  }
 0x367   :  { %11259 = vmatpush3.bf16.msk.msra.mxu0 %vm15743_vm1, %v15740_v21  ;;  %vm15755_vm1 = vnez %v15696_v7  ;;  %v1610_v26 = vrot.slane %v1609_v20, 2 }
 0x368   :  { %11261 = vmatprep.subr.msk.bf16.mxu0 %vm15745_vm5, %v15740_v21  ;;  %vm15757_vm5 = vmpackc.low %vm15755_vm1, %vm15756_vm4  ;;  %vm15767_vm1 = vnez %v15720_v8  ;;  %vm15768_vm4 = vnez %v15718_v5 }
 0x369   :  { %v1611_v27 = vadd.f32 %v1610_v26, %v1609_v20  ;;  %v11770_v20 = vld [vmem:[#allocation7 + $0x1c0] ss:$8 sps:$4 sm:$0xff]  }
 0x36b   :  { %11263 = vmatpush3.bf16.msk.msra.mxu0 %vm15748_vm8, %v15740_v21  ;;  %vm15760_vm8 = vmpackc.low %vm15758_vm15, %vm15759_vm7  ;;  %vm15770_vm15 = vnez %v15728_v3  ;;  %vm15771_vm7 = vnez %v15723_v23  ;;  %v1612_v30 = vrot.slane %v1611_v27, 1  ;;  %v11735_v3 = vld [vmem:[#allocation7 + $0x104] ss:$8 sps:$4 sm:$0xff]  }
 0x36c   :  { %11265 = vmatprep.subr.msk.bf16.mxu0 %vm15751_vm2, %v15740_v21  ;;  %vm15763_vm2 = vmpackc.low %vm15761_vm10, %vm15762_vm11  ;;  %2222 = vmatprep.subr.bf16.mxu1 %v11735_v3  ;;  %v11760_v3 = vld [vmem:[#allocation6 + $0x18] sm:$0xff]  }
 0x36d   :  { %vm15773_vm10 = vmpackc.low %vm13740_vm6, %vm13735_vm3  ;;  %v1613_v34 = vadd.f32 %v1612_v30, %v1611_v27  ;;  %vm13928_vm3 = vcmp.eq.s32.totalorder %v1477_v40, %v13322_v41  ;;  %vm13933_vm6 = vcmp.eq.s32.totalorder %v1477_v40, %v13358_v14  ;;  %2223 = vmatpush1.bf16.msra.mxu1 %v11733_v57 }
 0x36e   :  { %vm15774_vm11 = vmpackc.low %vm13750_vm13, %vm13745_vm9  ;;  %vm1498_vm9 = vcmp.eq.s32.totalorder %v1484_v46, %v13322_v41  ;;  %vm1500_vm13 = vcmp.eq.s32.totalorder %v1484_v46, %v13358_v14  ;;  %2224 = vmatprep.subr.bf16.mxu1 %v11738_v16  ;;  %v11775_v16 = vld [vmem:[#allocation7 + $0x1d4] ss:$8 sps:$4 sm:$0xff]  }
 0x36f   :  { %11267 = vmatpush3.bf16.msk.msra.mxu0 %vm15754_vm12, %v15740_v21  ;;  %vm15766_vm12 = vmpackc.low %vm15764_vm0, %vm15765_vm14  ;;  %vm15575_vm14 = vcmask 130048  }
 0x370   :  { %11269 = vmatprep.subr.msk.bf16.mxu0 %vm15757_vm5, %v15740_v21  ;;  %vm15769_vm5 = vmpackc.low %vm15767_vm1, %vm15768_vm4 }
 0x371   :  { %vm11284_vm0 = vmpackc.low %vm1500_vm13, %vm1498_vm9  ;;  %2225 = vmatpush1.bf16.msra.mxu1 %v11736_v51  ;;  %v11773_v51 = vld [vmem:[#allocation7 + $0x1d0] ss:$8 sps:$4 sm:$0xff]  }
 0x372   :  { %2226 = vmatprep.subr.bf16.mxu1 %v11741_v11  ;;  %v11776_v11 = vld [vmem:[#allocation7 + $0x1e0] ss:$8 sps:$4 sm:$0xff]  }
 0x373   :  { %11271 = vmatpush3.bf16.msk.msra.mxu0 %vm15760_vm8, %v15740_v21  ;;  %vm15772_vm8 = vmpackc.low %vm15770_vm15, %vm15771_vm7 }
 0x374   :  { %11273 = vmatprep.subr.msk.bf16.mxu0 %vm15763_vm2, %v15740_v21  ;;  %vm11286_vm2 = vmpackc.low %vm13933_vm6, %vm13928_vm3 }
 0x375   :  { %2227 = vmatpush1.bf16.msra.mxu1 %v11739_v49  ;;  %v11778_v49 = vld [vmem:[#allocation7 + $0x1e4] ss:$8 sps:$4 sm:$0xff]  }
 0x376   :  { %2228 = vmatprep.subr.bf16.mxu1 %v11744_v1  ;;  %v11781_v1 = vld [vmem:[#allocation7 + $0x1f4] ss:$8 sps:$4 sm:$0xff]  }
 0x377   :  { %11275 = vmatpush3.bf16.msk.msra.mxu0 %vm15766_vm12, %v15740_v21  ;;  %vm15780_vm12 = vcmask 261120  }
 0x378   :  { %11277 = vmatprep.subr.msk.bf16.mxu0 %vm15769_vm5, %v15740_v21  ;;  %vm15781_vm1 = vmmov %vm15780_vm12 }
 0x379   :  { %2229 = vmatpush1.bf16.msra.mxu1 %v11742_v60  ;;  %vm15782_vm4 = vmmov %vm15781_vm1  ;;  %v11779_v60 = vld [vmem:[#allocation7 + $0x1f0] ss:$8 sps:$4 sm:$0xff]  }
 0x37a   :  { %2230 = vmatprep.subr.bf16.mxu1 %v11747_v47  ;;  %vm15783_vm5 = vmmov %vm15781_vm1  ;;  %v11784_v47 = vld [vmem:[#allocation7 + $0x4] ss:$8 sps:$4 sm:$0xff]  }
 0x37b   :  { %11279 = vmatpush3.bf16.msk.msra.mxu0 %vm15772_vm8, %v15740_v21 }
 0x37c   :  { %11281 = vmatprep.subr.msk.bf16.mxu0 %vm15773_vm10, %v15740_v21 }
 0x37d   :  { %2231 = vmatpush1.bf16.msra.mxu1 %v11745_v55 }
 0x37e   :  { %2232 = vmatprep.subr.bf16.mxu1 %v11750_v32 }
 0x37f   :  { %11283 = vmatpush3.bf16.msk.msra.mxu0 %vm15774_vm11, %v15740_v21 }
 0x380   :  { %11285 = vmatprep.subr.msk.bf16.mxu0 %vm11284_vm0, %v15740_v21 }
 0x381   :  { %2233 = vmatpush1.bf16.msra.mxu1 %v11748_v48 }
 0x382   :  { %1688 = vmatmul.mubr.f32.vlgmr.msra.gmra.mrb[10].mxu0 %v1613_v34  ;;  %2234 = vmatprep.subr.bf16.mxu1 %v11753_v4 }
 0x383   :  { %1768 = vmatprep.mubr.f32.mxu0 %v15600_v45  ;;  %11287 = vmatpush1.bf16.msk.msra.mxu0 %vm11286_vm2, %v15740_v21 }
 0x384   :  { %11289 = vmatprep.subr.msk.bf16.mxu0 %vm11284_vm0, %v15740_v21 }
 0x385   :  { %2235 = vmatpush1.bf16.msra.mxu1 %v11751_v2 }
 0x386   :  { %2236 = vmatprep.subr.bf16.mxu1 %v11756_v50 }
 0x389   :  { %2237 = vmatpush1.bf16.msra.mxu1 %v11754_v25 }
 0x38a   :  { %2238 = vmatprep.subr.bf16.mxu1 %v11759_v24 }
 0x38d   :  { %2239 = vmatpush1.bf16.msra.mxu1 %v11757_v59 }
 0x38e   :  { %2240 = vmatprep.subr.bf16.mxu1 %v11763_v35 }
 0x391   :  { %2241 = vmatpush1.bf16.msra.mxu1 %v11761_v33 }
 0x392   :  { %2242 = vmatprep.subr.bf16.mxu1 %v11766_v18 }
 0x395   :  { %2243 = vmatpush1.bf16.msra.mxu1 %v11764_v43  ;;  %v11782_v43 = vld [vmem:[#allocation7] ss:$8 sps:$4 sm:$0xff]  }
 0x396   :  { %2244 = vmatprep.subr.bf16.mxu1 %v11769_v17  ;;  %v11787_v17 = vld [vmem:[#allocation7 + $0x14] ss:$8 sps:$4 sm:$0xff]  }
 0x399   :  { %2245 = vmatpush1.bf16.msra.mxu1 %v11767_v42  ;;  %v11785_v42 = vld [vmem:[#allocation7 + $0x10] ss:$8 sps:$4 sm:$0xff]  }
 0x39a   :  { %2246 = vmatprep.subr.bf16.mxu1 %v11772_v19 }
 0x39d   :  { %2247 = vmatpush1.bf16.msra.mxu1 %v11770_v20  ;;  %v11790_v20 = vld [vmem:[#allocation7 + $0x24] ss:$8 sps:$4 sm:$0xff]  }
 0x39e   :  { %2248 = vmatprep.subr.bf16.mxu1 %v11775_v16 }
 0x3a1   :  { %2249 = vmatpush1.bf16.msra.mxu1 %v11773_v51 }
 0x3a2   :  { %2250 = vmatprep.subr.bf16.mxu1 %v11778_v49 }
 0x3a5   :  { %2251 = vmatpush1.bf16.msra.mxu1 %v11776_v11 }
 0x3a6   :  { %2252 = vmatprep.subr.bf16.mxu1 %v11781_v1  ;;  %v11827_v1 = vld [vmem:[#allocation7 + $0xf0] ss:$8 sps:$4 sm:$0xff]  }
 0x3a9   :  { %2253 = vmatpush1.bf16.msra.mxu1 %v11779_v60 }
 0x3aa   :  { %2425 = vmatprep.subr.bf16.mxu1 %v11784_v47  ;;  %v11832_v47 = vld [vmem:[#allocation7 + $0x204] ss:$8 sps:$4 sm:$0xff]  }
 0x435   :  { %v10847_v62 = vpop.f32.mrb[8].mxu0 }
 0x436   :  { %v10848_v63 = vpop.f32.mrb[9].mxu0 }
 0x437   :  { %v10849_v6 = vadd.f32 %v10848_v63, %v10847_v62 }
 0x439   :  { %v1693_v7 = vmul.f32 0.001953125, %v10849_v6 }
 0x43b   :  { %v1695_v37 = vmul.f32 %v1693_v7, %v1693_v7 }
 0x455   :  { %v10882_v10 = vpop.f32.mrb[10].mxu0 }
 0x456   :  { %v10883_v15 = vpop.f32.mrb[11].mxu0 }
 0x457   :  { %v10884_v28 = vadd.f32 %v10883_v15, %v10882_v10 }
 0x459   :  { %v1694_v38 = vmul.f32 0.001953125, %v10884_v28 }
 0x45b   :  { %v1696_v54 = vsub.f32 %v1694_v38, %v1695_v37 }
 0x45d   :  { %v1697_v5 = vmax.f32 %v1696_v54, 0.0 }
 0x45f   :  { %v1698_v8 = vadd.f32 0.8, %v1697_v5 }
 0x461   :  { %12494 = vrsqrt.f32 %v1698_v8 }
 0x46b   :  { %v12495_v22 = vpop.eup %12494 }
 0x46c   :  { %9760 = vmatmul.mubr.msk.f32.vlgmr.msra.gmra.mrb[12].mxu0 %vm15575_vm14, %v12495_v22  ;;  %v1775_v23 = vmul.f32 %v12495_v22, %v1693_v7 }
 0x46d   :  { %11291 = vmatpush1.bf16.msk.msra.mxu0 %vm11286_vm2, %v15740_v21  ;;  %1843 = vmatprep.mubr.f32.mxu0 %v15600_v45  ;;  %v15862_v45 = vmov 0 }
 0x470   :  { %9765 = vmatmul.mubr.msk.f32.vlgmr.msra.gmra.mrb[14].mxu0 %vm15575_vm14, %v1775_v23 }
 0x471   :  { %1928 = vmatprep.mubr.bf16.mxu0 %v15779_v56 }
 0x53f   :  { %v1770_v26 = vpop.f32.mrb[12].mxu0 }
 0x540   :  { %v1853_v27 = vrot.slane %v1770_v26, %v13781_v0  ;;  %v1772_v30 = vpop.f32.mrb[13].mxu0 }
 0x541   :  { %v1857_v34 = vrot.slane %v1772_v30, %v13781_v0 }
 0x542   :  { %v1858_v40 = vmul.f32 %v1853_v27, %v13797_v12  ;;  %v1860_v46 = vmul.f32 %v1853_v27, %v13795_v36  ;;  %v1862_v61 = vmul.f32 %v1853_v27, %v13807_v13  ;;  %v1864_v62 = vmul.f32 %v1853_v27, %v13815_v29 }
 0x543   :  { %v1845_v58 = vpop.f32.mrb[14].mxu0  ;;  %v1859_v63 = vmul.f32 %v1857_v34, %v13791_v53  ;;  %v1861_v10 = vmul.f32 %v1857_v34, %v13793_v52  ;;  %v1863_v15 = vmul.f32 %v1857_v34, %v13810_v31  ;;  %v1865_v28 = vmul.f32 %v1857_v34, %v13818_v9  ;;  %v11730_v31 = vld [vmem:[#allocation6] sm:$0xff]   ;;  %v11731_v52 = vld [vmem:[#allocation6 + $0x8] sm:$0xff]   ;;  %v11732_v9 = vld [vmem:[#allocation6 + $0x10] sm:$0xff]  }
 0x544   :  { %v1869_v6 = vrot.slane %v1845_v58, %v13781_v0  ;;  %v1847_v7 = vpop.f32.mrb[15].mxu0  ;;  %v11793_v58 = vld [vmem:[#allocation7 + $0x34] ss:$8 sps:$4 sm:$0xff]  }
 0x545   :  { %v1873_v12 = vrot.slane %v1847_v7, %v13781_v0  ;;  %v11797_v7 = vld [vmem:[#allocation7 + $0x50] ss:$8 sps:$4 sm:$0xff]  }
 0x546   :  { %v1874_v37 = vsub.f32 %v1858_v40, %v1869_v6  ;;  %v1876_v36 = vsub.f32 %v1860_v46, %v1869_v6  ;;  %v1878_v38 = vsub.f32 %v1862_v61, %v1869_v6  ;;  %v1880_v54 = vsub.f32 %v1864_v62, %v1869_v6  ;;  %v11788_v40 = vld [vmem:[#allocation7 + $0x20] ss:$8 sps:$4 sm:$0xff]   ;;  %v11791_v61 = vld [vmem:[#allocation7 + $0x30] ss:$8 sps:$4 sm:$0xff]   ;;  %v11796_v62 = vld [vmem:[#allocation7 + $0x44] ss:$8 sps:$4 sm:$0xff]  }
 0x547   :  { %v1875_v13 = vsub.f32 %v1859_v63, %v1873_v12  ;;  %v1877_v5 = vsub.f32 %v1861_v10, %v1873_v12  ;;  %v1879_v29 = vsub.f32 %v1863_v15, %v1873_v12  ;;  %v1881_v8 = vsub.f32 %v1865_v28, %v1873_v12  ;;  %v11794_v63 = vld [vmem:[#allocation7 + $0x40] ss:$8 sps:$4 sm:$0xff]   ;;  %v11799_v6 = vld [vmem:[#allocation7 + $0x54] ss:$8 sps:$4 sm:$0xff]   ;;  %v11802_v10 = vld [vmem:[#allocation7 + $0x64] ss:$8 sps:$4 sm:$0xff]  }
 0x548   :  { %v1882_v53 = vpack.c.bf16 %v1876_v36, %v1874_v37  ;;  %v1884_v22 = vpack.c.bf16 %v1880_v54, %v1878_v38  ;;  %v11800_v15 = vld [vmem:[#allocation7 + $0x60] ss:$8 sps:$4 sm:$0xff]   ;;  %v11805_v28 = vld [vmem:[#allocation7 + $0x74] ss:$8 sps:$4 sm:$0xff]   ;;  %v11803_v12 = vld [vmem:[#allocation7 + $0x70] ss:$8 sps:$4 sm:$0xff]  }
 0x549   :  { %v1883_v23 = vpack.c.bf16 %v1877_v5, %v1875_v13  ;;  %v1885_v57 = vpack.c.bf16 %v1881_v8, %v1879_v29  ;;  %v11808_v37 = vld [vmem:[#allocation7 + $0x84] ss:$8 sps:$4 sm:$0xff]   ;;  %v11806_v36 = vld [vmem:[#allocation7 + $0x80] ss:$8 sps:$4 sm:$0xff]   ;;  %v11811_v38 = vld [vmem:[#allocation7 + $0x94] ss:$8 sps:$4 sm:$0xff]  }
 0x54a   :  { %v11809_v54 = vld [vmem:[#allocation7 + $0x90] ss:$8 sps:$4 sm:$0xff]   ;;  %v11814_v13 = vld [vmem:[#allocation7 + $0xa4] ss:$8 sps:$4 sm:$0xff]   ;;  %v11812_v5 = vld [vmem:[#allocation7 + $0xa0] ss:$8 sps:$4 sm:$0xff]  }
 0x54b   :  { %1896 = vmatprep.subr.bf16.mxu0 %v1883_v23  ;;  %v11817_v29 = vld [vmem:[#allocation7 + $0xb4] ss:$8 sps:$4 sm:$0xff]   ;;  %v11815_v8 = vld [vmem:[#allocation7 + $0xb0] ss:$8 sps:$4 sm:$0xff]  }
 0x54c   :  { %1897 = vmatpush1.bf16.msra.mxu0 %v1882_v53 }
 0x54d   :  { %1898 = vmatprep.subr.bf16.mxu0 %v1885_v57 }
 0x550   :  { %1899 = vmatpush1.bf16.msra.mxu0 %v1884_v22 }
 0x551   :  { %1984 = vmatprep.subr.bf16.mxu0 %v1883_v23 }
 0x553   :  { %9767 = vmatmul.mubr.msk.bf16.vlgmr.msra.gmra.mrb[16].mxu0 %vm15780_vm12, %v11730_v31  ;;  %v11826_v31 = vld [vmem:[#allocation7 + $0xe4] ss:$8 sps:$4 sm:$0xff]  }
 0x554   :  { %1985 = vmatpush1.bf16.msra.mxu0 %v1882_v53  ;;  %2016 = vmatprep.mubr.bf16.mxu0 %v15779_v56 }
 0x555   :  { %1986 = vmatprep.subr.bf16.mxu0 %v1885_v57 }
 0x558   :  { %1987 = vmatpush1.bf16.msra.mxu0 %v1884_v22 }
 0x559   :  { %2479 = vmatprep.subr.bf16.mxu0 %v1883_v23 }
 0x55b   :  { %9769 = vmatmul.mubr.msk.bf16.vlgmr.msra.gmra.mrb[20].mxu0 %vm15781_vm1, %v11731_v52  ;;  %v11824_v52 = vld [vmem:[#allocation7 + $0xe0] ss:$8 sps:$4 sm:$0xff]  }
 0x55c   :  { %2480 = vmatpush1.bf16.msra.mxu0 %v1882_v53  ;;  %2511 = vmatprep.mubr.bf16.mxu0 %v15779_v56 }
 0x55d   :  { %2481 = vmatprep.subr.bf16.mxu0 %v1885_v57 }
 0x560   :  { %2482 = vmatpush1.bf16.msra.mxu0 %v1884_v22 }
 0x561   :  { %2775 = vmatprep.subr.bf16.mxu0 %v1883_v23  ;;  %v11823_v23 = vld [vmem:[#allocation7 + $0xd4] ss:$8 sps:$4 sm:$0xff]  }
 0x563   :  { %9835 = vmatmul.mubr.msk.bf16.vlgmr.msra.gmra.mrb[24].mxu0 %vm15782_vm4, %v11732_v9 }
 0x564   :  { %2776 = vmatpush1.bf16.msra.mxu0 %v1882_v53  ;;  %2807 = vmatprep.mubr.bf16.mxu0 %v15779_v56  ;;  %v11820_v53 = vld [vmem:[#allocation7 + $0xc4] ss:$8 sps:$4 sm:$0xff]  }
 0x565   :  { %2777 = vmatprep.subr.bf16.mxu0 %v1885_v57  ;;  %v11821_v57 = vld [vmem:[#allocation7 + $0xd0] ss:$8 sps:$4 sm:$0xff]  }
 0x568   :  { %2778 = vmatpush1.bf16.msra.mxu0 %v1884_v22  ;;  %v11818_v22 = vld [vmem:[#allocation7 + $0xc0] ss:$8 sps:$4 sm:$0xff]  }
 0x56b   :  { %9869 = vmatmul.mubr.msk.bf16.vlgmr.msra.gmra.mrb[28].mxu0 %vm15783_vm5, %v11760_v3  ;;  %v11829_v3 = vld [vmem:[#allocation7 + $0xf4] ss:$8 sps:$4 sm:$0xff]  }
 0x626   :  { %v13980_v55 = vpop.f32.mrb[16].mxu0 }
 0x627   :  { %v1932_v32 = vpop.f32.mrb[17].mxu0 }
 0x628   :  { %v13982_v48 = vpop.f32.mrb[18].mxu0 }
 0x629   :  { %v1939_v4 = vpack.c.bf16 %v13982_v48, %v13980_v55  ;;  %v1936_v2 = vpop.f32.mrb[19].mxu0  ;;  %v15788_v55 = vld [vmem:[#allocation40_spill] sm:$0xff] }
 0x62a   :  { %v1940_v50 = vpack.c.bf16 %v1936_v2, %v1932_v32  ;;  %v11830_v32 = vld [vmem:[#allocation7 + $0x200] ss:$8 sps:$4 sm:$0xff]   ;;  %v11835_v2 = vld [vmem:[#allocation7 + $0x214] ss:$8 sps:$4 sm:$0xff]   ;;  %v3106_v48 = vand.u32 31, %v15788_v55 }
 0x62c   :  { %vm14059_vm9 = vcmp.eq.s32.totalorder %v3106_v48, %v13330_v44  ;;  %v11872_v48 = vld [vmem:[#allocation7 + $0x2e0] ss:$8 sps:$4 sm:$0xff]  }
 0x62e   :  { %v2018_v25 = vpop.f32.mrb[20].mxu0 }
 0x62f   :  { %v2020_v24 = vpop.f32.mrb[21].mxu0 }
 0x630   :  { %v2022_v59 = vpop.f32.mrb[22].mxu0 }
 0x631   :  { %v2027_v35 = vpack.c.bf16 %v2022_v59, %v2018_v25  ;;  %v2024_v33 = vpop.f32.mrb[23].mxu0 }
 0x632   :  { %v2028_v18 = vpack.c.bf16 %v2024_v33, %v2020_v24  ;;  %v15785_v24 = vld [vmem:[#allocation37_spill] sm:$0xff]  ;;  %v3099_v33 = vand.u32 31, %v13358_v14 }
 0x633   :  { %v3211_v59 = vand.u32 31, %v15785_v24 }
 0x634   :  { %2254 = vmatprep.mubr.bf16.mxu1 %v2028_v18  ;;  %v11833_v18 = vld [vmem:[#allocation7 + $0x210] ss:$8 sps:$4 sm:$0xff]   ;;  %vm14040_vm10 = vcmp.eq.s32.totalorder %v3099_v33, %v13330_v44  ;;  %v11866_v33 = vld [vmem:[#allocation7 + $0x2c0] ss:$8 sps:$4 sm:$0xff]  }
 0x635   :  { %2255 = vmatmul.mubr.bf16.vlgmr.msra.gmra.mrb[8].mxu1 %v2027_v35  ;;  %v3092_v35 = vand.u32 31, %v13322_v41  ;;  %vm14030_vm7 = vcmp.eq.s32.totalorder %v3211_v59, %v13330_v44  ;;  %v11863_v59 = vld [vmem:[#allocation7 + $0x2b0] ss:$8 sps:$4 sm:$0xff]  }
 0x636   :  { %2426 = vmatpush1.bf16.msra.mxu1 %v11782_v43  ;;  %2457 = vmatprep.mubr.bf16.mxu1 %v1940_v50  ;;  %v13986_v19 = vpop.f32.mrb[24].mxu0  ;;  %v15784_v50 = vld [vmem:[#allocation36_spill] sm:$0xff]  ;;  %v15786_v43 = vld [vmem:[#allocation38_spill] sm:$0xff] }
 0x637   :  { %2427 = vmatprep.subr.bf16.mxu1 %v11787_v17  ;;  %v13988_v26 = vpop.f32.mrb[25].mxu0  ;;  %v3204_v25 = vand.u32 31, %v15784_v50  ;;  %v3218_v17 = vand.u32 31, %v15786_v43  ;;  %vm14035_vm8 = vcmp.eq.s32.totalorder %v3092_v35, %v13330_v44  ;;  %v11868_v35 = vld [vmem:[#allocation7 + $0x2c4] ss:$8 sps:$4 sm:$0xff]  }
 0x638   :  { %v13990_v27 = vpop.f32.mrb[26].mxu0  ;;  %vm15579_vm2 = vmpackc.low %vm14040_vm10, %vm14035_vm8 }
 0x639   :  { %v2522_v30 = vpack.c.bf16 %v13990_v27, %v13986_v19  ;;  %v13994_v34 = vpop.f32.mrb[27].mxu0  ;;  %vm14025_vm15 = vcmp.eq.s32.totalorder %v3204_v25, %v13330_v44  ;;  %vm14049_vm3 = vcmp.eq.s32.totalorder %v3218_v17, %v13330_v44  ;;  %v11865_v25 = vld [vmem:[#allocation7 + $0x2b4] ss:$8 sps:$4 sm:$0xff]   ;;  %v11869_v17 = vld [vmem:[#allocation7 + $0x2d0] ss:$8 sps:$4 sm:$0xff]  }
 0x63a   :  { %2428 = vmatpush1.bf16.msra.mxu1 %v11785_v42  ;;  %v2523_v46 = vpack.c.bf16 %v13994_v34, %v13988_v26  ;;  %v15787_v42 = vld [vmem:[#allocation39_spill] sm:$0xff]  ;;  %vm15580_vm11 = vmpackc.low %vm14030_vm7, %vm14025_vm15 }
 0x63b   :  { %2429 = vmatprep.subr.bf16.mxu1 %v11790_v20  ;;  %v3225_v20 = vand.u32 31, %v15787_v42  ;;  %11293 = vmatprep.subr.msk.bf16.mxu0 %vm15580_vm11, %v15740_v21  ;;  %v11895_v19 = vld [vmem:[#allocation7 + $0x354] ss:$8 sps:$4 sm:$0xff]   ;;  %v11893_v27 = vld [vmem:[#allocation7 + $0x350] ss:$8 sps:$4 sm:$0xff]  }
 0x63c   :  { %11295 = vmatpush3.bf16.msk.msra.mxu0 %vm15579_vm2, %v15740_v21 }
 0x63d   :  { %vm14054_vm6 = vcmp.eq.s32.totalorder %v3225_v20, %v13330_v44  ;;  %v11874_v20 = vld [vmem:[#allocation7 + $0x2e4] ss:$8 sps:$4 sm:$0xff]  }
 0x63e   :  { %2430 = vmatpush1.bf16.msra.mxu1 %v11788_v40  ;;  %v13998_v9 = vpop.f32.mrb[28].mxu0  ;;  %vm15578_vm0 = vmpackc.low %vm14054_vm6, %vm14049_vm3 }
 0x63f   :  { %2431 = vmatprep.subr.bf16.mxu1 %v11793_v58  ;;  %v14000_v16 = vpop.f32.mrb[29].mxu0  ;;  %v11838_v58 = vld [vmem:[#allocation7 + $0x224] ss:$8 sps:$4 sm:$0xff]   ;;  %11297 = vmatprep.subr.msk.bf16.mxu0 %vm15578_vm0, %v15740_v21 }
 0x640   :  { %v14002_v51 = vpop.f32.mrb[30].mxu0 }
 0x641   :  { %v2818_v11 = vpack.c.bf16 %v14002_v51, %v13998_v9  ;;  %v14006_v49 = vpop.f32.mrb[31].mxu0  ;;  %v15818_v9 = vld [vmem:[#allocation46_spill] sm:$0xff] }
 0x642   :  { %2432 = vmatpush1.bf16.msra.mxu1 %v11791_v61  ;;  %v2819_v60 = vpack.c.bf16 %v14006_v49, %v14000_v16  ;;  %v11896_v16 = vld [vmem:[#allocation7 + $0x360] ss:$8 sps:$4 sm:$0xff]   ;;  %v11901_v49 = vld [vmem:[#allocation7 + $0x374] ss:$8 sps:$4 sm:$0xff]   ;;  %v3246_v51 = vand.u32 31, %v15818_v9 }
 0x643   :  { %2433 = vmatprep.subr.bf16.mxu1 %v11796_v62 }
 0x644   :  { %vm14163_vm0 = vcmp.eq.s32.totalorder %v3246_v51, %v13330_v44  ;;  %v15850_v51 = vmov 0 }
 0x646   :  { %2434 = vmatpush1.bf16.msra.mxu1 %v11794_v63 }
 0x647   :  { %2435 = vmatprep.subr.bf16.mxu1 %v11799_v6  ;;  %v3579_v6 = vand.u32 31, %v13922_v39 }
 0x64a   :  { %2436 = vmatpush1.bf16.msra.mxu1 %v11797_v7  ;;  %v3572_v7 = vand.u32 31, %v13330_v44 }
 0x64b   :  { %2437 = vmatprep.subr.bf16.mxu1 %v11802_v10  ;;  %v15806_v10 = vld [vmem:[#allocation42_spill] sm:$0xff] }
 0x64e   :  { %2438 = vmatpush1.bf16.msra.mxu1 %v11800_v15  ;;  %v3232_v15 = vand.u32 31, %v15806_v10 }
 0x64f   :  { %2439 = vmatprep.subr.bf16.mxu1 %v11805_v28  ;;  %v15807_v28 = vld [vmem:[#allocation43_spill] sm:$0xff] }
 0x650   :  { %vm14101_vm1 = vcmp.eq.s32.totalorder %v3232_v15, %v13330_v44  ;;  %v11880_v15 = vld [vmem:[#allocation7 + $0x304] ss:$8 sps:$4 sm:$0xff]  }
 0x652   :  { %2440 = vmatpush1.bf16.msra.mxu1 %v11803_v12  ;;  %v3239_v12 = vand.u32 31, %v15807_v28 }
 0x653   :  { %2441 = vmatprep.subr.bf16.mxu1 %v11808_v37  ;;  %v11836_v37 = vld [vmem:[#allocation7 + $0x220] ss:$8 sps:$4 sm:$0xff]  }
 0x654   :  { %vm14106_vm4 = vcmp.eq.s32.totalorder %v3239_v12, %v13330_v44  ;;  %v11878_v12 = vld [vmem:[#allocation7 + $0x300] ss:$8 sps:$4 sm:$0xff]  }
 0x655   :  { %vm15576_vm5 = vmpackc.low %vm14106_vm4, %vm14101_vm1 }
 0x656   :  { %2442 = vmatpush1.bf16.msra.mxu1 %v11806_v36  ;;  %v11841_v36 = vld [vmem:[#allocation7 + $0x234] ss:$8 sps:$4 sm:$0xff]  }
 0x657   :  { %2443 = vmatprep.subr.bf16.mxu1 %v11811_v38  ;;  %v15808_v38 = vmov 0 }
 0x658   :  { %v15809_v38 = vsel %vm14101_vm1, 4294967295, %v15808_v38 }
 0x65a   :  { %2444 = vmatpush1.bf16.msra.mxu1 %v11809_v54 }
 0x65b   :  { %2445 = vmatprep.subr.bf16.mxu1 %v11814_v13  ;;  %v11839_v13 = vld [vmem:[#allocation7 + $0x230] ss:$8 sps:$4 sm:$0xff]  }
 0x65e   :  { %2446 = vmatpush1.bf16.msra.mxu1 %v11812_v5  ;;  %v11844_v5 = vld [vmem:[#allocation7 + $0x244] ss:$8 sps:$4 sm:$0xff]  }
 0x65f   :  { %2447 = vmatprep.subr.bf16.mxu1 %v11817_v29  ;;  %v11842_v29 = vld [vmem:[#allocation7 + $0x240] ss:$8 sps:$4 sm:$0xff]  }
 0x662   :  { %2448 = vmatpush1.bf16.msra.mxu1 %v11815_v8  ;;  %v11847_v8 = vld [vmem:[#allocation7 + $0x254] ss:$8 sps:$4 sm:$0xff]  }
 0x663   :  { %2449 = vmatprep.subr.bf16.mxu1 %v11820_v53  ;;  %v11845_v53 = vld [vmem:[#allocation7 + $0x250] ss:$8 sps:$4 sm:$0xff]  }
 0x666   :  { %2450 = vmatpush1.bf16.msra.mxu1 %v11818_v22  ;;  %v11850_v22 = vld [vmem:[#allocation7 + $0x264] ss:$8 sps:$4 sm:$0xff]  }
 0x667   :  { %2451 = vmatprep.subr.bf16.mxu1 %v11823_v23  ;;  %v11848_v23 = vld [vmem:[#allocation7 + $0x260] ss:$8 sps:$4 sm:$0xff]  }
 0x66a   :  { %2452 = vmatpush1.bf16.msra.mxu1 %v11821_v57  ;;  %v11853_v57 = vld [vmem:[#allocation7 + $0x274] ss:$8 sps:$4 sm:$0xff]  }
 0x66b   :  { %2453 = vmatprep.subr.bf16.mxu1 %v11826_v31  ;;  %v11851_v31 = vld [vmem:[#allocation7 + $0x270] ss:$8 sps:$4 sm:$0xff]  }
 0x66e   :  { %2454 = vmatpush1.bf16.msra.mxu1 %v11824_v52  ;;  %v11856_v52 = vld [vmem:[#allocation7 + $0x284] ss:$8 sps:$4 sm:$0xff]  }
 0x66f   :  { %2455 = vmatprep.subr.bf16.mxu1 %v11829_v3  ;;  %v11854_v3 = vld [vmem:[#allocation7 + $0x280] ss:$8 sps:$4 sm:$0xff]  }
 0x672   :  { %2456 = vmatpush1.bf16.msra.mxu1 %v11827_v1  ;;  %v11859_v1 = vld [vmem:[#allocation7 + $0x294] ss:$8 sps:$4 sm:$0xff]  }
 0x673   :  { %2717 = vmatprep.subr.bf16.mxu1 %v11832_v47  ;;  %v11857_v47 = vld [vmem:[#allocation7 + $0x290] ss:$8 sps:$4 sm:$0xff]  }
 0x675   :  { %2458 = vmatmul.mubr.bf16.vlgmr.msra.gmra.mrb[8].mxu1 %v1939_v4  ;;  %v15789_v4 = vld [vmem:[#allocation41_spill] sm:$0xff] }
 0x676   :  { %2718 = vmatpush1.bf16.msra.mxu1 %v11830_v32  ;;  %2749 = vmatprep.mubr.bf16.mxu1 %v2523_v46  ;;  %v3113_v40 = vand.u32 31, %v15789_v4  ;;  %v11862_v32 = vld [vmem:[#allocation7 + $0x2a4] ss:$8 sps:$4 sm:$0xff]  }
 0x677   :  { %2719 = vmatprep.subr.bf16.mxu1 %v11835_v2  ;;  %v11860_v2 = vld [vmem:[#allocation7 + $0x2a0] ss:$8 sps:$4 sm:$0xff]  }
 0x678   :  { %vm14064_vm13 = vcmp.eq.s32.totalorder %v3113_v40, %v13330_v44  ;;  %v11877_v40 = vld [vmem:[#allocation7 + $0x2f4] ss:$8 sps:$4 sm:$0xff]  }
 0x679   :  { %vm15577_vm12 = vmpackc.low %vm14064_vm13, %vm14059_vm9 }
 0x67a   :  { %2720 = vmatpush1.bf16.msra.mxu1 %v11833_v18  ;;  %11299 = vmatpush3.bf16.msk.msra.mxu0 %vm15577_vm12, %v15740_v21  ;;  %v11871_v18 = vld [vmem:[#allocation7 + $0x2d4] ss:$8 sps:$4 sm:$0xff]  }
 0x67b   :  { %2721 = vmatprep.subr.bf16.mxu1 %v11838_v58  ;;  %11301 = vmatprep.subr.msk.bf16.mxu0 %vm15576_vm5, %v15740_v21  ;;  %v11875_v58 = vld [vmem:[#allocation7 + $0x2f0] ss:$8 sps:$4 sm:$0xff]  }
 0x67e   :  { %2722 = vmatpush1.bf16.msra.mxu1 %v11836_v37  ;;  %v11883_v37 = vld [vmem:[#allocation7 + $0x314] ss:$8 sps:$4 sm:$0xff]  }
 0x67f   :  { %2723 = vmatprep.subr.bf16.mxu1 %v11841_v36  ;;  %v11881_v36 = vld [vmem:[#allocation7 + $0x310] ss:$8 sps:$4 sm:$0xff]  }
 0x682   :  { %2724 = vmatpush1.bf16.msra.mxu1 %v11839_v13  ;;  %v11886_v13 = vld [vmem:[#allocation7 + $0x324] ss:$8 sps:$4 sm:$0xff]  }
 0x683   :  { %2725 = vmatprep.subr.bf16.mxu1 %v11844_v5  ;;  %v11884_v5 = vld [vmem:[#allocation7 + $0x320] ss:$8 sps:$4 sm:$0xff]  }
 0x686   :  { %2726 = vmatpush1.bf16.msra.mxu1 %v11842_v29  ;;  %v11889_v29 = vld [vmem:[#allocation7 + $0x334] ss:$8 sps:$4 sm:$0xff]  }
 0x687   :  { %2727 = vmatprep.subr.bf16.mxu1 %v11847_v8  ;;  %v11887_v8 = vld [vmem:[#allocation7 + $0x330] ss:$8 sps:$4 sm:$0xff]  }
 0x68a   :  { %2728 = vmatpush1.bf16.msra.mxu1 %v11845_v53  ;;  %v11892_v53 = vld [vmem:[#allocation7 + $0x344] ss:$8 sps:$4 sm:$0xff]  }
 0x68b   :  { %2729 = vmatprep.subr.bf16.mxu1 %v11850_v22  ;;  %v11890_v22 = vld [vmem:[#allocation7 + $0x340] ss:$8 sps:$4 sm:$0xff]  }
 0x68e   :  { %2730 = vmatpush1.bf16.msra.mxu1 %v11848_v23  ;;  %v11904_v23 = vld [vmem:[#allocation7 + $0x384] ss:$8 sps:$4 sm:$0xff]  }
 0x68f   :  { %2731 = vmatprep.subr.bf16.mxu1 %v11853_v57  ;;  %v11902_v57 = vld [vmem:[#allocation7 + $0x380] ss:$8 sps:$4 sm:$0xff]  }
 0x692   :  { %2732 = vmatpush1.bf16.msra.mxu1 %v11851_v31  ;;  %v11907_v31 = vld [vmem:[#allocation7 + $0x394] ss:$8 sps:$4 sm:$0xff]  }
 0x693   :  { %2733 = vmatprep.subr.bf16.mxu1 %v11856_v52  ;;  %v11905_v52 = vld [vmem:[#allocation7 + $0x390] ss:$8 sps:$4 sm:$0xff]  }
 0x696   :  { %2734 = vmatpush1.bf16.msra.mxu1 %v11854_v3  ;;  %v11910_v3 = vld [vmem:[#allocation7 + $0x3a4] ss:$8 sps:$4 sm:$0xff]  }
 0x697   :  { %2735 = vmatprep.subr.bf16.mxu1 %v11859_v1  ;;  %v11908_v1 = vld [vmem:[#allocation7 + $0x3a0] ss:$8 sps:$4 sm:$0xff]  }
 0x69a   :  { %2736 = vmatpush1.bf16.msra.mxu1 %v11857_v47  ;;  %v11913_v47 = vld [vmem:[#allocation7 + $0x3b4] ss:$8 sps:$4 sm:$0xff]  }
 0x69b   :  { %2737 = vmatprep.subr.bf16.mxu1 %v11862_v32  ;;  %v11911_v32 = vld [vmem:[#allocation7 + $0x3b0] ss:$8 sps:$4 sm:$0xff]  }
 0x69e   :  { %2738 = vmatpush1.bf16.msra.mxu1 %v11860_v2  ;;  %v11916_v2 = vld [vmem:[#allocation7 + $0x3c4] ss:$8 sps:$4 sm:$0xff]  }
 0x69f   :  { %2739 = vmatprep.subr.bf16.mxu1 %v11865_v25  ;;  %v11914_v25 = vld [vmem:[#allocation7 + $0x3c0] ss:$8 sps:$4 sm:$0xff]  }
 0x6a2   :  { %2740 = vmatpush1.bf16.msra.mxu1 %v11863_v59  ;;  %v11919_v59 = vld [vmem:[#allocation7 + $0x3d4] ss:$8 sps:$4 sm:$0xff]  }
 0x6a3   :  { %2741 = vmatprep.subr.bf16.mxu1 %v11868_v35  ;;  %v11917_v35 = vld [vmem:[#allocation7 + $0x3d0] ss:$8 sps:$4 sm:$0xff]  }
 0x6a6   :  { %2742 = vmatpush1.bf16.msra.mxu1 %v11866_v33  ;;  %v11922_v33 = vld [vmem:[#allocation7 + $0x3e4] ss:$8 sps:$4 sm:$0xff]  }
 0x6a7   :  { %2743 = vmatprep.subr.bf16.mxu1 %v11871_v18  ;;  %v11920_v18 = vld [vmem:[#allocation7 + $0x3e0] ss:$8 sps:$4 sm:$0xff]  }
 0x6aa   :  { %2744 = vmatpush1.bf16.msra.mxu1 %v11869_v17  ;;  %v11925_v17 = vld [vmem:[#allocation7 + $0x3f4] ss:$8 sps:$4 sm:$0xff]  }
 0x6ab   :  { %2745 = vmatprep.subr.bf16.mxu1 %v11874_v20  ;;  %v11923_v20 = vld [vmem:[#allocation7 + $0x3f0] ss:$8 sps:$4 sm:$0xff]  }
 0x6ae   :  { %2746 = vmatpush1.bf16.msra.mxu1 %v11872_v48  ;;  %v15812_v48 = vld [vmem:[#allocation44_spill] sm:$0xff] }
 0x6af   :  { %2747 = vmatprep.subr.bf16.mxu1 %v11877_v40  ;;  %v3120_v40 = vand.u32 31, %v15812_v48 }
 0x6b1   :  { %vm14139_vm14 = vcmp.eq.s32.totalorder %v3120_v40, %v13330_v44  ;;  %v15846_v40 = vmov 0 }
 0x6b2   :  { %2748 = vmatpush1.bf16.msra.mxu1 %v11875_v58  ;;  %v15813_v58 = vld [vmem:[#allocation45_spill] sm:$0xff] }
 0x6b3   :  { %3013 = vmatprep.subr.bf16.mxu1 %v11880_v15  ;;  %v3127_v15 = vand.u32 31, %v15813_v58 }
 0x6b5   :  { %2750 = vmatmul.mubr.bf16.vlgmr.msra.gmra.mrb[8].mxu1 %v2522_v30  ;;  %v11898_v30 = vld [vmem:[#allocation7 + $0x364] ss:$8 sps:$4 sm:$0xff]   ;;  %vm14144_vm5 = vcmp.eq.s32.totalorder %v3127_v15, %v13330_v44  ;;  %v15848_v15 = vmov 0 }
 0x6b6   :  { %3014 = vmatpush1.bf16.msra.mxu1 %v11878_v12  ;;  %3045 = vmatprep.mubr.bf16.mxu1 %v2819_v60  ;;  %v11899_v60 = vld [vmem:[#allocation7 + $0x370] ss:$8 sps:$4 sm:$0xff]   ;;  %v15814_v12 = vmov 0  ;;  %vm15581_vm12 = vmpackc.low %vm14144_vm5, %vm14139_vm14 }
 0x6b7   :  { %3015 = vmatprep.subr.bf16.mxu1 %v11883_v37  ;;  %v15815_v12 = vsel %vm14139_vm14, 4294967295, %v15814_v12  ;;  %v15816_v37 = vmov 0  ;;  %11303 = vmatpush3.bf16.msk.msra.mxu0 %vm15581_vm12, %v15740_v21 }
 0x6b8   :  { %v15817_v37 = vsel %vm14144_vm5, 4294967295, %v15816_v37 }
 0x6ba   :  { %3016 = vmatpush1.bf16.msra.mxu1 %v11881_v36 }
 0x6bb   :  { %3017 = vmatprep.subr.bf16.mxu1 %v11886_v13  ;;  %v15820_v13 = vld [vmem:[#allocation48_spill] sm:$0xff] }
 0x6be   :  { %3018 = vmatpush1.bf16.msra.mxu1 %v11884_v5  ;;  %v3134_v5 = vand.u32 31, %v15820_v13 }
 0x6bf   :  { %3019 = vmatprep.subr.bf16.mxu1 %v11889_v29  ;;  %v15821_v29 = vld [vmem:[#allocation49_spill] sm:$0xff] }
 0x6c0   :  { %vm14177_vm12 = vcmp.eq.s32.totalorder %v3134_v5, %v13330_v44  ;;  %v15854_v5 = vld [vmem:[#allocation58_spill] sm:$0xff] }
 0x6c2   :  { %3020 = vmatpush1.bf16.msra.mxu1 %v11887_v8  ;;  %v3141_v8 = vand.u32 31, %v15821_v29 }
 0x6c3   :  { %3021 = vmatprep.subr.bf16.mxu1 %v11892_v53  ;;  %v15822_v53 = vmov 0 }
 0x6c4   :  { %v15823_v53 = vsel %vm14163_vm0, 4294967295, %v15822_v53  ;;  %vm14182_vm14 = vcmp.eq.s32.totalorder %v3141_v8, %v13330_v44  ;;  %v3288_v8 = vand.u32 31, %v15854_v5  ;;  %v15869_v5 = vld [vmem:[#allocation65_spill] sm:$0xff] }
 0x6c5   :  { %vm15587_vm5 = vmpackc.low %vm14182_vm14, %vm14177_vm12 }
 0x6c6   :  { %3022 = vmatpush1.bf16.msra.mxu1 %v11890_v22  ;;  %v15824_v22 = vmov 0 }
 0x6c7   :  { %3023 = vmatprep.subr.bf16.mxu1 %v11895_v19  ;;  %v15826_v19 = vmov 0 }
 0x6c8   :  { %v15827_v19 = vsel %vm14177_vm12, 4294967295, %v15826_v19 }
 0x6ca   :  { %3024 = vmatpush1.bf16.msra.mxu1 %v11893_v27  ;;  %v15828_v27 = vmov 0 }
 0x6cb   :  { %3025 = vmatprep.subr.bf16.mxu1 %v11898_v30  ;;  %v15829_v27 = vsel %vm14182_vm14, 4294967295, %v15828_v27  ;;  %v15830_v30 = vld [vmem:[#allocation50_spill] sm:$0xff] }
 0x6ce   :  { %3026 = vmatpush1.bf16.msra.mxu1 %v11896_v16  ;;  %v3260_v16 = vand.u32 31, %v15830_v30 }
 0x6cf   :  { %3027 = vmatprep.subr.bf16.mxu1 %v11901_v49  ;;  %v15831_v49 = vld [vmem:[#allocation51_spill] sm:$0xff] }
 0x6d2   :  { %3028 = vmatpush1.bf16.msra.mxu1 %v11899_v60  ;;  %v3267_v60 = vand.u32 31, %v15831_v49 }
 0x6d3   :  { %3029 = vmatprep.subr.bf16.mxu1 %v11904_v23  ;;  %v15832_v23 = vld [vmem:[#allocation52_spill] sm:$0xff] }
 0x6d6   :  { %3030 = vmatpush1.bf16.msra.mxu1 %v11902_v57  ;;  %v3148_v57 = vand.u32 31, %v15832_v23 }
 0x6d7   :  { %3031 = vmatprep.subr.bf16.mxu1 %v11907_v31  ;;  %v15833_v31 = vld [vmem:[#allocation53_spill] sm:$0xff] }
 0x6da   :  { %3032 = vmatpush1.bf16.msra.mxu1 %v11905_v52  ;;  %v3155_v52 = vand.u32 31, %v15833_v31 }
 0x6db   :  { %3033 = vmatprep.subr.bf16.mxu1 %v11910_v3  ;;  %v15834_v3 = vmov 0 }
 0x6dc   :  { %vm14226_vm14 = vcmp.eq.s32.totalorder %v3155_v52, %v13330_v44 }
 0x6de   :  { %3034 = vmatpush1.bf16.msra.mxu1 %v11908_v1  ;;  %v15836_v1 = vmov 0 }
 0x6df   :  { %3035 = vmatprep.subr.bf16.mxu1 %v11913_v47  ;;  %v15838_v47 = vmov 0 }
 0x6e2   :  { %3036 = vmatpush1.bf16.msra.mxu1 %v11911_v32  ;;  %v15840_v32 = vmov 0 }
 0x6e3   :  { %3037 = vmatprep.subr.bf16.mxu1 %v11916_v2  ;;  %v15841_v32 = vsel %vm14226_vm14, 4294967295, %v15840_v32  ;;  %v15842_v2 = vld [vmem:[#allocation54_spill] sm:$0xff] }
 0x6e6   :  { %3038 = vmatpush1.bf16.msra.mxu1 %v11914_v25  ;;  %v3274_v25 = vand.u32 31, %v15842_v2 }
 0x6e7   :  { %3039 = vmatprep.subr.bf16.mxu1 %v11919_v59  ;;  %v15843_v59 = vld [vmem:[#allocation55_spill] sm:$0xff] }
 0x6ea   :  { %3040 = vmatpush1.bf16.msra.mxu1 %v11917_v35  ;;  %v3281_v35 = vand.u32 31, %v15843_v59 }
 0x6eb   :  { %3041 = vmatprep.subr.bf16.mxu1 %v11922_v33  ;;  %v15844_v33 = vld [vmem:[#allocation56_spill] sm:$0xff] }
 0x6ee   :  { %3042 = vmatpush1.bf16.msra.mxu1 %v11920_v18  ;;  %v3162_v18 = vand.u32 31, %v15844_v33 }
 0x6ef   :  { %3043 = vmatprep.subr.bf16.mxu1 %v11925_v17  ;;  %v15845_v17 = vld [vmem:[#allocation57_spill] sm:$0xff] }
 0x6f2   :  { %3044 = vmatpush1.bf16.msra.mxu1 %v11923_v20  ;;  %v3169_v20 = vand.u32 31, %v15845_v17  ;;  %v3197_v17 = vand.u32 31, %v15869_v5  ;;  %v15874_v5 = vmov 0 }
 0x6f5   :  { %3046 = vmatmul.mubr.bf16.vlgmr.msra.gmra.mrb[8].mxu1 %v2818_v11  ;;  %v15819_v11 = vld [vmem:[#allocation47_spill] sm:$0xff] }
 0x6f6   :  { %4853 = vmatprep.mubr.bf16.mxu1 %v15779_v56  ;;  %v3253_v36 = vand.u32 31, %v15819_v11 }
 0x6f8   :  { %vm14168_vm2 = vcmp.eq.s32.totalorder %v3253_v36, %v13330_v44  ;;  %v15852_v36 = vmov 0 }
 0x6f9   :  { %v15825_v22 = vsel %vm14168_vm2, 4294967295, %v15824_v22  ;;  %vm15584_vm11 = vmpackc.low %vm14168_vm2, %vm14163_vm0  ;;  %vm14212_vm0 = vcmp.eq.s32.totalorder %v3267_v60, %v13330_v44 }
 0x6fa   :  { %11305 = vmatprep.subr.msk.bf16.mxu0 %vm15584_vm11, %v15740_v21  ;;  %vm14207_vm11 = vcmp.eq.s32.totalorder %v3260_v16, %v13330_v44  ;;  %v15837_v1 = vsel %vm14212_vm0, 4294967295, %v15836_v1  ;;  %v15855_v16 = vld [vmem:[#allocation59_spill] sm:$0xff] }
 0x6fb   :  { %11307 = vmatpush3.bf16.msk.msra.mxu0 %vm15587_vm5, %v15740_v21  ;;  %v15835_v3 = vsel %vm14207_vm11, 4294967295, %v15834_v3  ;;  %vm15590_vm12 = vmpackc.low %vm14212_vm0, %vm14207_vm11  ;;  %vm14221_vm5 = vcmp.eq.s32.totalorder %v3148_v57, %v13330_v44  ;;  %vm14256_vm11 = vcmp.eq.s32.totalorder %v3281_v35, %v13330_v44  ;;  %v3295_v60 = vand.u32 31, %v15855_v16  ;;  %v15856_v57 = vld [vmem:[#allocation60_spill] sm:$0xff] }
 0x6fc   :  { %v15839_v47 = vsel %vm14221_vm5, 4294967295, %v15838_v47  ;;  %11309 = vmatprep.subr.msk.bf16.mxu0 %vm15590_vm12, %v15740_v21  ;;  %vm15593_vm2 = vmpackc.low %vm14226_vm14, %vm14221_vm5  ;;  %vm14251_vm12 = vcmp.eq.s32.totalorder %v3274_v25, %v13330_v44  ;;  %v15849_v15 = vsel %vm14256_vm11, 4294967295, %v15848_v15  ;;  %vm14270_vm14 = vcmp.eq.s32.totalorder %v3169_v20, %v13330_v44  ;;  %v15857_v25 = vld [vmem:[#allocation61_spill] sm:$0xff] }
 0x6fd   :  { %v15847_v40 = vsel %vm14251_vm12, 4294967295, %v15846_v40  ;;  %vm15596_vm5 = vmpackc.low %vm14256_vm11, %vm14251_vm12  ;;  %v15853_v36 = vsel %vm14270_vm14, 4294967295, %v15852_v36  ;;  %v3176_v52 = vand.u32 31, %v15856_v57  ;;  %v3183_v35 = vand.u32 31, %v15857_v25  ;;  %v15866_v25 = vld [vmem:[#allocation62_spill] sm:$0xff]  ;;  %v15867_v57 = vld [vmem:[#allocation63_spill] sm:$0xff] }
 0x6fe   :  { %vm14300_vm12 = vcmp.eq.s32.totalorder %v3295_v60, %v13330_v44  ;;  %v15860_v20 = vmov 0  ;;  %v3302_v60 = vand.u32 31, %v15866_v25  ;;  %v3309_v16 = vand.u32 31, %v15867_v57 }
 0x6ff   :  { %11311 = vmatpush3.bf16.msk.msra.mxu0 %vm15593_vm2, %v15740_v21  ;;  %vm14265_vm2 = vcmp.eq.s32.totalorder %v3162_v18, %v13330_v44  ;;  %v15858_v18 = vmov 0  ;;  %v15861_v20 = vsel %vm14300_vm12, 4294967295, %v15860_v20 }
 0x700   :  { %v15851_v51 = vsel %vm14265_vm2, 4294967295, %v15850_v51  ;;  %11313 = vmatprep.subr.msk.bf16.mxu0 %vm15596_vm5, %v15740_v21  ;;  %vm15599_vm0 = vmpackc.low %vm14270_vm14, %vm14265_vm2  ;;  %vm14295_vm5 = vcmp.eq.s32.totalorder %v3288_v8, %v13330_v44  ;;  %vm14314_vm14 = vcmp.eq.s32.totalorder %v3183_v35, %v13330_v44  ;;  %v15864_v8 = vmov 0 }
 0x701   :  { %v15859_v18 = vsel %vm14295_vm5, 4294967295, %v15858_v18  ;;  %vm15605_vm2 = vmpackc.low %vm14300_vm12, %vm14295_vm5  ;;  %v15865_v8 = vsel %vm14314_vm14, 4294967295, %v15864_v8  ;;  %vm14339_vm1 = vcmp.eq.s32.totalorder %v3302_v60, %v13330_v44 }
 0x703   :  { %11315 = vmatpush3.bf16.msk.msra.mxu0 %vm15599_vm0, %v15740_v21  ;;  %vm14309_vm0 = vcmp.eq.s32.totalorder %v3176_v52, %v13330_v44  ;;  %v15868_v52 = vld [vmem:[#allocation64_spill] sm:$0xff] }
 0x704   :  { %v15863_v45 = vsel %vm14309_vm0, 4294967295, %v15862_v45  ;;  %11317 = vmatprep.subr.msk.bf16.mxu0 %vm15605_vm2, %v15740_v21  ;;  %vm15608_vm11 = vmpackc.low %vm14314_vm14, %vm14309_vm0  ;;  %v3190_v35 = vand.u32 31, %v15868_v52  ;;  %vm14344_vm2 = vcmp.eq.s32.totalorder %v3309_v16, %v13330_v44 }
 0x705   :  { %vm15612_vm5 = vmpackc.low %vm14344_vm2, %vm14339_vm1 }
 0x706   :  { %vm14353_vm12 = vcmp.eq.s32.totalorder %v3190_v35, %v13330_v44  ;;  %vm15878_vm14 = vmpackc.low %vm14030_vm7, %vm14025_vm15  ;;  %v15879_v35 = vld [vmem:[#allocation66_spill] sm:$0xff] }
 0x707   :  { %11319 = vmatpush3.bf16.msk.msra.mxu0 %vm15608_vm11, %v15740_v21  ;;  %v15875_v5 = vsel %vm14353_vm12, 4294967295, %v15874_v5  ;;  %vm14358_vm11 = vcmp.eq.s32.totalorder %v3197_v17, %v13330_v44  ;;  %v3060_v17 = vld [vmem:[#allocation9] sm:$0x3]  ;;  %vm15882_vm15 = vmpackc.low %vm14040_vm10, %vm14035_vm8  ;;  %vm15885_vm10 = vnez %v15809_v38  ;;  %v11950_v38 = vld [vmem:[#allocation12 + $0x180] ss:$8 sps:$4 sm:$0xff]  }
 0x708   :  { %11321 = vmatprep.subr.msk.bf16.mxu0 %vm15612_vm5, %v15740_v21  ;;  %vm15611_vm0 = vmpackc.low %vm14358_vm11, %vm14353_vm12  ;;  %v3065_v16 = vrot.slane %v3060_v17, %v13781_v0  ;;  %v3069_v52 = vrot.slane %v3060_v17, %v15879_v35 }
 0x709   :  { %vm15883_vm7 = vmpackc.low %vm14054_vm6, %vm14049_vm3  ;;  %vm15887_vm3 = vnez %v15817_v37  ;;  %vm15888_vm6 = vnez %v15815_v12 }
 0x70a   :  { %vm15884_vm8 = vmpackc.low %vm14064_vm13, %vm14059_vm9  ;;  %vm15890_vm9 = vnez %v15825_v22  ;;  %vm15891_vm13 = vnez %v15823_v53 }
 0x70b   :  { %11323 = vmatpush3.bf16.msk.msra.mxu0 %vm15611_vm0, %v15740_v21 }
 0x70c   :  { %11325 = vmatprep.subr.msk.bf16.mxu0 %vm15878_vm14, %v15740_v21 }
 0x7c8   :  { %v3047_v33 = vpop.f32.mrb[8].mxu1 }
 0x7c9   :  { %v3072_v59 = vadd.f32 %v3065_v16, %v3047_v33  ;;  %v3049_v2 = vpop.f32.mrb[9].mxu1 }
 0x7ca   :  { %v3073_v31 = vadd.f32 %v3069_v52, %v3049_v2  ;;  %v3051_v23 = vpop.f32.mrb[10].mxu1 }
 0x7cb   :  { %v3080_v49 = vmul.f32 0.2, %v3072_v59  ;;  %v3074_v30 = vadd.f32 %v3065_v16, %v3051_v23  ;;  %v3053_v29 = vpop.f32.mrb[11].mxu1  ;;  %vm3076_vm0 = vcmp.ge.f32.partialorder %v3072_v59, 0.0 }
 0x7cc   :  { %vm3077_vm5 = vcmp.ge.f32.partialorder %v3073_v31, 0.0  ;;  %v3081_v62 = vmul.f32 0.2, %v3073_v31  ;;  %v3075_v13 = vadd.f32 %v3069_v52, %v3053_v29 }
 0x7cd   :  { %vm3078_vm12 = vcmp.ge.f32.partialorder %v3074_v30, 0.0  ;;  %v3082_v61 = vmul.f32 0.2, %v3074_v30  ;;  %v14388_v58 = vsel %vm3076_vm0, %v3072_v59, %v3080_v49  ;;  %vm15886_vm0 = vmpackc.low %vm14106_vm4, %vm15885_vm10  ;;  %vm15894_vm4 = vnez %v15827_v19 }
 0x7ce   :  { %v14386_v11 = vsel %vm3077_vm5, %v3073_v31, %v3081_v62  ;;  %vm3079_vm14 = vcmp.ge.f32.partialorder %v3075_v13, 0.0  ;;  %v3083_v9 = vmul.f32 0.2, %v3075_v13  ;;  %vm15892_vm5 = vmpackc.low %vm15890_vm9, %vm15891_vm13  ;;  %vm15903_vm9 = vnez %v15847_v40 }
 0x7cf   :  { %15880 = vst [vmem:[#allocation40_spill] sm:$0xff] %v14386_v11  ;;  %v14390_v17 = vsel %vm3078_vm12, %v3074_v30, %v3082_v61  ;;  %v3701_v23 = vmul.f32 %v14386_v11, %v14386_v11  ;;  %vm15889_vm12 = vmpackc.low %vm15887_vm3, %vm15888_vm6  ;;  %vm15900_vm3 = vnez %v15839_v47 }
 0x7d0   :  { %v3616_v2 = vadd.f32 %v14390_v17, %v14388_v58  ;;  %v14394_v33 = vsel %vm3079_vm14, %v3075_v13, %v3083_v9  ;;  %vm15893_vm14 = vnez %v15829_v27 }
 0x7d1   :  { %15881 = vst [vmem:[#allocation41_spill] sm:$0xff] %v14394_v33  ;;  %v3623_v29 = vadd.f32 %v14394_v33, %v14386_v11  ;;  %v3703_v31 = vmul.f32 %v14394_v33, %v14394_v33 }
 0x7d2   :  { %v3617_v52 = vrot.slane %v3616_v2, 4 }
 0x7d3   :  { %v3624_v16 = vrot.slane %v3623_v29, 4  ;;  %v3711_v49 = vadd.f32 %v3703_v31, %v3701_v23 }
 0x7d4   :  { %v3618_v59 = vadd.f32 %v3617_v52, %v3616_v2 }
 0x7d5   :  { %v3625_v30 = vadd.f32 %v3624_v16, %v3623_v29  ;;  %v3712_v62 = vrot.slane %v3711_v49, 4 }
 0x7d6   :  { %v3619_v61 = vrot.slane %v3618_v59, 2  ;;  %v15926_v60 = vld [vmem:[#allocation40_spill] sm:$0xff] }
 0x7d7   :  { %v3626_v35 = vrot.slane %v3625_v30, 2  ;;  %v3713_v48 = vadd.f32 %v3712_v62, %v3711_v49  ;;  %v4050_v62 = vld [vmem:[#allocation10 + $0x4] sm:$0xf] }
 0x7d8   :  { %v3620_v9 = vadd.f32 %v3619_v61, %v3618_v59  ;;  %v11926_v61 = vld [vmem:[#allocation12 + $0x100] ss:$8 sps:$4 sm:$0xff]  }
 0x7d9   :  { %v3627_v13 = vadd.f32 %v3626_v35, %v3625_v30  ;;  %v3714_v28 = vrot.slane %v3713_v48, 2  ;;  %v3702_v35 = vmul.f32 %v14390_v17, %v14390_v17 }
 0x7da   :  { %v3621_v10 = vrot.slane %v3620_v9, 1 }
 0x7db   :  { %v3628_v42 = vrot.slane %v3627_v13, 1  ;;  %v3715_v43 = vadd.f32 %v3714_v28, %v3713_v48  ;;  %v11952_v28 = vld [vmem:[#allocation12 + $0x184] ss:$8 sps:$4 sm:$0xff]  }
 0x7dc   :  { %v3622_v11 = vadd.f32 %v3621_v10, %v3620_v9  ;;  %v11931_v9 = vld [vmem:[#allocation12 + $0x114] ss:$8 sps:$4 sm:$0xff]   ;;  %v11947_v10 = vld [vmem:[#allocation12 + $0x170] ss:$8 sps:$4 sm:$0xff]  }
 0x7dd   :  { %v3629_v24 = vadd.f32 %v3628_v42, %v3627_v13  ;;  %v3716_v50 = vrot.slane %v3715_v43, 1  ;;  %v11929_v13 = vld [vmem:[#allocation12 + $0x110] ss:$8 sps:$4 sm:$0xff]  }
 0x7df   :  { %3694 = vmatprep.mubr.f32.mxu0 %v3629_v24  ;;  %v3717_v33 = vadd.f32 %v3716_v50, %v3715_v43  ;;  %v3700_v50 = vmul.f32 %v14388_v58, %v14388_v58 }
 0x7e0   :  { %3695 = vmatmul.mubr.f32.vlgmr.msra.gmra.mrb[32].mxu0 %v3622_v11 }
 0x7e1   :  { %11327 = vmatpush3.bf16.msk.msra.mxu0 %vm15882_vm15, %v15740_v21  ;;  %3782 = vmatprep.mubr.f32.mxu0 %v3717_v33  ;;  %v3704_v24 = vadd.f32 %v3702_v35, %v3700_v50  ;;  %vm15895_vm15 = vmpackc.low %vm15893_vm14, %vm15894_vm4  ;;  %vm15906_vm14 = vnez %v15851_v51  ;;  %v15927_v33 = vld [vmem:[#allocation41_spill] sm:$0xff]  ;;  %v11934_v35 = vld [vmem:[#allocation12 + $0x124] ss:$8 sps:$4 sm:$0xff]  }
 0x7e2   :  { %11329 = vmatprep.subr.msk.bf16.mxu0 %vm15883_vm7, %v15740_v21  ;;  %vm15896_vm7 = vnez %v15837_v1  ;;  %v11932_v50 = vld [vmem:[#allocation12 + $0x120] ss:$8 sps:$4 sm:$0xff]  }
 0x7e3   :  { %v3705_v43 = vrot.slane %v3704_v24, 4 }
 0x7e5   :  { %11331 = vmatpush3.bf16.msk.msra.mxu0 %vm15884_vm8, %v15740_v21  ;;  %v3706_v42 = vadd.f32 %v3705_v43, %v3704_v24  ;;  %vm15897_vm8 = vnez %v15835_v3  ;;  %v11937_v24 = vld [vmem:[#allocation12 + $0x134] ss:$8 sps:$4 sm:$0xff]   ;;  %v11935_v43 = vld [vmem:[#allocation12 + $0x130] ss:$8 sps:$4 sm:$0xff]  }
 0x7e6   :  { %11333 = vmatprep.subr.msk.bf16.mxu0 %vm15886_vm0, %v15740_v21  ;;  %vm15898_vm10 = vmpackc.low %vm15896_vm7, %vm15897_vm8  ;;  %vm15899_vm0 = vnez %v15841_v32  ;;  %vm15909_vm7 = vnez %v15859_v18 }
 0x7e7   :  { %vm15901_vm6 = vmpackc.low %vm15899_vm0, %vm15900_vm3  ;;  %v3707_v26 = vrot.slane %v3706_v42, 2  ;;  %vm15912_vm0 = vnez %v15863_v45  ;;  %v15917_v45 = vmov 0.0  }
 0x7e9   :  { %11335 = vmatpush3.bf16.msk.msra.mxu0 %vm15889_vm12, %v15740_v21  ;;  %vm15902_vm12 = vnez %v15849_v15  ;;  %v3708_v34 = vadd.f32 %v3707_v26, %v3706_v42  ;;  %v11940_v42 = vld [vmem:[#allocation12 + $0x144] ss:$8 sps:$4 sm:$0xff]   ;;  %v11938_v26 = vld [vmem:[#allocation12 + $0x140] ss:$8 sps:$4 sm:$0xff]  }
 0x7ea   :  { %11337 = vmatprep.subr.msk.bf16.mxu0 %vm15892_vm5, %v15740_v21  ;;  %vm15904_vm13 = vmpackc.low %vm15902_vm12, %vm15903_vm9  ;;  %vm15905_vm5 = vnez %v15853_v36  ;;  %vm15915_vm12 = vnez %v15875_v5 }
 0x7eb   :  { %vm15907_vm4 = vmpackc.low %vm15905_vm5, %vm15906_vm14  ;;  %v3709_v46 = vrot.slane %v3708_v34, 1  ;;  %vm3599_vm5 = vcmp.eq.s32.totalorder %v3579_v6, %v15789_v4 }
 0x7ec   :  { %vm15916_vm9 = vmpackc.low %vm14358_vm11, %vm15915_vm12  ;;  %vm3592_vm11 = vcmp.eq.s32.totalorder %v3572_v7, %v13322_v41  ;;  %vm15928_vm12 = vcmask 130048  }
 0x7ed   :  { %11339 = vmatpush3.bf16.msk.msra.mxu0 %vm15895_vm15, %v15740_v21  ;;  %vm15908_vm15 = vnez %v15861_v20  ;;  %v3710_v63 = vadd.f32 %v3709_v46, %v3708_v34  ;;  %v11943_v34 = vld [vmem:[#allocation12 + $0x154] ss:$8 sps:$4 sm:$0xff]   ;;  %v11941_v46 = vld [vmem:[#allocation12 + $0x150] ss:$8 sps:$4 sm:$0xff]  }
 0x7ee   :  { %11341 = vmatprep.subr.msk.bf16.mxu0 %vm15898_vm10, %v15740_v21  ;;  %vm15910_vm8 = vmpackc.low %vm15908_vm15, %vm15909_vm7  ;;  %vm15911_vm10 = vnez %v15865_v8  ;;  %vm3596_vm15 = vcmp.eq.s32.totalorder %v3572_v7, %v15788_v55  ;;  %vm3598_vm7 = vcmp.eq.s32.totalorder %v3572_v7, %v15789_v4 }
 0x7ef   :  { %vm15913_vm3 = vmpackc.low %vm15911_vm10, %vm15912_vm0 }
 0x7f0   :  { %vm14522_vm0 = vmpackc.low %vm3598_vm7, %vm3596_vm15 }
 0x7f1   :  { %11343 = vmatpush3.bf16.msk.msra.mxu0 %vm15901_vm6, %v15740_v21  ;;  %vm15914_vm6 = vmpackc.low %vm14344_vm2, %vm14339_vm1  ;;  %vm3595_vm2 = vcmp.eq.s32.totalorder %v3579_v6, %v13358_v14  ;;  %vm3597_vm1 = vcmp.eq.s32.totalorder %v3579_v6, %v15788_v55 }
 0x7f2   :  { %11345 = vmatprep.subr.msk.bf16.mxu0 %vm15904_vm13, %v15740_v21  ;;  %vm3593_vm13 = vcmp.eq.s32.totalorder %v3579_v6, %v13322_v41  ;;  %vm14515_vm10 = vmpackc.low %vm3599_vm5, %vm3597_vm1  ;;  %v11944_v6 = vld [vmem:[#allocation12 + $0x160] ss:$8 sps:$4 sm:$0xff]  }
 0x7f3   :  { %vm11356_vm14 = vmpackc.low %vm3595_vm2, %vm3593_vm13 }
 0x7f5   :  { %11347 = vmatpush3.bf16.msk.msra.mxu0 %vm15907_vm4, %v15740_v21  ;;  %vm3594_vm4 = vcmp.eq.s32.totalorder %v3572_v7, %v13358_v14  ;;  %v11949_v7 = vld [vmem:[#allocation12 + $0x174] ss:$8 sps:$4 sm:$0xff]  }
 0x7f6   :  { %11349 = vmatprep.subr.msk.bf16.mxu0 %vm15910_vm8, %v15740_v21  ;;  %vm14508_vm8 = vmpackc.low %vm3594_vm4, %vm3592_vm11 }
 0x7f9   :  { %11351 = vmatpush3.bf16.msk.msra.mxu0 %vm15913_vm3, %v15740_v21  ;;  %vm15924_vm3 = vcmask 261120  }
 0x7fa   :  { %11353 = vmatprep.subr.msk.bf16.mxu0 %vm15914_vm6, %v15740_v21  ;;  %vm15925_vm6 = vmmov %vm15924_vm3 }
 0x7fd   :  { %11355 = vmatpush3.bf16.msk.msra.mxu0 %vm15916_vm9, %v15740_v21  ;;  %vm15929_vm9 = vmmov %vm15928_vm12 }
 0x7fe   :  { %11357 = vmatprep.subr.msk.bf16.mxu0 %vm11356_vm14, %v15740_v21  ;;  %vm15930_vm13 = vmmov %vm15929_vm9 }
 0x7ff   :  { %vm15931_vm2 = vmmov %vm15929_vm9 }
 0x800   :  { %3783 = vmatmul.mubr.f32.vlgmr.msra.gmra.mrb[34].mxu0 %v3710_v63  ;;  %v11946_v63 = vld [vmem:[#allocation12 + $0x164] ss:$8 sps:$4 sm:$0xff]  }
 0x801   :  { %3862 = vmatprep.mubr.f32.mxu0 %v15917_v45  ;;  %11359 = vmatpush1.bf16.msk.msra.mxu0 %vm14508_vm8, %v15740_v21 }
 0x802   :  { %11361 = vmatprep.subr.msk.bf16.mxu0 %vm14515_vm10, %v15740_v21 }
 0x805   :  { %11363 = vmatpush1.bf16.msk.msra.mxu0 %vm14522_vm0, %v15740_v21 }
 0x806   :  { %11365 = vmatprep.subr.msk.bf16.mxu0 %vm11356_vm14, %v15740_v21 }
 0x8b3   :  { %v10917_v54 = vpop.f32.mrb[32].mxu0 }
 0x8b4   :  { %v10918_v48 = vpop.f32.mrb[33].mxu0 }
 0x8b5   :  { %v10919_v12 = vadd.f32 %v10918_v48, %v10917_v54  ;;  %v11955_v54 = vld [vmem:[#allocation12 + $0x194] ss:$8 sps:$4 sm:$0xff]   ;;  %v11953_v48 = vld [vmem:[#allocation12 + $0x190] ss:$8 sps:$4 sm:$0xff]  }
 0x8b7   :  { %v3788_v37 = vmul.f32 0.0078125, %v10919_v12  ;;  %v11958_v12 = vld [vmem:[#allocation12 + $0x1a4] ss:$8 sps:$4 sm:$0xff]  }
 0x8b9   :  { %v3790_v19 = vmul.f32 %v3788_v37, %v3788_v37 }
 0x8d3   :  { %v10952_v11 = vpop.f32.mrb[34].mxu0 }
 0x8d4   :  { %v10953_v53 = vpop.f32.mrb[35].mxu0 }
 0x8d5   :  { %v10954_v22 = vadd.f32 %v10953_v53, %v10952_v11  ;;  %v11961_v11 = vld [vmem:[#allocation12 + $0x1b4] ss:$8 sps:$4 sm:$0xff]   ;;  %v11959_v53 = vld [vmem:[#allocation12 + $0x1b0] ss:$8 sps:$4 sm:$0xff]  }
 0x8d7   :  { %v3789_v27 = vmul.f32 0.0078125, %v10954_v22  ;;  %v11964_v22 = vld [vmem:[#allocation12 + $0x1c4] ss:$8 sps:$4 sm:$0xff]  }
 0x8d9   :  { %v3791_v3 = vsub.f32 %v3789_v27, %v3790_v19  ;;  %v11962_v19 = vld [vmem:[#allocation12 + $0x1c0] ss:$8 sps:$4 sm:$0xff]   ;;  %v11967_v27 = vld [vmem:[#allocation12 + $0x1d4] ss:$8 sps:$4 sm:$0xff]  }
 0x8db   :  { %v3792_v1 = vmax.f32 %v3791_v3, 0.0  ;;  %v11965_v3 = vld [vmem:[#allocation12 + $0x1d0] ss:$8 sps:$4 sm:$0xff]  }
 0x8dd   :  { %v3793_v47 = vadd.f32 0.8, %v3792_v1  ;;  %v11970_v1 = vld [vmem:[#allocation12 + $0x1e4] ss:$8 sps:$4 sm:$0xff]  }
 0x8df   :  { %12496 = vrsqrt.f32 %v3793_v47  ;;  %v11968_v47 = vld [vmem:[#allocation12 + $0x1e0] ss:$8 sps:$4 sm:$0xff]  }
 0x8e9   :  { %v12497_v32 = vpop.eup %12496 }
 0x8ea   :  { %10014 = vmatmul.mubr.msk.f32.vlgmr.msra.gmra.mrb[36].mxu0 %vm15924_vm3, %v12497_v32  ;;  %v3869_v40 = vmul.f32 %v12497_v32, %v3788_v37  ;;  %v11956_v37 = vld [vmem:[#allocation12 + $0x1a0] ss:$8 sps:$4 sm:$0xff]   ;;  %v11973_v32 = vld [vmem:[#allocation12 + $0x1f4] ss:$8 sps:$4 sm:$0xff]  }
 0x8eb   :  { %11367 = vmatpush1.bf16.msk.msra.mxu0 %vm14508_vm8, %v15740_v21  ;;  %3937 = vmatprep.mubr.f32.mxu0 %v15917_v45 }
 0x8ec   :  { %11369 = vmatprep.subr.msk.bf16.mxu0 %vm14515_vm10, %v15740_v21 }
 0x8ef   :  { %11371 = vmatpush1.bf16.msk.msra.mxu0 %vm14522_vm0, %v15740_v21 }
 0x8f2   :  { %10023 = vmatmul.mubr.msk.f32.vlgmr.msra.gmra.mrb[38].mxu0 %vm15925_vm6, %v3869_v40  ;;  %v11971_v40 = vld [vmem:[#allocation12 + $0x1f0] ss:$8 sps:$4 sm:$0xff]  }
 0x8f3   :  { %4006 = vmatprep.mubr.bf16.mxu0 %v15779_v56 }
 0x9bd   :  { %v3864_v15 = vpop.f32.mrb[36].mxu0 }
 0x9be   :  { %v3866_v51 = vpop.f32.mrb[37].mxu0  ;;  %v3947_v36 = vrot.slane %v3864_v15, %v13781_v0  ;;  %v11976_v15 = vld [vmem:[#allocation12 + $0x4] ss:$8 sps:$4 sm:$0xff]  }
 0x9bf   :  { %v3951_v5 = vrot.slane %v3866_v51, %v13781_v0  ;;  %v4817_v51 = vld [vmem:[#allocation10 + $0xc] sm:$0xf] }
 0x9c0   :  { %v3952_v25 = vmul.f32 %v3947_v36, %v14388_v58  ;;  %v3954_v18 = vmul.f32 %v3947_v36, %v14390_v17  ;;  %v3970_v58 = vld [vmem:[#allocation10] sm:$0xf]  ;;  %v11928_v17 = vld [vmem:[#allocation12 + $0x104] ss:$8 sps:$4 sm:$0xff]  }
 0x9c1   :  { %v3953_v2 = vmul.f32 %v3951_v5, %v15926_v60  ;;  %v3955_v23 = vmul.f32 %v3951_v5, %v15927_v33 }
 0x9c5   :  { %v3939_v57 = vpop.f32.mrb[38].mxu0 }
 0x9c6   :  { %v3959_v20 = vrot.slane %v3939_v57, %v13781_v0  ;;  %v3941_v8 = vpop.f32.mrb[39].mxu0 }
 0x9c7   :  { %v3963_v29 = vrot.slane %v3941_v8, %v13781_v0 }
 0x9c8   :  { %v3964_v31 = vsub.f32 %v3952_v25, %v3959_v20  ;;  %v3966_v52 = vsub.f32 %v3954_v18, %v3959_v20 }
 0x9c9   :  { %v3965_v16 = vsub.f32 %v3953_v2, %v3963_v29  ;;  %v3967_v49 = vsub.f32 %v3955_v23, %v3963_v29  ;;  %v11974_v2 = vld [vmem:[#allocation12] ss:$8 sps:$4 sm:$0xff]   ;;  %v11979_v29 = vld [vmem:[#allocation12 + $0x14] ss:$8 sps:$4 sm:$0xff]  }
 0x9ca   :  { %v14551_v59 = vpack.c.bf16 %v3966_v52, %v3964_v31  ;;  %v11977_v52 = vld [vmem:[#allocation12 + $0x10] ss:$8 sps:$4 sm:$0xff]  }
 0x9cb   :  { %v14553_v30 = vpack.c.bf16 %v3967_v49, %v3965_v16  ;;  %v11982_v16 = vld [vmem:[#allocation12 + $0x24] ss:$8 sps:$4 sm:$0xff]   ;;  %v11980_v49 = vld [vmem:[#allocation12 + $0x20] ss:$8 sps:$4 sm:$0xff]  }
 0x9cd   :  { %3974 = vmatprep.subr.bf16.mxu0 %v14553_v30  ;;  %4821 = vmatprep.subr.bf16.mxu1 %v14553_v30 }
 0x9ce   :  { %3975 = vmatpush1.bf16.msra.mxu0 %v14551_v59  ;;  %4822 = vmatpush1.bf16.msra.mxu1 %v14551_v59 }
 0x9cf   :  { %4054 = vmatprep.subr.bf16.mxu0 %v14553_v30 }
 0x9d1   :  { %10024 = vmatmul.mubr.msk.bf16.vlgmr.msra.gmra.mrb[40].mxu0 %vm15928_vm12, %v3970_v58  ;;  %10123 = vmatmul.mubr.msk.bf16.vlgmr.msra.gmra.mrb[12].mxu1 %vm15930_vm13, %v4817_v51  ;;  %v11985_v58 = vld [vmem:[#allocation12 + $0x34] ss:$8 sps:$4 sm:$0xff]   ;;  %v12036_v51 = vld [vmem:[#allocation12 + $0x324] ss:$8 sps:$4 sm:$0xff]  }
 0x9d2   :  { %4055 = vmatpush1.bf16.msra.mxu0 %v14551_v59  ;;  %4086 = vmatprep.mubr.bf16.mxu0 %v15779_v56 }
 0x9d3   :  { %4290 = vmatprep.subr.bf16.mxu0 %v11928_v17  ;;  %v11983_v17 = vld [vmem:[#allocation12 + $0x30] ss:$8 sps:$4 sm:$0xff]  }
 0x9d9   :  { %10025 = vmatmul.mubr.msk.bf16.vlgmr.msra.gmra.mrb[44].mxu0 %vm15929_vm9, %v4050_v62  ;;  %v11988_v62 = vld [vmem:[#allocation12 + $0x44] ss:$8 sps:$4 sm:$0xff]  }
 0x9da   :  { %4291 = vmatpush1.bf16.msra.mxu0 %v11926_v61  ;;  %v11986_v61 = vld [vmem:[#allocation12 + $0x40] ss:$8 sps:$4 sm:$0xff]  }
 0x9db   :  { %4292 = vmatprep.subr.bf16.mxu0 %v11931_v9  ;;  %v11991_v9 = vld [vmem:[#allocation12 + $0x54] ss:$8 sps:$4 sm:$0xff]  }
 0x9de   :  { %4293 = vmatpush1.bf16.msra.mxu0 %v11929_v13  ;;  %v11989_v13 = vld [vmem:[#allocation12 + $0x50] ss:$8 sps:$4 sm:$0xff]  }
 0x9df   :  { %4294 = vmatprep.subr.bf16.mxu0 %v11934_v35  ;;  %v11994_v35 = vld [vmem:[#allocation12 + $0x64] ss:$8 sps:$4 sm:$0xff]  }
 0x9e2   :  { %4295 = vmatpush1.bf16.msra.mxu0 %v11932_v50  ;;  %v11992_v50 = vld [vmem:[#allocation12 + $0x60] ss:$8 sps:$4 sm:$0xff]  }
 0x9e3   :  { %4296 = vmatprep.subr.bf16.mxu0 %v11937_v24  ;;  %v11997_v24 = vld [vmem:[#allocation12 + $0x74] ss:$8 sps:$4 sm:$0xff]  }
 0x9e6   :  { %4297 = vmatpush1.bf16.msra.mxu0 %v11935_v43  ;;  %v11995_v43 = vld [vmem:[#allocation12 + $0x70] ss:$8 sps:$4 sm:$0xff]  }
 0x9e7   :  { %4298 = vmatprep.subr.bf16.mxu0 %v11940_v42  ;;  %v12000_v42 = vld [vmem:[#allocation12 + $0x84] ss:$8 sps:$4 sm:$0xff]  }
 0x9ea   :  { %4299 = vmatpush1.bf16.msra.mxu0 %v11938_v26  ;;  %v11998_v26 = vld [vmem:[#allocation12 + $0x80] ss:$8 sps:$4 sm:$0xff]  }
 0x9eb   :  { %4300 = vmatprep.subr.bf16.mxu0 %v11943_v34  ;;  %v12003_v34 = vld [vmem:[#allocation12 + $0x94] ss:$8 sps:$4 sm:$0xff]  }
 0x9ee   :  { %4301 = vmatpush1.bf16.msra.mxu0 %v11941_v46  ;;  %v12001_v46 = vld [vmem:[#allocation12 + $0x90] ss:$8 sps:$4 sm:$0xff]  }
 0x9ef   :  { %4302 = vmatprep.subr.bf16.mxu0 %v11946_v63  ;;  %v12006_v63 = vld [vmem:[#allocation12 + $0xa4] ss:$8 sps:$4 sm:$0xff]  }
 0x9f2   :  { %4303 = vmatpush1.bf16.msra.mxu0 %v11944_v6  ;;  %v12004_v6 = vld [vmem:[#allocation12 + $0xa0] ss:$8 sps:$4 sm:$0xff]  }
 0x9f3   :  { %4304 = vmatprep.subr.bf16.mxu0 %v11949_v7  ;;  %v12009_v7 = vld [vmem:[#allocation12 + $0xb4] ss:$8 sps:$4 sm:$0xff]  }
 0x9f6   :  { %4305 = vmatpush1.bf16.msra.mxu0 %v11947_v10  ;;  %v12007_v10 = vld [vmem:[#allocation12 + $0xb0] ss:$8 sps:$4 sm:$0xff]  }
 0x9f7   :  { %4306 = vmatprep.subr.bf16.mxu0 %v11952_v28  ;;  %v12012_v28 = vld [vmem:[#allocation12 + $0xc4] ss:$8 sps:$4 sm:$0xff]  }
 0x9fa   :  { %4307 = vmatpush1.bf16.msra.mxu0 %v11950_v38  ;;  %v12010_v38 = vld [vmem:[#allocation12 + $0xc0] ss:$8 sps:$4 sm:$0xff]  }
 0x9fb   :  { %4308 = vmatprep.subr.bf16.mxu0 %v11955_v54  ;;  %v12015_v54 = vld [vmem:[#allocation12 + $0xd4] ss:$8 sps:$4 sm:$0xff]  }
 0x9fe   :  { %4309 = vmatpush1.bf16.msra.mxu0 %v11953_v48  ;;  %v12013_v48 = vld [vmem:[#allocation12 + $0xd0] ss:$8 sps:$4 sm:$0xff]  }
 0x9ff   :  { %4310 = vmatprep.subr.bf16.mxu0 %v11958_v12  ;;  %v12018_v12 = vld [vmem:[#allocation12 + $0xe4] ss:$8 sps:$4 sm:$0xff]  }
 0xa02   :  { %4311 = vmatpush1.bf16.msra.mxu0 %v11956_v37  ;;  %v12016_v37 = vld [vmem:[#allocation12 + $0xe0] ss:$8 sps:$4 sm:$0xff]  }
 0xa03   :  { %4312 = vmatprep.subr.bf16.mxu0 %v11961_v11  ;;  %v12021_v11 = vld [vmem:[#allocation12 + $0xf4] ss:$8 sps:$4 sm:$0xff]  }
 0xa06   :  { %4313 = vmatpush1.bf16.msra.mxu0 %v11959_v53  ;;  %v12019_v53 = vld [vmem:[#allocation12 + $0xf0] ss:$8 sps:$4 sm:$0xff]  }
 0xa07   :  { %4314 = vmatprep.subr.bf16.mxu0 %v11964_v22 }
 0xa0a   :  { %4315 = vmatpush1.bf16.msra.mxu0 %v11962_v19  ;;  %v4533_v19 = vld [vmem:[#allocation10 + $0x8] sm:$0xf] }
 0xa0b   :  { %4316 = vmatprep.subr.bf16.mxu0 %v11967_v27  ;;  %v12022_v27 = vld [vmem:[#allocation12 + $0x300] ss:$8 sps:$4 sm:$0xff]  }
 0xa0e   :  { %4317 = vmatpush1.bf16.msra.mxu0 %v11965_v3  ;;  %v12024_v3 = vld [vmem:[#allocation12 + $0x304] ss:$8 sps:$4 sm:$0xff]  }
 0xa0f   :  { %4318 = vmatprep.subr.bf16.mxu0 %v11970_v1  ;;  %v12025_v1 = vld [vmem:[#allocation12 + $0x200] ss:$8 sps:$4 sm:$0xff]   ;;  %5057 = vmatprep.subr.bf16.mxu1 %v12024_v3  ;;  %v12103_v3 = vld [vmem:[#allocation12 + $0x2d0] ss:$8 sps:$4 sm:$0xff]  }
 0xa10   :  { %5058 = vmatpush1.bf16.msra.mxu1 %v12022_v27  ;;  %v12105_v27 = vld [vmem:[#allocation12 + $0x2d4] ss:$8 sps:$4 sm:$0xff]  }
 0xa12   :  { %4319 = vmatpush1.bf16.msra.mxu0 %v11968_v47  ;;  %v12027_v47 = vld [vmem:[#allocation12 + $0x204] ss:$8 sps:$4 sm:$0xff]  }
 0xa13   :  { %4320 = vmatprep.subr.bf16.mxu0 %v11973_v32  ;;  %v12030_v32 = vld [vmem:[#allocation12 + $0x314] ss:$8 sps:$4 sm:$0xff]  }
 0xa14   :  { %5059 = vmatprep.subr.bf16.mxu1 %v12030_v32  ;;  %v12109_v32 = vld [vmem:[#allocation12 + $0x2e0] ss:$8 sps:$4 sm:$0xff]  }
 0xa16   :  { %4321 = vmatpush1.bf16.msra.mxu0 %v11971_v40  ;;  %v12033_v40 = vld [vmem:[#allocation12 + $0x214] ss:$8 sps:$4 sm:$0xff]  }
 0xa17   :  { %4491 = vmatprep.subr.bf16.mxu0 %v11976_v15  ;;  %v12028_v15 = vld [vmem:[#allocation12 + $0x310] ss:$8 sps:$4 sm:$0xff]  }
 0xa18   :  { %5060 = vmatpush1.bf16.msra.mxu1 %v12028_v15 }
 0xa19   :  { %5061 = vmatprep.subr.bf16.mxu1 %v12036_v51  ;;  %v12112_v51 = vld [vmem:[#allocation12 + $0x3f0] ss:$8 sps:$4 sm:$0xff]  }
 0xaa4   :  { %v14565_v36 = vpop.f32.mrb[40].mxu0  ;;  %v4855_v15 = vpop.f32.mrb[12].mxu1 }
 0xaa5   :  { %v4010_v5 = vpop.f32.mrb[41].mxu0  ;;  %v4015_v22 = vpack.c.bf16 %v14565_v36, %v14565_v36  ;;  %v12034_v36 = vld [vmem:[#allocation12 + $0x320] ss:$8 sps:$4 sm:$0xff]  }
 0xaa6   :  { %v4012_v57 = vpop.f32.mrb[42].mxu0  ;;  %v4016_v31 = vpack.c.bf16 %v4010_v5, %v4010_v5  ;;  %v12037_v5 = vld [vmem:[#allocation12 + $0x220] ss:$8 sps:$4 sm:$0xff]   ;;  %5062 = vmatpush1.bf16.msra.mxu1 %v12034_v36 }
 0xaa7   :  { %v4013_v25 = vpop.f32.mrb[43].mxu0  ;;  %v12042_v57 = vld [vmem:[#allocation12 + $0x334] ss:$8 sps:$4 sm:$0xff]  }
 0xaa8   :  { %v12045_v25 = vld [vmem:[#allocation12 + $0x234] ss:$8 sps:$4 sm:$0xff]   ;;  %5063 = vmatprep.subr.bf16.mxu1 %v12042_v57  ;;  %v4862_v57 = vpack.c.bf16 %v4855_v15, %v4855_v15 }
 0xaac   :  { %v4088_v18 = vpop.f32.mrb[44].mxu0 }
 0xaad   :  { %v4090_v20 = vpop.f32.mrb[45].mxu0  ;;  %v4095_v33 = vpack.c.bf16 %v4088_v18, %v4088_v18  ;;  %v12040_v18 = vld [vmem:[#allocation12 + $0x330] ss:$8 sps:$4 sm:$0xff]  }
 0xaae   :  { %v4096_v8 = vpack.c.bf16 %v4090_v20, %v4090_v20  ;;  %v4092_v60 = vpop.f32.mrb[46].mxu0  ;;  %v12043_v20 = vld [vmem:[#allocation12 + $0x230] ss:$8 sps:$4 sm:$0xff]   ;;  %5064 = vmatpush1.bf16.msra.mxu1 %v12040_v18  ;;  %v12117_v18 = vld [vmem:[#allocation12 + $0x2f4] ss:$8 sps:$4 sm:$0xff]  }
 0xaaf   :  { %v4093_v23 = vpop.f32.mrb[47].mxu0  ;;  %v12051_v60 = vld [vmem:[#allocation12 + $0x244] ss:$8 sps:$4 sm:$0xff]  }
 0xab0   :  { %4322 = vmatprep.mubr.bf16.mxu0 %v4096_v8  ;;  %v12048_v8 = vld [vmem:[#allocation12 + $0x344] ss:$8 sps:$4 sm:$0xff]   ;;  %v12054_v23 = vld [vmem:[#allocation12 + $0x354] ss:$8 sps:$4 sm:$0xff]  }
 0xab1   :  { %4323 = vmatmul.mubr.bf16.vlgmr.msra.gmra.mrb[48].mxu0 %v4095_v33  ;;  %5065 = vmatprep.subr.bf16.mxu1 %v12048_v8  ;;  %v12049_v33 = vld [vmem:[#allocation12 + $0x240] ss:$8 sps:$4 sm:$0xff]   ;;  %v15932_v8 = vld [vmem:[#allocation36_spill] sm:$0xff] }
 0xab2   :  { %4492 = vmatpush1.bf16.msra.mxu0 %v11974_v2  ;;  %4523 = vmatprep.mubr.bf16.mxu0 %v4016_v31  ;;  %v12046_v2 = vld [vmem:[#allocation12 + $0x340] ss:$8 sps:$4 sm:$0xff]   ;;  %v12052_v31 = vld [vmem:[#allocation12 + $0x350] ss:$8 sps:$4 sm:$0xff]  }
 0xab3   :  { %4493 = vmatprep.subr.bf16.mxu0 %v11979_v29  ;;  %v12057_v29 = vld [vmem:[#allocation12 + $0x254] ss:$8 sps:$4 sm:$0xff]   ;;  %5066 = vmatpush1.bf16.msra.mxu1 %v12046_v2 }
 0xab4   :  { %5067 = vmatprep.subr.bf16.mxu1 %v12054_v23  ;;  %v15933_v2 = vld [vmem:[#allocation37_spill] sm:$0xff]  ;;  %v5124_v23 = vand.u32 63, %v13322_v41 }
 0xab6   :  { %4494 = vmatpush1.bf16.msra.mxu0 %v11977_v52  ;;  %v12055_v52 = vld [vmem:[#allocation12 + $0x250] ss:$8 sps:$4 sm:$0xff]   ;;  %vm14582_vm14 = vcmp.eq.s32.totalorder %v5124_v23, %v13330_v44  ;;  %v15957_v23 = vld [vmem:[#allocation51_spill] sm:$0xff] }
 0xab7   :  { %4495 = vmatprep.subr.bf16.mxu0 %v11982_v16  ;;  %v12060_v16 = vld [vmem:[#allocation12 + $0x364] ss:$8 sps:$4 sm:$0xff]   ;;  %5068 = vmatpush1.bf16.msra.mxu1 %v12052_v31 }
 0xab8   :  { %5069 = vmatprep.subr.bf16.mxu1 %v12060_v16  ;;  %v15934_v31 = vld [vmem:[#allocation38_spill] sm:$0xff]  ;;  %v15935_v16 = vld [vmem:[#allocation39_spill] sm:$0xff] }
 0xaba   :  { %4496 = vmatpush1.bf16.msra.mxu0 %v11980_v49  ;;  %v12063_v49 = vld [vmem:[#allocation12 + $0x264] ss:$8 sps:$4 sm:$0xff]  }
 0xabb   :  { %4497 = vmatprep.subr.bf16.mxu0 %v11985_v58  ;;  %v12058_v58 = vld [vmem:[#allocation12 + $0x360] ss:$8 sps:$4 sm:$0xff]  }
 0xabc   :  { %5070 = vmatpush1.bf16.msra.mxu1 %v12058_v58  ;;  %v15959_v58 = vld [vmem:[#allocation53_spill] sm:$0xff] }
 0xabe   :  { %4498 = vmatpush1.bf16.msra.mxu0 %v11983_v17  ;;  %v12061_v17 = vld [vmem:[#allocation12 + $0x260] ss:$8 sps:$4 sm:$0xff]  }
 0xabf   :  { %4499 = vmatprep.subr.bf16.mxu0 %v11988_v62  ;;  %v12066_v62 = vld [vmem:[#allocation12 + $0x374] ss:$8 sps:$4 sm:$0xff]  }
 0xac0   :  { %5071 = vmatprep.subr.bf16.mxu1 %v12066_v62  ;;  %v15960_v62 = vld [vmem:[#allocation54_spill] sm:$0xff] }
 0xac2   :  { %4500 = vmatpush1.bf16.msra.mxu0 %v11986_v61  ;;  %v12069_v61 = vld [vmem:[#allocation12 + $0x274] ss:$8 sps:$4 sm:$0xff]  }
 0xac3   :  { %4501 = vmatprep.subr.bf16.mxu0 %v11991_v9  ;;  %v12064_v9 = vld [vmem:[#allocation12 + $0x370] ss:$8 sps:$4 sm:$0xff]  }
 0xac4   :  { %5072 = vmatpush1.bf16.msra.mxu1 %v12064_v9 }
 0xac6   :  { %4502 = vmatpush1.bf16.msra.mxu0 %v11989_v13  ;;  %v12067_v13 = vld [vmem:[#allocation12 + $0x270] ss:$8 sps:$4 sm:$0xff]  }
 0xac7   :  { %4503 = vmatprep.subr.bf16.mxu0 %v11994_v35  ;;  %v12072_v35 = vld [vmem:[#allocation12 + $0x384] ss:$8 sps:$4 sm:$0xff]  }
 0xac8   :  { %5073 = vmatprep.subr.bf16.mxu1 %v12072_v35 }
 0xaca   :  { %4504 = vmatpush1.bf16.msra.mxu0 %v11992_v50  ;;  %v12075_v50 = vld [vmem:[#allocation12 + $0x284] ss:$8 sps:$4 sm:$0xff]  }
 0xacb   :  { %4505 = vmatprep.subr.bf16.mxu0 %v11997_v24  ;;  %v12070_v24 = vld [vmem:[#allocation12 + $0x380] ss:$8 sps:$4 sm:$0xff]  }
 0xacc   :  { %5074 = vmatpush1.bf16.msra.mxu1 %v12070_v24  ;;  %v5138_v24 = vand.u32 63, %v15788_v55 }
 0xace   :  { %4506 = vmatpush1.bf16.msra.mxu0 %v11995_v43  ;;  %v12073_v43 = vld [vmem:[#allocation12 + $0x280] ss:$8 sps:$4 sm:$0xff]   ;;  %vm14626_vm0 = vcmp.eq.s32.totalorder %v5138_v24, %v13330_v44  ;;  %v15963_v24 = vld [vmem:[#allocation57_spill] sm:$0xff] }
 0xacf   :  { %4507 = vmatprep.subr.bf16.mxu0 %v12000_v42  ;;  %v12078_v42 = vld [vmem:[#allocation12 + $0x394] ss:$8 sps:$4 sm:$0xff]  }
 0xad0   :  { %5075 = vmatprep.subr.bf16.mxu1 %v12078_v42  ;;  %v15964_v42 = vld [vmem:[#allocation58_spill] sm:$0xff] }
 0xad2   :  { %4508 = vmatpush1.bf16.msra.mxu0 %v11998_v26  ;;  %v12081_v26 = vld [vmem:[#allocation12 + $0x294] ss:$8 sps:$4 sm:$0xff]  }
 0xad3   :  { %4509 = vmatprep.subr.bf16.mxu0 %v12003_v34  ;;  %v12076_v34 = vld [vmem:[#allocation12 + $0x390] ss:$8 sps:$4 sm:$0xff]  }
 0xad4   :  { %5076 = vmatpush1.bf16.msra.mxu1 %v12076_v34 }
 0xad6   :  { %4510 = vmatpush1.bf16.msra.mxu0 %v12001_v46  ;;  %v12079_v46 = vld [vmem:[#allocation12 + $0x290] ss:$8 sps:$4 sm:$0xff]  }
 0xad7   :  { %4511 = vmatprep.subr.bf16.mxu0 %v12006_v63  ;;  %v12084_v63 = vld [vmem:[#allocation12 + $0x3a4] ss:$8 sps:$4 sm:$0xff]  }
 0xad8   :  { %5077 = vmatprep.subr.bf16.mxu1 %v12084_v63 }
 0xada   :  { %4512 = vmatpush1.bf16.msra.mxu0 %v12004_v6  ;;  %v12087_v6 = vld [vmem:[#allocation12 + $0x2a4] ss:$8 sps:$4 sm:$0xff]  }
 0xadb   :  { %4513 = vmatprep.subr.bf16.mxu0 %v12009_v7  ;;  %v12082_v7 = vld [vmem:[#allocation12 + $0x3a0] ss:$8 sps:$4 sm:$0xff]  }
 0xadc   :  { %5078 = vmatpush1.bf16.msra.mxu1 %v12082_v7 }
 0xade   :  { %4514 = vmatpush1.bf16.msra.mxu0 %v12007_v10  ;;  %v12085_v10 = vld [vmem:[#allocation12 + $0x2a0] ss:$8 sps:$4 sm:$0xff]  }
 0xadf   :  { %4515 = vmatprep.subr.bf16.mxu0 %v12012_v28  ;;  %v12090_v28 = vld [vmem:[#allocation12 + $0x3b4] ss:$8 sps:$4 sm:$0xff]  }
 0xae0   :  { %5079 = vmatprep.subr.bf16.mxu1 %v12090_v28 }
 0xae2   :  { %4516 = vmatpush1.bf16.msra.mxu0 %v12010_v38  ;;  %v12093_v38 = vld [vmem:[#allocation12 + $0x2b4] ss:$8 sps:$4 sm:$0xff]  }
 0xae3   :  { %4517 = vmatprep.subr.bf16.mxu0 %v12015_v54  ;;  %v12088_v54 = vld [vmem:[#allocation12 + $0x3b0] ss:$8 sps:$4 sm:$0xff]  }
 0xae4   :  { %5080 = vmatpush1.bf16.msra.mxu1 %v12088_v54 }
 0xae6   :  { %4518 = vmatpush1.bf16.msra.mxu0 %v12013_v48  ;;  %v12091_v48 = vld [vmem:[#allocation12 + $0x2b0] ss:$8 sps:$4 sm:$0xff]  }
 0xae7   :  { %4519 = vmatprep.subr.bf16.mxu0 %v12018_v12  ;;  %v12096_v12 = vld [vmem:[#allocation12 + $0x3c4] ss:$8 sps:$4 sm:$0xff]  }
 0xae8   :  { %5081 = vmatprep.subr.bf16.mxu1 %v12096_v12 }
 0xaea   :  { %4520 = vmatpush1.bf16.msra.mxu0 %v12016_v37  ;;  %v12099_v37 = vld [vmem:[#allocation12 + $0x2c4] ss:$8 sps:$4 sm:$0xff]  }
 0xaeb   :  { %4521 = vmatprep.subr.bf16.mxu0 %v12021_v11  ;;  %v12094_v11 = vld [vmem:[#allocation12 + $0x3c0] ss:$8 sps:$4 sm:$0xff]  }
 0xaec   :  { %5082 = vmatpush1.bf16.msra.mxu1 %v12094_v11  ;;  %v15948_v11 = vld [vmem:[#allocation42_spill] sm:$0xff] }
 0xaee   :  { %4522 = vmatpush1.bf16.msra.mxu0 %v12019_v53  ;;  %v12097_v53 = vld [vmem:[#allocation12 + $0x2c0] ss:$8 sps:$4 sm:$0xff]  }
 0xaef   :  { %4537 = vmatprep.subr.bf16.mxu0 %v14553_v30  ;;  %v12031_v30 = vld [vmem:[#allocation12 + $0x210] ss:$8 sps:$4 sm:$0xff]  }
 0xaf1   :  { %4524 = vmatmul.mubr.bf16.vlgmr.msra.gmra.mrb[52].mxu0 %v4015_v22  ;;  %v12102_v22 = vld [vmem:[#allocation12 + $0x3d4] ss:$8 sps:$4 sm:$0xff]  }
 0xaf2   :  { %4538 = vmatpush1.bf16.msra.mxu0 %v14551_v59  ;;  %4569 = vmatprep.mubr.bf16.mxu0 %v15779_v56  ;;  %v12039_v59 = vld [vmem:[#allocation12 + $0x224] ss:$8 sps:$4 sm:$0xff]  }
 0xaf3   :  { %4773 = vmatprep.subr.bf16.mxu0 %v12027_v47  ;;  %5083 = vmatprep.subr.bf16.mxu1 %v12102_v22  ;;  %v12106_v47 = vld [vmem:[#allocation12 + $0x3e0] ss:$8 sps:$4 sm:$0xff]  }
 0xaf4   :  { %v15949_v22 = vld [vmem:[#allocation43_spill] sm:$0xff] }
 0xaf9   :  { %10090 = vmatmul.mubr.msk.bf16.vlgmr.msra.gmra.mrb[56].mxu0 %vm15931_vm2, %v4533_v19  ;;  %v12100_v19 = vld [vmem:[#allocation12 + $0x3d0] ss:$8 sps:$4 sm:$0xff]  }
 0xafa   :  { %4774 = vmatpush1.bf16.msra.mxu0 %v12025_v1  ;;  %5084 = vmatpush1.bf16.msra.mxu1 %v12100_v19  ;;  %v12108_v1 = vld [vmem:[#allocation12 + $0x3e4] ss:$8 sps:$4 sm:$0xff]   ;;  %v5271_v19 = vand.u32 63, %v15949_v22 }
 0xafb   :  { %4775 = vmatprep.subr.bf16.mxu0 %v12033_v40  ;;  %5085 = vmatprep.subr.bf16.mxu1 %v12108_v1  ;;  %v12111_v40 = vld [vmem:[#allocation12 + $0x2e4] ss:$8 sps:$4 sm:$0xff]  }
 0xafc   :  { %vm5525_vm9 = vcmp.eq.s32.totalorder %v5271_v19, %v13330_v44 }
 0xafe   :  { %4776 = vmatpush1.bf16.msra.mxu0 %v12031_v30  ;;  %5086 = vmatpush1.bf16.msra.mxu1 %v12106_v47  ;;  %v4857_v30 = vpop.f32.mrb[13].mxu1  ;;  %v15951_v47 = vld [vmem:[#allocation45_spill] sm:$0xff] }
 0xaff   :  { %4777 = vmatprep.subr.bf16.mxu0 %v12039_v59  ;;  %v12114_v59 = vld [vmem:[#allocation12 + $0x3f4] ss:$8 sps:$4 sm:$0xff]   ;;  %v4863_v36 = vpack.c.bf16 %v4857_v30, %v4857_v30 }
 0xb00   :  { %5087 = vmatprep.subr.bf16.mxu1 %v12114_v59 }
 0xb01   :  { %5089 = vmatprep.mubr.bf16.mxu1 %v4863_v36  ;;  %v15953_v36 = vld [vmem:[#allocation47_spill] sm:$0xff] }
 0xb02   :  { %4778 = vmatpush1.bf16.msra.mxu0 %v12037_v5  ;;  %v4859_v5 = vpop.f32.mrb[14].mxu1  ;;  %5088 = vmatpush1.bf16.msra.mxu1 %v12112_v51  ;;  %v15952_v51 = vld [vmem:[#allocation46_spill] sm:$0xff] }
 0xb03   :  { %4779 = vmatprep.subr.bf16.mxu0 %v12045_v25  ;;  %v4860_v25 = vpop.f32.mrb[15].mxu1  ;;  %v5278_v59 = vand.u32 63, %v15952_v51  ;;  %v5285_v5 = vand.u32 63, %v15953_v36 }
 0xb05   :  { %5090 = vmatmul.mubr.bf16.vlgmr.msra.gmra.mrb[16].mxu1 %v4862_v57  ;;  %v15954_v57 = vld [vmem:[#allocation48_spill] sm:$0xff] }
 0xb06   :  { %4780 = vmatpush1.bf16.msra.mxu0 %v12043_v20  ;;  %v12115_v20 = vld [vmem:[#allocation12 + $0x2f0] ss:$8 sps:$4 sm:$0xff]   ;;  %v5166_v25 = vand.u32 63, %v15954_v57 }
 0xb07   :  { %4781 = vmatprep.subr.bf16.mxu0 %v12051_v60  ;;  %v5236_v60 = vand.u32 63, %v15932_v8 }
 0xb09   :  { %vm5520_vm1 = vcmp.eq.s32.totalorder %v5236_v60, %v13330_v44  ;;  %v15956_v60 = vld [vmem:[#allocation50_spill] sm:$0xff] }
 0xb0a   :  { %4782 = vmatpush1.bf16.msra.mxu0 %v12049_v33  ;;  %v5243_v33 = vand.u32 63, %v15933_v2 }
 0xb0b   :  { %4783 = vmatprep.subr.bf16.mxu0 %v12057_v29  ;;  %v5131_v29 = vand.u32 63, %v13358_v14 }
 0xb0c   :  { %vm5521_vm5 = vcmp.eq.s32.totalorder %v5243_v33, %v13330_v44  ;;  %v5292_v33 = vand.u32 63, %v15956_v60 }
 0xb0d   :  { %vm14587_vm11 = vcmp.eq.s32.totalorder %v5131_v29, %v13330_v44  ;;  %vm11372_vm4 = vmpackc.low %vm5521_vm5, %vm5520_vm1  ;;  %v5299_v29 = vand.u32 63, %v15957_v23 }
 0xb0e   :  { %4784 = vmatpush1.bf16.msra.mxu0 %v12055_v52  ;;  %v5250_v52 = vand.u32 63, %v15934_v31  ;;  %vm11374_vm8 = vmpackc.low %vm14587_vm11, %vm14582_vm14  ;;  %11405 = vmatprep.subr.msk.bf16.mxu1 %vm11372_vm4, %v15740_v21  ;;  %vm5526_vm14 = vcmp.eq.s32.totalorder %v5278_v59, %v13330_v44  ;;  %vm5527_vm11 = vcmp.eq.s32.totalorder %v5285_v5, %v13330_v44 }
 0xb0f   :  { %4785 = vmatprep.subr.bf16.mxu0 %v12063_v49  ;;  %v5257_v49 = vand.u32 63, %v15935_v16  ;;  %11407 = vmatpush3.bf16.msk.msra.mxu1 %vm11374_vm8, %v15740_v21 }
 0xb10   :  { %vm14592_vm15 = vcmp.eq.s32.totalorder %v5250_v52, %v13330_v44  ;;  %v15958_v52 = vld [vmem:[#allocation52_spill] sm:$0xff] }
 0xb11   :  { %vm14597_vm7 = vcmp.eq.s32.totalorder %v5257_v49, %v13330_v44  ;;  %v5180_v49 = vand.u32 63, %v15958_v52 }
 0xb12   :  { %4786 = vmatpush1.bf16.msra.mxu0 %v12061_v17  ;;  %vm11376_vm10 = vmpackc.low %vm14597_vm7, %vm14592_vm15  ;;  %vm5510_vm15 = vcmp.eq.s32.totalorder %v5166_v25, %v13330_v44  ;;  %v5187_v17 = vand.u32 63, %v15959_v58 }
 0xb13   :  { %4787 = vmatprep.subr.bf16.mxu0 %v12069_v61  ;;  %11409 = vmatprep.subr.msk.bf16.mxu1 %vm11376_vm10, %v15740_v21  ;;  %v5306_v61 = vand.u32 63, %v15960_v62 }
 0xb16   :  { %4788 = vmatpush1.bf16.msra.mxu0 %v12067_v13 }
 0xb17   :  { %4789 = vmatprep.subr.bf16.mxu0 %v12075_v50 }
 0xb1a   :  { %4790 = vmatpush1.bf16.msra.mxu0 %v12073_v43  ;;  %v5145_v43 = vand.u32 63, %v15789_v4 }
 0xb1b   :  { %4791 = vmatprep.subr.bf16.mxu0 %v12081_v26  ;;  %v5320_v26 = vand.u32 63, %v15964_v42 }
 0xb1c   :  { %vm14631_vm3 = vcmp.eq.s32.totalorder %v5145_v43, %v13330_v44  ;;  %v5201_v43 = vand.u32 63, %v15963_v24 }
 0xb1d   :  { %vm11378_vm6 = vmpackc.low %vm14631_vm3, %vm14626_vm0  ;;  %vm5529_vm0 = vcmp.eq.s32.totalorder %v5299_v29, %v13330_v44 }
 0xb1e   :  { %4792 = vmatpush1.bf16.msra.mxu0 %v12079_v46  ;;  %11411 = vmatpush3.bf16.msk.msra.mxu1 %vm11378_vm6, %v15740_v21 }
 0xb1f   :  { %4793 = vmatprep.subr.bf16.mxu0 %v12087_v6 }
 0xb22   :  { %4794 = vmatpush1.bf16.msra.mxu0 %v12085_v10 }
 0xb23   :  { %4795 = vmatprep.subr.bf16.mxu0 %v12093_v38 }
 0xb26   :  { %4796 = vmatpush1.bf16.msra.mxu0 %v12091_v48 }
 0xb27   :  { %4797 = vmatprep.subr.bf16.mxu0 %v12099_v37 }
 0xb2a   :  { %4798 = vmatpush1.bf16.msra.mxu0 %v12097_v53  ;;  %v5264_v53 = vand.u32 63, %v15948_v11 }
 0xb2b   :  { %4799 = vmatprep.subr.bf16.mxu0 %v12105_v27 }
 0xb2c   :  { %vm5524_vm12 = vcmp.eq.s32.totalorder %v5264_v53, %v13330_v44  ;;  %v15970_v53 = vld [vmem:[#allocation64_spill] sm:$0xff] }
 0xb2d   :  { %vm11380_vm13 = vmpackc.low %vm5525_vm9, %vm5524_vm12  ;;  %vm5513_vm12 = vcmp.eq.s32.totalorder %v5187_v17, %v13330_v44  ;;  %v5222_v19 = vand.u32 63, %v15970_v53 }
 0xb2e   :  { %4800 = vmatpush1.bf16.msra.mxu0 %v12103_v3  ;;  %v15950_v3 = vld [vmem:[#allocation44_spill] sm:$0xff]  ;;  %11413 = vmatprep.subr.msk.bf16.mxu1 %vm11380_vm13, %v15740_v21 }
 0xb2f   :  { %4801 = vmatprep.subr.bf16.mxu0 %v12111_v40  ;;  %v5152_v1 = vand.u32 63, %v15950_v3 }
 0xb31   :  { %vm5508_vm2 = vcmp.eq.s32.totalorder %v5152_v1, %v13330_v44  ;;  %v15971_v1 = vld [vmem:[#allocation65_spill] sm:$0xff] }
 0xb32   :  { %4802 = vmatpush1.bf16.msra.mxu0 %v12109_v32  ;;  %v5159_v32 = vand.u32 63, %v15951_v47 }
 0xb33   :  { %4803 = vmatprep.subr.bf16.mxu0 %v12117_v18  ;;  %v15955_v18 = vld [vmem:[#allocation49_spill] sm:$0xff] }
 0xb34   :  { %vm5509_vm1 = vcmp.eq.s32.totalorder %v5159_v32, %v13330_v44  ;;  %v5229_v32 = vand.u32 63, %v15971_v1 }
 0xb35   :  { %vm11382_vm5 = vmpackc.low %vm5509_vm1, %vm5508_vm2 }
 0xb36   :  { %4804 = vmatpush1.bf16.msra.mxu0 %v12115_v20  ;;  %11415 = vmatpush3.bf16.msk.msra.mxu1 %vm11382_vm5, %v15740_v21  ;;  %v5173_v20 = vand.u32 63, %v15955_v18 }
 0xb37   :  { %11373 = vmatprep.subr.msk.bf16.mxu0 %vm11372_vm4, %v15740_v21  ;;  %vm11384_vm4 = vmpackc.low %vm5527_vm11, %vm5526_vm14  ;;  %vm5515_vm14 = vcmp.eq.s32.totalorder %v5201_v43, %v13330_v44 }
 0xb38   :  { %vm5511_vm7 = vcmp.eq.s32.totalorder %v5173_v20, %v13330_v44  ;;  %11417 = vmatprep.subr.msk.bf16.mxu1 %vm11384_vm4, %v15740_v21 }
 0xb84   :  { %v4324_v9 = vpop.f32.mrb[48].mxu0 }
 0xb85   :  { %v4326_v13 = vpop.f32.mrb[49].mxu0 }
 0xb86   :  { %v4328_v35 = vpop.f32.mrb[50].mxu0 }
 0xb87   :  { %v4329_v50 = vpop.f32.mrb[51].mxu0  ;;  %v15962_v35 = vld [vmem:[#allocation56_spill] sm:$0xff] }
 0xb88   :  { %v5194_v50 = vand.u32 63, %v15962_v35 }
 0xbc4   :  { %v4525_v34 = vpop.f32.mrb[52].mxu0 }
 0xbc5   :  { %v14645_v46 = vadd.f32 %v4525_v34, %v4324_v9  ;;  %v4527_v63 = vpop.f32.mrb[53].mxu0  ;;  %v15961_v9 = vld [vmem:[#allocation55_spill] sm:$0xff] }
 0xbc6   :  { %v14647_v6 = vadd.f32 %v4527_v63, %v4326_v13  ;;  %v4529_v7 = vpop.f32.mrb[54].mxu0  ;;  %v5313_v13 = vand.u32 63, %v15961_v9  ;;  %v15965_v34 = vld [vmem:[#allocation59_spill] sm:$0xff] }
 0xbc7   :  { %v4530_v10 = vpop.f32.mrb[55].mxu0  ;;  %v5327_v63 = vand.u32 63, %v15965_v34  ;;  %v15966_v7 = vld [vmem:[#allocation60_spill] sm:$0xff] }
 0xbc8   :  { %vm5531_vm2 = vcmp.eq.s32.totalorder %v5313_v13, %v13330_v44  ;;  %v5208_v10 = vand.u32 63, %v15966_v7 }
 0xbcc   :  { %v4571_v28 = vpop.f32.mrb[56].mxu0 }
 0xbcd   :  { %v4573_v38 = vpop.f32.mrb[57].mxu0  ;;  %v4578_v12 = vpack.c.bf16 %v4571_v28, %v4571_v28  ;;  %v15967_v28 = vld [vmem:[#allocation61_spill] sm:$0xff] }
 0xbce   :  { %v4579_v54 = vpack.c.bf16 %v4573_v38, %v4573_v38  ;;  %v4575_v48 = vpop.f32.mrb[58].mxu0  ;;  %v5215_v38 = vand.u32 63, %v15967_v28 }
 0xbcf   :  { %v4576_v37 = vpop.f32.mrb[59].mxu0 }
 0xbd0   :  { %4805 = vmatprep.mubr.bf16.mxu0 %v4579_v54  ;;  %v15968_v54 = vld [vmem:[#allocation62_spill] sm:$0xff] }
 0xbd1   :  { %4806 = vmatmul.mubr.bf16.vlgmr.msra.gmra.mrb[60].mxu0 %v4578_v12  ;;  %v5334_v48 = vand.u32 63, %v15968_v54  ;;  %v15969_v12 = vld [vmem:[#allocation63_spill] sm:$0xff] }
 0xbd2   :  { %11375 = vmatpush3.bf16.msk.msra.mxu0 %vm11374_vm8, %v15740_v21  ;;  %vm11386_vm8 = vmpackc.low %vm5511_vm7, %vm5510_vm15  ;;  %vm5533_vm15 = vcmp.eq.s32.totalorder %v5327_v63, %v13330_v44  ;;  %v5341_v37 = vand.u32 63, %v15969_v12 }
 0xbd3   :  { %11377 = vmatprep.subr.msk.bf16.mxu0 %vm11376_vm10, %v15740_v21  ;;  %11419 = vmatpush3.bf16.msk.msra.mxu1 %vm11386_vm8, %v15740_v21  ;;  %vm5528_vm10 = vcmp.eq.s32.totalorder %v5292_v33, %v13330_v44  ;;  %v15972_v33 = vld [vmem:[#allocation66_spill] sm:$0xff] }
 0xbd4   :  { %vm11388_vm3 = vmpackc.low %vm5529_vm0, %vm5528_vm10  ;;  %vm5517_vm10 = vcmp.eq.s32.totalorder %v5215_v38, %v13330_v44 }
 0xbd5   :  { %11421 = vmatprep.subr.msk.bf16.mxu1 %vm11388_vm3, %v15740_v21 }
 0xbd6   :  { %11379 = vmatpush3.bf16.msk.msra.mxu0 %vm11378_vm6, %v15740_v21  ;;  %vm5512_vm6 = vcmp.eq.s32.totalorder %v5180_v49, %v13330_v44 }
 0xbd7   :  { %11381 = vmatprep.subr.msk.bf16.mxu0 %vm11380_vm13, %v15740_v21  ;;  %vm11390_vm9 = vmpackc.low %vm5513_vm12, %vm5512_vm6  ;;  %vm5530_vm13 = vcmp.eq.s32.totalorder %v5306_v61, %v13330_v44  ;;  %vm5535_vm6 = vcmp.eq.s32.totalorder %v5341_v37, %v13330_v44 }
 0xbd8   :  { %v14669_v27 = vpop.f32.mrb[16].mxu1  ;;  %11423 = vmatpush3.bf16.msk.msra.mxu1 %vm11390_vm9, %v15740_v21  ;;  %vm11392_vm1 = vmpackc.low %vm5531_vm2, %vm5530_vm13  ;;  %vm5519_vm13 = vcmp.eq.s32.totalorder %v5229_v32, %v13330_v44 }
 0xbd9   :  { %v14673_v40 = vpop.f32.mrb[17].mxu1  ;;  %11425 = vmatprep.subr.msk.bf16.mxu1 %vm11392_vm1, %v15740_v21 }
 0xbda   :  { %v5095_v15 = vpop.f32.mrb[18].mxu1  ;;  %11383 = vmatpush3.bf16.msk.msra.mxu0 %vm11382_vm5, %v15740_v21  ;;  %vm5514_vm5 = vcmp.eq.s32.totalorder %v5194_v50, %v13330_v44 }
 0xbdb   :  { %v5096_v30 = vpop.f32.mrb[19].mxu1  ;;  %11385 = vmatprep.subr.msk.bf16.mxu0 %vm11384_vm4, %v15740_v21  ;;  %vm11394_vm11 = vmpackc.low %vm5515_vm14, %vm5514_vm5  ;;  %vm5532_vm4 = vcmp.eq.s32.totalorder %v5320_v26, %v13330_v44  ;;  %v5100_v15 = vld [vmem:[#allocation13] sm:$0x3] }
 0xbdc   :  { %11427 = vmatpush3.bf16.msk.msra.mxu1 %vm11394_vm11, %v15740_v21  ;;  %vm11396_vm7 = vmpackc.low %vm5533_vm15, %vm5532_vm4  ;;  %v5105_v5 = vrot.slane %v5100_v15, %v13781_v0  ;;  %v5109_v29 = vrot.slane %v5100_v15, %v15972_v33 }
 0xbdd   :  { %11429 = vmatprep.subr.msk.bf16.mxu1 %vm11396_vm7, %v15740_v21 }
 0xbde   :  { %11387 = vmatpush3.bf16.msk.msra.mxu0 %vm11386_vm8, %v15740_v21  ;;  %vm5516_vm8 = vcmp.eq.s32.totalorder %v5208_v10, %v13330_v44 }
 0xbdf   :  { %11389 = vmatprep.subr.msk.bf16.mxu0 %vm11388_vm3, %v15740_v21  ;;  %vm11398_vm0 = vmpackc.low %vm5517_vm10, %vm5516_vm8  ;;  %vm5534_vm3 = vcmp.eq.s32.totalorder %v5334_v48, %v13330_v44 }
 0xbe0   :  { %vm11400_vm12 = vmpackc.low %vm5535_vm6, %vm5534_vm3  ;;  %11431 = vmatpush3.bf16.msk.msra.mxu1 %vm11398_vm0, %v15740_v21 }
 0xbe1   :  { %11433 = vmatprep.subr.msk.bf16.mxu1 %vm11400_vm12, %v15740_v21 }
 0xbe2   :  { %11391 = vmatpush3.bf16.msk.msra.mxu0 %vm11390_vm9, %v15740_v21  ;;  %vm5518_vm9 = vcmp.eq.s32.totalorder %v5222_v19, %v13330_v44 }
 0xbe3   :  { %11393 = vmatprep.subr.msk.bf16.mxu0 %vm11392_vm1, %v15740_v21  ;;  %vm11402_vm2 = vmpackc.low %vm5519_vm13, %vm5518_vm9 }
 0xbe4   :  { %11435 = vmatpush3.bf16.msk.msra.mxu1 %vm11402_vm2, %v15740_v21 }
 0xbe6   :  { %11395 = vmatpush3.bf16.msk.msra.mxu0 %vm11394_vm11, %v15740_v21 }
 0xbe7   :  { %11397 = vmatprep.subr.msk.bf16.mxu0 %vm11396_vm7, %v15740_v21 }
 0xbea   :  { %11399 = vmatpush3.bf16.msk.msra.mxu0 %vm11398_vm0, %v15740_v21 }
 0xbeb   :  { %11401 = vmatprep.subr.msk.bf16.mxu0 %vm11400_vm12, %v15740_v21 }
 0xbee   :  { %11403 = vmatpush3.bf16.msk.msra.mxu0 %vm11402_vm2, %v15740_v21 }
 0xca4   :  { %v4807_v30 = vpop.f32.mrb[60].mxu0 }
 0xca5   :  { %v4814_v59 = vadd.f32 %v4807_v30, %v14645_v46  ;;  %v4809_v25 = vpop.f32.mrb[61].mxu0 }
 0xca6   :  { %v4815_v20 = vadd.f32 %v4809_v25, %v14647_v6  ;;  %v4811_v49 = vpop.f32.mrb[62].mxu0 }
 0xca7   :  { %v5098_v17 = vadd.f32 %v14669_v27, %v4814_v59  ;;  %v4812_v61 = vpop.f32.mrb[63].mxu0 }
 0xca8   :  { %v5099_v13 = vadd.f32 %v14673_v40, %v4815_v20 }
 0xca9   :  { %v5112_v50 = vadd.f32 %v5105_v5, %v5098_v17 }
 0xcaa   :  { %v5113_v43 = vadd.f32 %v5109_v29, %v5099_v13 }
 0xcab   :  { %vm5114_vm1 = vcmp.ge.f32.partialorder %v5112_v50, 0.0  ;;  %v5116_v26 = vmul.f32 0.2, %v5112_v50 }
 0xcac   :  { %vm5115_vm5 = vcmp.ge.f32.partialorder %v5113_v43, 0.0  ;;  %v5117_v63 = vmul.f32 0.2, %v5113_v43 }
 0xcad   :  { %v14749_v46 = vsel %vm5114_vm1, %v5112_v50, %v5116_v26 }
 0xcae   :  { %v5672_v10 = vrot.slane %v14749_v46, 4  ;;  %v5754_v6 = vmul.f32 %v14749_v46, %v14749_v46  ;;  %v14754_v38 = vsel %vm5115_vm5, %v5113_v43, %v5117_v63 }
 0xcaf   :  { %v5678_v27 = vrot.slane %v14754_v38, 4  ;;  %v5755_v40 = vmul.f32 %v14754_v38, %v14754_v38 }
 0xcb0   :  { %v5673_v48 = vadd.f32 %v5672_v10, %v14749_v46  ;;  %v5756_v37 = vrot.slane %v5754_v6, 4 }
 0xcb1   :  { %v5679_v19 = vadd.f32 %v5678_v27, %v14754_v38  ;;  %v5762_v32 = vrot.slane %v5755_v40, 4 }
 0xcb2   :  { %v5674_v15 = vrot.slane %v5673_v48, 2  ;;  %v5757_v30 = vadd.f32 %v5756_v37, %v5754_v6  ;;  %v5611_v6 = vand.u32 63, %v13922_v39 }
 0xcb3   :  { %v5680_v59 = vrot.slane %v5679_v19, 2  ;;  %v5763_v5 = vadd.f32 %v5762_v32, %v5755_v40  ;;  %v5604_v40 = vand.u32 63, %v13330_v44 }
 0xcb4   :  { %v5675_v25 = vadd.f32 %v5674_v15, %v5673_v48  ;;  %v5758_v20 = vrot.slane %v5757_v30, 2  ;;  %vm5625_vm14 = vcmp.eq.s32.totalorder %v5611_v6, %v13322_v41  ;;  %vm5627_vm11 = vcmp.eq.s32.totalorder %v5611_v6, %v13358_v14 }
 0xcb5   :  { %v5681_v29 = vadd.f32 %v5680_v59, %v5679_v19  ;;  %v5764_v49 = vrot.slane %v5763_v5, 2  ;;  %vm11436_vm4 = vmpackc.low %vm5627_vm11, %vm5625_vm14  ;;  %vm5624_vm15 = vcmp.eq.s32.totalorder %v5604_v40, %v13322_v41  ;;  %vm5626_vm7 = vcmp.eq.s32.totalorder %v5604_v40, %v13358_v14 }
 0xcb6   :  { %v5676_v17 = vrot.slane %v5675_v25, 1  ;;  %v5759_v61 = vadd.f32 %v5758_v20, %v5757_v30  ;;  %11437 = vmatprep.subr.msk.bf16.mxu0 %vm11436_vm4, %v15740_v21  ;;  %vm11438_vm8 = vmpackc.low %vm5626_vm7, %vm5624_vm15  ;;  %11453 = vmatprep.subr.msk.bf16.mxu1 %vm11436_vm4, %v15740_v21  ;;  %vm5629_vm10 = vcmp.eq.s32.totalorder %v5611_v6, %v15788_v55  ;;  %vm5631_vm0 = vcmp.eq.s32.totalorder %v5611_v6, %v15789_v4 }
 0xcb7   :  { %v5682_v13 = vrot.slane %v5681_v29, 1  ;;  %v5765_v50 = vadd.f32 %v5764_v49, %v5763_v5  ;;  %vm11440_vm3 = vmpackc.low %vm5631_vm0, %vm5629_vm10  ;;  %vm5628_vm6 = vcmp.eq.s32.totalorder %v5604_v40, %v15788_v55  ;;  %vm5630_vm12 = vcmp.eq.s32.totalorder %v5604_v40, %v15789_v4 }
 0xcb8   :  { %v5760_v43 = vrot.slane %v5759_v61, 1  ;;  %v5677_v10 = vadd.f32 %v5676_v17, %v5675_v25  ;;  %vm11442_vm9 = vmpackc.low %vm5630_vm12, %vm5628_vm6  ;;  %vm5633_vm13 = vcmp.eq.s32.totalorder %v5611_v6, %v15950_v3  ;;  %vm5635_vm2 = vcmp.eq.s32.totalorder %v5611_v6, %v15951_v47 }
 0xcb9   :  { %v5683_v26 = vadd.f32 %v5682_v13, %v5681_v29  ;;  %v5766_v63 = vrot.slane %v5765_v50, 1  ;;  %vm5632_vm1 = vcmp.eq.s32.totalorder %v5604_v40, %v15950_v3  ;;  %vm11444_vm5 = vmpackc.low %vm5635_vm2, %vm5633_vm13  ;;  %vm5634_vm14 = vcmp.eq.s32.totalorder %v5604_v40, %v15951_v47  ;;  %v12168_v13 = vld [vmem:[#allocation16 + $0x4] ss:$8 sps:$4 sm:$0xff]  }
 0xcba   :  { %v5761_v27 = vadd.f32 %v5760_v43, %v5759_v61  ;;  %vm5637_vm11 = vcmp.eq.s32.totalorder %v5611_v6, %v15954_v57  ;;  %vm5639_vm4 = vcmp.eq.s32.totalorder %v5611_v6, %v15955_v18  ;;  %vm11446_vm15 = vmpackc.low %vm5634_vm14, %vm5632_vm1  ;;  %vm5636_vm7 = vcmp.eq.s32.totalorder %v5604_v40, %v15954_v57  ;;  %v12166_v61 = vld [vmem:[#allocation16] ss:$8 sps:$4 sm:$0xff]   ;;  %v12169_v43 = vld [vmem:[#allocation16 + $0x10] ss:$8 sps:$4 sm:$0xff]  }
 0xcbb   :  { %5748 = vmatprep.mubr.f32.mxu0 %v5683_v26  ;;  %v5767_v33 = vadd.f32 %v5766_v63, %v5765_v50  ;;  %vm11448_vm10 = vmpackc.low %vm5639_vm4, %vm5637_vm11  ;;  %v12171_v50 = vld [vmem:[#allocation16 + $0x14] ss:$8 sps:$4 sm:$0xff]   ;;  %v12174_v26 = vld [vmem:[#allocation16 + $0x24] ss:$8 sps:$4 sm:$0xff]   ;;  %vm6022_vm6 = vcmask 1043456   ;;  %vm6018_vm12 = vcmask 64512  }
 0xcbc   :  { %5749 = vmatmul.mubr.f32.vlgmr.msra.gmra.mrb[64].mxu0 %v5677_v10  ;;  %v12172_v63 = vld [vmem:[#allocation16 + $0x20] ss:$8 sps:$4 sm:$0xff]   ;;  %v12177_v10 = vld [vmem:[#allocation16 + $0x34] ss:$8 sps:$4 sm:$0xff]   ;;  %v12180_v6 = vld [vmem:[#allocation16 + $0x44] ss:$8 sps:$4 sm:$0xff]  }
 0xcbd   :  { %5832 = vmatprep.mubr.f32.mxu1 %v5767_v33  ;;  %5913 = vmatprep.mubr.f32.mxu0 %v15917_v45 }
 0xcbe   :  { %5833 = vmatmul.mubr.f32.vlgmr.msra.gmra.mrb[20].mxu1 %v5761_v27  ;;  %11439 = vmatpush1.bf16.msk.msra.mxu0 %vm11438_vm8, %v15740_v21  ;;  %v12175_v27 = vld [vmem:[#allocation16 + $0x30] ss:$8 sps:$4 sm:$0xff]  }
 0xcbf   :  { %5988 = vmatprep.mubr.f32.mxu1 %v15917_v45  ;;  %11455 = vmatpush1.bf16.msk.msra.mxu1 %vm11438_vm8, %v15740_v21  ;;  %vm5638_vm8 = vcmp.eq.s32.totalorder %v5604_v40, %v15955_v18  ;;  %v12178_v40 = vld [vmem:[#allocation16 + $0x40] ss:$8 sps:$4 sm:$0xff]  }
 0xcc0   :  { %11441 = vmatprep.subr.msk.bf16.mxu0 %vm11440_vm3, %v15740_v21  ;;  %11457 = vmatprep.subr.msk.bf16.mxu1 %vm11440_vm3, %v15740_v21  ;;  %vm11450_vm0 = vmpackc.low %vm5638_vm8, %vm5636_vm7  ;;  %vm5845_vm3 = vcmask 523264  }
 0xcc2   :  { %11443 = vmatpush1.bf16.msk.msra.mxu0 %vm11442_vm9, %v15740_v21 }
 0xcc3   :  { %11459 = vmatpush1.bf16.msk.msra.mxu1 %vm11442_vm9, %v15740_v21  ;;  %11445 = vmatprep.subr.msk.bf16.mxu0 %vm11444_vm5, %v15740_v21 }
 0xcc4   :  { %11461 = vmatprep.subr.msk.bf16.mxu1 %vm11444_vm5, %v15740_v21 }
 0xcc6   :  { %11447 = vmatpush1.bf16.msk.msra.mxu0 %vm11446_vm15, %v15740_v21 }
 0xcc7   :  { %11463 = vmatpush1.bf16.msk.msra.mxu1 %vm11446_vm15, %v15740_v21  ;;  %11449 = vmatprep.subr.msk.bf16.mxu0 %vm11448_vm10, %v15740_v21 }
 0xcc8   :  { %11465 = vmatprep.subr.msk.bf16.mxu1 %vm11448_vm10, %v15740_v21 }
 0xcca   :  { %11451 = vmatpush1.bf16.msk.msra.mxu0 %vm11450_vm0, %v15740_v21 }
 0xccb   :  { %11467 = vmatpush1.bf16.msk.msra.mxu1 %vm11450_vm0, %v15740_v21 }
 0xccc   :  { %6546 = vmatprep.subr.bf16.mxu1 %v12168_v13  ;;  %v12204_v13 = vld [vmem:[#allocation16 + $0xc4] ss:$8 sps:$4 sm:$0xff]  }
 0xd8f   :  { %v10987_v33 = vpop.f32.mrb[64].mxu0 }
 0xd90   :  { %v10988_v48 = vpop.f32.mrb[65].mxu0 }
 0xd91   :  { %v10989_v37 = vadd.f32 %v10988_v48, %v10987_v33  ;;  %v11022_v19 = vpop.f32.mrb[20].mxu1  ;;  %v12183_v33 = vld [vmem:[#allocation16 + $0x54] ss:$8 sps:$4 sm:$0xff]   ;;  %v12181_v48 = vld [vmem:[#allocation16 + $0x50] ss:$8 sps:$4 sm:$0xff]  }
 0xd92   :  { %v11023_v32 = vpop.f32.mrb[21].mxu1 }
 0xd93   :  { %v5838_v15 = vmul.f32 0.03125, %v10989_v37  ;;  %v11024_v30 = vadd.f32 %v11023_v32, %v11022_v19  ;;  %v12186_v37 = vld [vmem:[#allocation16 + $0x64] ss:$8 sps:$4 sm:$0xff]   ;;  %v12184_v19 = vld [vmem:[#allocation16 + $0x60] ss:$8 sps:$4 sm:$0xff]  }
 0xd94   :  { %v12189_v32 = vld [vmem:[#allocation16 + $0x74] ss:$8 sps:$4 sm:$0xff]  }
 0xd95   :  { %v5840_v59 = vmul.f32 %v5838_v15, %v5838_v15  ;;  %v5839_v5 = vmul.f32 0.03125, %v11024_v30  ;;  %v12192_v30 = vld [vmem:[#allocation16 + $0x84] ss:$8 sps:$4 sm:$0xff]  }
 0xd97   :  { %v5841_v25 = vsub.f32 %v5839_v5, %v5840_v59  ;;  %v12190_v59 = vld [vmem:[#allocation16 + $0x80] ss:$8 sps:$4 sm:$0xff]   ;;  %v12195_v5 = vld [vmem:[#allocation16 + $0x94] ss:$8 sps:$4 sm:$0xff]  }
 0xd99   :  { %v5842_v20 = vmax.f32 %v5841_v25, 0.0  ;;  %v12193_v25 = vld [vmem:[#allocation16 + $0x90] ss:$8 sps:$4 sm:$0xff]  }
 0xd9b   :  { %v5843_v29 = vadd.f32 0.8, %v5842_v20  ;;  %v12198_v20 = vld [vmem:[#allocation16 + $0xa4] ss:$8 sps:$4 sm:$0xff]  }
 0xd9d   :  { %12498 = vrsqrt.f32 %v5843_v29  ;;  %v12196_v29 = vld [vmem:[#allocation16 + $0xa0] ss:$8 sps:$4 sm:$0xff]  }
 0xda7   :  { %v12499_v49 = vpop.eup %12498 }
 0xda8   :  { %10284 = vmatmul.mubr.msk.f32.vlgmr.msra.gmra.mrb[66].mxu0 %vm5845_vm3, %v12499_v49  ;;  %v5920_v17 = vmul.f32 %v12499_v49, %v5838_v15  ;;  %v12187_v15 = vld [vmem:[#allocation16 + $0x70] ss:$8 sps:$4 sm:$0xff]   ;;  %v12201_v49 = vld [vmem:[#allocation16 + $0xb4] ss:$8 sps:$4 sm:$0xff]  }
 0xda9   :  { %6061 = vmatprep.mubr.bf16.mxu0 %v15779_v56 }
 0xdaa   :  { %10301 = vmatmul.mubr.msk.f32.vlgmr.msra.gmra.mrb[22].mxu1 %vm5845_vm3, %v5920_v17  ;;  %v12199_v17 = vld [vmem:[#allocation16 + $0xb0] ss:$8 sps:$4 sm:$0xff]  }
 0xdab   :  { %6547 = vmatpush1.bf16.msra.mxu1 %v12166_v61 }
 0xdac   :  { %6548 = vmatprep.subr.bf16.mxu1 %v12171_v50 }
 0xdaf   :  { %6549 = vmatpush1.bf16.msra.mxu1 %v12169_v43 }
 0xdb0   :  { %6550 = vmatprep.subr.bf16.mxu1 %v12174_v26 }
 0xdb3   :  { %6551 = vmatpush1.bf16.msra.mxu1 %v12172_v63 }
 0xdb4   :  { %6552 = vmatprep.subr.bf16.mxu1 %v12177_v10 }
 0xdb7   :  { %6553 = vmatpush1.bf16.msra.mxu1 %v12175_v27 }
 0xdb8   :  { %6554 = vmatprep.subr.bf16.mxu1 %v12180_v6 }
 0xdbb   :  { %6555 = vmatpush1.bf16.msra.mxu1 %v12178_v40  ;;  %v12202_v40 = vld [vmem:[#allocation16 + $0xc0] ss:$8 sps:$4 sm:$0xff]  }
 0xdbc   :  { %6556 = vmatprep.subr.bf16.mxu1 %v12183_v33 }
 0xdbf   :  { %6557 = vmatpush1.bf16.msra.mxu1 %v12181_v48 }
 0xdc0   :  { %6558 = vmatprep.subr.bf16.mxu1 %v12186_v37  ;;  %v12207_v37 = vld [vmem:[#allocation16 + $0xd4] ss:$8 sps:$4 sm:$0xff]  }
 0xdc3   :  { %6559 = vmatpush1.bf16.msra.mxu1 %v12184_v19 }
 0xdc4   :  { %6560 = vmatprep.subr.bf16.mxu1 %v12189_v32 }
 0xdc7   :  { %6561 = vmatpush1.bf16.msra.mxu1 %v12187_v15 }
 0xdc8   :  { %6562 = vmatprep.subr.bf16.mxu1 %v12192_v30  ;;  %v12205_v30 = vld [vmem:[#allocation16 + $0xd0] ss:$8 sps:$4 sm:$0xff]  }
 0xdcb   :  { %6563 = vmatpush1.bf16.msra.mxu1 %v12190_v59 }
 0xdcc   :  { %6564 = vmatprep.subr.bf16.mxu1 %v12195_v5 }
 0xdcf   :  { %6565 = vmatpush1.bf16.msra.mxu1 %v12193_v25  ;;  %v12120_v25 = vld [vmem:[#allocation16 + $0x104] ss:$8 sps:$4 sm:$0xff]  }
 0xdd0   :  { %6566 = vmatprep.subr.bf16.mxu1 %v12198_v20  ;;  %v12208_v20 = vld [vmem:[#allocation16 + $0xe0] ss:$8 sps:$4 sm:$0xff]  }
 0xdd3   :  { %6567 = vmatpush1.bf16.msra.mxu1 %v12196_v29  ;;  %v12118_v29 = vld [vmem:[#allocation16 + $0x100] ss:$8 sps:$4 sm:$0xff]  }
 0xdd4   :  { %6568 = vmatprep.subr.bf16.mxu1 %v12201_v49  ;;  %v6105_v49 = vld [vmem:[#allocation15 + $0x2] sm:$0x3] }
 0xdd7   :  { %6569 = vmatpush1.bf16.msra.mxu1 %v12199_v17  ;;  %v12123_v17 = vld [vmem:[#allocation16 + $0x114] ss:$8 sps:$4 sm:$0xff]  }
 0xdd8   :  { %6570 = vmatprep.subr.bf16.mxu1 %v12204_v13  ;;  %v12126_v13 = vld [vmem:[#allocation16 + $0x124] ss:$8 sps:$4 sm:$0xff]  }
 0xddb   :  { %6571 = vmatpush1.bf16.msra.mxu1 %v12202_v40  ;;  %v12138_v40 = vld [vmem:[#allocation16 + $0x164] ss:$8 sps:$4 sm:$0xff]  }
 0xddc   :  { %6572 = vmatprep.subr.bf16.mxu1 %v12207_v37  ;;  %v12139_v37 = vld [vmem:[#allocation16 + $0x170] ss:$8 sps:$4 sm:$0xff]  }
 0xddf   :  { %6573 = vmatpush1.bf16.msra.mxu1 %v12205_v30  ;;  %v12145_v30 = vld [vmem:[#allocation16 + $0x190] ss:$8 sps:$4 sm:$0xff]  }
 0xe7b   :  { %v5915_v61 = vpop.f32.mrb[66].mxu0 }
 0xe7c   :  { %v5998_v50 = vrot.slane %v5915_v61, %v13781_v0  ;;  %v5917_v43 = vpop.f32.mrb[67].mxu0  ;;  %v12121_v61 = vld [vmem:[#allocation16 + $0x110] ss:$8 sps:$4 sm:$0xff]  }
 0xe7d   :  { %v6002_v26 = vrot.slane %v5917_v43, %v13781_v0  ;;  %v5990_v63 = vpop.f32.mrb[22].mxu1  ;;  %v12129_v43 = vld [vmem:[#allocation16 + $0x134] ss:$8 sps:$4 sm:$0xff]  }
 0xe7e   :  { %v6003_v10 = vmul.f32 %v5998_v50, %v14749_v46  ;;  %v6008_v27 = vrot.slane %v5990_v63, %v13781_v0  ;;  %v5992_v6 = vpop.f32.mrb[23].mxu1  ;;  %v12210_v46 = vld [vmem:[#allocation16 + $0xe4] ss:$8 sps:$4 sm:$0xff]   ;;  %v12124_v50 = vld [vmem:[#allocation16 + $0x120] ss:$8 sps:$4 sm:$0xff]  }
 0xe7f   :  { %v6004_v33 = vmul.f32 %v6002_v26, %v14754_v38  ;;  %v6012_v48 = vrot.slane %v5992_v6, %v13781_v0  ;;  %v6017_v38 = vld [vmem:[#allocation15] sm:$0x3]  ;;  %6574 = vmatprep.subr.bf16.mxu1 %v12210_v46  ;;  %v12132_v63 = vld [vmem:[#allocation16 + $0x144] ss:$8 sps:$4 sm:$0xff]  }
 0xe80   :  { %v6013_v19 = vsub.f32 %v6003_v10, %v6008_v27  ;;  %6575 = vmatpush1.bf16.msra.mxu1 %v12208_v20  ;;  %v12127_v26 = vld [vmem:[#allocation16 + $0x130] ss:$8 sps:$4 sm:$0xff]   ;;  %v12130_v10 = vld [vmem:[#allocation16 + $0x140] ss:$8 sps:$4 sm:$0xff]   ;;  %v12135_v27 = vld [vmem:[#allocation16 + $0x154] ss:$8 sps:$4 sm:$0xff]  }
 0xe81   :  { %v6014_v32 = vsub.f32 %v6004_v33, %v6012_v48  ;;  %v12133_v6 = vld [vmem:[#allocation16 + $0x150] ss:$8 sps:$4 sm:$0xff]   ;;  %v12136_v33 = vld [vmem:[#allocation16 + $0x160] ss:$8 sps:$4 sm:$0xff]   ;;  %v12141_v48 = vld [vmem:[#allocation16 + $0x174] ss:$8 sps:$4 sm:$0xff]  }
 0xe82   :  { %v6015_v15 = vpack.c.bf16 %v6013_v19, %v6013_v19  ;;  %v12144_v19 = vld [vmem:[#allocation16 + $0x184] ss:$8 sps:$4 sm:$0xff]   ;;  %v12151_v20 = vld [vmem:[#allocation16 + $0x1b0] ss:$8 sps:$4 sm:$0xff]  }
 0xe83   :  { %v14804_v59 = vpack.c.bf16 %v6014_v32, %v6014_v32  ;;  %v12142_v32 = vld [vmem:[#allocation16 + $0x180] ss:$8 sps:$4 sm:$0xff]   ;;  %v12150_v46 = vld [vmem:[#allocation16 + $0x1a4] ss:$8 sps:$4 sm:$0xff]  }
 0xe84   :  { %v14807_v5 = vsel %vm6022_vm6, %v6015_v15, 0  ;;  %v12147_v15 = vld [vmem:[#allocation16 + $0x194] ss:$8 sps:$4 sm:$0xff]  }
 0xe85   :  { %10302 = vmatprep.subr.msk.bf16.mxu0 %vm6022_vm6, %v14804_v59 }
 0xe86   :  { %6030 = vmatpush1.bf16.msra.mxu0 %v14807_v5 }
 0xe87   :  { %10304 = vmatprep.subr.msk.bf16.mxu0 %vm6022_vm6, %v14804_v59 }
 0xe89   :  { %10303 = vmatmul.mubr.msk.bf16.vlgmr.msra.gmra.mrb[68].mxu0 %vm6018_vm12, %v6017_v38  ;;  %v12148_v38 = vld [vmem:[#allocation16 + $0x1a0] ss:$8 sps:$4 sm:$0xff]  }
 0xe8a   :  { %6110 = vmatpush1.bf16.msra.mxu0 %v14807_v5  ;;  %6141 = vmatprep.mubr.bf16.mxu0 %v15779_v56 }
 0xe8b   :  { %6345 = vmatprep.subr.bf16.mxu0 %v12120_v25  ;;  %v12153_v25 = vld [vmem:[#allocation16 + $0x1b4] ss:$8 sps:$4 sm:$0xff]  }
 0xe91   :  { %10305 = vmatmul.mubr.msk.bf16.vlgmr.msra.gmra.mrb[72].mxu0 %vm6018_vm12, %v6105_v49  ;;  %v12154_v49 = vld [vmem:[#allocation16 + $0x1c0] ss:$8 sps:$4 sm:$0xff]  }
 0xe92   :  { %6346 = vmatpush1.bf16.msra.mxu0 %v12118_v29  ;;  %v12156_v29 = vld [vmem:[#allocation16 + $0x1c4] ss:$8 sps:$4 sm:$0xff]  }
 0xe93   :  { %6347 = vmatprep.subr.bf16.mxu0 %v12123_v17  ;;  %v12159_v17 = vld [vmem:[#allocation16 + $0x1d4] ss:$8 sps:$4 sm:$0xff]  }
 0xe96   :  { %6348 = vmatpush1.bf16.msra.mxu0 %v12121_v61  ;;  %v12157_v61 = vld [vmem:[#allocation16 + $0x1d0] ss:$8 sps:$4 sm:$0xff]  }
 0xe97   :  { %6349 = vmatprep.subr.bf16.mxu0 %v12126_v13  ;;  %v12162_v13 = vld [vmem:[#allocation16 + $0x1e4] ss:$8 sps:$4 sm:$0xff]  }
 0xe9a   :  { %6350 = vmatpush1.bf16.msra.mxu0 %v12124_v50  ;;  %v12160_v50 = vld [vmem:[#allocation16 + $0x1e0] ss:$8 sps:$4 sm:$0xff]  }
 0xe9b   :  { %6351 = vmatprep.subr.bf16.mxu0 %v12129_v43  ;;  %v12165_v43 = vld [vmem:[#allocation16 + $0x1f4] ss:$8 sps:$4 sm:$0xff]  }
 0xe9e   :  { %6352 = vmatpush1.bf16.msra.mxu0 %v12127_v26  ;;  %v12163_v26 = vld [vmem:[#allocation16 + $0x1f0] ss:$8 sps:$4 sm:$0xff]  }
 0xe9f   :  { %6353 = vmatprep.subr.bf16.mxu0 %v12132_v63  ;;  %v12213_v63 = vld [vmem:[#allocation16 + $0xf4] ss:$8 sps:$4 sm:$0xff]  }
 0xea0   :  { %6576 = vmatprep.subr.bf16.mxu1 %v12213_v63  ;;  %v12225_v63 = vld [vmem:[#allocation16 + $0x304] ss:$8 sps:$4 sm:$0xff]  }
 0xea2   :  { %6354 = vmatpush1.bf16.msra.mxu0 %v12130_v10  ;;  %v12211_v10 = vld [vmem:[#allocation16 + $0xf0] ss:$8 sps:$4 sm:$0xff]  }
 0xea3   :  { %6355 = vmatprep.subr.bf16.mxu0 %v12135_v27  ;;  %6577 = vmatpush1.bf16.msra.mxu1 %v12211_v10  ;;  %v12216_v27 = vld [vmem:[#allocation16 + $0x204] ss:$8 sps:$4 sm:$0xff]   ;;  %v12232_v10 = vld [vmem:[#allocation16 + $0x240] ss:$8 sps:$4 sm:$0xff]  }
 0xea4   :  { %6828 = vmatprep.subr.bf16.mxu1 %v12216_v27  ;;  %v12240_v27 = vld [vmem:[#allocation16 + $0x254] ss:$8 sps:$4 sm:$0xff]  }
 0xea6   :  { %6356 = vmatpush1.bf16.msra.mxu0 %v12133_v6 }
 0xea7   :  { %6357 = vmatprep.subr.bf16.mxu0 %v12138_v40 }
 0xeaa   :  { %6358 = vmatpush1.bf16.msra.mxu0 %v12136_v33 }
 0xeab   :  { %6359 = vmatprep.subr.bf16.mxu0 %v12141_v48 }
 0xeae   :  { %6360 = vmatpush1.bf16.msra.mxu0 %v12139_v37  ;;  %v12214_v37 = vld [vmem:[#allocation16 + $0x200] ss:$8 sps:$4 sm:$0xff]  }
 0xeaf   :  { %6361 = vmatprep.subr.bf16.mxu0 %v12144_v19 }
 0xeb2   :  { %6362 = vmatpush1.bf16.msra.mxu0 %v12142_v32 }
 0xeb3   :  { %6363 = vmatprep.subr.bf16.mxu0 %v12147_v15  ;;  %v12219_v15 = vld [vmem:[#allocation16 + $0x214] ss:$8 sps:$4 sm:$0xff]  }
 0xeb6   :  { %6364 = vmatpush1.bf16.msra.mxu0 %v12145_v30  ;;  %v12217_v30 = vld [vmem:[#allocation16 + $0x210] ss:$8 sps:$4 sm:$0xff]  }
 0xeb7   :  { %6365 = vmatprep.subr.bf16.mxu0 %v12150_v46  ;;  %v12222_v46 = vld [vmem:[#allocation16 + $0x224] ss:$8 sps:$4 sm:$0xff]  }
 0xeba   :  { %6366 = vmatpush1.bf16.msra.mxu0 %v12148_v38 }
 0xebb   :  { %6367 = vmatprep.subr.bf16.mxu0 %v12153_v25 }
 0xebe   :  { %6368 = vmatpush1.bf16.msra.mxu0 %v12151_v20 }
 0xebf   :  { %6369 = vmatprep.subr.bf16.mxu0 %v12156_v29 }
 0xec2   :  { %6370 = vmatpush1.bf16.msra.mxu0 %v12154_v49 }
 0xec3   :  { %6371 = vmatprep.subr.bf16.mxu0 %v12159_v17 }
 0xec6   :  { %6372 = vmatpush1.bf16.msra.mxu0 %v12157_v61  ;;  %v12220_v61 = vld [vmem:[#allocation16 + $0x220] ss:$8 sps:$4 sm:$0xff]  }
 0xec7   :  { %6373 = vmatprep.subr.bf16.mxu0 %v12162_v13  ;;  %v12228_v13 = vld [vmem:[#allocation16 + $0x234] ss:$8 sps:$4 sm:$0xff]  }
 0xeca   :  { %6374 = vmatpush1.bf16.msra.mxu0 %v12160_v50  ;;  %v12226_v50 = vld [vmem:[#allocation16 + $0x230] ss:$8 sps:$4 sm:$0xff]  }
 0xecb   :  { %6375 = vmatprep.subr.bf16.mxu0 %v12165_v43  ;;  %v12234_v43 = vld [vmem:[#allocation16 + $0x244] ss:$8 sps:$4 sm:$0xff]  }
 0xece   :  { %6376 = vmatpush1.bf16.msra.mxu0 %v12163_v26  ;;  %v6588_v26 = vld [vmem:[#allocation15 + $0x4] sm:$0x3] }
 0xecf   :  { %10370 = vmatprep.subr.msk.bf16.mxu0 %vm6022_vm6, %v14804_v59 }
 0xf5c   :  { %v6063_v6 = vpop.f32.mrb[68].mxu0 }
 0xf5d   :  { %v6065_v40 = vpop.f32.mrb[69].mxu0  ;;  %v6070_v19 = vpack.c.bf16 %v6063_v6, %v6063_v6  ;;  %v12238_v6 = vld [vmem:[#allocation16 + $0x250] ss:$8 sps:$4 sm:$0xff]  }
 0xf5e   :  { %v6071_v33 = vpack.c.bf16 %v6065_v40, %v6065_v40  ;;  %v6067_v48 = vpop.f32.mrb[70].mxu0  ;;  %v6872_v40 = vld [vmem:[#allocation15 + $0x6] sm:$0x3] }
 0xf5f   :  { %v6068_v32 = vpop.f32.mrb[71].mxu0  ;;  %v12231_v48 = vld [vmem:[#allocation16 + $0x314] ss:$8 sps:$4 sm:$0xff]  }
 0xf60   :  { %6578 = vmatprep.mubr.bf16.mxu1 %v6071_v33  ;;  %v12223_v33 = vld [vmem:[#allocation16 + $0x300] ss:$8 sps:$4 sm:$0xff]   ;;  %v12229_v32 = vld [vmem:[#allocation16 + $0x310] ss:$8 sps:$4 sm:$0xff]  }
 0xf61   :  { %6579 = vmatmul.mubr.bf16.vlgmr.msra.gmra.mrb[24].mxu1 %v6070_v19  ;;  %v12252_v19 = vld [vmem:[#allocation16 + $0x274] ss:$8 sps:$4 sm:$0xff]  }
 0xf62   :  { %6829 = vmatpush1.bf16.msra.mxu1 %v12214_v37  ;;  %v12244_v37 = vld [vmem:[#allocation16 + $0x260] ss:$8 sps:$4 sm:$0xff]  }
 0xf63   :  { %6830 = vmatprep.subr.bf16.mxu1 %v12219_v15  ;;  %v12250_v15 = vld [vmem:[#allocation16 + $0x270] ss:$8 sps:$4 sm:$0xff]  }
 0xf64   :  { %v6143_v38 = vpop.f32.mrb[72].mxu0 }
 0xf65   :  { %v6145_v25 = vpop.f32.mrb[73].mxu0  ;;  %v6150_v49 = vpack.c.bf16 %v6143_v38, %v6143_v38  ;;  %v12243_v38 = vld [vmem:[#allocation16 + $0x334] ss:$8 sps:$4 sm:$0xff]  }
 0xf66   :  { %v6151_v20 = vpack.c.bf16 %v6145_v25, %v6145_v25  ;;  %v6147_v29 = vpop.f32.mrb[74].mxu0  ;;  %6831 = vmatpush1.bf16.msra.mxu1 %v12217_v30  ;;  %v12258_v30 = vld [vmem:[#allocation16 + $0x284] ss:$8 sps:$4 sm:$0xff]   ;;  %v12256_v25 = vld [vmem:[#allocation16 + $0x280] ss:$8 sps:$4 sm:$0xff]  }
 0xf67   :  { %v6148_v17 = vpop.f32.mrb[75].mxu0  ;;  %6832 = vmatprep.subr.bf16.mxu1 %v12222_v46  ;;  %v12235_v46 = vld [vmem:[#allocation16 + $0x320] ss:$8 sps:$4 sm:$0xff]   ;;  %v12241_v29 = vld [vmem:[#allocation16 + $0x330] ss:$8 sps:$4 sm:$0xff]  }
 0xf68   :  { %6377 = vmatprep.mubr.bf16.mxu0 %v6151_v20  ;;  %v12264_v20 = vld [vmem:[#allocation16 + $0x294] ss:$8 sps:$4 sm:$0xff]   ;;  %v12262_v17 = vld [vmem:[#allocation16 + $0x290] ss:$8 sps:$4 sm:$0xff]  }
 0xf69   :  { %6378 = vmatmul.mubr.bf16.vlgmr.msra.gmra.mrb[76].mxu0 %v6150_v49  ;;  %v12249_v49 = vld [vmem:[#allocation16 + $0x344] ss:$8 sps:$4 sm:$0xff]  }
 0xf6a   :  { %6593 = vmatpush1.bf16.msra.mxu0 %v14807_v5  ;;  %6624 = vmatprep.mubr.bf16.mxu0 %v15779_v56 }
 0xf6b   :  { %10404 = vmatprep.subr.msk.bf16.mxu0 %vm6022_vm6, %v14804_v59  ;;  %6833 = vmatpush1.bf16.msra.mxu1 %v12220_v61  ;;  %v12246_v59 = vld [vmem:[#allocation16 + $0x264] ss:$8 sps:$4 sm:$0xff]  }
 0xf6c   :  { %6834 = vmatprep.subr.bf16.mxu1 %v12228_v13  ;;  %v12270_v61 = vld [vmem:[#allocation16 + $0x2a4] ss:$8 sps:$4 sm:$0xff]   ;;  %v12247_v13 = vld [vmem:[#allocation16 + $0x340] ss:$8 sps:$4 sm:$0xff]  }
 0xf6f   :  { %6835 = vmatpush1.bf16.msra.mxu1 %v12226_v50  ;;  %v12255_v50 = vld [vmem:[#allocation16 + $0x354] ss:$8 sps:$4 sm:$0xff]  }
 0xf70   :  { %6836 = vmatprep.subr.bf16.mxu1 %v12234_v43  ;;  %v12268_v43 = vld [vmem:[#allocation16 + $0x2a0] ss:$8 sps:$4 sm:$0xff]  }
 0xf71   :  { %10371 = vmatmul.mubr.msk.bf16.vlgmr.msra.gmra.mrb[80].mxu0 %vm6018_vm12, %v6588_v26  ;;  %v12253_v26 = vld [vmem:[#allocation16 + $0x350] ss:$8 sps:$4 sm:$0xff]  }
 0xf72   :  { %6877 = vmatpush1.bf16.msra.mxu0 %v14807_v5  ;;  %6908 = vmatprep.mubr.bf16.mxu0 %v15779_v56  ;;  %v12237_v5 = vld [vmem:[#allocation16 + $0x324] ss:$8 sps:$4 sm:$0xff]  }
 0xf73   :  { %7112 = vmatprep.subr.bf16.mxu0 %v12225_v63  ;;  %6837 = vmatpush1.bf16.msra.mxu1 %v12232_v10  ;;  %v12261_v63 = vld [vmem:[#allocation16 + $0x364] ss:$8 sps:$4 sm:$0xff]   ;;  %v12259_v10 = vld [vmem:[#allocation16 + $0x360] ss:$8 sps:$4 sm:$0xff]  }
 0xf74   :  { %6838 = vmatprep.subr.bf16.mxu1 %v12240_v27  ;;  %v12267_v27 = vld [vmem:[#allocation16 + $0x374] ss:$8 sps:$4 sm:$0xff]  }
 0xf77   :  { %6839 = vmatpush1.bf16.msra.mxu1 %v12238_v6  ;;  %v12265_v6 = vld [vmem:[#allocation16 + $0x370] ss:$8 sps:$4 sm:$0xff]  }
 0xf78   :  { %6840 = vmatprep.subr.bf16.mxu1 %v12246_v59  ;;  %v12273_v59 = vld [vmem:[#allocation16 + $0x384] ss:$8 sps:$4 sm:$0xff]  }
 0xf79   :  { %10405 = vmatmul.mubr.msk.bf16.vlgmr.msra.gmra.mrb[84].mxu0 %vm6018_vm12, %v6872_v40  ;;  %v12271_v40 = vld [vmem:[#allocation16 + $0x380] ss:$8 sps:$4 sm:$0xff]  }
 0xf7a   :  { %7113 = vmatpush1.bf16.msra.mxu0 %v12223_v33  ;;  %v12276_v33 = vld [vmem:[#allocation16 + $0x2b4] ss:$8 sps:$4 sm:$0xff]  }
 0xf7b   :  { %7114 = vmatprep.subr.bf16.mxu0 %v12231_v48  ;;  %6841 = vmatpush1.bf16.msra.mxu1 %v12244_v37  ;;  %v12279_v48 = vld [vmem:[#allocation16 + $0x394] ss:$8 sps:$4 sm:$0xff]   ;;  %v12274_v37 = vld [vmem:[#allocation16 + $0x2b0] ss:$8 sps:$4 sm:$0xff]  }
 0xf7c   :  { %6842 = vmatprep.subr.bf16.mxu1 %v12252_v19  ;;  %v12277_v19 = vld [vmem:[#allocation16 + $0x390] ss:$8 sps:$4 sm:$0xff]  }
 0xf7e   :  { %7115 = vmatpush1.bf16.msra.mxu0 %v12229_v32  ;;  %v12280_v32 = vld [vmem:[#allocation16 + $0x2c0] ss:$8 sps:$4 sm:$0xff]  }
 0xf7f   :  { %7116 = vmatprep.subr.bf16.mxu0 %v12237_v5  ;;  %6843 = vmatpush1.bf16.msra.mxu1 %v12250_v15  ;;  %v12282_v5 = vld [vmem:[#allocation16 + $0x2c4] ss:$8 sps:$4 sm:$0xff]   ;;  %v12283_v15 = vld [vmem:[#allocation16 + $0x3a0] ss:$8 sps:$4 sm:$0xff]  }
 0xf80   :  { %6844 = vmatprep.subr.bf16.mxu1 %v12258_v30  ;;  %v12285_v30 = vld [vmem:[#allocation16 + $0x3a4] ss:$8 sps:$4 sm:$0xff]  }
 0xf82   :  { %7117 = vmatpush1.bf16.msra.mxu0 %v12235_v46  ;;  %v12288_v46 = vld [vmem:[#allocation16 + $0x2d4] ss:$8 sps:$4 sm:$0xff]  }
 0xf83   :  { %7118 = vmatprep.subr.bf16.mxu0 %v12243_v38  ;;  %6845 = vmatpush1.bf16.msra.mxu1 %v12256_v25  ;;  %v12291_v38 = vld [vmem:[#allocation16 + $0x3b4] ss:$8 sps:$4 sm:$0xff]   ;;  %v12286_v25 = vld [vmem:[#allocation16 + $0x2d0] ss:$8 sps:$4 sm:$0xff]  }
 0xf84   :  { %6846 = vmatprep.subr.bf16.mxu1 %v12264_v20  ;;  %v12289_v20 = vld [vmem:[#allocation16 + $0x3b0] ss:$8 sps:$4 sm:$0xff]  }
 0xf86   :  { %7119 = vmatpush1.bf16.msra.mxu0 %v12241_v29  ;;  %v12292_v29 = vld [vmem:[#allocation16 + $0x2e0] ss:$8 sps:$4 sm:$0xff]  }
 0xf87   :  { %7120 = vmatprep.subr.bf16.mxu0 %v12249_v49  ;;  %6847 = vmatpush1.bf16.msra.mxu1 %v12262_v17  ;;  %v12294_v49 = vld [vmem:[#allocation16 + $0x2e4] ss:$8 sps:$4 sm:$0xff]   ;;  %v12295_v17 = vld [vmem:[#allocation16 + $0x3c0] ss:$8 sps:$4 sm:$0xff]  }
 0xf88   :  { %6848 = vmatprep.subr.bf16.mxu1 %v12270_v61  ;;  %v12297_v61 = vld [vmem:[#allocation16 + $0x3c4] ss:$8 sps:$4 sm:$0xff]  }
 0xf8a   :  { %7121 = vmatpush1.bf16.msra.mxu0 %v12247_v13  ;;  %v12300_v13 = vld [vmem:[#allocation16 + $0x2f4] ss:$8 sps:$4 sm:$0xff]  }
 0xf8b   :  { %7122 = vmatprep.subr.bf16.mxu0 %v12255_v50  ;;  %6849 = vmatpush1.bf16.msra.mxu1 %v12268_v43  ;;  %v12303_v50 = vld [vmem:[#allocation16 + $0x3d4] ss:$8 sps:$4 sm:$0xff]   ;;  %v12298_v43 = vld [vmem:[#allocation16 + $0x2f0] ss:$8 sps:$4 sm:$0xff]  }
 0xf8c   :  { %6850 = vmatprep.subr.bf16.mxu1 %v12276_v33 }
 0xf8e   :  { %7123 = vmatpush1.bf16.msra.mxu0 %v12253_v26  ;;  %v12301_v26 = vld [vmem:[#allocation16 + $0x3d0] ss:$8 sps:$4 sm:$0xff]  }
 0xf8f   :  { %7124 = vmatprep.subr.bf16.mxu0 %v12261_v63  ;;  %6851 = vmatpush1.bf16.msra.mxu1 %v12274_v37  ;;  %v12306_v63 = vld [vmem:[#allocation16 + $0x3e4] ss:$8 sps:$4 sm:$0xff]  }
 0xf90   :  { %6852 = vmatprep.subr.bf16.mxu1 %v12282_v5 }
 0xf92   :  { %7125 = vmatpush1.bf16.msra.mxu0 %v12259_v10  ;;  %v12304_v10 = vld [vmem:[#allocation16 + $0x3e0] ss:$8 sps:$4 sm:$0xff]  }
 0xf93   :  { %7126 = vmatprep.subr.bf16.mxu0 %v12267_v27  ;;  %6853 = vmatpush1.bf16.msra.mxu1 %v12280_v32  ;;  %v12309_v27 = vld [vmem:[#allocation16 + $0x3f4] ss:$8 sps:$4 sm:$0xff]  }
 0xf94   :  { %6854 = vmatprep.subr.bf16.mxu1 %v12288_v46 }
 0xf96   :  { %7127 = vmatpush1.bf16.msra.mxu0 %v12265_v6  ;;  %v12307_v6 = vld [vmem:[#allocation16 + $0x3f0] ss:$8 sps:$4 sm:$0xff]  }
 0xf97   :  { %7128 = vmatprep.subr.bf16.mxu0 %v12273_v59  ;;  %6855 = vmatpush1.bf16.msra.mxu1 %v12286_v25  ;;  %v7291_v59 = vand.u32 127, %v15932_v8 }
 0xf98   :  { %6856 = vmatprep.subr.bf16.mxu1 %v12294_v49 }
 0xf99   :  { %vm7575_vm9 = vcmp.eq.s32.totalorder %v7291_v59, %v13330_v44  ;;  %v7193_v59 = vand.u32 127, %v15788_v55 }
 0xf9a   :  { %7129 = vmatpush1.bf16.msra.mxu0 %v12271_v40  ;;  %v7298_v40 = vand.u32 127, %v15933_v2 }
 0xf9b   :  { %7130 = vmatprep.subr.bf16.mxu0 %v12279_v48  ;;  %6857 = vmatpush1.bf16.msra.mxu1 %v12292_v29  ;;  %vm7561_vm7 = vcmp.eq.s32.totalorder %v7193_v59, %v13330_v44 }
 0xf9c   :  { %6858 = vmatprep.subr.bf16.mxu1 %v12300_v13  ;;  %vm7576_vm13 = vcmp.eq.s32.totalorder %v7298_v40, %v13330_v44  ;;  %v7200_v40 = vand.u32 127, %v15789_v4 }
 0xf9d   :  { %vm11468_vm2 = vmpackc.low %vm7576_vm13, %vm7575_vm9 }
 0xf9e   :  { %7131 = vmatpush1.bf16.msra.mxu0 %v12277_v19  ;;  %vm7562_vm8 = vcmp.eq.s32.totalorder %v7200_v40, %v13330_v44 }
 0xf9f   :  { %7132 = vmatprep.subr.bf16.mxu0 %v12285_v30  ;;  %6859 = vmatpush1.bf16.msra.mxu1 %v12298_v43  ;;  %vm11474_vm10 = vmpackc.low %vm7562_vm8, %vm7561_vm7 }
 0xfa0   :  { %11469 = vmatprep.subr.msk.bf16.mxu1 %vm11468_vm2, %v15740_v21 }
 0xfa2   :  { %7133 = vmatpush1.bf16.msra.mxu0 %v12283_v15 }
 0xfa3   :  { %7134 = vmatprep.subr.bf16.mxu0 %v12291_v38 }
 0xfa6   :  { %7135 = vmatpush1.bf16.msra.mxu0 %v12289_v20 }
 0xfa7   :  { %7136 = vmatprep.subr.bf16.mxu0 %v12297_v61 }
 0xfaa   :  { %7137 = vmatpush1.bf16.msra.mxu0 %v12295_v17 }
 0xfab   :  { %7138 = vmatprep.subr.bf16.mxu0 %v12303_v50 }
 0xfae   :  { %7139 = vmatpush1.bf16.msra.mxu0 %v12301_v26 }
 0xfaf   :  { %7140 = vmatprep.subr.bf16.mxu0 %v12306_v63  ;;  %v7179_v63 = vand.u32 127, %v13322_v41 }
 0xfb1   :  { %vm7559_vm1 = vcmp.eq.s32.totalorder %v7179_v63, %v13330_v44 }
 0xfb2   :  { %7141 = vmatpush1.bf16.msra.mxu0 %v12304_v10  ;;  %v7186_v10 = vand.u32 127, %v13358_v14 }
 0xfb3   :  { %7142 = vmatprep.subr.bf16.mxu0 %v12309_v27  ;;  %v7305_v27 = vand.u32 127, %v15934_v31  ;;  %v7319_v31 = vand.u32 127, %v15948_v11  ;;  %v7333_v11 = vand.u32 127, %v15952_v51  ;;  %v7347_v51 = vand.u32 127, %v15956_v60 }
 0xfb4   :  { %vm7560_vm5 = vcmp.eq.s32.totalorder %v7186_v10, %v13330_v44  ;;  %v7361_v60 = vand.u32 127, %v15960_v62  ;;  %v7375_v62 = vand.u32 127, %v15964_v42  ;;  %v7277_v42 = vand.u32 127, %v15970_v53 }
 0xfb5   :  { %vm11470_vm14 = vmpackc.low %vm7560_vm5, %vm7559_vm1  ;;  %vm7577_vm11 = vcmp.eq.s32.totalorder %v7305_v27, %v13330_v44  ;;  %vm7579_vm0 = vcmp.eq.s32.totalorder %v7319_v31, %v13330_v44  ;;  %vm7581_vm1 = vcmp.eq.s32.totalorder %v7333_v11, %v13330_v44  ;;  %vm7583_vm7 = vcmp.eq.s32.totalorder %v7347_v51, %v13330_v44 }
 0xfb6   :  { %7143 = vmatpush1.bf16.msra.mxu0 %v12307_v6  ;;  %v7312_v6 = vand.u32 127, %v15935_v16  ;;  %v7326_v16 = vand.u32 127, %v15949_v22  ;;  %v7340_v22 = vand.u32 127, %v15953_v36  ;;  %v7354_v36 = vand.u32 127, %v15957_v23 }
 0xfb7   :  { %11501 = vmatprep.subr.msk.bf16.mxu0 %vm11468_vm2, %v15740_v21  ;;  %v7368_v23 = vand.u32 127, %v15961_v9  ;;  %v7382_v9 = vand.u32 127, %v15965_v34  ;;  %v7284_v34 = vand.u32 127, %v15971_v1 }
 0xfb8   :  { %vm7578_vm4 = vcmp.eq.s32.totalorder %v7312_v6, %v13330_v44  ;;  %vm7580_vm3 = vcmp.eq.s32.totalorder %v7326_v16, %v13330_v44  ;;  %vm7582_vm5 = vcmp.eq.s32.totalorder %v7340_v22, %v13330_v44  ;;  %vm7584_vm8 = vcmp.eq.s32.totalorder %v7354_v36, %v13330_v44 }
 0xfb9   :  { %vm11472_vm15 = vmpackc.low %vm7578_vm4, %vm7577_vm11 }
 0xfba   :  { %vm11476_vm12 = vmpackc.low %vm7580_vm3, %vm7579_vm0 }
0x1034   :  { %v6580_v33 = vpop.f32.mrb[24].mxu1 }
0x1035   :  { %v6582_v48 = vpop.f32.mrb[25].mxu1 }
0x1036   :  { %v6584_v37 = vpop.f32.mrb[26].mxu1 }
0x1037   :  { %v6585_v19 = vpop.f32.mrb[27].mxu1  ;;  %v7221_v37 = vand.u32 127, %v15954_v57 }
0x1038   :  { %v7228_v19 = vand.u32 127, %v15955_v18 }
0x1039   :  { %vm7565_vm11 = vcmp.eq.s32.totalorder %v7221_v37, %v13330_v44 }
0x103a   :  { %vm7566_vm4 = vcmp.eq.s32.totalorder %v7228_v19, %v13330_v44 }
0x103c   :  { %v6379_v32 = vpop.f32.mrb[76].mxu0 }
0x103d   :  { %v14834_v5 = vadd.f32 %v6580_v33, %v6379_v32  ;;  %v6381_v15 = vpop.f32.mrb[77].mxu0  ;;  %v7207_v33 = vand.u32 127, %v15950_v3  ;;  %v7235_v32 = vand.u32 127, %v15958_v52 }
0x103e   :  { %v14836_v8 = vadd.f32 %v6582_v48, %v6381_v15  ;;  %v6383_v2 = vpop.f32.mrb[78].mxu0  ;;  %v7214_v48 = vand.u32 127, %v15951_v47  ;;  %v7242_v15 = vand.u32 127, %v15959_v58 }
0x103f   :  { %v6384_v30 = vpop.f32.mrb[79].mxu0  ;;  %vm7563_vm9 = vcmp.eq.s32.totalorder %v7207_v33, %v13330_v44  ;;  %vm7567_vm0 = vcmp.eq.s32.totalorder %v7235_v32, %v13330_v44  ;;  %v7249_v2 = vand.u32 127, %v15962_v35 }
0x1040   :  { %vm7564_vm13 = vcmp.eq.s32.totalorder %v7214_v48, %v13330_v44  ;;  %vm7568_vm3 = vcmp.eq.s32.totalorder %v7242_v15, %v13330_v44  ;;  %v7256_v30 = vand.u32 127, %v15963_v24 }
0x1041   :  { %vm11478_vm2 = vmpackc.low %vm7564_vm13, %vm7563_vm9  ;;  %vm7585_vm9 = vcmp.eq.s32.totalorder %v7361_v60, %v13330_v44  ;;  %vm7586_vm13 = vcmp.eq.s32.totalorder %v7368_v23, %v13330_v44 }
0x1044   :  { %v6626_v46 = vpop.f32.mrb[80].mxu0 }
0x1045   :  { %v6628_v38 = vpop.f32.mrb[81].mxu0  ;;  %v6633_v29 = vpack.c.bf16 %v6626_v46, %v6626_v46  ;;  %v7263_v46 = vand.u32 127, %v15966_v7 }
0x1046   :  { %v6634_v25 = vpack.c.bf16 %v6628_v38, %v6628_v38  ;;  %v6630_v20 = vpop.f32.mrb[82].mxu0  ;;  %v7270_v38 = vand.u32 127, %v15967_v28 }
0x1047   :  { %v6631_v49 = vpop.f32.mrb[83].mxu0  ;;  %v7396_v20 = vand.u32 127, %v15969_v12 }
0x1048   :  { %6860 = vmatprep.mubr.bf16.mxu1 %v6634_v25  ;;  %v7389_v25 = vand.u32 127, %v15968_v54  ;;  %v14927_v54 = vand.u32 127, %v13922_v39 }
0x1049   :  { %6861 = vmatmul.mubr.bf16.vlgmr.msra.gmra.mrb[28].mxu1 %v6633_v29 }
0x104a   :  { %11471 = vmatpush3.bf16.msk.msra.mxu1 %vm11470_vm14, %v15740_v21 }
0x104b   :  { %11473 = vmatprep.subr.msk.bf16.mxu1 %vm11472_vm15, %v15740_v21 }
0x104c   :  { %v6910_v17 = vpop.f32.mrb[84].mxu0 }
0x104d   :  { %v6912_v61 = vpop.f32.mrb[85].mxu0  ;;  %v6917_v43 = vpack.c.bf16 %v6910_v17, %v6910_v17 }
0x104e   :  { %v6918_v13 = vpack.c.bf16 %v6912_v61, %v6912_v61  ;;  %v6914_v50 = vpop.f32.mrb[86].mxu0  ;;  %11475 = vmatpush3.bf16.msk.msra.mxu1 %vm11474_vm10, %v15740_v21 }
0x104f   :  { %v6915_v26 = vpop.f32.mrb[87].mxu0  ;;  %11477 = vmatprep.subr.msk.bf16.mxu1 %vm11476_vm12, %v15740_v21 }
0x1050   :  { %7144 = vmatprep.mubr.bf16.mxu0 %v6918_v13  ;;  %v7155_v13 = vld [vmem:[#allocation18] sm:$0x3]  ;;  %v15973_v26 = vld [vmem:[#allocation66_spill] sm:$0xff] }
0x1051   :  { %7145 = vmatmul.mubr.bf16.vlgmr.msra.gmra.mrb[88].mxu0 %v6917_v43  ;;  %v7160_v50 = vrot.slane %v7155_v13, %v13781_v0  ;;  %v7164_v63 = vrot.slane %v7155_v13, %v15973_v26 }
0x1052   :  { %11503 = vmatpush3.bf16.msk.msra.mxu0 %vm11470_vm14, %v15740_v21  ;;  %11479 = vmatpush3.bf16.msk.msra.mxu1 %vm11478_vm2, %v15740_v21  ;;  %vm11480_vm14 = vmpackc.low %vm7582_vm5, %vm7581_vm1  ;;  %vm7569_vm1 = vcmp.eq.s32.totalorder %v7249_v2, %v13330_v44  ;;  %vm7570_vm5 = vcmp.eq.s32.totalorder %v7256_v30, %v13330_v44 }
0x1053   :  { %11505 = vmatprep.subr.msk.bf16.mxu0 %vm11472_vm15, %v15740_v21  ;;  %11481 = vmatprep.subr.msk.bf16.mxu1 %vm11480_vm14, %v15740_v21  ;;  %vm11482_vm15 = vmpackc.low %vm7566_vm4, %vm7565_vm11  ;;  %vm7587_vm11 = vcmp.eq.s32.totalorder %v7375_v62, %v13330_v44  ;;  %vm7588_vm4 = vcmp.eq.s32.totalorder %v7382_v9, %v13330_v44 }
0x1056   :  { %11507 = vmatpush3.bf16.msk.msra.mxu0 %vm11474_vm10, %v15740_v21  ;;  %11483 = vmatpush3.bf16.msk.msra.mxu1 %vm11482_vm15, %v15740_v21  ;;  %vm11484_vm10 = vmpackc.low %vm7584_vm8, %vm7583_vm7  ;;  %vm7571_vm7 = vcmp.eq.s32.totalorder %v7263_v46, %v13330_v44  ;;  %vm7572_vm8 = vcmp.eq.s32.totalorder %v7270_v38, %v13330_v44 }
0x1057   :  { %11509 = vmatprep.subr.msk.bf16.mxu0 %vm11476_vm12, %v15740_v21  ;;  %11485 = vmatprep.subr.msk.bf16.mxu1 %vm11484_vm10, %v15740_v21  ;;  %vm11486_vm12 = vmpackc.low %vm7568_vm3, %vm7567_vm0  ;;  %vm7590_vm0 = vcmp.eq.s32.totalorder %v7396_v20, %v13330_v44 }
0x1058   :  { %vm11494_vm3 = vmpackc.low %vm7572_vm8, %vm7571_vm7  ;;  %vm7684_vm7 = vcmp.eq.s32.totalorder %v14927_v54, %v15788_v55  ;;  %vm7686_vm8 = vcmp.eq.s32.totalorder %v14927_v54, %v15789_v4 }
0x105a   :  { %11511 = vmatpush3.bf16.msk.msra.mxu0 %vm11478_vm2, %v15740_v21  ;;  %11487 = vmatpush3.bf16.msk.msra.mxu1 %vm11486_vm12, %v15740_v21  ;;  %vm11488_vm2 = vmpackc.low %vm7586_vm13, %vm7585_vm9  ;;  %vm7574_vm9 = vcmp.eq.s32.totalorder %v7284_v34, %v13330_v44 }
0x105b   :  { %11513 = vmatprep.subr.msk.bf16.mxu0 %vm11480_vm14, %v15740_v21  ;;  %11489 = vmatprep.subr.msk.bf16.mxu1 %vm11488_vm2, %v15740_v21  ;;  %vm11490_vm14 = vmpackc.low %vm7570_vm5, %vm7569_vm1  ;;  %vm7680_vm1 = vcmp.eq.s32.totalorder %v14927_v54, %v13322_v41  ;;  %vm7682_vm5 = vcmp.eq.s32.totalorder %v14927_v54, %v13358_v14 }
0x105e   :  { %11515 = vmatpush3.bf16.msk.msra.mxu0 %vm11482_vm15, %v15740_v21  ;;  %11491 = vmatpush3.bf16.msk.msra.mxu1 %vm11490_vm14, %v15740_v21  ;;  %vm11492_vm15 = vmpackc.low %vm7588_vm4, %vm7587_vm11 }
0x105f   :  { %11517 = vmatprep.subr.msk.bf16.mxu0 %vm11484_vm10, %v15740_v21  ;;  %vm7589_vm10 = vcmp.eq.s32.totalorder %v7389_v25, %v13330_v44  ;;  %11493 = vmatprep.subr.msk.bf16.mxu1 %vm11492_vm15, %v15740_v21 }
0x1060   :  { %vm11496_vm13 = vmpackc.low %vm7590_vm0, %vm7589_vm10 }
0x1061   :  { %vm11536_vm0 = vmpackc.low %vm7686_vm8, %vm7684_vm7  ;;  %vm7691_vm7 = vcmp.eq.s32.totalorder %v13330_v44, %v15954_v57  ;;  %vm7693_vm8 = vcmp.eq.s32.totalorder %v13330_v44, %v15955_v18 }
0x1062   :  { %11519 = vmatpush3.bf16.msk.msra.mxu0 %vm11486_vm12, %v15740_v21  ;;  %vm7573_vm12 = vcmp.eq.s32.totalorder %v7277_v42, %v13330_v44  ;;  %11495 = vmatpush3.bf16.msk.msra.mxu1 %vm11494_vm3, %v15740_v21 }
0x1063   :  { %11521 = vmatprep.subr.msk.bf16.mxu0 %vm11488_vm2, %v15740_v21  ;;  %11497 = vmatprep.subr.msk.bf16.mxu1 %vm11496_vm13, %v15740_v21  ;;  %vm11498_vm2 = vmpackc.low %vm7574_vm9, %vm7573_vm12  ;;  %vm7685_vm12 = vcmp.eq.s32.totalorder %v13330_v44, %v15789_v4 }
0x1066   :  { %11523 = vmatpush3.bf16.msk.msra.mxu0 %vm11490_vm14, %v15740_v21  ;;  %11499 = vmatpush3.bf16.msk.msra.mxu1 %vm11498_vm2, %v15740_v21  ;;  %vm11532_vm14 = vmpackc.low %vm7682_vm5, %vm7680_vm1  ;;  %vm7687_vm5 = vcmp.eq.s32.totalorder %v13330_v44, %v15950_v3 }
0x1067   :  { %11525 = vmatprep.subr.msk.bf16.mxu0 %vm11492_vm15, %v15740_v21  ;;  %11533 = vmatprep.subr.msk.bf16.mxu1 %vm11532_vm14, %v15740_v21  ;;  %vm7679_vm15 = vcmp.eq.s32.totalorder %v13330_v44, %v13322_v41 }
0x106a   :  { %11527 = vmatpush3.bf16.msk.msra.mxu0 %vm11494_vm3, %v15740_v21  ;;  %vm7683_vm3 = vcmp.eq.s32.totalorder %v13330_v44, %v15788_v55 }
0x106b   :  { %11529 = vmatprep.subr.msk.bf16.mxu0 %vm11496_vm13, %v15740_v21  ;;  %vm11538_vm9 = vmpackc.low %vm7685_vm12, %vm7683_vm3  ;;  %vm7688_vm13 = vcmp.eq.s32.totalorder %v14927_v54, %v15950_v3  ;;  %vm7698_vm3 = vcmp.eq.s32.totalorder %v14927_v54, %v15959_v58 }
0x106e   :  { %11531 = vmatpush3.bf16.msk.msra.mxu0 %vm11498_vm2, %v15740_v21  ;;  %vm7690_vm2 = vcmp.eq.s32.totalorder %v14927_v54, %v15951_v47 }
0x106f   :  { %11565 = vmatprep.subr.msk.bf16.mxu0 %vm11532_vm14, %v15740_v21  ;;  %vm11540_vm1 = vmpackc.low %vm7690_vm2, %vm7688_vm13  ;;  %vm7689_vm14 = vcmp.eq.s32.totalorder %v13330_v44, %v15951_v47  ;;  %vm7697_vm13 = vcmp.eq.s32.totalorder %v13330_v44, %v15959_v58 }
0x111c   :  { %v6862_v12 = vpop.f32.mrb[28].mxu1 }
0x111d   :  { %v6869_v29 = vadd.f32 %v6862_v12, %v14834_v5  ;;  %v6864_v39 = vpop.f32.mrb[29].mxu1 }
0x111e   :  { %v6870_v49 = vadd.f32 %v6864_v39, %v14836_v8  ;;  %v6866_v17 = vpop.f32.mrb[30].mxu1 }
0x111f   :  { %v6867_v61 = vpop.f32.mrb[31].mxu1 }
0x1124   :  { %v7146_v43 = vpop.f32.mrb[88].mxu0 }
0x1125   :  { %v7153_v10 = vadd.f32 %v7146_v43, %v6869_v29  ;;  %v7148_v27 = vpop.f32.mrb[89].mxu0 }
0x1126   :  { %v7154_v6 = vadd.f32 %v7148_v27, %v6870_v49  ;;  %v7150_v59 = vpop.f32.mrb[90].mxu0  ;;  %v12327_v27 = vld [vmem:[%s15444_s14 + $0x34] ss:$8 sps:$4 sm:$0xff]  }
0x1127   :  { %v7167_v40 = vadd.f32 %v7160_v50, %v7153_v10  ;;  %v7151_v31 = vpop.f32.mrb[91].mxu0  ;;  %v12319_v10 = vld [vmem:[%s15444_s14 + $0x20] ss:$8 sps:$4 sm:$0xff]   ;;  %v12333_v59 = vld [vmem:[%s15444_s14 + $0x44] ss:$8 sps:$4 sm:$0xff]  }
0x1128   :  { %v7168_v16 = vadd.f32 %v7164_v63, %v7154_v6  ;;  %v12321_v63 = vld [vmem:[%s15444_s14 + $0x24] ss:$8 sps:$4 sm:$0xff]   ;;  %v12325_v6 = vld [vmem:[%s15444_s14 + $0x30] ss:$8 sps:$4 sm:$0xff]   ;;  %v12339_v31 = vld [vmem:[%s15444_s14 + $0x54] ss:$8 sps:$4 sm:$0xff]  }
0x1129   :  { %vm7169_vm11 = vcmp.ge.f32.partialorder %v7167_v40, 0.0  ;;  %v7171_v5 = vmul.f32 0.2, %v7167_v40 }
0x112a   :  { %vm7170_vm4 = vcmp.ge.f32.partialorder %v7168_v16, 0.0  ;;  %v7172_v33 = vmul.f32 0.2, %v7168_v16 }
0x112b   :  { %v14941_v8 = vsel %vm7169_vm11, %v7167_v40, %v7171_v5  ;;  %vm11542_vm11 = vmpackc.low %vm7689_vm14, %vm7687_vm5  ;;  %vm7702_vm5 = vcmp.eq.s32.totalorder %v14927_v54, %v15963_v24  ;;  %v12331_v40 = vld [vmem:[%s15444_s14 + $0x40] ss:$8 sps:$4 sm:$0xff]   ;;  %v12345_v5 = vld [vmem:[%s15444_s14 + $0x64] ss:$8 sps:$4 sm:$0xff]  }
0x112c   :  { %v7775_v48 = vsel %vm6022_vm6, %v14941_v8, 0.0  ;;  %v7859_v11 = vmul.f32 %v14941_v8, %v14941_v8  ;;  %v14947_v22 = vsel %vm7170_vm4, %v7168_v16, %v7172_v33  ;;  %vm7692_vm4 = vcmp.eq.s32.totalorder %v14927_v54, %v15954_v57  ;;  %v12337_v16 = vld [vmem:[%s15444_s14 + $0x50] ss:$8 sps:$4 sm:$0xff]   ;;  %v12343_v33 = vld [vmem:[%s15444_s14 + $0x60] ss:$8 sps:$4 sm:$0xff]  }
0x112d   :  { %v7776_v37 = vrot.slane %v7775_v48, 4  ;;  %v7860_v19 = vmul.f32 %v14947_v22, %v14947_v22  ;;  %v7782_v51 = vsel %vm6022_vm6, %v14947_v22, 0.0 }
0x112e   :  { %v7861_v36 = vsel %vm6022_vm6, %v7859_v11, 0.0  ;;  %v7783_v32 = vrot.slane %v7782_v51, 4  ;;  %v12349_v11 = vld [vmem:[%s15444_s14 + $0x70] ss:$8 sps:$4 sm:$0xff]  }
0x112f   :  { %v7777_v15 = vadd.f32 %v7776_v37, %v7775_v48  ;;  %v7862_v60 = vrot.slane %v7861_v36, 4  ;;  %v7868_v23 = vsel %vm6022_vm6, %v7860_v19, 0.0  ;;  %vm7681_vm6 = vcmp.eq.s32.totalorder %v13330_v44, %v13358_v14  ;;  %v12351_v48 = vld [vmem:[%s15444_s14 + $0x74] ss:$8 sps:$4 sm:$0xff]   ;;  %v12357_v37 = vld [vmem:[%s15444_s14 + $0x84] ss:$8 sps:$4 sm:$0xff]  }
0x1130   :  { %v7784_v2 = vadd.f32 %v7783_v32, %v7782_v51  ;;  %v7869_v30 = vrot.slane %v7868_v23, 4  ;;  %vm11534_vm10 = vmpackc.low %vm7681_vm6, %vm7679_vm15  ;;  %vm7694_vm15 = vcmp.eq.s32.totalorder %v14927_v54, %v15955_v18  ;;  %v12355_v19 = vld [vmem:[%s15444_s14 + $0x80] ss:$8 sps:$4 sm:$0xff]   ;;  %v12363_v51 = vld [vmem:[%s15444_s14 + $0x94] ss:$8 sps:$4 sm:$0xff]  }
0x1131   :  { %v7778_v62 = vrot.slane %v7777_v15, 2  ;;  %v7863_v9 = vadd.f32 %v7862_v60, %v7861_v36  ;;  %vm11544_vm6 = vmpackc.low %vm7694_vm15, %vm7692_vm4  ;;  %vm7701_vm4 = vcmp.eq.s32.totalorder %v13330_v44, %v15963_v24  ;;  %v12361_v36 = vld [vmem:[%s15444_s14 + $0x90] ss:$8 sps:$4 sm:$0xff]   ;;  %v12369_v32 = vld [vmem:[%s15444_s14 + $0xa4] ss:$8 sps:$4 sm:$0xff]  }
0x1132   :  { %v7785_v46 = vrot.slane %v7784_v2, 2  ;;  %v7870_v38 = vadd.f32 %v7869_v30, %v7868_v23  ;;  %v12375_v60 = vld [vmem:[%s15444_s14 + $0xb4] ss:$8 sps:$4 sm:$0xff]   ;;  %v12373_v23 = vld [vmem:[%s15444_s14 + $0xb0] ss:$8 sps:$4 sm:$0xff]  }
0x1133   :  { %v7779_v25 = vadd.f32 %v7778_v62, %v7777_v15  ;;  %v7864_v20 = vrot.slane %v7863_v9, 2  ;;  %v12367_v15 = vld [vmem:[%s15444_s14 + $0xa0] ss:$8 sps:$4 sm:$0xff]   ;;  %v12387_v62 = vld [vmem:[%s15444_s14 + $0xd4] ss:$8 sps:$4 sm:$0xff]  }
0x1134   :  { %v7786_v42 = vadd.f32 %v7785_v46, %v7784_v2  ;;  %v7871_v34 = vrot.slane %v7870_v38, 2  ;;  %v12381_v2 = vld [vmem:[%s15444_s14 + $0xc4] ss:$8 sps:$4 sm:$0xff]   ;;  %v12379_v30 = vld [vmem:[%s15444_s14 + $0xc0] ss:$8 sps:$4 sm:$0xff]  }
0x1135   :  { %v7780_v12 = vrot.slane %v7779_v25, 1  ;;  %v7865_v29 = vadd.f32 %v7864_v20, %v7863_v9  ;;  %v12385_v9 = vld [vmem:[%s15444_s14 + $0xd0] ss:$8 sps:$4 sm:$0xff]   ;;  %v12393_v46 = vld [vmem:[%s15444_s14 + $0xe4] ss:$8 sps:$4 sm:$0xff]  }
0x1136   :  { %v7787_v39 = vrot.slane %v7786_v42, 1  ;;  %v7872_v49 = vadd.f32 %v7871_v34, %v7870_v38  ;;  %v12391_v38 = vld [vmem:[%s15444_s14 + $0xe0] ss:$8 sps:$4 sm:$0xff]  }
0x1137   :  { %v7866_v17 = vrot.slane %v7865_v29, 1  ;;  %v7781_v50 = vadd.f32 %v7780_v12, %v7779_v25 }
0x1138   :  { %v7788_v61 = vadd.f32 %v7787_v39, %v7786_v42  ;;  %v7873_v13 = vrot.slane %v7872_v49, 1 }
0x1139   :  { %v7867_v41 = vadd.f32 %v7866_v17, %v7865_v29 }
0x113a   :  { %7853 = vmatprep.mubr.f32.mxu1 %v7788_v61  ;;  %v7874_v43 = vadd.f32 %v7873_v13, %v7872_v49 }
0x113b   :  { %7854 = vmatmul.mubr.f32.vlgmr.msra.gmra.mrb[32].mxu1 %v7781_v50 }
0x113c   :  { %7939 = vmatprep.mubr.f32.mxu0 %v7874_v43  ;;  %11535 = vmatpush1.bf16.msk.msra.mxu1 %vm11534_vm10, %v15740_v21 }
0x113d   :  { %7940 = vmatmul.mubr.f32.vlgmr.msra.gmra.mrb[92].mxu0 %v7867_v41  ;;  %11537 = vmatprep.subr.msk.bf16.mxu1 %vm11536_vm0, %v15740_v21 }
0x113e   :  { %11567 = vmatpush1.bf16.msk.msra.mxu0 %vm11534_vm10, %v15740_v21  ;;  %8016 = vmatprep.mubr.f32.mxu1 %v15917_v45  ;;  %vm11546_vm10 = vmpackc.low %vm7693_vm8, %vm7691_vm7  ;;  %vm7706_vm7 = vcmp.eq.s32.totalorder %v14927_v54, %v15967_v28  ;;  %vm7703_vm8 = vcmp.eq.s32.totalorder %v13330_v44, %v15966_v7 }
0x113f   :  { %11569 = vmatprep.subr.msk.bf16.mxu0 %vm11536_vm0, %v15740_v21  ;;  %8088 = vmatprep.mubr.f32.mxu0 %v15917_v45  ;;  %vm7696_vm0 = vcmp.eq.s32.totalorder %v14927_v54, %v15958_v52 }
0x1140   :  { %11539 = vmatpush1.bf16.msk.msra.mxu1 %vm11538_vm9, %v15740_v21  ;;  %vm11548_vm12 = vmpackc.low %vm7698_vm3, %vm7696_vm0  ;;  %vm7705_vm0 = vcmp.eq.s32.totalorder %v13330_v44, %v15967_v28  ;;  %vm7708_vm3 = vcmp.eq.s32.totalorder %v14927_v54, %v15970_v53 }
0x1141   :  { %11541 = vmatprep.subr.msk.bf16.mxu1 %vm11540_vm1, %v15740_v21 }
0x1142   :  { %11571 = vmatpush1.bf16.msk.msra.mxu0 %vm11538_vm9, %v15740_v21  ;;  %vm7695_vm9 = vcmp.eq.s32.totalorder %v13330_v44, %v15958_v52 }
0x1143   :  { %11573 = vmatprep.subr.msk.bf16.mxu0 %vm11540_vm1, %v15740_v21  ;;  %vm11550_vm2 = vmpackc.low %vm7697_vm13, %vm7695_vm9  ;;  %vm7700_vm1 = vcmp.eq.s32.totalorder %v14927_v54, %v15962_v35 }
0x1144   :  { %11543 = vmatpush1.bf16.msk.msra.mxu1 %vm11542_vm11, %v15740_v21  ;;  %vm11552_vm14 = vmpackc.low %vm7702_vm5, %vm7700_vm1  ;;  %vm7709_vm1 = vcmp.eq.s32.totalorder %v13330_v44, %v15971_v1 }
0x1145   :  { %11545 = vmatprep.subr.msk.bf16.mxu1 %vm11544_vm6, %v15740_v21  ;;  %vm11558_vm9 = vmpackc.low %vm7705_vm0, %vm7703_vm8  ;;  %vm12911_vm8 = vmmov 0  }
0x1146   :  { %11575 = vmatpush1.bf16.msk.msra.mxu0 %vm11542_vm11, %v15740_v21  ;;  %vm7699_vm11 = vcmp.eq.s32.totalorder %v13330_v44, %v15962_v35 }
0x1147   :  { %11577 = vmatprep.subr.msk.bf16.mxu0 %vm11544_vm6, %v15740_v21  ;;  %vm11554_vm15 = vmpackc.low %vm7701_vm4, %vm7699_vm11  ;;  %vm7704_vm6 = vcmp.eq.s32.totalorder %v14927_v54, %v15966_v7  ;;  %vm8118_vm11 = vcmask 31744  }
0x1148   :  { %11547 = vmatpush1.bf16.msk.msra.mxu1 %vm11546_vm10, %v15740_v21 }
0x1149   :  { %11549 = vmatprep.subr.msk.bf16.mxu1 %vm11548_vm12, %v15740_v21 }
0x114a   :  { %11579 = vmatpush1.bf16.msk.msra.mxu0 %vm11546_vm10, %v15740_v21  ;;  %vm11556_vm10 = vmpackc.low %vm7706_vm7, %vm7704_vm6 }
0x114b   :  { %11581 = vmatprep.subr.msk.bf16.mxu0 %vm11548_vm12, %v15740_v21  ;;  %vm7710_vm12 = vcmp.eq.s32.totalorder %v14927_v54, %v15971_v1  ;;  %v12315_v1 = vld [vmem:[%s15444_s14 + $0x14] ss:$8 sps:$4 sm:$0xff]   ;;  %v12313_v54 = vld [vmem:[%s15444_s14 + $0x10] ss:$8 sps:$4 sm:$0xff]  }
0x114c   :  { %11551 = vmatpush1.bf16.msk.msra.mxu1 %vm11550_vm2, %v15740_v21  ;;  %vm11560_vm13 = vmpackc.low %vm7710_vm12, %vm7708_vm3 }
0x114d   :  { %11553 = vmatprep.subr.msk.bf16.mxu1 %vm11552_vm14, %v15740_v21 }
0x114e   :  { %11583 = vmatpush1.bf16.msk.msra.mxu0 %vm11550_vm2, %v15740_v21  ;;  %vm7707_vm2 = vcmp.eq.s32.totalorder %v13330_v44, %v15970_v53  ;;  %v12312_v53 = vld [vmem:[%s15444_s14 + $0x4] ss:$8 sps:$4 sm:$0xff]  }
0x114f   :  { %11585 = vmatprep.subr.msk.bf16.mxu0 %vm11552_vm14, %v15740_v21  ;;  %vm11562_vm5 = vmpackc.low %vm7709_vm1, %vm7707_vm2  ;;  %vm8122_vm14 = vcmask 1041408  }
0x1150   :  { %11555 = vmatpush1.bf16.msk.msra.mxu1 %vm11554_vm15, %v15740_v21 }
0x1151   :  { %11557 = vmatprep.subr.msk.bf16.mxu1 %vm11556_vm10, %v15740_v21 }
0x1152   :  { %11587 = vmatpush1.bf16.msk.msra.mxu0 %vm11554_vm15, %v15740_v21 }
0x1153   :  { %11589 = vmatprep.subr.msk.bf16.mxu0 %vm11556_vm10, %v15740_v21 }
0x1154   :  { %11559 = vmatpush1.bf16.msk.msra.mxu1 %vm11558_vm9, %v15740_v21 }
0x1155   :  { %11561 = vmatprep.subr.msk.bf16.mxu1 %vm11560_vm13, %v15740_v21 }
0x1156   :  { %11591 = vmatpush1.bf16.msk.msra.mxu0 %vm11558_vm9, %v15740_v21 }
0x1157   :  { %11593 = vmatprep.subr.msk.bf16.mxu0 %vm11560_vm13, %v15740_v21 }
0x1158   :  { %11563 = vmatpush1.bf16.msk.msra.mxu1 %vm11562_vm5, %v15740_v21 }
0x115a   :  { %11595 = vmatpush1.bf16.msk.msra.mxu0 %vm11562_vm5, %v15740_v21  ;;  %v12310_v21 = vld [vmem:[%s15444_s14] ss:$8 sps:$4 sm:$0xff]  }
0x115b   :  { %8646 = vmatprep.subr.bf16.mxu0 %v12312_v53  ;;  %v12358_v53 = vld [vmem:[%s15444_s14 + $0x170] ss:$8 sps:$4 sm:$0xff]  }
0x120e   :  { %v11057_v14 = vpop.f32.mrb[32].mxu1 }
0x120f   :  { %v11058_v55 = vpop.f32.mrb[33].mxu1 }
0x1210   :  { %v11059_v4 = vadd.f32 %v11058_v55, %v11057_v14  ;;  %v11092_v3 = vpop.f32.mrb[92].mxu0  ;;  %v8117_v55 = vld [vmem:[#allocation19] sm:$0x1] }
0x1211   :  { %v11093_v47 = vpop.f32.mrb[93].mxu0 }
0x1212   :  { %v7945_v57 = vmul.f32 0.125, %v11059_v4  ;;  %v11094_v44 = vadd.f32 %v11093_v47, %v11092_v3  ;;  %v12316_v4 = vld [vmem:[%s15444_s14 + $0x100] ss:$8 sps:$4 sm:$0xff]   ;;  %v12324_v3 = vld [vmem:[%s15444_s14 + $0x114] ss:$8 sps:$4 sm:$0xff]  }
0x1213   :  { %v12322_v47 = vld [vmem:[%s15444_s14 + $0x110] ss:$8 sps:$4 sm:$0xff]  }
0x1214   :  { %v7947_v18 = vmul.f32 %v7945_v57, %v7945_v57  ;;  %v7946_v52 = vmul.f32 0.125, %v11094_v44  ;;  %v12336_v44 = vld [vmem:[%s15444_s14 + $0x134] ss:$8 sps:$4 sm:$0xff]  }
0x1216   :  { %v7948_v58 = vsub.f32 %v7946_v52, %v7947_v18  ;;  %v12334_v18 = vld [vmem:[%s15444_s14 + $0x130] ss:$8 sps:$4 sm:$0xff]   ;;  %v12342_v52 = vld [vmem:[%s15444_s14 + $0x144] ss:$8 sps:$4 sm:$0xff]  }
0x1218   :  { %v7949_v35 = vmax.f32 %v7948_v58, 0.0  ;;  %v12340_v58 = vld [vmem:[%s15444_s14 + $0x140] ss:$8 sps:$4 sm:$0xff]  }
0x121a   :  { %v7950_v24 = vadd.f32 0.8, %v7949_v35  ;;  %v12348_v35 = vld [vmem:[%s15444_s14 + $0x154] ss:$8 sps:$4 sm:$0xff]  }
0x121c   :  { %12500 = vrsqrt.f32 %v7950_v24  ;;  %v12346_v24 = vld [vmem:[%s15444_s14 + $0x150] ss:$8 sps:$4 sm:$0xff]  }
0x1226   :  { %v12501_v7 = vpop.eup %12500 }
0x1227   :  { %8017 = vmatmul.mubr.f32.vlgmr.msra.gmra.mrb[34].mxu1 %v12501_v7  ;;  %v8023_v28 = vmul.f32 %v12501_v7, %v7945_v57  ;;  %v12328_v57 = vld [vmem:[%s15444_s14 + $0x120] ss:$8 sps:$4 sm:$0xff]   ;;  %v12354_v7 = vld [vmem:[%s15444_s14 + $0x164] ss:$8 sps:$4 sm:$0xff]  }
0x1228   :  { %8161 = vmatprep.mubr.bf16.mxu1 %v15779_v56 }
0x1229   :  { %8089 = vmatmul.mubr.f32.vlgmr.msra.gmra.mrb[94].mxu0 %v8023_v28  ;;  %v12352_v28 = vld [vmem:[%s15444_s14 + $0x160] ss:$8 sps:$4 sm:$0xff]  }
0x122a   :  { %8647 = vmatpush1.bf16.msra.mxu0 %v12310_v21  ;;  %v12360_v21 = vld [vmem:[%s15444_s14 + $0x174] ss:$8 sps:$4 sm:$0xff]  }
0x122b   :  { %8648 = vmatprep.subr.bf16.mxu0 %v12315_v1  ;;  %v12366_v1 = vld [vmem:[%s15444_s14 + $0x184] ss:$8 sps:$4 sm:$0xff]  }
0x122e   :  { %8649 = vmatpush1.bf16.msra.mxu0 %v12313_v54  ;;  %v12364_v54 = vld [vmem:[%s15444_s14 + $0x180] ss:$8 sps:$4 sm:$0xff]  }
0x122f   :  { %8650 = vmatprep.subr.bf16.mxu0 %v12321_v63  ;;  %v12372_v63 = vld [vmem:[%s15444_s14 + $0x194] ss:$8 sps:$4 sm:$0xff]  }
0x1232   :  { %8651 = vmatpush1.bf16.msra.mxu0 %v12319_v10  ;;  %v12370_v10 = vld [vmem:[%s15444_s14 + $0x190] ss:$8 sps:$4 sm:$0xff]  }
0x1233   :  { %8652 = vmatprep.subr.bf16.mxu0 %v12327_v27  ;;  %v12378_v27 = vld [vmem:[%s15444_s14 + $0x1a4] ss:$8 sps:$4 sm:$0xff]  }
0x1236   :  { %8653 = vmatpush1.bf16.msra.mxu0 %v12325_v6  ;;  %v12376_v6 = vld [vmem:[%s15444_s14 + $0x1a0] ss:$8 sps:$4 sm:$0xff]  }
0x1237   :  { %8654 = vmatprep.subr.bf16.mxu0 %v12333_v59  ;;  %v12384_v59 = vld [vmem:[%s15444_s14 + $0x1b4] ss:$8 sps:$4 sm:$0xff]  }
0x123a   :  { %8655 = vmatpush1.bf16.msra.mxu0 %v12331_v40  ;;  %v12382_v40 = vld [vmem:[%s15444_s14 + $0x1b0] ss:$8 sps:$4 sm:$0xff]  }
0x123b   :  { %8656 = vmatprep.subr.bf16.mxu0 %v12339_v31  ;;  %v12390_v31 = vld [vmem:[%s15444_s14 + $0x1c4] ss:$8 sps:$4 sm:$0xff]  }
0x123e   :  { %8657 = vmatpush1.bf16.msra.mxu0 %v12337_v16  ;;  %v12388_v16 = vld [vmem:[%s15444_s14 + $0x1c0] ss:$8 sps:$4 sm:$0xff]  }
0x123f   :  { %8658 = vmatprep.subr.bf16.mxu0 %v12345_v5  ;;  %v12396_v5 = vld [vmem:[%s15444_s14 + $0x1d4] ss:$8 sps:$4 sm:$0xff]  }
0x1242   :  { %8659 = vmatpush1.bf16.msra.mxu0 %v12343_v33  ;;  %v12399_v33 = vld [vmem:[%s15444_s14 + $0xf4] ss:$8 sps:$4 sm:$0xff]  }
0x1243   :  { %8660 = vmatprep.subr.bf16.mxu0 %v12351_v48  ;;  %v12394_v48 = vld [vmem:[%s15444_s14 + $0x1d0] ss:$8 sps:$4 sm:$0xff]  }
0x1246   :  { %8661 = vmatpush1.bf16.msra.mxu0 %v12349_v11  ;;  %v12397_v11 = vld [vmem:[%s15444_s14 + $0xf0] ss:$8 sps:$4 sm:$0xff]  }
0x1247   :  { %8662 = vmatprep.subr.bf16.mxu0 %v12357_v37  ;;  %v12400_v37 = vld [vmem:[%s15444_s14 + $0x1e0] ss:$8 sps:$4 sm:$0xff]  }
0x124a   :  { %8663 = vmatpush1.bf16.msra.mxu0 %v12355_v19  ;;  %v12402_v19 = vld [vmem:[%s15444_s14 + $0x1e4] ss:$8 sps:$4 sm:$0xff]  }
0x124b   :  { %8664 = vmatprep.subr.bf16.mxu0 %v12363_v51  ;;  %v12405_v51 = vld [vmem:[%s15444_s14 + $0x1f4] ss:$8 sps:$4 sm:$0xff]  }
0x124e   :  { %8665 = vmatpush1.bf16.msra.mxu0 %v12361_v36  ;;  %v12403_v36 = vld [vmem:[%s15444_s14 + $0x1f0] ss:$8 sps:$4 sm:$0xff]  }
0x124f   :  { %8666 = vmatprep.subr.bf16.mxu0 %v12369_v32  ;;  %v12408_v32 = vld [vmem:[%s15447_s17 + $0x4] ss:$8 sps:$4 sm:$0xff]  }
0x1252   :  { %8667 = vmatpush1.bf16.msra.mxu0 %v12367_v15 }
0x1253   :  { %8668 = vmatprep.subr.bf16.mxu0 %v12375_v60 }
0x1256   :  { %8669 = vmatpush1.bf16.msra.mxu0 %v12373_v23 }
0x1257   :  { %8670 = vmatprep.subr.bf16.mxu0 %v12381_v2 }
0x125a   :  { %8671 = vmatpush1.bf16.msra.mxu0 %v12379_v30 }
0x125b   :  { %8672 = vmatprep.subr.bf16.mxu0 %v12387_v62 }
0x125e   :  { %8673 = vmatpush1.bf16.msra.mxu0 %v12385_v9 }
0x125f   :  { %8674 = vmatprep.subr.bf16.mxu0 %v12393_v46 }
0x1262   :  { %8675 = vmatpush1.bf16.msra.mxu0 %v12391_v38 }
0x1263   :  { %8676 = vmatprep.subr.bf16.mxu0 %v12399_v33 }
0x1266   :  { %8677 = vmatpush1.bf16.msra.mxu0 %v12397_v11 }
0x12fa   :  { %v8018_v25 = vpop.f32.mrb[34].mxu1 }
0x12fb   :  { %v8098_v20 = vrot.slane %v8018_v25, %v13781_v0  ;;  %v8020_v42 = vpop.f32.mrb[35].mxu1 }
0x12fc   :  { %v8102_v34 = vrot.slane %v8020_v42, %v13781_v0  ;;  %v8090_v12 = vpop.f32.mrb[94].mxu0 }
0x12fd   :  { %v8103_v29 = vmul.f32 %v8098_v20, %v14941_v8  ;;  %v8108_v39 = vrot.slane %v8090_v12, %v13781_v0  ;;  %v8092_v49 = vpop.f32.mrb[95].mxu0  ;;  %v12318_v8 = vld [vmem:[%s15444_s14 + $0x104] ss:$8 sps:$4 sm:$0xff]   ;;  %v12406_v20 = vld [vmem:[%s15447_s17] ss:$8 sps:$4 sm:$0xff]  }
0x12fe   :  { %v8104_v17 = vmul.f32 %v8102_v34, %v14947_v22  ;;  %v8112_v61 = vrot.slane %v8092_v49, %v13781_v0  ;;  %v8205_v22 = vld [vmem:[#allocation19 + $0x1] sm:$0x1]  ;;  %v12411_v12 = vld [vmem:[%s15447_s17 + $0x14] ss:$8 sps:$4 sm:$0xff]   ;;  %v12412_v49 = vld [vmem:[%s15447_s17 + $0x20] ss:$8 sps:$4 sm:$0xff]  }
0x12ff   :  { %v8113_v13 = vsub.f32 %v8103_v29, %v8108_v39  ;;  %v12409_v29 = vld [vmem:[%s15447_s17 + $0x10] ss:$8 sps:$4 sm:$0xff]   ;;  %v12414_v39 = vld [vmem:[%s15447_s17 + $0x24] ss:$8 sps:$4 sm:$0xff]  }
0x1300   :  { %v8114_v50 = vsub.f32 %v8104_v17, %v8112_v61  ;;  %v12415_v17 = vld [vmem:[%s15447_s17 + $0x30] ss:$8 sps:$4 sm:$0xff]   ;;  %v12417_v61 = vld [vmem:[%s15447_s17 + $0x34] ss:$8 sps:$4 sm:$0xff]  }
0x1301   :  { %v8115_v43 = vpack.c.bf16 %v8113_v13, %v8113_v13  ;;  %v12420_v13 = vld [vmem:[%s15447_s17 + $0x44] ss:$8 sps:$4 sm:$0xff]  }
0x1302   :  { %v8116_v41 = vpack.c.bf16 %v8114_v50, %v8114_v50  ;;  %v12418_v50 = vld [vmem:[%s15447_s17 + $0x40] ss:$8 sps:$4 sm:$0xff]  }
0x1303   :  { %v8124_v14 = vsel %vm8122_vm14, %v8115_v43, 0  ;;  %v12423_v43 = vld [vmem:[%s15447_s17 + $0x54] ss:$8 sps:$4 sm:$0xff]  }
0x1304   :  { %10630 = vmatprep.subr.msk.bf16.mxu1 %vm8122_vm14, %v8116_v41 }
0x1305   :  { %8130 = vmatpush1.bf16.msra.mxu1 %v8124_v14 }
0x1306   :  { %10632 = vmatprep.subr.msk.bf16.mxu1 %vm8122_vm14, %v8116_v41  ;;  %v12421_v41 = vld [vmem:[%s15447_s17 + $0x50] ss:$8 sps:$4 sm:$0xff]  }
0x1308   :  { %10631 = vmatmul.mubr.msk.bf16.vlgmr.msra.gmra.mrb[36].mxu1 %vm8118_vm11, %v8117_v55  ;;  %v12424_v55 = vld [vmem:[%s15447_s17 + $0x60] ss:$8 sps:$4 sm:$0xff]  }
0x1309   :  { %8210 = vmatpush1.bf16.msra.mxu1 %v8124_v14  ;;  %8241 = vmatprep.mubr.bf16.mxu1 %v15779_v56  ;;  %v12330_v56 = vld [vmem:[%s15444_s14 + $0x124] ss:$8 sps:$4 sm:$0xff]  }
0x130a   :  { %8445 = vmatprep.subr.bf16.mxu1 %v12318_v8  ;;  %v12426_v14 = vld [vmem:[%s15447_s17 + $0x64] ss:$8 sps:$4 sm:$0xff]   ;;  %v12429_v8 = vld [vmem:[%s15447_s17 + $0x74] ss:$8 sps:$4 sm:$0xff]  }
0x1310   :  { %10633 = vmatmul.mubr.msk.bf16.vlgmr.msra.gmra.mrb[40].mxu1 %vm8118_vm11, %v8205_v22  ;;  %v12427_v22 = vld [vmem:[%s15447_s17 + $0x70] ss:$8 sps:$4 sm:$0xff]  }
0x1311   :  { %8446 = vmatpush1.bf16.msra.mxu1 %v12316_v4  ;;  %v12432_v4 = vld [vmem:[%s15447_s17 + $0x84] ss:$8 sps:$4 sm:$0xff]  }
0x1312   :  { %8447 = vmatprep.subr.bf16.mxu1 %v12324_v3  ;;  %v12430_v3 = vld [vmem:[%s15447_s17 + $0x80] ss:$8 sps:$4 sm:$0xff]  }
0x1315   :  { %8448 = vmatpush1.bf16.msra.mxu1 %v12322_v47  ;;  %v12435_v47 = vld [vmem:[%s15447_s17 + $0x94] ss:$8 sps:$4 sm:$0xff]  }
0x1316   :  { %8449 = vmatprep.subr.bf16.mxu1 %v12330_v56  ;;  %v12433_v56 = vld [vmem:[%s15447_s17 + $0x90] ss:$8 sps:$4 sm:$0xff]  }
0x1319   :  { %8450 = vmatpush1.bf16.msra.mxu1 %v12328_v57  ;;  %v12438_v57 = vld [vmem:[%s15447_s17 + $0xa4] ss:$8 sps:$4 sm:$0xff]  }
0x131a   :  { %8451 = vmatprep.subr.bf16.mxu1 %v12336_v44  ;;  %v12436_v44 = vld [vmem:[%s15447_s17 + $0xa0] ss:$8 sps:$4 sm:$0xff]  }
0x131d   :  { %8452 = vmatpush1.bf16.msra.mxu1 %v12334_v18  ;;  %v12441_v18 = vld [vmem:[%s15447_s17 + $0xb4] ss:$8 sps:$4 sm:$0xff]  }
0x131e   :  { %8453 = vmatprep.subr.bf16.mxu1 %v12342_v52  ;;  %v12439_v52 = vld [vmem:[%s15447_s17 + $0xb0] ss:$8 sps:$4 sm:$0xff]  }
0x1321   :  { %8454 = vmatpush1.bf16.msra.mxu1 %v12340_v58  ;;  %v12442_v58 = vld [vmem:[%s15447_s17 + $0xc0] ss:$8 sps:$4 sm:$0xff]  }
0x1322   :  { %8455 = vmatprep.subr.bf16.mxu1 %v12348_v35  ;;  %v12444_v35 = vld [vmem:[%s15447_s17 + $0xc4] ss:$8 sps:$4 sm:$0xff]  }
0x1325   :  { %8456 = vmatpush1.bf16.msra.mxu1 %v12346_v24  ;;  %v12447_v24 = vld [vmem:[%s15447_s17 + $0xd4] ss:$8 sps:$4 sm:$0xff]  }
0x1326   :  { %8457 = vmatprep.subr.bf16.mxu1 %v12354_v7  ;;  %v12445_v7 = vld [vmem:[%s15447_s17 + $0xd0] ss:$8 sps:$4 sm:$0xff]  }
0x1329   :  { %8458 = vmatpush1.bf16.msra.mxu1 %v12352_v28  ;;  %v12450_v28 = vld [vmem:[%s15447_s17 + $0xe4] ss:$8 sps:$4 sm:$0xff]  }
0x132a   :  { %8459 = vmatprep.subr.bf16.mxu1 %v12360_v21  ;;  %v12448_v21 = vld [vmem:[%s15447_s17 + $0xe0] ss:$8 sps:$4 sm:$0xff]  }
0x132d   :  { %8460 = vmatpush1.bf16.msra.mxu1 %v12358_v53  ;;  %v12453_v53 = vld [vmem:[%s15447_s17 + $0xf4] ss:$8 sps:$4 sm:$0xff]  }
0x132e   :  { %8461 = vmatprep.subr.bf16.mxu1 %v12366_v1  ;;  %v12451_v1 = vld [vmem:[%s15447_s17 + $0xf0] ss:$8 sps:$4 sm:$0xff]  }
0x1331   :  { %8462 = vmatpush1.bf16.msra.mxu1 %v12364_v54 }
0x1332   :  { %8463 = vmatprep.subr.bf16.mxu1 %v12372_v63 }
0x1335   :  { %8464 = vmatpush1.bf16.msra.mxu1 %v12370_v10 }
0x1336   :  { %8465 = vmatprep.subr.bf16.mxu1 %v12378_v27 }
0x1339   :  { %8466 = vmatpush1.bf16.msra.mxu1 %v12376_v6  ;;  %v8687_v6 = vld [vmem:[#allocation21] sm:$0x3] }
0x133a   :  { %8467 = vmatprep.subr.bf16.mxu1 %v12384_v59  ;;  %v8692_v59 = vrot.slane %v8687_v6, %v13781_v0 }
0x133d   :  { %8468 = vmatpush1.bf16.msra.mxu1 %v12382_v40 }
0x133e   :  { %8469 = vmatprep.subr.bf16.mxu1 %v12390_v31  ;;  %v8696_v31 = vrot.slane %v8687_v6, %v15973_v26 }
0x1341   :  { %8470 = vmatpush1.bf16.msra.mxu1 %v12388_v16 }
0x1342   :  { %8471 = vmatprep.subr.bf16.mxu1 %v12396_v5 }
0x1345   :  { %8472 = vmatpush1.bf16.msra.mxu1 %v12394_v48 }
0x1346   :  { %8473 = vmatprep.subr.bf16.mxu1 %v12402_v19 }
0x1349   :  { %8474 = vmatpush1.bf16.msra.mxu1 %v12400_v37 }
0x134a   :  { %8475 = vmatprep.subr.bf16.mxu1 %v12405_v51 }
0x134d   :  { %8476 = vmatpush1.bf16.msra.mxu1 %v12403_v36 }
0x134e   :  { %8961 = vmatprep.subr.bf16.mxu1 %v12408_v32 }
0x13db   :  { %v8163_v15 = vpop.f32.mrb[36].mxu1 }
0x13dc   :  { %v8165_v60 = vpop.f32.mrb[37].mxu1  ;;  %v8170_v30 = vpack.c.bf16 %v8163_v15, %v8163_v15 }
0x13dd   :  { %v8171_v23 = vpack.c.bf16 %v8165_v60, %v8165_v60  ;;  %v8167_v2 = vpop.f32.mrb[38].mxu1 }
0x13de   :  { %v8168_v62 = vpop.f32.mrb[39].mxu1 }
0x13df   :  { %8678 = vmatprep.mubr.bf16.mxu0 %v8171_v23 }
0x13e0   :  { %8679 = vmatmul.mubr.bf16.vlgmr.msra.gmra.mrb[96].mxu0 %v8170_v30 }
0x13e3   :  { %v8243_v9 = vpop.f32.mrb[40].mxu1 }
0x13e4   :  { %v8245_v46 = vpop.f32.mrb[41].mxu1  ;;  %v8250_v42 = vpack.c.bf16 %v8243_v9, %v8243_v9 }
0x13e5   :  { %v8251_v38 = vpack.c.bf16 %v8245_v46, %v8245_v46  ;;  %v8247_v25 = vpop.f32.mrb[42].mxu1 }
0x13e6   :  { %v8248_v34 = vpop.f32.mrb[43].mxu1 }
0x13e7   :  { %8477 = vmatprep.mubr.bf16.mxu1 %v8251_v38 }
0x13e8   :  { %8478 = vmatmul.mubr.bf16.vlgmr.msra.gmra.mrb[44].mxu1 %v8250_v42 }
0x13e9   :  { %8962 = vmatpush1.bf16.msra.mxu1 %v12406_v20 }
0x13ea   :  { %8963 = vmatprep.subr.bf16.mxu1 %v12411_v12 }
0x13ed   :  { %8964 = vmatpush1.bf16.msra.mxu1 %v12409_v29 }
0x13ee   :  { %8965 = vmatprep.subr.bf16.mxu1 %v12414_v39 }
0x13f1   :  { %8966 = vmatpush1.bf16.msra.mxu1 %v12412_v49 }
0x13f2   :  { %8967 = vmatprep.subr.bf16.mxu1 %v12417_v61 }
0x13f5   :  { %8968 = vmatpush1.bf16.msra.mxu1 %v12415_v17 }
0x13f6   :  { %8969 = vmatprep.subr.bf16.mxu1 %v12420_v13 }
0x13f9   :  { %8970 = vmatpush1.bf16.msra.mxu1 %v12418_v50 }
0x13fa   :  { %8971 = vmatprep.subr.bf16.mxu1 %v12423_v43 }
0x13fd   :  { %8972 = vmatpush1.bf16.msra.mxu1 %v12421_v41 }
0x13fe   :  { %8973 = vmatprep.subr.bf16.mxu1 %v12426_v14 }
0x1401   :  { %8974 = vmatpush1.bf16.msra.mxu1 %v12424_v55 }
0x1402   :  { %8975 = vmatprep.subr.bf16.mxu1 %v12429_v8 }
0x1405   :  { %8976 = vmatpush1.bf16.msra.mxu1 %v12427_v22 }
0x1406   :  { %8977 = vmatprep.subr.bf16.mxu1 %v12432_v4 }
0x1409   :  { %8978 = vmatpush1.bf16.msra.mxu1 %v12430_v3 }
0x140a   :  { %8979 = vmatprep.subr.bf16.mxu1 %v12435_v47 }
0x140d   :  { %8980 = vmatpush1.bf16.msra.mxu1 %v12433_v56 }
0x140e   :  { %8981 = vmatprep.subr.bf16.mxu1 %v12438_v57 }
0x1411   :  { %8982 = vmatpush1.bf16.msra.mxu1 %v12436_v44 }
0x1412   :  { %8983 = vmatprep.subr.bf16.mxu1 %v12441_v18 }
0x1415   :  { %8984 = vmatpush1.bf16.msra.mxu1 %v12439_v52 }
0x1416   :  { %8985 = vmatprep.subr.bf16.mxu1 %v12444_v35 }
0x1419   :  { %8986 = vmatpush1.bf16.msra.mxu1 %v12442_v58 }
0x141a   :  { %8987 = vmatprep.subr.bf16.mxu1 %v12447_v24 }
0x141d   :  { %8988 = vmatpush1.bf16.msra.mxu1 %v12445_v7 }
0x141e   :  { %8989 = vmatprep.subr.bf16.mxu1 %v12450_v28 }
0x1421   :  { %8990 = vmatpush1.bf16.msra.mxu1 %v12448_v21 }
0x1422   :  { %8991 = vmatprep.subr.bf16.mxu1 %v12453_v53 }
0x1425   :  { %8992 = vmatpush1.bf16.msra.mxu1 %v12451_v1 }
0x1426   :  { %11180 = vmatprep.subr.bf16.mxu1 %v15917_v45 }
0x14b3   :  { %v8680_v54 = vpop.f32.mrb[96].mxu0 }
0x14b4   :  { %v8682_v63 = vpop.f32.mrb[97].mxu0 }
0x14b5   :  { %v8684_v10 = vpop.f32.mrb[98].mxu0 }
0x14b6   :  { %v8685_v27 = vpop.f32.mrb[99].mxu0 }
0x14bb   :  { %v8479_v40 = vpop.f32.mrb[44].mxu1 }
0x14bc   :  { %v8681_v16 = vadd.f32 %v8680_v54, %v8479_v40  ;;  %v8481_v5 = vpop.f32.mrb[45].mxu1 }
0x14bd   :  { %v8683_v33 = vadd.f32 %v8682_v63, %v8481_v5  ;;  %v8483_v48 = vpop.f32.mrb[46].mxu1  ;;  %v12455_v5 = vld [vmem:[#allocation22] sm:$0xff]  }
0x14be   :  { %v8699_v11 = vadd.f32 %v8692_v59, %v8681_v16  ;;  %v8484_v37 = vpop.f32.mrb[47].mxu1  ;;  %v12454_v16 = vld [vmem:[#allocation22 + $0x40] sm:$0xff]   ;;  %v12457_v48 = vld [vmem:[#allocation22 + $0x8] sm:$0xff]  }
0x14bf   :  { %v8700_v19 = vadd.f32 %v8696_v31, %v8683_v33  ;;  %11095 = vmatprep.subr.bf16.mxu0 %v12454_v16  ;;  %v12456_v33 = vld [vmem:[#allocation22 + $0x48] sm:$0xff]   ;;  %v12459_v37 = vld [vmem:[#allocation22 + $0x10] sm:$0xff]  }
0x14c0   :  { %vm8701_vm4 = vcmp.ge.f32.partialorder %v8699_v11, 0.0  ;;  %v8703_v51 = vmul.f32 0.2, %v8699_v11  ;;  %11096 = vmatpush3.bf16.msra.mxu0 %v12455_v5 }
0x14c1   :  { %vm8702_vm15 = vcmp.ge.f32.partialorder %v8700_v19, 0.0  ;;  %v8704_v36 = vmul.f32 0.2, %v8700_v19  ;;  %11097 = vmatprep.subr.bf16.mxu0 %v12456_v33 }
0x14c2   :  { %v8705_v32 = vsel %vm8701_vm4, %v8699_v11, %v8703_v51  ;;  %v12458_v11 = vld [vmem:[#allocation22 + $0x50] sm:$0xff]   ;;  %v12461_v51 = vld [vmem:[#allocation22 + $0x18] sm:$0xff]  }
0x14c3   :  { %v8707_v15 = vsel %vm8122_vm14, %v8705_v32, 0.0  ;;  %v8721_v60 = vmul.f32 %v8705_v32, %v8705_v32  ;;  %v8706_v23 = vsel %vm8702_vm15, %v8700_v19, %v8704_v36  ;;  %v12460_v19 = vld [vmem:[#allocation22 + $0x58] sm:$0xff]   ;;  %v12462_v36 = vld [vmem:[#allocation22 + $0x60] sm:$0xff]  }
0x14c4   :  { %v8708_v2 = vrot.slane %v8707_v15, 4  ;;  %v8714_v30 = vsel %vm8122_vm14, %v8706_v23, 0.0  ;;  %v8722_v62 = vmul.f32 %v8706_v23, %v8706_v23  ;;  %11098 = vmatpush3.bf16.msra.mxu0 %v12457_v48 }
0x14c5   :  { %v8723_v9 = vsel %vm8122_vm14, %v8721_v60, 0.0  ;;  %v8715_v46 = vrot.slane %v8714_v30, 4  ;;  %11099 = vmatprep.subr.bf16.mxu0 %v12458_v11  ;;  %v12465_v60 = vld [vmem:[#allocation22 + $0x28] sm:$0xff]  }
0x14c6   :  { %v8709_v38 = vadd.f32 %v8708_v2, %v8707_v15  ;;  %v8724_v25 = vrot.slane %v8723_v9, 4  ;;  %v8730_v20 = vsel %vm8122_vm14, %v8722_v62, 0.0  ;;  %v12464_v15 = vld [vmem:[#allocation22 + $0x68] sm:$0xff]   ;;  %v12467_v2 = vld [vmem:[#allocation22 + $0x30] sm:$0xff]   ;;  %v12469_v62 = vld [vmem:[#allocation22 + $0x38] sm:$0xff]  }
0x14c7   :  { %v8716_v42 = vadd.f32 %v8715_v46, %v8714_v30  ;;  %v8731_v34 = vrot.slane %v8730_v20, 4  ;;  %v12468_v30 = vld [vmem:[#allocation22 + $0x78] sm:$0xff]  }
0x14c8   :  { %v8710_v12 = vrot.slane %v8709_v38, 2  ;;  %v8725_v29 = vadd.f32 %v8724_v25, %v8723_v9  ;;  %11100 = vmatpush3.bf16.msra.mxu0 %v12459_v37  ;;  %v8789_v9 = vld [vmem:[%s15448_s18] sm:$0x3] }
0x14c9   :  { %v8717_v39 = vrot.slane %v8716_v42, 2  ;;  %v8732_v49 = vadd.f32 %v8731_v34, %v8730_v20  ;;  %11101 = vmatprep.subr.bf16.mxu0 %v12460_v19  ;;  %v8794_v46 = vrot.slane %v8789_v9, %v13781_v0 }
0x14ca   :  { %v8711_v17 = vadd.f32 %v8710_v12, %v8709_v38  ;;  %v8726_v61 = vrot.slane %v8725_v29, 2  ;;  %v8798_v38 = vrot.slane %v8789_v9, %v15973_v26 }
0x14cb   :  { %v8733_v13 = vrot.slane %v8732_v49, 2  ;;  %v8718_v50 = vadd.f32 %v8717_v39, %v8716_v42 }
0x14cc   :  { %v8712_v43 = vrot.slane %v8711_v17, 1  ;;  %v8727_v41 = vadd.f32 %v8726_v61, %v8725_v29  ;;  %11102 = vmatpush3.bf16.msra.mxu0 %v12461_v51 }
0x14cd   :  { %v8734_v14 = vadd.f32 %v8733_v13, %v8732_v49  ;;  %v8719_v55 = vrot.slane %v8718_v50, 1  ;;  %11103 = vmatprep.subr.bf16.mxu0 %v12462_v36 }
0x14ce   :  { %v8713_v8 = vadd.f32 %v8712_v43, %v8711_v17  ;;  %v8728_v22 = vrot.slane %v8727_v41, 1 }
0x14cf   :  { %v8735_v4 = vrot.slane %v8734_v14, 1  ;;  %v8720_v3 = vadd.f32 %v8719_v55, %v8718_v50 }
0x14d0   :  { %v8729_v47 = vadd.f32 %v8728_v22, %v8727_v41  ;;  %v8737_v56 = vmul.f32 0.5, %v8713_v8 }
0x14d1   :  { %v8736_v57 = vadd.f32 %v8735_v4, %v8734_v14  ;;  %v8738_v44 = vmul.f32 0.5, %v8720_v3 }
0x14d2   :  { %v8739_v18 = vmul.f32 0.5, %v8729_v47  ;;  %v8741_v52 = vmul.f32 %v8737_v56, %v8737_v56  ;;  %v8747_v54 = vsub.f32 %v8705_v32, %v8737_v56  ;;  %v12463_v32 = vld [vmem:[#allocation22 + $0x20] sm:$0xff]  }
0x14d3   :  { %v8740_v58 = vmul.f32 0.5, %v8736_v57  ;;  %v8742_v35 = vmul.f32 %v8738_v44, %v8738_v44  ;;  %v8748_v10 = vsub.f32 %v8706_v23, %v8738_v44  ;;  %11104 = vmatpush3.bf16.msra.mxu0 %v12463_v32  ;;  %v12466_v23 = vld [vmem:[#allocation22 + $0x70] sm:$0xff]  }
0x14d4   :  { %v8743_v24 = vsub.f32 %v8739_v18, %v8741_v52  ;;  %11105 = vmatprep.subr.bf16.mxu0 %v12464_v15 }
0x14d5   :  { %v8744_v7 = vsub.f32 %v8740_v58, %v8742_v35 }
0x14d6   :  { %v8745_v28 = vmax.f32 %v8743_v24, 0.0 }
0x14d7   :  { %v8746_v21 = vmax.f32 %v8744_v7, 0.0  ;;  %11106 = vmatpush3.bf16.msra.mxu0 %v12465_v60 }
0x14d8   :  { %v8749_v53 = vadd.f32 0.8, %v8745_v28  ;;  %11107 = vmatprep.subr.bf16.mxu0 %v12466_v23 }
0x14d9   :  { %v8750_v1 = vadd.f32 0.8, %v8746_v21 }
0x14da   :  { %12502 = vrsqrt.f32 %v8749_v53 }
0x14db   :  { %12504 = vrsqrt.f32 %v8750_v1  ;;  %11108 = vmatpush3.bf16.msra.mxu0 %v12467_v2 }
0x14dc   :  { %11109 = vmatprep.subr.bf16.mxu0 %v12468_v30 }
0x14df   :  { %11110 = vmatpush3.bf16.msra.mxu0 %v12469_v62  ;;  %v12470_v62 = vld [vmem:[%s15451_s21] sm:$0xff]  }
0x14e0   :  { %11160 = vmatprep.subr.bf16.mxu0 %v15917_v45 }
0x14e4   :  { %v12503_v63 = vpop.eup %12502 }
0x14e5   :  { %v12505_v27 = vpop.eup %12504  ;;  %v8753_v6 = vmul.f32 %v12503_v63, %v8747_v54 }
0x14e6   :  { %v8754_v59 = vmul.f32 %v12505_v27, %v8748_v10 }
0x14e7   :  { %v8755_v31 = vpack.c.bf16 %v8753_v6, %v8753_v6 }
0x14e8   :  { %v8756_v40 = vpack.c.bf16 %v8754_v59, %v8754_v59 }
0x14ea   :  { %8993 = vmatprep.mubr.bf16.mxu1 %v8756_v40 }
0x14eb   :  { %8994 = vmatmul.mubr.bf16.vlgmr.msra.gmra.mrb[48].mxu1 %v8755_v31 }
0x14ec   :  { %11196 = vmatprep.mubr.msk.bf16.mxu1 %vm12911_vm8, %v15917_v45 }
0x15be   :  { %v8995_v25 = vpop.f32.mrb[48].mxu1 }
0x15bf   :  { %v8996_v20 = vadd.f32 %v8995_v25, %v8794_v46  ;;  %v8997_v42 = vpop.f32.mrb[49].mxu1  ;;  %v12471_v46 = vld [vmem:[%s15451_s21 + $0x8] sm:$0xff]   ;;  %v12473_v25 = vld [vmem:[%s15451_s21 + $0x18] sm:$0xff]  }
0x15c0   :  { %v8998_v34 = vadd.f32 %v8997_v42, %v8798_v38  ;;  %v8999_v12 = vpop.f32.mrb[50].mxu1  ;;  %v12472_v38 = vld [vmem:[%s15451_s21 + $0x10] sm:$0xff]   ;;  %v12475_v42 = vld [vmem:[%s15451_s21 + $0x28] sm:$0xff]  }
0x15c1   :  { %vm9002_vm6 = vcmp.ge.f32.partialorder %v8996_v20, 0.0  ;;  %v9004_v29 = vmul.f32 0.2, %v8996_v20  ;;  %v9000_v39 = vpop.f32.mrb[51].mxu1  ;;  %v12477_v12 = vld [vmem:[%s15451_s21 + $0x38] sm:$0xff]  }
0x15c2   :  { %vm9003_vm7 = vcmp.ge.f32.partialorder %v8998_v34, 0.0  ;;  %v9005_v49 = vmul.f32 0.2, %v8998_v34  ;;  %v12479_v39 = vld [vmem:[#allocation24 + $0x8] sm:$0xff]  }
0x15c3   :  { %v9006_v17 = vsel %vm9002_vm6, %v8996_v20, %v9004_v29  ;;  %v12474_v20 = vld [vmem:[%s15451_s21 + $0x20] sm:$0xff]   ;;  %v12478_v29 = vld [vmem:[#allocation24] sm:$0xff]  }
0x15c4   :  { %v9008_v61 = vsel %vm8122_vm14, %v9006_v17, 0.0  ;;  %v9022_v13 = vmul.f32 %v9006_v17, %v9006_v17  ;;  %v9007_v50 = vsel %vm9003_vm7, %v8998_v34, %v9005_v49  ;;  %v12476_v34 = vld [vmem:[%s15451_s21 + $0x30] sm:$0xff]   ;;  %11181 = vmatpush3.bf16.msra.mxu1 %v12478_v29  ;;  %v12480_v49 = vld [vmem:[#allocation24 + $0x10] sm:$0xff]  }
0x15c5   :  { %v9009_v43 = vrot.slane %v9008_v61, 4  ;;  %v9015_v0 = vsel %vm8122_vm14, %v9007_v50, 0.0  ;;  %v9023_v41 = vmul.f32 %v9007_v50, %v9007_v50  ;;  %11182 = vmatprep.subr.bf16.mxu1 %v15917_v45 }
0x15c6   :  { %v9024_v26 = vsel %vm8122_vm14, %v9022_v13, 0.0  ;;  %v9016_v14 = vrot.slane %v9015_v0, 4  ;;  %v12483_v13 = vld [vmem:[#allocation24 + $0x28] sm:$0xff]  }
0x15c7   :  { %v9010_v55 = vadd.f32 %v9009_v43, %v9008_v61  ;;  %v9025_v8 = vrot.slane %v9024_v26, 4  ;;  %v9031_v22 = vsel %vm8122_vm14, %v9023_v41, 0.0  ;;  %v12482_v61 = vld [vmem:[#allocation24 + $0x20] sm:$0xff]   ;;  %v10762_v43 = vld [vmem:[%s15450_s20] ss:$0 sm:$0xff] }
0x15c8   :  { %v9017_v4 = vadd.f32 %v9016_v14, %v9015_v0  ;;  %v9032_v3 = vrot.slane %v9031_v22, 4  ;;  %11183 = vmatpush3.bf16.msra.mxu1 %v12479_v39 }
0x15c9   :  { %v9011_v47 = vrot.slane %v9010_v55, 2  ;;  %v9026_v56 = vadd.f32 %v9025_v8, %v9024_v26  ;;  %11184 = vmatprep.subr.bf16.mxu1 %v15917_v45 }
0x15ca   :  { %v9018_v57 = vrot.slane %v9017_v4, 2  ;;  %v9033_v44 = vadd.f32 %v9032_v3, %v9031_v22  ;;  %v12484_v3 = vld [vmem:[#allocation24 + $0x30] sm:$0xff]  }
0x15cb   :  { %v9012_v18 = vadd.f32 %v9011_v47, %v9010_v55  ;;  %v9027_v52 = vrot.slane %v9026_v56, 2  ;;  %v12485_v47 = vld [vmem:[#allocation24 + $0x38] sm:$0xff]  }
0x15cc   :  { %v9019_v58 = vadd.f32 %v9018_v57, %v9017_v4  ;;  %v9034_v35 = vrot.slane %v9033_v44, 2  ;;  %11185 = vmatpush3.bf16.msra.mxu1 %v12480_v49  ;;  %v12487_v57 = vld [vmem:[#allocation25 + $0x8] sm:$0xff]  }
0x15cd   :  { %v9013_v24 = vrot.slane %v9012_v18, 1  ;;  %v9028_v7 = vadd.f32 %v9027_v52, %v9026_v56  ;;  %11186 = vmatprep.subr.bf16.mxu1 %v15917_v45  ;;  %v12486_v56 = vld [vmem:[#allocation25] sm:$0xff]  }
0x15ce   :  { %v9035_v28 = vadd.f32 %v9034_v35, %v9033_v44  ;;  %v9020_v21 = vrot.slane %v9019_v58, 1  ;;  %v12488_v44 = vld [vmem:[#allocation25 + $0x10] sm:$0xff]   ;;  %v12490_v52 = vld [vmem:[#allocation25 + $0x20] sm:$0xff]   ;;  %v10779_v35 = vld [vmem:[%s15452_s22] ss:$0 sm:$0xff] }
0x15cf   :  { %v9014_v53 = vadd.f32 %v9013_v24, %v9012_v18  ;;  %v9029_v1 = vrot.slane %v9028_v7, 1  ;;  %v12489_v18 = vld [vmem:[#allocation25 + $0x18] sm:$0xff]  }
0x15d0   :  { %v9036_v54 = vrot.slane %v9035_v28, 1  ;;  %v9021_v63 = vadd.f32 %v9020_v21, %v9019_v58  ;;  %v12491_v58 = vld [vmem:[#allocation25 + $0x28] sm:$0xff]  }
0x15d1   :  { %v9030_v10 = vadd.f32 %v9029_v1, %v9028_v7  ;;  %v9038_v27 = vmul.f32 0.5, %v9014_v53 }
0x15d2   :  { %v9037_v6 = vadd.f32 %v9036_v54, %v9035_v28  ;;  %v9039_v59 = vmul.f32 0.5, %v9021_v63 }
0x15d3   :  { %v9040_v40 = vmul.f32 0.5, %v9030_v10  ;;  %v9042_v31 = vmul.f32 %v9038_v27, %v9038_v27  ;;  %v9048_v36 = vsub.f32 %v9006_v17, %v9038_v27  ;;  %v12481_v17 = vld [vmem:[#allocation24 + $0x18] sm:$0xff]   ;;  %v12492_v10 = vld [vmem:[#allocation25 + $0x30] sm:$0xff]  }
0x15d4   :  { %v9041_v16 = vmul.f32 0.5, %v9037_v6  ;;  %v9043_v5 = vmul.f32 %v9039_v59, %v9039_v59  ;;  %v9049_v15 = vsub.f32 %v9007_v50, %v9039_v59  ;;  %11187 = vmatpush3.bf16.msra.mxu1 %v12481_v17  ;;  %v12493_v27 = vld [vmem:[#allocation25 + $0x38] sm:$0xff]   ;;  %v10788_v6 = vld [vmem:[%s15454_s24] ss:$0 sm:$0xff] }
0x15d5   :  { %v9044_v33 = vsub.f32 %v9040_v40, %v9042_v31  ;;  %11188 = vmatprep.subr.bf16.mxu1 %v15917_v45 }
0x15d6   :  { %v9045_v48 = vsub.f32 %v9041_v16, %v9043_v5 }
0x15d7   :  { %v9046_v11 = vmax.f32 %v9044_v33, 0.0 }
0x15d8   :  { %v9047_v37 = vmax.f32 %v9045_v48, 0.0  ;;  %11189 = vmatpush3.bf16.msra.mxu1 %v12482_v61 }
0x15d9   :  { %v9050_v19 = vadd.f32 0.8, %v9046_v11  ;;  %11190 = vmatprep.subr.bf16.mxu1 %v15917_v45 }
0x15da   :  { %v9051_v51 = vadd.f32 0.8, %v9047_v37 }
0x15db   :  { %12506 = vrsqrt.f32 %v9050_v19 }
0x15dc   :  { %12508 = vrsqrt.f32 %v9051_v51  ;;  %11191 = vmatpush3.bf16.msra.mxu1 %v12483_v13 }
0x15dd   :  { %11192 = vmatprep.subr.bf16.mxu1 %v15917_v45 }
0x15e0   :  { %11193 = vmatpush3.bf16.msra.mxu1 %v12484_v3 }
0x15e1   :  { %11194 = vmatprep.subr.bf16.mxu1 %v15917_v45 }
0x15e4   :  { %11195 = vmatpush3.bf16.msra.mxu1 %v12485_v47 }
0x15e5   :  { %v12507_v32 = vpop.eup %12506 }
0x15e6   :  { %v12509_v60 = vpop.eup %12508  ;;  %v9054_v23 = vmul.f32 %v12507_v32, %v9048_v36 }
0x15e7   :  { %v9055_v2 = vmul.f32 %v12509_v60, %v9049_v15 }
0x15e8   :  { %v9056_v9 = vpack.c.bf16 %v9054_v23, %v9054_v23 }
0x15e9   :  { %v9057_v30 = vpack.c.bf16 %v9055_v2, %v9055_v2 }
0x15eb   :  { %9225 = vmatprep.mubr.bf16.mxu0 %v9057_v30 }
0x15ec   :  { %9226 = vmatmul.mubr.bf16.vlgmr.msra.gmra.mrb[100].mxu0 %v9056_v9 }
0x15ed   :  { %11161 = vmatpush3.bf16.msra.mxu0 %v12470_v62  ;;  %11176 = vmatprep.mubr.msk.bf16.mxu0 %vm12911_vm8, %v15917_v45 }
0x15ee   :  { %11162 = vmatprep.subr.bf16.mxu0 %v15917_v45 }
0x15f1   :  { %11163 = vmatpush3.bf16.msra.mxu0 %v12471_v46 }
0x15f2   :  { %11164 = vmatprep.subr.bf16.mxu0 %v15917_v45 }
0x15f5   :  { %11165 = vmatpush3.bf16.msra.mxu0 %v12472_v38 }
0x15f6   :  { %11166 = vmatprep.subr.bf16.mxu0 %v15917_v45 }
0x15f9   :  { %11167 = vmatpush3.bf16.msra.mxu0 %v12473_v25 }
0x15fa   :  { %11168 = vmatprep.subr.bf16.mxu0 %v15917_v45 }
0x15fd   :  { %11169 = vmatpush3.bf16.msra.mxu0 %v12474_v20 }
0x15fe   :  { %11170 = vmatprep.subr.bf16.mxu0 %v15917_v45 }
0x1601   :  { %11171 = vmatpush3.bf16.msra.mxu0 %v12475_v42 }
0x1602   :  { %11172 = vmatprep.subr.bf16.mxu0 %v15917_v45 }
0x1605   :  { %11173 = vmatpush3.bf16.msra.mxu0 %v12476_v34 }
0x1606   :  { %11174 = vmatprep.subr.bf16.mxu0 %v15917_v45 }
0x1609   :  { %11175 = vmatpush3.bf16.msra.mxu0 %v12477_v12 }
0x160a   :  { %11200 = vmatprep.subr.bf16.mxu0 %v15917_v45 }
0x16bf   :  { %v11111_v50 = vpop.f32.mrb[100].mxu0 }
0x16c0   :  { %v11112_v0 = vpop.f32.mrb[101].mxu0 }
0x16c1   :  { %v11113_v41 = vadd.f32 %v11112_v0, %v11111_v50  ;;  %v11114_v26 = vpop.f32.mrb[102].mxu0 }
0x16c2   :  { %v11115_v14 = vpop.f32.mrb[103].mxu0 }
0x16c3   :  { %v9228_v55 = vadd.f32 %v11113_v41, %v10762_v43 }
0x16c5   :  { %vm9233_vm10 = vcmp.ge.f32.partialorder %v9228_v55, 0.0  ;;  %v9234_v8 = vmul.f32 0.2, %v9228_v55 }
0x16c7   :  { %v9235_v22 = vsel %vm9233_vm10, %v9228_v55, %v9234_v8 }
0x16c8   :  { %v9236_v4 = vpack.c.bf16 %v9235_v22, %v9235_v22 }
0x16ca   :  { %11177 = vmatmul.mubr.bf16.vlgmr.msra.gmra.mrb[104].mxu0 %v9236_v4 }
0x16cb   :  { %11216 = vmatprep.mubr.msk.bf16.mxu0 %vm12911_vm8, %v15917_v45  ;;  %11201 = vmatpush3.bf16.msra.mxu0 %v12486_v56 }
0x16cc   :  { %11202 = vmatprep.subr.bf16.mxu0 %v15917_v45 }
0x16cf   :  { %11203 = vmatpush3.bf16.msra.mxu0 %v12487_v57 }
0x16d0   :  { %11204 = vmatprep.subr.bf16.mxu0 %v15917_v45 }
0x16d3   :  { %11205 = vmatpush3.bf16.msra.mxu0 %v12488_v44 }
0x16d4   :  { %11206 = vmatprep.subr.bf16.mxu0 %v15917_v45 }
0x16d7   :  { %11207 = vmatpush3.bf16.msra.mxu0 %v12489_v18 }
0x16d8   :  { %11208 = vmatprep.subr.bf16.mxu0 %v15917_v45 }
0x16db   :  { %11209 = vmatpush3.bf16.msra.mxu0 %v12490_v52 }
0x16dc   :  { %11210 = vmatprep.subr.bf16.mxu0 %v15917_v45 }
0x16df   :  { %11211 = vmatpush3.bf16.msra.mxu0 %v12491_v58 }
0x16e0   :  { %11212 = vmatprep.subr.bf16.mxu0 %v15917_v45 }
0x16e3   :  { %11213 = vmatpush3.bf16.msra.mxu0 %v12492_v10 }
0x16e4   :  { %11214 = vmatprep.subr.bf16.mxu0 %v15917_v45  ;;  %v10797_v45 = vld [vmem:[%s15974_s2] ss:$0 sm:$0xff] }
0x16e7   :  { %11215 = vmatpush3.bf16.msra.mxu0 %v12493_v27 }
0x179d   :  { %v9342_v24 = vpop.f32.mrb[104].mxu0 }
0x179e   :  { %v9343_v7 = vadd.f32 %v10779_v35, %v9342_v24  ;;  %v11178_v28 = vpop.f32.mrb[105].mxu0 }
0x179f   :  { %v9345_v21 = vpop.f32.mrb[106].mxu0 }
0x17a0   :  { %vm9348_vm0 = vcmp.ge.f32.partialorder %v9343_v7, 0.0  ;;  %v9349_v53 = vmul.f32 0.2, %v9343_v7  ;;  %v11179_v1 = vpop.f32.mrb[107].mxu0 }
0x17a2   :  { %v9350_v54 = vsel %vm9348_vm0, %v9343_v7, %v9349_v53 }
0x17a3   :  { %v9351_v63 = vpack.c.bf16 %v9350_v54, %v9350_v54 }
0x17a5   :  { %11197 = vmatmul.mubr.bf16.vlgmr.msra.gmra.mrb[52].mxu1 %v9351_v63 }
0x1878   :  { %v9457_v59 = vpop.f32.mrb[52].mxu1 }
0x1879   :  { %v9458_v40 = vadd.f32 %v10788_v6, %v9457_v59  ;;  %v11198_v31 = vpop.f32.mrb[53].mxu1 }
0x187a   :  { %v9460_v16 = vpop.f32.mrb[54].mxu1 }
0x187b   :  { %vm9463_vm3 = vcmp.ge.f32.partialorder %v9458_v40, 0.0  ;;  %v9464_v5 = vmul.f32 0.2, %v9458_v40  ;;  %v11199_v33 = vpop.f32.mrb[55].mxu1 }
0x187d   :  { %v9465_v48 = vsel %vm9463_vm3, %v9458_v40, %v9464_v5 }
0x187e   :  { %v9466_v11 = vpack.c.bf16 %v9465_v48, %v9465_v48 }
0x1880   :  { %11217 = vmatmul.mubr.bf16.vlgmr.msra.gmra.mrb[108].mxu0 %v9466_v11 }
0x1953   :  { %v9572_v37 = vpop.f32.mrb[108].mxu0 }
0x1954   :  { %v9573_v19 = vadd.f32 %v10797_v45, %v9572_v37  ;;  %v11218_v51 = vpop.f32.mrb[109].mxu0 }
0x1955   :  { %v9575_v36 = vpop.f32.mrb[110].mxu0 }
0x1956   :  { %v10806_v32 = vmul.f32 -1.442695, %v9573_v19  ;;  %v11219_v15 = vpop.f32.mrb[111].mxu0 }
0x1958   :  { %12510 = vpow2.f32 %v10806_v32 }
0x1962   :  { %v12511_v60 = vpop.eup %12510 }
0x1963   :  { %v9581_v23 = vadd.f32 1.0, %v12511_v60 }
0x1965   :  { %12512 = vrcp.f32 %v9581_v23 }
0x196f   :  { %v12513_v2 = vpop.eup %12512 }
0x1970   :  { %9584 = vst [vmem:[%s15975_s9] sm:$0x3] %v12513_v2 }
0x1971   :  { %9589 = vsyncpa [#allocation3], 1 }
0x1972   :  { %9590 = vsyncpa [#allocation5], 1 }
0x1973   :  { %9591 = vsyncpa [#allocation8], 1 }
0x1974   :  { %9592 = vsyncpa [#allocation11], 1 }
0x1975   :  { %9593 = vsyncpa [#allocation14], 1 }
0x1976   :  { %9594 = vsyncpa [#allocation17], 1 }
0x1977   :  { %9595 = vsyncpa [#allocation20], 1 }
0x1978   :  { %9596 = vsyncpa [#allocation23], 1 }
0x1979   :  { %9597 = vsyncpa [#allocation26], 1 }

</bundles_post_ra>
